<compile_context>
chip_gen: v5e
topology: v5e:2x2
jax: 0.10.0
libtpu: 0.0.40
codegen_flags: <defaults>
</compile_context>

<pallas_src>
import functools

import jax
import jax.numpy as jnp
from jax.experimental import pallas as pl
from jax.experimental.pallas import tpu as pltpu

LEAKY = 0.2
BN_EPS = 0.8  # nn.BatchNorm2d(out_filters, 0.8) -> eps = 0.8


def _leaky(x):
    # max(x, 0.2*x) == LeakyReLU(0.2) for all x (0.2*x > x iff x < 0).
    return jnp.maximum(x, LEAKY * x)


def _store_padded(ref, y):
    """Write y into the interior of a spatially padded (Hp, Wp, BT, C) scratch.

    Only padded row 0 / col 0 are ever read by the next block's stride-2 taps
    (row/col Hp-1 are never selected), so zero just those two strips.  Zeroed
    every grid step because with a 'parallel' batch grid each TensorCore runs
    its own scratch instance.
    """
    Hp, Wp, BT, C = ref.shape
    Ho, Wo = Hp - 2, Wp - 2
    ref[0:1, :, :, :] = jnp.zeros((1, Wp, BT, C), ref.dtype)
    ref[:, 0:1, :, :] = jnp.zeros((Hp, 1, BT, C), ref.dtype)
    ref[1:Ho + 1, 1:Wo + 1, :, :] = y


def _conv3x3s2(xpad, w_merged, Ho, Wo, BT):
    """Stride-2 3x3 conv as a single wide-K im2col matmul.

    xpad: (2*Ho+2, 2*Wo+2, BT, Cin) padded activation value.
    w_merged: (9*Cin, Cout) weight, row index = (kh*3+kw)*Cin + cin.
    Returns (Ho*Wo*BT, Cout) f32, rows ordered (oh, ow, b).
    All tap selection happens on leading dims (free vreg selection); the single
    lane-axis concatenate builds the K=9*Cin operand once per block.
    """
    Cin = xpad.shape[-1]
    rows_split = xpad.reshape(Ho + 1, 2, 2 * Wo + 2, BT, Cin)
    taps = []
    for kh in range(3):
        dh, ph = divmod(kh, 2)
        cols_split = rows_split[dh:dh + Ho, ph].reshape(Ho, Wo + 1, 2, BT, Cin)
        for kw in range(3):
            dw, pw = divmod(kw, 2)
            patch = cols_split[:, dw:dw + Wo, pw]            # (Ho, Wo, BT, Cin)
            taps.append(patch.reshape(Ho * Wo * BT, Cin))    # free: BT % 8 == 0
    lhs = jnp.concatenate(taps, axis=-1)                     # (Ho*Wo*BT, 9*Cin)
    return jnp.dot(lhs, w_merged, preferred_element_type=jnp.float32)


def _disc_kernel(p1_ref, w1_ref, b1_ref,
                 w2_ref, b2_ref, s2_ref, t2_ref,
                 w3_ref, b3_ref, s3_ref, t3_ref,
                 w4_ref, b4_ref, s4_ref, t4_ref,
                 wadv_ref, badv_ref,
                 o_ref,
                 a1p_ref, a2p_ref, a3p_ref, *, BT):
    # ---- block 1: Conv2d(1, 16, 3, 2, 1) as one K=9 matmul, LeakyReLU, no BN --
    y1 = jnp.dot(p1_ref[...], w1_ref[...], preferred_element_type=jnp.float32)
    y1 = _leaky(y1 + b1_ref[...])                            # (256*BT, 16)
    _store_padded(a1p_ref, y1.reshape(16, 16, BT, 16))

    # ---- block 2: Conv2d(16, 32) + LeakyReLU + BN  (single K=144 matmul) ------
    y2 = _conv3x3s2(a1p_ref[...], w2_ref[...], 8, 8, BT)
    y2 = _leaky(y2 + b2_ref[...]) * s2_ref[...] + t2_ref[...]
    _store_padded(a2p_ref, y2.reshape(8, 8, BT, 32))

    # ---- block 3: Conv2d(32, 64) + LeakyReLU + BN  (single K=288 matmul) ------
    y3 = _conv3x3s2(a2p_ref[...], w3_ref[...], 4, 4, BT)
    y3 = _leaky(y3 + b3_ref[...]) * s3_ref[...] + t3_ref[...]
    _store_padded(a3p_ref, y3.reshape(4, 4, BT, 64))

    # ---- block 4: Conv2d(64, 128) + LeakyReLU + BN (single K=576 matmul) ------
    y4 = _conv3x3s2(a3p_ref[...], w4_ref[...], 2, 2, BT)
    y4 = _leaky(y4 + b4_ref[...]) * s4_ref[...] + t4_ref[...]   # (4*BT, 128)

    # ---- NCHW flatten + Linear(512, 1) folded into the activation layout ------
    prod = y4.reshape(4, BT, 128) * wadv_ref[...]            # (4, BT, 128)
    red = jnp.sum(prod, axis=2, keepdims=True)               # lane reduce
    o_ref[...] = jnp.sum(red, axis=0) + badv_ref[...]        # (BT, 1)


def _im2col_block1(img_nchw, BT):
    """Wrapper-side im2col of the (tiny) input, batch-padded to a multiple of BT.

    Returns patches of shape (T*16*16*BT, 9), rows ordered (tile, oh, ow, b)."""
    B = img_nchw.shape[0]
    BP = ((B + BT - 1) // BT) * BT
    T = BP // BT
    x = jnp.pad(img_nchw[:, 0], ((0, BP - B), (1, 1), (1, 1)))   # (BP, 34, 34)
    taps = [x[:, kh:kh + 32:2, kw:kw + 32:2]
            for kh in range(3) for kw in range(3)]               # 9 x (BP,16,16)
    p = jnp.stack(taps, axis=-1)                                  # (BP,16,16,9)
    p = p.reshape(T, BT, 16, 16, 9).transpose(0, 2, 3, 1, 4)      # (T,16,16,BT,9)
    return p.reshape(T * 16 * 16 * BT, 9), BP, T


def discriminator_forward(img_nchw, params, *, batch_tile=8):
    (w1f, b1, w2m, b2, s2, t2, w3m, b3, s3, t3,
     w4m, b4, s4, t4, wadv, badv) = params
    B = img_nchw.shape[0]
    assert img_nchw.shape[1:] == (1, 32, 32)
    BT = batch_tile
    assert BT % 8 == 0, "batch tile must be sublane-aligned (multiple of 8)"

    patches, BP, T = _im2col_block1(img_nchw, BT)
    weight_args = (w1f, b1, w2m, b2, s2, t2, w3m, b3, s3, t3,
                   w4m, b4, s4, t4, wadv, badv)

    def _const_spec(a):
        if a.ndim == 2:
            return pl.BlockSpec(a.shape, lambda t: (0, 0))
        return pl.BlockSpec(a.shape, lambda t: (0, 0, 0))

    in_specs = ([pl.BlockSpec((16 * 16 * BT, 9), lambda t: (t, 0))]
                + [_const_spec(a) for a in weight_args])

    grid_spec = pltpu.PrefetchScalarGridSpec(
        num_scalar_prefetch=0,
        grid=(T,),
        in_specs=in_specs,
        out_specs=pl.BlockSpec((BT, 1), lambda t: (t, 0)),
        scratch_shapes=[
            pltpu.VMEM((18, 18, BT, 16), jnp.float32),   # padded block-1 output
            pltpu.VMEM((10, 10, BT, 32), jnp.float32),   # padded block-2 output
            pltpu.VMEM((6, 6, BT, 64), jnp.float32),     # padded block-3 output
        ],
    )

    flops = 2 * BP * (256 * 9 * 16 + 64 * 9 * 16 * 32 + 16 * 9 * 32 * 64
                      + 4 * 9 * 64 * 128 + 512)
    bytes_accessed = (int(patches.size) * 4
                      + sum(int(a.size) for a in weight_args) * 4 * T
                      + BP * 4)

    kernel = functools.partial(_disc_kernel, BT=BT)
    out = pl.pallas_call(
        kernel,
        out_shape=jax.ShapeDtypeStruct((BP, 1), jnp.float32),
        grid_spec=grid_spec,
        compiler_params=pltpu.CompilerParams(
            dimension_semantics=("parallel",),
            vmem_limit_bytes=32 * 1024 * 1024),
        cost_estimate=pl.CostEstimate(flops=flops, transcendentals=0,
                                      bytes_accessed=bytes_accessed),
    )(patches, *weight_args)
    return out[:B]


# ------------------------------------------------------------------------------
# Parameters (deterministic, in-script)
# ------------------------------------------------------------------------------
def init_params(key):
    """Random parameters mirroring the torch module layout (f32)."""
    blocks = [(1, 16, False), (16, 32, True), (32, 64, True), (64, 128, True)]
    conv = []
    for cin, cout, bn in blocks:
        key, kw_, kb_, kg_, kbt = jax.random.split(key, 5)
        # conv weight stored as (kh, kw, Cin, Cout)  (torch: (Cout, Cin, kh, kw))
        w = jax.random.normal(kw_, (3, 3, cin, cout), jnp.float32) / jnp.sqrt(9.0 * cin)
        b = 0.05 * jax.random.normal(kb_, (cout,), jnp.float32)
        if bn:
            gamma = 1.0 + 0.1 * jax.random.normal(kg_, (cout,), jnp.float32)
            beta = 0.1 * jax.random.normal(kbt, (cout,), jnp.float32)
        else:
            gamma = beta = None
        conv.append((w, b, gamma, beta))
    key, kwa, kba = jax.random.split(key, 3)
    ds_size = 32 // 2 ** 4                                # = 2
    w_adv = jax.random.normal(kwa, (128 * ds_size ** 2, 1), jnp.float32) / jnp.sqrt(512.0)
    b_adv = 0.05 * jax.random.normal(kba, (1,), jnp.float32)
    return conv, (w_adv, b_adv)


def pack_params(conv, adv, running_stats=None):
    """Re-layout parameters for the fused kernel (wrapper-side, free).

    running_stats: optional [(mean, var)] * 3 for the three BN layers; defaults
    to fresh-init stats (mean=0, var=1), which is the state of a just-constructed
    torch module.  TODO(synk): pass real running stats for a trained checkpoint.
    """
    (w1, b1, _, _), (w2, b2, g2, be2), (w3, b3, g3, be3), (w4, b4, g4, be4) = conv
    w_adv, b_adv = adv
    if running_stats is None:
        running_stats = [(None, None)] * 3

    def bn(gamma, beta, mean, var):
        if mean is None:
            mean = jnp.zeros_like(gamma)
        if var is None:
            var = jnp.ones_like(gamma)
        s = gamma / jnp.sqrt(var + BN_EPS)
        t = beta - mean * s
        return s.reshape(1, -1), t.reshape(1, -1)

    s2, t2 = bn(g2, be2, *running_stats[0])
    s3, t3 = bn(g3, be3, *running_stats[1])
    s4, t4 = bn(g4, be4, *running_stats[2])
    # adv weight flat index is c*4 + oh*2 + ow (NCHW flatten) -> (s=oh*2+ow, 1, c).
    wadv = jnp.transpose(w_adv.reshape(128, 2, 2), (1, 2, 0)).reshape(4, 1, 128)
    # Conv weights merged for single wide-K matmuls: row = (kh*3+kw)*Cin + cin.
    return (w1.reshape(9, 16), b1.reshape(1, 16),
            w2.reshape(9 * 16, 32), b2.reshape(1, 32), s2, t2,
            w3.reshape(9 * 32, 64), b3.reshape(1, 64), s3, t3,
            w4.reshape(9 * 64, 128), b4.reshape(1, 128), s4, t4,
            wadv, b_adv.reshape(1, 1))


# ------------------------------------------------------------------------------
# Pure-JAX reference (same inference-mode semantics) for the correctness check
# ------------------------------------------------------------------------------
def reference_forward(img, conv, adv):
    x = img
    for w, b, gamma, beta in conv:
        x = jax.lax.conv_general_dilated(
            x, w, window_strides=(2, 2), padding=((1, 1), (1, 1)),
            dimension_numbers=("NCHW", "HWIO", "NCHW"),
            precision=jax.lax.Precision.HIGHEST)
        x = x + b.reshape(1, -1, 1, 1)
        x = jnp.where(x > 0, x, LEAKY * x)
        if gamma is not None:
            scale = gamma / jnp.sqrt(1.0 + BN_EPS)
            x = x * scale.reshape(1, -1, 1, 1) + beta.reshape(1, -1, 1, 1)
    w_adv, b_adv = adv
    return x.reshape(x.shape[0], -1) @ w_adv + b_adv.reshape(1, 1)


if __name__ == "__main__":
    key = jax.random.PRNGKey(0)
    kp, kx = jax.random.split(key)
    conv_raw, adv_raw = init_params(kp)
    params = pack_params(conv_raw, adv_raw)

    # The module's adv_layer fixes the input spatial size at 1x32x32.
    img = jax.random.normal(kx, (2, 1, 32, 32), jnp.float32)

    validity = jax.jit(discriminator_forward)(img, params)
    validity = jax.block_until_ready(validity)
    assert validity.shape == (2, 1), validity.shape
    assert bool(jnp.all(jnp.isfinite(validity)))

    ref = reference_forward(img, conv_raw, adv_raw)
    err = float(jnp.max(jnp.abs(validity - ref)))
    scale = max(1.0, float(jnp.max(jnp.abs(ref))))
    assert err <= 1e-5 * scale, (validity, ref, err)

    print("KERNEL_OK")
</pallas_src>

<mosaic_0001>
module attributes {stable_mosaic.version = 11 : i64} {
  func.func @_disc_kernel(%arg0: i32, %arg1: memref<2048x9xf32, #tpu.memory_space<vmem>>, %arg2: memref<9x16xf32, #tpu.memory_space<vmem>>, %arg3: memref<1x16xf32, #tpu.memory_space<vmem>>, %arg4: memref<144x32xf32, #tpu.memory_space<vmem>>, %arg5: memref<1x32xf32, #tpu.memory_space<vmem>>, %arg6: memref<1x32xf32, #tpu.memory_space<vmem>>, %arg7: memref<1x32xf32, #tpu.memory_space<vmem>>, %arg8: memref<288x64xf32, #tpu.memory_space<vmem>>, %arg9: memref<1x64xf32, #tpu.memory_space<vmem>>, %arg10: memref<1x64xf32, #tpu.memory_space<vmem>>, %arg11: memref<1x64xf32, #tpu.memory_space<vmem>>, %arg12: memref<576x128xf32, #tpu.memory_space<vmem>>, %arg13: memref<1x128xf32, #tpu.memory_space<vmem>>, %arg14: memref<1x128xf32, #tpu.memory_space<vmem>>, %arg15: memref<1x128xf32, #tpu.memory_space<vmem>>, %arg16: memref<4x1x128xf32, #tpu.memory_space<vmem>>, %arg17: memref<1x1xf32, #tpu.memory_space<vmem>>, %arg18: memref<8x1xf32, #tpu.memory_space<vmem>>, %arg19: memref<18x18x8x16xf32, #tpu.memory_space<vmem>>, %arg20: memref<10x10x8x32xf32, #tpu.memory_space<vmem>>, %arg21: memref<6x6x8x64xf32, #tpu.memory_space<vmem>>) attributes {dimension_semantics = [#tpu.dimension_semantics<parallel>], iteration_bounds = array<i64: 1>, scalar_prefetch = 0 : i64, scratch_operands = 3 : i64, tpu.core_type = #tpu.core_type<tc>, window_params = [{transform_indices = @transform_0, window_bounds = array<i64: 2048, 9>}, {pipeline_mode = #tpu.pipeline_mode<synchronous>, transform_indices = @transform_1, window_bounds = array<i64: 9, 16>}, {pipeline_mode = #tpu.pipeline_mode<synchronous>, transform_indices = @transform_2, window_bounds = array<i64: 1, 16>}, {pipeline_mode = #tpu.pipeline_mode<synchronous>, transform_indices = @transform_3, window_bounds = array<i64: 144, 32>}, {pipeline_mode = #tpu.pipeline_mode<synchronous>, transform_indices = @transform_4, window_bounds = array<i64: 1, 32>}, {pipeline_mode = #tpu.pipeline_mode<synchronous>, transform_indices = @transform_5, window_bounds = array<i64: 1, 32>}, {pipeline_mode = #tpu.pipeline_mode<synchronous>, transform_indices = @transform_6, window_bounds = array<i64: 1, 32>}, {pipeline_mode = #tpu.pipeline_mode<synchronous>, transform_indices = @transform_7, window_bounds = array<i64: 288, 64>}, {pipeline_mode = #tpu.pipeline_mode<synchronous>, transform_indices = @transform_8, window_bounds = array<i64: 1, 64>}, {pipeline_mode = #tpu.pipeline_mode<synchronous>, transform_indices = @transform_9, window_bounds = array<i64: 1, 64>}, {pipeline_mode = #tpu.pipeline_mode<synchronous>, transform_indices = @transform_10, window_bounds = array<i64: 1, 64>}, {pipeline_mode = #tpu.pipeline_mode<synchronous>, transform_indices = @transform_11, window_bounds = array<i64: 576, 128>}, {pipeline_mode = #tpu.pipeline_mode<synchronous>, transform_indices = @transform_12, window_bounds = array<i64: 1, 128>}, {pipeline_mode = #tpu.pipeline_mode<synchronous>, transform_indices = @transform_13, window_bounds = array<i64: 1, 128>}, {pipeline_mode = #tpu.pipeline_mode<synchronous>, transform_indices = @transform_14, window_bounds = array<i64: 1, 128>}, {pipeline_mode = #tpu.pipeline_mode<synchronous>, transform_indices = @transform_15, window_bounds = array<i64: 4, 1, 128>}, {pipeline_mode = #tpu.pipeline_mode<synchronous>, transform_indices = @transform_16, window_bounds = array<i64: 1, 1>}, {transform_indices = @transform_17, window_bounds = array<i64: 8, 1>}]} {
    %c0 = arith.constant 0 : index
    %c0_0 = arith.constant 0 : index
    %0 = vector.load %arg1[%c0, %c0_0] : memref<2048x9xf32, #tpu.memory_space<vmem>>, vector<2048x9xf32>
    %c0_1 = arith.constant 0 : index
    %c0_2 = arith.constant 0 : index
    %1 = vector.load %arg2[%c0_1, %c0_2] : memref<9x16xf32, #tpu.memory_space<vmem>>, vector<9x16xf32>
    %cst = arith.constant dense<0.000000e+00> : vector<2048x16xf32>
    %2 = tpu.matmul %0, %1, %cst {dimension_numbers = #tpu.dot_dimension_numbers<[1], [0], [0], [1], [0, 0, 1, 1], [], []>} : vector<2048x9xf32>, vector<9x16xf32>, vector<2048x16xf32> -> vector<2048x16xf32>
    %c0_3 = arith.constant 0 : index
    %c0_4 = arith.constant 0 : index
    %3 = vector.load %arg3[%c0_3, %c0_4] : memref<1x16xf32, #tpu.memory_space<vmem>>, vector<1x16xf32>
    %4 = vector.broadcast %3 : vector<1x16xf32> to vector<2048x16xf32>
    %5 = arith.addf %2, %4 : vector<2048x16xf32>
    %cst_5 = arith.constant 2.000000e-01 : f32
    %6 = vector.broadcast %cst_5 : f32 to vector<2048x16xf32>
    %7 = arith.mulf %6, %5 : vector<2048x16xf32>
    %8 = arith.maximumf %5, %7 : vector<2048x16xf32>
    %9 = vector.shape_cast %8 : vector<2048x16xf32> to vector<16x16x8x16xf32>
    %cst_6 = arith.constant 0.000000e+00 : f32
    %10 = vector.broadcast %cst_6 : f32 to vector<1x18x8x16xf32>
    %c0_7 = arith.constant 0 : index
    %c0_8 = arith.constant 0 : index
    %c0_9 = arith.constant 0 : index
    %c0_10 = arith.constant 0 : index
    %11 = vector.load %arg19[%c0_7, %c0_8, %c0_9, %c0_10] : memref<18x18x8x16xf32, #tpu.memory_space<vmem>>, vector<1x18x8x16xf32>
    tpu.vector_store %arg19[%c0_7, %c0_8, %c0_9, %c0_10], %10 {strides = array<i32>} : memref<18x18x8x16xf32, #tpu.memory_space<vmem>>, vector<1x18x8x16xf32>,
    %cst_11 = arith.constant 0.000000e+00 : f32
    %12 = vector.broadcast %cst_11 : f32 to vector<18x1x8x16xf32>
    %c0_12 = arith.constant 0 : index
    %c0_13 = arith.constant 0 : index
    %c0_14 = arith.constant 0 : index
    %c0_15 = arith.constant 0 : index
    %13 = vector.load %arg19[%c0_12, %c0_13, %c0_14, %c0_15] : memref<18x18x8x16xf32, #tpu.memory_space<vmem>>, vector<18x1x8x16xf32>
    tpu.vector_store %arg19[%c0_12, %c0_13, %c0_14, %c0_15], %12 {strides = array<i32>} : memref<18x18x8x16xf32, #tpu.memory_space<vmem>>, vector<18x1x8x16xf32>,
    %c1 = arith.constant 1 : index
    %c1_16 = arith.constant 1 : index
    %c0_17 = arith.constant 0 : index
    %c0_18 = arith.constant 0 : index
    %14 = vector.load %arg19[%c1, %c1_16, %c0_17, %c0_18] : memref<18x18x8x16xf32, #tpu.memory_space<vmem>>, vector<16x16x8x16xf32>
    tpu.vector_store %arg19[%c1, %c1_16, %c0_17, %c0_18], %9 {strides = array<i32>} : memref<18x18x8x16xf32, #tpu.memory_space<vmem>>, vector<16x16x8x16xf32>,
    %c0_19 = arith.constant 0 : index
    %c0_20 = arith.constant 0 : index
    %c0_21 = arith.constant 0 : index
    %c0_22 = arith.constant 0 : index
    %15 = vector.load %arg19[%c0_19, %c0_20, %c0_21, %c0_22] : memref<18x18x8x16xf32, #tpu.memory_space<vmem>>, vector<18x18x8x16xf32>
    %c0_23 = arith.constant 0 : index
    %c0_24 = arith.constant 0 : index
    %16 = vector.load %arg4[%c0_23, %c0_24] : memref<144x32xf32, #tpu.memory_space<vmem>>, vector<144x32xf32>
    %17 = vector.shape_cast %15 : vector<18x18x8x16xf32> to vector<9x2x18x8x16xf32>
    %18 = vector.extract_strided_slice %17 {offsets = [0, 0, 0, 0, 0], sizes = [8, 1, 18, 8, 16], strides = [1, 1, 1, 1, 1]} : vector<9x2x18x8x16xf32> to vector<8x1x18x8x16xf32>
    %19 = vector.shape_cast %18 : vector<8x1x18x8x16xf32> to vector<8x18x8x16xf32>
    %20 = vector.shape_cast %19 : vector<8x18x8x16xf32> to vector<8x9x2x8x16xf32>
    %21 = vector.extract_strided_slice %20 {offsets = [0, 0, 0, 0, 0], sizes = [8, 8, 1, 8, 16], strides = [1, 1, 1, 1, 1]} : vector<8x9x2x8x16xf32> to vector<8x8x1x8x16xf32>
    %22 = vector.shape_cast %21 : vector<8x8x1x8x16xf32> to vector<8x8x8x16xf32>
    %23 = vector.shape_cast %22 : vector<8x8x8x16xf32> to vector<512x16xf32>
    %24 = vector.extract_strided_slice %20 {offsets = [0, 0, 1, 0, 0], sizes = [8, 8, 1, 8, 16], strides = [1, 1, 1, 1, 1]} : vector<8x9x2x8x16xf32> to vector<8x8x1x8x16xf32>
    %25 = vector.shape_cast %24 : vector<8x8x1x8x16xf32> to vector<8x8x8x16xf32>
    %26 = vector.shape_cast %25 : vector<8x8x8x16xf32> to vector<512x16xf32>
    %27 = vector.extract_strided_slice %20 {offsets = [0, 1, 0, 0, 0], sizes = [8, 8, 1, 8, 16], strides = [1, 1, 1, 1, 1]} : vector<8x9x2x8x16xf32> to vector<8x8x1x8x16xf32>
    %28 = vector.shape_cast %27 : vector<8x8x1x8x16xf32> to vector<8x8x8x16xf32>
    %29 = vector.shape_cast %28 : vector<8x8x8x16xf32> to vector<512x16xf32>
    %30 = vector.extract_strided_slice %17 {offsets = [0, 1, 0, 0, 0], sizes = [8, 1, 18, 8, 16], strides = [1, 1, 1, 1, 1]} : vector<9x2x18x8x16xf32> to vector<8x1x18x8x16xf32>
    %31 = vector.shape_cast %30 : vector<8x1x18x8x16xf32> to vector<8x18x8x16xf32>
    %32 = vector.shape_cast %31 : vector<8x18x8x16xf32> to vector<8x9x2x8x16xf32>
    %33 = vector.extract_strided_slice %32 {offsets = [0, 0, 0, 0, 0], sizes = [8, 8, 1, 8, 16], strides = [1, 1, 1, 1, 1]} : vector<8x9x2x8x16xf32> to vector<8x8x1x8x16xf32>
    %34 = vector.shape_cast %33 : vector<8x8x1x8x16xf32> to vector<8x8x8x16xf32>
    %35 = vector.shape_cast %34 : vector<8x8x8x16xf32> to vector<512x16xf32>
    %36 = vector.extract_strided_slice %32 {offsets = [0, 0, 1, 0, 0], sizes = [8, 8, 1, 8, 16], strides = [1, 1, 1, 1, 1]} : vector<8x9x2x8x16xf32> to vector<8x8x1x8x16xf32>
    %37 = vector.shape_cast %36 : vector<8x8x1x8x16xf32> to vector<8x8x8x16xf32>
    %38 = vector.shape_cast %37 : vector<8x8x8x16xf32> to vector<512x16xf32>
    %39 = vector.extract_strided_slice %32 {offsets = [0, 1, 0, 0, 0], sizes = [8, 8, 1, 8, 16], strides = [1, 1, 1, 1, 1]} : vector<8x9x2x8x16xf32> to vector<8x8x1x8x16xf32>
    %40 = vector.shape_cast %39 : vector<8x8x1x8x16xf32> to vector<8x8x8x16xf32>
    %41 = vector.shape_cast %40 : vector<8x8x8x16xf32> to vector<512x16xf32>
    %42 = vector.extract_strided_slice %17 {offsets = [1, 0, 0, 0, 0], sizes = [8, 1, 18, 8, 16], strides = [1, 1, 1, 1, 1]} : vector<9x2x18x8x16xf32> to vector<8x1x18x8x16xf32>
    %43 = vector.shape_cast %42 : vector<8x1x18x8x16xf32> to vector<8x18x8x16xf32>
    %44 = vector.shape_cast %43 : vector<8x18x8x16xf32> to vector<8x9x2x8x16xf32>
    %45 = vector.extract_strided_slice %44 {offsets = [0, 0, 0, 0, 0], sizes = [8, 8, 1, 8, 16], strides = [1, 1, 1, 1, 1]} : vector<8x9x2x8x16xf32> to vector<8x8x1x8x16xf32>
    %46 = vector.shape_cast %45 : vector<8x8x1x8x16xf32> to vector<8x8x8x16xf32>
    %47 = vector.shape_cast %46 : vector<8x8x8x16xf32> to vector<512x16xf32>
    %48 = vector.extract_strided_slice %44 {offsets = [0, 0, 1, 0, 0], sizes = [8, 8, 1, 8, 16], strides = [1, 1, 1, 1, 1]} : vector<8x9x2x8x16xf32> to vector<8x8x1x8x16xf32>
    %49 = vector.shape_cast %48 : vector<8x8x1x8x16xf32> to vector<8x8x8x16xf32>
    %50 = vector.shape_cast %49 : vector<8x8x8x16xf32> to vector<512x16xf32>
    %51 = vector.extract_strided_slice %44 {offsets = [0, 1, 0, 0, 0], sizes = [8, 8, 1, 8, 16], strides = [1, 1, 1, 1, 1]} : vector<8x9x2x8x16xf32> to vector<8x8x1x8x16xf32>
    %52 = vector.shape_cast %51 : vector<8x8x1x8x16xf32> to vector<8x8x8x16xf32>
    %53 = vector.shape_cast %52 : vector<8x8x8x16xf32> to vector<512x16xf32>
    %54 = tpu.concatenate %23, %26, %29, %35, %38, %41, %47, %50, %53 in 1 : vector<512x16xf32>, vector<512x16xf32>, vector<512x16xf32>, vector<512x16xf32>, vector<512x16xf32>, vector<512x16xf32>, vector<512x16xf32>, vector<512x16xf32>, vector<512x16xf32> -> vector<512x144xf32>
    %cst_25 = arith.constant dense<0.000000e+00> : vector<512x32xf32>
    %55 = tpu.matmul %54, %16, %cst_25 {dimension_numbers = #tpu.dot_dimension_numbers<[1], [0], [0], [1], [0, 0, 1, 1], [], []>} : vector<512x144xf32>, vector<144x32xf32>, vector<512x32xf32> -> vector<512x32xf32>
    %c0_26 = arith.constant 0 : index
    %c0_27 = arith.constant 0 : index
    %56 = vector.load %arg5[%c0_26, %c0_27] : memref<1x32xf32, #tpu.memory_space<vmem>>, vector<1x32xf32>
    %57 = vector.broadcast %56 : vector<1x32xf32> to vector<512x32xf32>
    %58 = arith.addf %55, %57 : vector<512x32xf32>
    %cst_28 = arith.constant 2.000000e-01 : f32
    %59 = vector.broadcast %cst_28 : f32 to vector<512x32xf32>
    %60 = arith.mulf %59, %58 : vector<512x32xf32>
    %61 = arith.maximumf %58, %60 : vector<512x32xf32>
    %c0_29 = arith.constant 0 : index
    %c0_30 = arith.constant 0 : index
    %62 = vector.load %arg6[%c0_29, %c0_30] : memref<1x32xf32, #tpu.memory_space<vmem>>, vector<1x32xf32>
    %63 = vector.broadcast %62 : vector<1x32xf32> to vector<512x32xf32>
    %64 = arith.mulf %61, %63 : vector<512x32xf32>
    %c0_31 = arith.constant 0 : index
    %c0_32 = arith.constant 0 : index
    %65 = vector.load %arg7[%c0_31, %c0_32] : memref<1x32xf32, #tpu.memory_space<vmem>>, vector<1x32xf32>
    %66 = vector.broadcast %65 : vector<1x32xf32> to vector<512x32xf32>
    %67 = arith.addf %64, %66 : vector<512x32xf32>
    %68 = vector.shape_cast %67 : vector<512x32xf32> to vector<8x8x8x32xf32>
    %cst_33 = arith.constant 0.000000e+00 : f32
    %69 = vector.broadcast %cst_33 : f32 to vector<1x10x8x32xf32>
    %c0_34 = arith.constant 0 : index
    %c0_35 = arith.constant 0 : index
    %c0_36 = arith.constant 0 : index
    %c0_37 = arith.constant 0 : index
    %70 = vector.load %arg20[%c0_34, %c0_35, %c0_36, %c0_37] : memref<10x10x8x32xf32, #tpu.memory_space<vmem>>, vector<1x10x8x32xf32>
    tpu.vector_store %arg20[%c0_34, %c0_35, %c0_36, %c0_37], %69 {strides = array<i32>} : memref<10x10x8x32xf32, #tpu.memory_space<vmem>>, vector<1x10x8x32xf32>,
    %cst_38 = arith.constant 0.000000e+00 : f32
    %71 = vector.broadcast %cst_38 : f32 to vector<10x1x8x32xf32>
    %c0_39 = arith.constant 0 : index
    %c0_40 = arith.constant 0 : index
    %c0_41 = arith.constant 0 : index
    %c0_42 = arith.constant 0 : index
    %72 = vector.load %arg20[%c0_39, %c0_40, %c0_41, %c0_42] : memref<10x10x8x32xf32, #tpu.memory_space<vmem>>, vector<10x1x8x32xf32>
    tpu.vector_store %arg20[%c0_39, %c0_40, %c0_41, %c0_42], %71 {strides = array<i32>} : memref<10x10x8x32xf32, #tpu.memory_space<vmem>>, vector<10x1x8x32xf32>,
    %c1_43 = arith.constant 1 : index
    %c1_44 = arith.constant 1 : index
    %c0_45 = arith.constant 0 : index
    %c0_46 = arith.constant 0 : index
    %73 = vector.load %arg20[%c1_43, %c1_44, %c0_45, %c0_46] : memref<10x10x8x32xf32, #tpu.memory_space<vmem>>, vector<8x8x8x32xf32>
    tpu.vector_store %arg20[%c1_43, %c1_44, %c0_45, %c0_46], %68 {strides = array<i32>} : memref<10x10x8x32xf32, #tpu.memory_space<vmem>>, vector<8x8x8x32xf32>,
    %c0_47 = arith.constant 0 : index
    %c0_48 = arith.constant 0 : index
    %c0_49 = arith.constant 0 : index
    %c0_50 = arith.constant 0 : index
    %74 = vector.load %arg20[%c0_47, %c0_48, %c0_49, %c0_50] : memref<10x10x8x32xf32, #tpu.memory_space<vmem>>, vector<10x10x8x32xf32>
    %c0_51 = arith.constant 0 : index
    %c0_52 = arith.constant 0 : index
    %75 = vector.load %arg8[%c0_51, %c0_52] : memref<288x64xf32, #tpu.memory_space<vmem>>, vector<288x64xf32>
    %76 = vector.shape_cast %74 : vector<10x10x8x32xf32> to vector<5x2x10x8x32xf32>
    %77 = vector.extract_strided_slice %76 {offsets = [0, 0, 0, 0, 0], sizes = [4, 1, 10, 8, 32], strides = [1, 1, 1, 1, 1]} : vector<5x2x10x8x32xf32> to vector<4x1x10x8x32xf32>
    %78 = vector.shape_cast %77 : vector<4x1x10x8x32xf32> to vector<4x10x8x32xf32>
    %79 = vector.shape_cast %78 : vector<4x10x8x32xf32> to vector<4x5x2x8x32xf32>
    %80 = vector.extract_strided_slice %79 {offsets = [0, 0, 0, 0, 0], sizes = [4, 4, 1, 8, 32], strides = [1, 1, 1, 1, 1]} : vector<4x5x2x8x32xf32> to vector<4x4x1x8x32xf32>
    %81 = vector.shape_cast %80 : vector<4x4x1x8x32xf32> to vector<4x4x8x32xf32>
    %82 = vector.shape_cast %81 : vector<4x4x8x32xf32> to vector<128x32xf32>
    %83 = vector.extract_strided_slice %79 {offsets = [0, 0, 1, 0, 0], sizes = [4, 4, 1, 8, 32], strides = [1, 1, 1, 1, 1]} : vector<4x5x2x8x32xf32> to vector<4x4x1x8x32xf32>
    %84 = vector.shape_cast %83 : vector<4x4x1x8x32xf32> to vector<4x4x8x32xf32>
    %85 = vector.shape_cast %84 : vector<4x4x8x32xf32> to vector<128x32xf32>
    %86 = vector.extract_strided_slice %79 {offsets = [0, 1, 0, 0, 0], sizes = [4, 4, 1, 8, 32], strides = [1, 1, 1, 1, 1]} : vector<4x5x2x8x32xf32> to vector<4x4x1x8x32xf32>
    %87 = vector.shape_cast %86 : vector<4x4x1x8x32xf32> to vector<4x4x8x32xf32>
    %88 = vector.shape_cast %87 : vector<4x4x8x32xf32> to vector<128x32xf32>
    %89 = vector.extract_strided_slice %76 {offsets = [0, 1, 0, 0, 0], sizes = [4, 1, 10, 8, 32], strides = [1, 1, 1, 1, 1]} : vector<5x2x10x8x32xf32> to vector<4x1x10x8x32xf32>
    %90 = vector.shape_cast %89 : vector<4x1x10x8x32xf32> to vector<4x10x8x32xf32>
    %91 = vector.shape_cast %90 : vector<4x10x8x32xf32> to vector<4x5x2x8x32xf32>
    %92 = vector.extract_strided_slice %91 {offsets = [0, 0, 0, 0, 0], sizes = [4, 4, 1, 8, 32], strides = [1, 1, 1, 1, 1]} : vector<4x5x2x8x32xf32> to vector<4x4x1x8x32xf32>
    %93 = vector.shape_cast %92 : vector<4x4x1x8x32xf32> to vector<4x4x8x32xf32>
    %94 = vector.shape_cast %93 : vector<4x4x8x32xf32> to vector<128x32xf32>
    %95 = vector.extract_strided_slice %91 {offsets = [0, 0, 1, 0, 0], sizes = [4, 4, 1, 8, 32], strides = [1, 1, 1, 1, 1]} : vector<4x5x2x8x32xf32> to vector<4x4x1x8x32xf32>
    %96 = vector.shape_cast %95 : vector<4x4x1x8x32xf32> to vector<4x4x8x32xf32>
    %97 = vector.shape_cast %96 : vector<4x4x8x32xf32> to vector<128x32xf32>
    %98 = vector.extract_strided_slice %91 {offsets = [0, 1, 0, 0, 0], sizes = [4, 4, 1, 8, 32], strides = [1, 1, 1, 1, 1]} : vector<4x5x2x8x32xf32> to vector<4x4x1x8x32xf32>
    %99 = vector.shape_cast %98 : vector<4x4x1x8x32xf32> to vector<4x4x8x32xf32>
    %100 = vector.shape_cast %99 : vector<4x4x8x32xf32> to vector<128x32xf32>
    %101 = vector.extract_strided_slice %76 {offsets = [1, 0, 0, 0, 0], sizes = [4, 1, 10, 8, 32], strides = [1, 1, 1, 1, 1]} : vector<5x2x10x8x32xf32> to vector<4x1x10x8x32xf32>
    %102 = vector.shape_cast %101 : vector<4x1x10x8x32xf32> to vector<4x10x8x32xf32>
    %103 = vector.shape_cast %102 : vector<4x10x8x32xf32> to vector<4x5x2x8x32xf32>
    %104 = vector.extract_strided_slice %103 {offsets = [0, 0, 0, 0, 0], sizes = [4, 4, 1, 8, 32], strides = [1, 1, 1, 1, 1]} : vector<4x5x2x8x32xf32> to vector<4x4x1x8x32xf32>
    %105 = vector.shape_cast %104 : vector<4x4x1x8x32xf32> to vector<4x4x8x32xf32>
    %106 = vector.shape_cast %105 : vector<4x4x8x32xf32> to vector<128x32xf32>
    %107 = vector.extract_strided_slice %103 {offsets = [0, 0, 1, 0, 0], sizes = [4, 4, 1, 8, 32], strides = [1, 1, 1, 1, 1]} : vector<4x5x2x8x32xf32> to vector<4x4x1x8x32xf32>
    %108 = vector.shape_cast %107 : vector<4x4x1x8x32xf32> to vector<4x4x8x32xf32>
    %109 = vector.shape_cast %108 : vector<4x4x8x32xf32> to vector<128x32xf32>
    %110 = vector.extract_strided_slice %103 {offsets = [0, 1, 0, 0, 0], sizes = [4, 4, 1, 8, 32], strides = [1, 1, 1, 1, 1]} : vector<4x5x2x8x32xf32> to vector<4x4x1x8x32xf32>
    %111 = vector.shape_cast %110 : vector<4x4x1x8x32xf32> to vector<4x4x8x32xf32>
    %112 = vector.shape_cast %111 : vector<4x4x8x32xf32> to vector<128x32xf32>
    %113 = tpu.concatenate %82, %85, %88, %94, %97, %100, %106, %109, %112 in 1 : vector<128x32xf32>, vector<128x32xf32>, vector<128x32xf32>, vector<128x32xf32>, vector<128x32xf32>, vector<128x32xf32>, vector<128x32xf32>, vector<128x32xf32>, vector<128x32xf32> -> vector<128x288xf32>
    %cst_53 = arith.constant dense<0.000000e+00> : vector<128x64xf32>
    %114 = tpu.matmul %113, %75, %cst_53 {dimension_numbers = #tpu.dot_dimension_numbers<[1], [0], [0], [1], [0, 0, 1, 1], [], []>} : vector<128x288xf32>, vector<288x64xf32>, vector<128x64xf32> -> vector<128x64xf32>
    %c0_54 = arith.constant 0 : index
    %c0_55 = arith.constant 0 : index
    %115 = vector.load %arg9[%c0_54, %c0_55] : memref<1x64xf32, #tpu.memory_space<vmem>>, vector<1x64xf32>
    %116 = vector.broadcast %115 : vector<1x64xf32> to vector<128x64xf32>
    %117 = arith.addf %114, %116 : vector<128x64xf32>
    %cst_56 = arith.constant 2.000000e-01 : f32
    %118 = vector.broadcast %cst_56 : f32 to vector<128x64xf32>
    %119 = arith.mulf %118, %117 : vector<128x64xf32>
    %120 = arith.maximumf %117, %119 : vector<128x64xf32>
    %c0_57 = arith.constant 0 : index
    %c0_58 = arith.constant 0 : index
    %121 = vector.load %arg10[%c0_57, %c0_58] : memref<1x64xf32, #tpu.memory_space<vmem>>, vector<1x64xf32>
    %122 = vector.broadcast %121 : vector<1x64xf32> to vector<128x64xf32>
    %123 = arith.mulf %120, %122 : vector<128x64xf32>
    %c0_59 = arith.constant 0 : index
    %c0_60 = arith.constant 0 : index
    %124 = vector.load %arg11[%c0_59, %c0_60] : memref<1x64xf32, #tpu.memory_space<vmem>>, vector<1x64xf32>
    %125 = vector.broadcast %124 : vector<1x64xf32> to vector<128x64xf32>
    %126 = arith.addf %123, %125 : vector<128x64xf32>
    %127 = vector.shape_cast %126 : vector<128x64xf32> to vector<4x4x8x64xf32>
    %cst_61 = arith.constant 0.000000e+00 : f32
    %128 = vector.broadcast %cst_61 : f32 to vector<1x6x8x64xf32>
    %c0_62 = arith.constant 0 : index
    %c0_63 = arith.constant 0 : index
    %c0_64 = arith.constant 0 : index
    %c0_65 = arith.constant 0 : index
    %129 = vector.load %arg21[%c0_62, %c0_63, %c0_64, %c0_65] : memref<6x6x8x64xf32, #tpu.memory_space<vmem>>, vector<1x6x8x64xf32>
    tpu.vector_store %arg21[%c0_62, %c0_63, %c0_64, %c0_65], %128 {strides = array<i32>} : memref<6x6x8x64xf32, #tpu.memory_space<vmem>>, vector<1x6x8x64xf32>,
    %cst_66 = arith.constant 0.000000e+00 : f32
    %130 = vector.broadcast %cst_66 : f32 to vector<6x1x8x64xf32>
    %c0_67 = arith.constant 0 : index
    %c0_68 = arith.constant 0 : index
    %c0_69 = arith.constant 0 : index
    %c0_70 = arith.constant 0 : index
    %131 = vector.load %arg21[%c0_67, %c0_68, %c0_69, %c0_70] : memref<6x6x8x64xf32, #tpu.memory_space<vmem>>, vector<6x1x8x64xf32>
    tpu.vector_store %arg21[%c0_67, %c0_68, %c0_69, %c0_70], %130 {strides = array<i32>} : memref<6x6x8x64xf32, #tpu.memory_space<vmem>>, vector<6x1x8x64xf32>,
    %c1_71 = arith.constant 1 : index
    %c1_72 = arith.constant 1 : index
    %c0_73 = arith.constant 0 : index
    %c0_74 = arith.constant 0 : index
    %132 = vector.load %arg21[%c1_71, %c1_72, %c0_73, %c0_74] : memref<6x6x8x64xf32, #tpu.memory_space<vmem>>, vector<4x4x8x64xf32>
    tpu.vector_store %arg21[%c1_71, %c1_72, %c0_73, %c0_74], %127 {strides = array<i32>} : memref<6x6x8x64xf32, #tpu.memory_space<vmem>>, vector<4x4x8x64xf32>,
    %c0_75 = arith.constant 0 : index
    %c0_76 = arith.constant 0 : index
    %c0_77 = arith.constant 0 : index
    %c0_78 = arith.constant 0 : index
    %133 = vector.load %arg21[%c0_75, %c0_76, %c0_77, %c0_78] : memref<6x6x8x64xf32, #tpu.memory_space<vmem>>, vector<6x6x8x64xf32>
    %c0_79 = arith.constant 0 : index
    %c0_80 = arith.constant 0 : index
    %134 = vector.load %arg12[%c0_79, %c0_80] : memref<576x128xf32, #tpu.memory_space<vmem>>, vector<576x128xf32>
    %135 = vector.shape_cast %133 : vector<6x6x8x64xf32> to vector<3x2x6x8x64xf32>
    %136 = vector.extract_strided_slice %135 {offsets = [0, 0, 0, 0, 0], sizes = [2, 1, 6, 8, 64], strides = [1, 1, 1, 1, 1]} : vector<3x2x6x8x64xf32> to vector<2x1x6x8x64xf32>
    %137 = vector.shape_cast %136 : vector<2x1x6x8x64xf32> to vector<2x6x8x64xf32>
    %138 = vector.shape_cast %137 : vector<2x6x8x64xf32> to vector<2x3x2x8x64xf32>
    %139 = vector.extract_strided_slice %138 {offsets = [0, 0, 0, 0, 0], sizes = [2, 2, 1, 8, 64], strides = [1, 1, 1, 1, 1]} : vector<2x3x2x8x64xf32> to vector<2x2x1x8x64xf32>
    %140 = vector.shape_cast %139 : vector<2x2x1x8x64xf32> to vector<2x2x8x64xf32>
    %141 = vector.shape_cast %140 : vector<2x2x8x64xf32> to vector<32x64xf32>
    %142 = vector.extract_strided_slice %138 {offsets = [0, 0, 1, 0, 0], sizes = [2, 2, 1, 8, 64], strides = [1, 1, 1, 1, 1]} : vector<2x3x2x8x64xf32> to vector<2x2x1x8x64xf32>
    %143 = vector.shape_cast %142 : vector<2x2x1x8x64xf32> to vector<2x2x8x64xf32>
    %144 = vector.shape_cast %143 : vector<2x2x8x64xf32> to vector<32x64xf32>
    %145 = vector.extract_strided_slice %138 {offsets = [0, 1, 0, 0, 0], sizes = [2, 2, 1, 8, 64], strides = [1, 1, 1, 1, 1]} : vector<2x3x2x8x64xf32> to vector<2x2x1x8x64xf32>
    %146 = vector.shape_cast %145 : vector<2x2x1x8x64xf32> to vector<2x2x8x64xf32>
    %147 = vector.shape_cast %146 : vector<2x2x8x64xf32> to vector<32x64xf32>
    %148 = vector.extract_strided_slice %135 {offsets = [0, 1, 0, 0, 0], sizes = [2, 1, 6, 8, 64], strides = [1, 1, 1, 1, 1]} : vector<3x2x6x8x64xf32> to vector<2x1x6x8x64xf32>
    %149 = vector.shape_cast %148 : vector<2x1x6x8x64xf32> to vector<2x6x8x64xf32>
    %150 = vector.shape_cast %149 : vector<2x6x8x64xf32> to vector<2x3x2x8x64xf32>
    %151 = vector.extract_strided_slice %150 {offsets = [0, 0, 0, 0, 0], sizes = [2, 2, 1, 8, 64], strides = [1, 1, 1, 1, 1]} : vector<2x3x2x8x64xf32> to vector<2x2x1x8x64xf32>
    %152 = vector.shape_cast %151 : vector<2x2x1x8x64xf32> to vector<2x2x8x64xf32>
    %153 = vector.shape_cast %152 : vector<2x2x8x64xf32> to vector<32x64xf32>
    %154 = vector.extract_strided_slice %150 {offsets = [0, 0, 1, 0, 0], sizes = [2, 2, 1, 8, 64], strides = [1, 1, 1, 1, 1]} : vector<2x3x2x8x64xf32> to vector<2x2x1x8x64xf32>
    %155 = vector.shape_cast %154 : vector<2x2x1x8x64xf32> to vector<2x2x8x64xf32>
    %156 = vector.shape_cast %155 : vector<2x2x8x64xf32> to vector<32x64xf32>
    %157 = vector.extract_strided_slice %150 {offsets = [0, 1, 0, 0, 0], sizes = [2, 2, 1, 8, 64], strides = [1, 1, 1, 1, 1]} : vector<2x3x2x8x64xf32> to vector<2x2x1x8x64xf32>
    %158 = vector.shape_cast %157 : vector<2x2x1x8x64xf32> to vector<2x2x8x64xf32>
    %159 = vector.shape_cast %158 : vector<2x2x8x64xf32> to vector<32x64xf32>
    %160 = vector.extract_strided_slice %135 {offsets = [1, 0, 0, 0, 0], sizes = [2, 1, 6, 8, 64], strides = [1, 1, 1, 1, 1]} : vector<3x2x6x8x64xf32> to vector<2x1x6x8x64xf32>
    %161 = vector.shape_cast %160 : vector<2x1x6x8x64xf32> to vector<2x6x8x64xf32>
    %162 = vector.shape_cast %161 : vector<2x6x8x64xf32> to vector<2x3x2x8x64xf32>
    %163 = vector.extract_strided_slice %162 {offsets = [0, 0, 0, 0, 0], sizes = [2, 2, 1, 8, 64], strides = [1, 1, 1, 1, 1]} : vector<2x3x2x8x64xf32> to vector<2x2x1x8x64xf32>
    %164 = vector.shape_cast %163 : vector<2x2x1x8x64xf32> to vector<2x2x8x64xf32>
    %165 = vector.shape_cast %164 : vector<2x2x8x64xf32> to vector<32x64xf32>
    %166 = vector.extract_strided_slice %162 {offsets = [0, 0, 1, 0, 0], sizes = [2, 2, 1, 8, 64], strides = [1, 1, 1, 1, 1]} : vector<2x3x2x8x64xf32> to vector<2x2x1x8x64xf32>
    %167 = vector.shape_cast %166 : vector<2x2x1x8x64xf32> to vector<2x2x8x64xf32>
    %168 = vector.shape_cast %167 : vector<2x2x8x64xf32> to vector<32x64xf32>
    %169 = vector.extract_strided_slice %162 {offsets = [0, 1, 0, 0, 0], sizes = [2, 2, 1, 8, 64], strides = [1, 1, 1, 1, 1]} : vector<2x3x2x8x64xf32> to vector<2x2x1x8x64xf32>
    %170 = vector.shape_cast %169 : vector<2x2x1x8x64xf32> to vector<2x2x8x64xf32>
    %171 = vector.shape_cast %170 : vector<2x2x8x64xf32> to vector<32x64xf32>
    %172 = tpu.concatenate %141, %144, %147, %153, %156, %159, %165, %168, %171 in 1 : vector<32x64xf32>, vector<32x64xf32>, vector<32x64xf32>, vector<32x64xf32>, vector<32x64xf32>, vector<32x64xf32>, vector<32x64xf32>, vector<32x64xf32>, vector<32x64xf32> -> vector<32x576xf32>
    %cst_81 = arith.constant dense<0.000000e+00> : vector<32x128xf32>
    %173 = tpu.matmul %172, %134, %cst_81 {dimension_numbers = #tpu.dot_dimension_numbers<[1], [0], [0], [1], [0, 0, 1, 1], [], []>} : vector<32x576xf32>, vector<576x128xf32>, vector<32x128xf32> -> vector<32x128xf32>
    %c0_82 = arith.constant 0 : index
    %c0_83 = arith.constant 0 : index
    %174 = vector.load %arg13[%c0_82, %c0_83] : memref<1x128xf32, #tpu.memory_space<vmem>>, vector<1x128xf32>
    %175 = vector.broadcast %174 : vector<1x128xf32> to vector<32x128xf32>
    %176 = arith.addf %173, %175 : vector<32x128xf32>
    %cst_84 = arith.constant 2.000000e-01 : f32
    %177 = vector.broadcast %cst_84 : f32 to vector<32x128xf32>
    %178 = arith.mulf %177, %176 : vector<32x128xf32>
    %179 = arith.maximumf %176, %178 : vector<32x128xf32>
    %c0_85 = arith.constant 0 : index
    %c0_86 = arith.constant 0 : index
    %180 = vector.load %arg14[%c0_85, %c0_86] : memref<1x128xf32, #tpu.memory_space<vmem>>, vector<1x128xf32>
    %181 = vector.broadcast %180 : vector<1x128xf32> to vector<32x128xf32>
    %182 = arith.mulf %179, %181 : vector<32x128xf32>
    %c0_87 = arith.constant 0 : index
    %c0_88 = arith.constant 0 : index
    %183 = vector.load %arg15[%c0_87, %c0_88] : memref<1x128xf32, #tpu.memory_space<vmem>>, vector<1x128xf32>
    %184 = vector.broadcast %183 : vector<1x128xf32> to vector<32x128xf32>
    %185 = arith.addf %182, %184 : vector<32x128xf32>
    %186 = vector.shape_cast %185 : vector<32x128xf32> to vector<4x8x128xf32>
    %c0_89 = arith.constant 0 : index
    %c0_90 = arith.constant 0 : index
    %c0_91 = arith.constant 0 : index
    %187 = vector.load %arg16[%c0_89, %c0_90, %c0_91] : memref<4x1x128xf32, #tpu.memory_space<vmem>>, vector<4x1x128xf32>
    %188 = vector.broadcast %187 : vector<4x1x128xf32> to vector<4x8x128xf32>
    %189 = arith.mulf %186, %188 : vector<4x8x128xf32>
    %cst_92 = arith.constant dense<0.000000e+00> : vector<4x8xf32>
    %190 = vector.multi_reduction <add>, %189, %cst_92 [2] : vector<4x8x128xf32> to vector<4x8xf32>
    %191 = vector.shape_cast %190 : vector<4x8xf32> to vector<4x8x1xf32>
    %cst_93 = arith.constant dense<0.000000e+00> : vector<8x1xf32>
    %192 = vector.multi_reduction <add>, %191, %cst_93 [0] : vector<4x8x1xf32> to vector<8x1xf32>
    %c0_94 = arith.constant 0 : index
    %c0_95 = arith.constant 0 : index
    %193 = vector.load %arg17[%c0_94, %c0_95] : memref<1x1xf32, #tpu.memory_space<vmem>>, vector<1x1xf32>
    %194 = vector.broadcast %193 : vector<1x1xf32> to vector<8x1xf32>
    %195 = arith.addf %192, %194 : vector<8x1xf32>
    %c0_96 = arith.constant 0 : index
    %c0_97 = arith.constant 0 : index
    %196 = vector.load %arg18[%c0_96, %c0_97] : memref<8x1xf32, #tpu.memory_space<vmem>>, vector<8x1xf32>
    tpu.vector_store %arg18[%c0_96, %c0_97], %195 {strides = array<i32>} : memref<8x1xf32, #tpu.memory_space<vmem>>, vector<8x1xf32>,
    return
  }
  func.func @transform_0(%arg0: i32) -> (i32, i32) {
    %c0_i32 = arith.constant 0 : i32
    %c0_i32_0 = arith.constant 0 : i32
    return %arg0, %c0_i32 : i32, i32
  }
  func.func @transform_1(%arg0: i32) -> (i32, i32) {
    %c0_i32 = arith.constant 0 : i32
    %c0_i32_0 = arith.constant 0 : i32
    %c0_i32_1 = arith.constant 0 : i32
    return %c0_i32, %c0_i32_0 : i32, i32
  }
  func.func @transform_2(%arg0: i32) -> (i32, i32) {
    %c0_i32 = arith.constant 0 : i32
    %c0_i32_0 = arith.constant 0 : i32
    %c0_i32_1 = arith.constant 0 : i32
    return %c0_i32, %c0_i32_0 : i32, i32
  }
  func.func @transform_3(%arg0: i32) -> (i32, i32) {
    %c0_i32 = arith.constant 0 : i32
    %c0_i32_0 = arith.constant 0 : i32
    %c0_i32_1 = arith.constant 0 : i32
    return %c0_i32, %c0_i32_0 : i32, i32
  }
  func.func @transform_4(%arg0: i32) -> (i32, i32) {
    %c0_i32 = arith.constant 0 : i32
    %c0_i32_0 = arith.constant 0 : i32
    %c0_i32_1 = arith.constant 0 : i32
    return %c0_i32, %c0_i32_0 : i32, i32
  }
  func.func @transform_5(%arg0: i32) -> (i32, i32) {
    %c0_i32 = arith.constant 0 : i32
    %c0_i32_0 = arith.constant 0 : i32
    %c0_i32_1 = arith.constant 0 : i32
    return %c0_i32, %c0_i32_0 : i32, i32
  }
  func.func @transform_6(%arg0: i32) -> (i32, i32) {
    %c0_i32 = arith.constant 0 : i32
    %c0_i32_0 = arith.constant 0 : i32
    %c0_i32_1 = arith.constant 0 : i32
    return %c0_i32, %c0_i32_0 : i32, i32
  }
  func.func @transform_7(%arg0: i32) -> (i32, i32) {
    %c0_i32 = arith.constant 0 : i32
    %c0_i32_0 = arith.constant 0 : i32
    %c0_i32_1 = arith.constant 0 : i32
    return %c0_i32, %c0_i32_0 : i32, i32
  }
  func.func @transform_8(%arg0: i32) -> (i32, i32) {
    %c0_i32 = arith.constant 0 : i32
    %c0_i32_0 = arith.constant 0 : i32
    %c0_i32_1 = arith.constant 0 : i32
    return %c0_i32, %c0_i32_0 : i32, i32
  }
  func.func @transform_9(%arg0: i32) -> (i32, i32) {
    %c0_i32 = arith.constant 0 : i32
    %c0_i32_0 = arith.constant 0 : i32
    %c0_i32_1 = arith.constant 0 : i32
    return %c0_i32, %c0_i32_0 : i32, i32
  }
  func.func @transform_10(%arg0: i32) -> (i32, i32) {
    %c0_i32 = arith.constant 0 : i32
    %c0_i32_0 = arith.constant 0 : i32
    %c0_i32_1 = arith.constant 0 : i32
    return %c0_i32, %c0_i32_0 : i32, i32
  }
  func.func @transform_11(%arg0: i32) -> (i32, i32) {
    %c0_i32 = arith.constant 0 : i32
    %c0_i32_0 = arith.constant 0 : i32
    %c0_i32_1 = arith.constant 0 : i32
    return %c0_i32, %c0_i32_0 : i32, i32
  }
  func.func @transform_12(%arg0: i32) -> (i32, i32) {
    %c0_i32 = arith.constant 0 : i32
    %c0_i32_0 = arith.constant 0 : i32
    %c0_i32_1 = arith.constant 0 : i32
    return %c0_i32, %c0_i32_0 : i32, i32
  }
  func.func @transform_13(%arg0: i32) -> (i32, i32) {
    %c0_i32 = arith.constant 0 : i32
    %c0_i32_0 = arith.constant 0 : i32
    %c0_i32_1 = arith.constant 0 : i32
    return %c0_i32, %c0_i32_0 : i32, i32
  }
  func.func @transform_14(%arg0: i32) -> (i32, i32) {
    %c0_i32 = arith.constant 0 : i32
    %c0_i32_0 = arith.constant 0 : i32
    %c0_i32_1 = arith.constant 0 : i32
    return %c0_i32, %c0_i32_0 : i32, i32
  }
  func.func @transform_15(%arg0: i32) -> (i32, i32, i32) {
    %c0_i32 = arith.constant 0 : i32
    %c0_i32_0 = arith.constant 0 : i32
    %c0_i32_1 = arith.constant 0 : i32
    %c0_i32_2 = arith.constant 0 : i32
    return %c0_i32, %c0_i32_0, %c0_i32_1 : i32, i32, i32
  }
  func.func @transform_16(%arg0: i32) -> (i32, i32) {
    %c0_i32 = arith.constant 0 : i32
    %c0_i32_0 = arith.constant 0 : i32
    %c0_i32_1 = arith.constant 0 : i32
    return %c0_i32, %c0_i32_0 : i32, i32
  }
  func.func @transform_17(%arg0: i32) -> (i32, i32) {
    %c0_i32 = arith.constant 0 : i32
    %c0_i32_0 = arith.constant 0 : i32
    return %arg0, %c0_i32 : i32, i32
  }
}

</mosaic_0001>

<bundles_post_ra>
// kernel: discriminator_forward.1
= control target key start
LH: loop header
LB: loop body
LE: loop exit
PB: predicated region body
PF: predicated region fallthrough
CT: control target
= control target key end

     0   :  { %vm1089_vm0 = vcmask 1040384   ;;  %vm320_vm1 = vcmask 72704   ;;  %vm2390_vm2 = vcmask 130048   ;;  %v8947_v24 = vmov 0.0   ;;  %s8948_s25 = smov 16   ;;  %s8950_s21 = smov 48   ;;  %s13987_s1 = inlined_call_operand.vmem [shape: f32[9,16], index: 1, kind: input, shape index: {}]   ;;  %s13988_s0 = inlined_call_operand.vmem [shape: f32[2048,9], index: 0, kind: input, shape index: {}]   ;;  %s13989_s2 = inlined_call_operand.vmem [shape: f32[1,16], index: 2, kind: input, shape index: {}]   ;;  %s13990_s3 = inlined_call_operand.vmem [shape: f32[144,32], index: 3, kind: input, shape index: {}]   ;;  %s13991_s4 = inlined_call_operand.vmem [shape: f32[1,32], index: 4, kind: input, shape index: {}]   ;;  %s13992_s5 = inlined_call_operand.vmem [shape: f32[1,32], index: 5, kind: input, shape index: {}]   ;;  %s13993_s6 = inlined_call_operand.vmem [shape: f32[1,32], index: 6, kind: input, shape index: {}]   ;;  %s13994_s7 = inlined_call_operand.vmem [shape: f32[288,64], index: 7, kind: input, shape index: {}]   ;;  %s13995_s8 = inlined_call_operand.vmem [shape: f32[1,64], index: 8, kind: input, shape index: {}]   ;;  %s13996_s11 = inlined_call_operand.vmem [shape: f32[576,128], index: 11, kind: input, shape index: {}]   ;;  %s13997_s9 = inlined_call_operand.vmem [shape: f32[1,64], index: 9, kind: input, shape index: {}]   ;;  %s13998_s10 = inlined_call_operand.vmem [shape: f32[1,64], index: 10, kind: input, shape index: {}]   ;;  %s13999_s12 = inlined_call_operand.vmem [shape: f32[1,128], index: 12, kind: input, shape index: {}]   ;;  %s14000_s13 = inlined_call_operand.vmem [shape: f32[1,128], index: 13, kind: input, shape index: {}]   ;;  %s14001_s14 = inlined_call_operand.vmem [shape: f32[1,128], index: 14, kind: input, shape index: {}]   ;;  %s14002_s15 = inlined_call_operand.vmem [shape: f32[4,1,128], index: 15, kind: input, shape index: {}]   ;;  %s14003_s16 = inlined_call_operand.<no memory space> [shape: f32[1,1], index: 16, kind: input, shape index: {}]   ;;  %s14004_s17 = inlined_call_operand.vmem [shape: f32[8,1], index: 17, kind: output, shape index: {}]  }
   0x1   :  { %14037 = sst [smem:[#allocation32_spill]] %s13987_s1  ;;  %2392 = vst.msk [vmem:[#allocation2 + $0x8] sm:$0xff] %vm2390_vm2, %v8947_v24  ;;  %s14009_s1 = smov 32   ;;  %v9257_v56 = vld [vmem:[%s13989_s2] ss:$0 sm:$0xff]  ;;  %vm4686_vm3 = vcmask 261120  }
   0x2   :  { %14038 = sst [smem:[#allocation33_spill]] %s13988_s0  ;;  %2394 = vst.msk [vmem:[#allocation2 + $0x18] sm:$0xff] %vm2390_vm2, %v8947_v24  ;;  %s8951_s29 = smov 64   ;;  %vm4816_vm4 = vcmask 523264   ;;  %vm4751_vm5 = vcmask 392192   ;;  %vm4881_vm6 = vcmask 654336  }
   0x3   :  { %s14039_s26 = sld [smem:[#allocation32_spill]]  ;;  %2391 = vst.msk [vmem:[#allocation2] sm:$0xff] %vm2390_vm2, %v8947_v24  ;;  %s14007_s24 = smov 80   ;;  %vm4946_vm7 = vcmask 785408   ;;  %vm5011_vm8 = vcmask 916480   ;;  %vm7226_vm9 = vcmask 7168  }
   0x4   :  { %s14040_s30 = sld [smem:[#allocation33_spill]]  ;;  %2393 = vst.msk [vmem:[#allocation2 + $0x10] sm:$0xff] %vm2390_vm2, %v8947_v24  ;;  %s8953_s18 = smov 96  }
   0x5   :  { %2395 = vst.msk [vmem:[#allocation2 + $0x20] sm:$0xff] %vm2390_vm2, %v8947_v24  ;;  %s8954_s27 = smov 112   ;;  %s14050_s28 = smov 32  }
   0x6   :  { %2396 = vst.msk [vmem:[#allocation2 + $0x28] sm:$0xff] %vm2390_vm2, %v8947_v24 }
   0x7   :  { %2397 = vst.msk [vmem:[#allocation2 + $0x30] sm:$0xff] %vm2390_vm2, %v8947_v24 }
   0x8   :  { %v2685_v27 = vld [vmem:[#allocation2 + $0x8] sm:$0xff]  ;;  %2398 = vst.msk [vmem:[#allocation2 + $0x38] sm:$0xff] %vm2390_vm2, %v8947_v24 }
   0x9   :  { %v315_v0 = vld [vmem:[%s14039_s26 + $0x8] sm:$0x1]  ;;  %v314_v1 = vld [vmem:[%s14039_s26] sm:$0xff]  ;;  %v2687_v28 = vld [vmem:[#allocation2 + $0x18] sm:$0xff]  ;;  %2399 = vst.msk [vmem:[#allocation2 + $0x40] sm:$0xff] %vm2390_vm2, %v8947_v24 }
   0xa   :  { %7232 = vmatpush.msk.msra.mxu0 %vm1089_vm0, %v315_v0  ;;  %7573 = vmatpush.msk.msra.mxu1 %vm1089_vm0, %v315_v0  ;;  %v58_v2 = vld [vmem:[%s14040_s30] sm:$0xff]  ;;  %v172_v3 = vld [vmem:[%s14040_s30 + $0x390] sm:$0xff]  ;;  %v59_v4 = vld [vmem:[%s14040_s30 + $0x8] sm:$0xff]  ;;  %v7601_v29 = vpack.i.bf16 %v2687_v28, %v2685_v27  ;;  %2400 = vst.msk [vmem:[#allocation2 + $0x48] sm:$0xff] %vm2390_vm2, %v8947_v24 }
   0xb   :  { %7574 = vmatpush.msk.msra.mxu2 %vm1089_vm0, %v315_v0  ;;  %v173_v5 = vld [vmem:[%s14040_s30 + $0x398] sm:$0xff]  ;;  %v60_v6 = vld [vmem:[%s14040_s30 + $0x10] sm:$0xff]  ;;  %v174_v7 = vld [vmem:[%s14040_s30 + $0x3a0] sm:$0xff]  ;;  %2401 = vst.msk [vmem:[#allocation2 + $0x50] sm:$0xff] %vm2390_vm2, %v8947_v24 }
   0xc   :  { %1108 = vmatpush.msra.mxu0 %v314_v1  ;;  %7575 = vmatpush.msra.mxu1 %v314_v1  ;;  %v61_v8 = vld [vmem:[%s14040_s30 + $0x18] sm:$0xff]  ;;  %v175_v9 = vld [vmem:[%s14040_s30 + $0x3a8] sm:$0xff]  ;;  %v62_v10 = vld [vmem:[%s14040_s30 + $0x20] sm:$0xff]  ;;  %2402 = vst.msk [vmem:[#allocation2 + $0x58] sm:$0xff] %vm2390_vm2, %v8947_v24 }
   0xd   :  { %7233 = vmatmul.msk.f32.vlgmr.msra.gmra.mxu0 %vm320_vm1, %v58_v2  ;;  %7347 = vmatmul.msk.f32.vlgmr.msra.gmra.mxu1 %vm320_vm1, %v172_v3  ;;  %v176_v11 = vld [vmem:[%s14040_s30 + $0x3b0] sm:$0xff]  ;;  %v63_v12 = vld [vmem:[%s14040_s30 + $0x28] sm:$0xff]  ;;  %v177_v13 = vld [vmem:[%s14040_s30 + $0x3b8] sm:$0xff]  ;;  %2403 = vst.msk [vmem:[#allocation2 + $0x60] sm:$0xff] %vm2390_vm2, %v8947_v24 }
   0xe   :  { %7576 = vmatpush.msra.mxu2 %v314_v1  ;;  %v64_v14 = vld [vmem:[%s14040_s30 + $0x30] sm:$0xff]  ;;  %v178_v15 = vld [vmem:[%s14040_s30 + $0x3c0] sm:$0xff]  ;;  %v65_v16 = vld [vmem:[%s14040_s30 + $0x38] sm:$0xff]  ;;  %7602 = vrot.lane.b32.xlu0 %v7601_v29, %s8948_s25  ;;  %2404 = vst.msk [vmem:[#allocation2 + $0x68] sm:$0xff] %vm2390_vm2, %v8947_v24 }
   0xf   :  { %v179_v17 = vld [vmem:[%s14040_s30 + $0x3c8] sm:$0xff]  ;;  %v66_v18 = vld [vmem:[%s14040_s30 + $0x40] sm:$0xff]  ;;  %v180_v19 = vld [vmem:[%s14040_s30 + $0x3d0] sm:$0xff]  ;;  %2405 = vst.msk [vmem:[#allocation2 + $0x70] sm:$0xff] %vm2390_vm2, %v8947_v24 }
  0x10   :  { %v67_v20 = vld [vmem:[%s14040_s30 + $0x48] sm:$0xff]  ;;  %v181_v21 = vld [vmem:[%s14040_s30 + $0x3d8] sm:$0xff]  ;;  %v68_v22 = vld [vmem:[%s14040_s30 + $0x50] sm:$0xff]  ;;  %2406 = vst.msk [vmem:[#allocation2 + $0x78] sm:$0xff] %vm2390_vm2, %v8947_v24 }
  0x11   :  { %v182_v23 = vld [vmem:[%s14040_s30 + $0x3e0] sm:$0xff]  ;;  %v69_v25 = vld [vmem:[%s14040_s30 + $0x58] sm:$0xff]  ;;  %v183_v26 = vld [vmem:[%s14040_s30 + $0x3e8] sm:$0xff]  ;;  %2407 = vst.msk [vmem:[#allocation2 + $0x80] sm:$0xff] %vm2390_vm2, %v8947_v24 }
  0x12   :  { %v70_v30 = vld [vmem:[%s14040_s30 + $0x60] sm:$0xff]  ;;  %v184_v31 = vld [vmem:[%s14040_s30 + $0x3f0] sm:$0xff]  ;;  %2410 = vst.msk [vmem:[#allocation2 + $0x90] sm:$0xff] %vm2390_vm2, %v8947_v24  ;;  %v71_v35 = vld [vmem:[%s14040_s30 + $0x68] sm:$0xff] }
  0x13   :  { %v2686_v32 = vld [vmem:[#allocation2 + $0x10] sm:$0xff]  ;;  %v2688_v33 = vld [vmem:[#allocation2 + $0x20] sm:$0xff]  ;;  %v185_v36 = vld [vmem:[%s14040_s30 + $0x3f8] sm:$0xff]  ;;  %2411 = vst.msk [vmem:[#allocation2 + $0x120] sm:$0xff] %vm2390_vm2, %v8947_v24 }
  0x14   :  { %v7621_v34 = vpack.i.bf16 %v2688_v33, %v2686_v32  ;;  %2412 = vst.msk [vmem:[#allocation2 + $0x1b0] sm:$0xff] %vm2390_vm2, %v8947_v24  ;;  %v2693_v37 = vld [vmem:[#allocation2 + $0x48] sm:$0xff]  ;;  %v2695_v38 = vld [vmem:[#allocation2 + $0x58] sm:$0xff]  ;;  %v72_v44 = vld [vmem:[%s14040_s30 + $0x70] sm:$0xff] }
  0x15   :  { %7234 = vmatmul.msk.f32.gmra.mxu0 %vm320_vm1, %v59_v4  ;;  %7348 = vmatmul.msk.f32.gmra.mxu1 %vm320_vm1, %v173_v5  ;;  %2413 = vst.msk [vmem:[#allocation2 + $0x240] sm:$0xff] %vm2390_vm2, %v8947_v24  ;;  %v7611_v40 = vpack.i.bf16 %v2695_v38, %v2693_v37  ;;  %v2689_v42 = vld [vmem:[#allocation2 + $0x28] sm:$0xff]  ;;  %v2691_v43 = vld [vmem:[#allocation2 + $0x38] sm:$0xff]  ;;  %v186_v45 = vld [vmem:[%s14040_s30 + $0x400] sm:$0xff] }
  0x16   :  { %7622 = vrot.lane.b32.xlu2 %v7621_v34, %s14009_s1  ;;  %2414 = vst.msk [vmem:[#allocation2 + $0x2d0] sm:$0xff] %vm2390_vm2, %v8947_v24  ;;  %v2698_v39 = vld [vmem:[#allocation2 + $0x70] sm:$0xff]  ;;  %v7606_v47 = vpack.i.bf16 %v2691_v43, %v2689_v42  ;;  %v2697_v48 = vld [vmem:[#allocation2 + $0x68] sm:$0xff]  ;;  %v2692_v52 = vld [vmem:[#allocation2 + $0x40] sm:$0xff] }
  0x17   :  { %2415 = vst.msk [vmem:[#allocation2 + $0x360] sm:$0xff] %vm2390_vm2, %v8947_v24  ;;  %7612 = vrot.lane.b32.xlu1 %v7611_v40, %s8948_s25  ;;  %v2699_v49 = vld [vmem:[#allocation2 + $0x78] sm:$0xff]  ;;  %v2690_v50 = vld [vmem:[#allocation2 + $0x30] sm:$0xff]  ;;  %v187_v54 = vld [vmem:[%s14040_s30 + $0x408] sm:$0xff] }
  0x18   :  { %2416 = vst.msk [vmem:[#allocation2 + $0x3f0] sm:$0xff] %vm2390_vm2, %v8947_v24  ;;  %v2700_v41 = vld [vmem:[#allocation2 + $0x80] sm:$0xff]  ;;  %7607 = vrot.lane.b32.xlu0 %v7606_v47, %s8948_s25  ;;  %v7616_v51 = vpack.i.bf16 %v2699_v49, %v2697_v48  ;;  %v73_v53 = vld [vmem:[%s14040_s30 + $0x78] sm:$0xff]  ;;  %v7626_v55 = vpack.i.bf16 %v2692_v52, %v2690_v50  ;;  %v2694_v57 = vld [vmem:[#allocation2 + $0x50] sm:$0xff] }
  0x19   :  { %2417 = vst.msk [vmem:[#allocation2 + $0x480] sm:$0xff] %vm2390_vm2, %v8947_v24  ;;  %v7636_v46 = vpack.i.bf16 %v2700_v41, %v2698_v39  ;;  %v2696_v58 = vld [vmem:[#allocation2 + $0x60] sm:$0xff]  ;;  %v188_v62 = vld [vmem:[%s14040_s30 + $0x410] sm:$0xff]  ;;  %v77_v33 = vld [vmem:[%s14040_s30 + $0x98] sm:$0xff] }
  0x1a   :  { %2418 = vst.msk [vmem:[#allocation2 + $0x510] sm:$0xff] %vm2390_vm2, %v8947_v24  ;;  %v74_v61 = vld [vmem:[%s14040_s30 + $0x80] sm:$0xff]  ;;  %v7631_v63 = vpack.i.bf16 %v2696_v58, %v2694_v57  ;;  %v191_v34 = vld [vmem:[%s14040_s30 + $0x428] sm:$0xff]  ;;  %v192_v48 = vld [vmem:[%s14040_s30 + $0x430] sm:$0xff] }
  0x1b   :  { %2419 = vst.msk [vmem:[#allocation2 + $0x5a0] sm:$0xff] %vm2390_vm2, %v8947_v24  ;;  %v78_v47 = vld [vmem:[%s14040_s30 + $0xa0] sm:$0xff]  ;;  %v288_v58 = vld [vmem:[%s14040_s30 + $0x730] sm:$0xff] }
  0x1c   :  { %2420 = vst.msk [vmem:[#allocation2 + $0x630] sm:$0xff] %vm2390_vm2, %v8947_v24 }
  0x1d   :  { %7235 = vmatmul.msk.f32.gmra.mxu0 %vm320_vm1, %v60_v6  ;;  %7349 = vmatmul.msk.f32.gmra.mxu1 %vm320_vm1, %v174_v7  ;;  %2421 = vst.msk [vmem:[#allocation2 + $0x6c0] sm:$0xff] %vm2390_vm2, %v8947_v24 }
  0x1e   :  { %7637 = vrot.lane.b32.xlu2 %v7636_v46, %s14009_s1  ;;  %2422 = vst.msk [vmem:[#allocation2 + $0x750] sm:$0xff] %vm2390_vm2, %v8947_v24 }
  0x1f   :  { %2423 = vst.msk [vmem:[#allocation2 + $0x7e0] sm:$0xff] %vm2390_vm2, %v8947_v24  ;;  %7617 = vrot.lane.b32.xlu1 %v7616_v51, %s8948_s25 }
  0x20   :  { %2424 = vst.msk [vmem:[#allocation2 + $0x870] sm:$0xff] %vm2390_vm2, %v8947_v24  ;;  %7627 = vrot.lane.b32.xlu0 %v7626_v55, %s14009_s1 }
  0x21   :  { %2425 = vst.msk [vmem:[#allocation2 + $0x900] sm:$0xff] %vm2390_vm2, %v8947_v24 }
  0x22   :  { %2409 = vst.msk [vmem:[#allocation2] sm:$0xff] %vm2390_vm2, %v8947_v24 }
  0x23   :  { %5891 = vst.msk [vmem:[#allocation3] sm:$0xff] %vm4686_vm3, %v8947_v24 }
  0x24   :  { %5892 = vst.msk [vmem:[#allocation3 + $0x8] sm:$0xff] %vm4686_vm3, %v8947_v24 }
  0x25   :  { %7236 = vmatmul.msk.f32.gmra.mxu0 %vm320_vm1, %v61_v8  ;;  %7350 = vmatmul.msk.f32.gmra.mxu1 %vm320_vm1, %v175_v9  ;;  %v75_v8 = vld [vmem:[%s14040_s30 + $0x88] sm:$0xff]  ;;  %v189_v9 = vld [vmem:[%s14040_s30 + $0x418] sm:$0xff]  ;;  %5893 = vst.msk [vmem:[#allocation3 + $0x10] sm:$0xff] %vm4686_vm3, %v8947_v24 }
  0x26   :  { %5894 = vst.msk [vmem:[#allocation3 + $0x18] sm:$0xff] %vm4686_vm3, %v8947_v24 }
  0x27   :  { %7632 = vrot.lane.b32.xlu1 %v7631_v63, %s14009_s1  ;;  %5895 = vst.msk [vmem:[#allocation3 + $0x20] sm:$0xff] %vm4686_vm3, %v8947_v24 }
  0x28   :  { %5896 = vst.msk [vmem:[#allocation3 + $0x28] sm:$0xff] %vm4686_vm3, %v8947_v24 }
  0x29   :  { %5897 = vst.msk [vmem:[#allocation3 + $0x30] sm:$0xff] %vm4686_vm3, %v8947_v24 }
  0x2a   :  { %5898 = vst.msk [vmem:[#allocation3 + $0x38] sm:$0xff] %vm4686_vm3, %v8947_v24 }
  0x2b   :  { %5899 = vst.msk [vmem:[#allocation3 + $0x40] sm:$0xff] %vm4686_vm3, %v8947_v24 }
  0x2c   :  { %5902 = vst.msk [vmem:[#allocation3 + $0x50] sm:$0xff] %vm4686_vm3, %v8947_v24 }
  0x2d   :  { %7237 = vmatmul.msk.f32.gmra.mxu0 %vm320_vm1, %v62_v10  ;;  %7351 = vmatmul.msk.f32.gmra.mxu1 %vm320_vm1, %v176_v11  ;;  %5903 = vst.msk [vmem:[#allocation3 + $0xa0] sm:$0xff] %vm4686_vm3, %v8947_v24 }
  0x2e   :  { %5904 = vst.msk [vmem:[#allocation3 + $0xf0] sm:$0xff] %vm4686_vm3, %v8947_v24 }
  0x2f   :  { %5905 = vst.msk [vmem:[#allocation3 + $0x140] sm:$0xff] %vm4686_vm3, %v8947_v24 }
  0x30   :  { %5906 = vst.msk [vmem:[#allocation3 + $0x190] sm:$0xff] %vm4686_vm3, %v8947_v24 }
  0x31   :  { %5907 = vst.msk [vmem:[#allocation3 + $0x1e0] sm:$0xff] %vm4686_vm3, %v8947_v24 }
  0x32   :  { %5908 = vst.msk [vmem:[#allocation3 + $0x230] sm:$0xff] %vm4686_vm3, %v8947_v24 }
  0x33   :  { %5909 = vst.msk [vmem:[#allocation3 + $0x280] sm:$0xff] %vm4686_vm3, %v8947_v24 }
  0x34   :  { %5901 = vst.msk [vmem:[#allocation3] sm:$0xff] %vm4686_vm3, %v8947_v24 }
  0x35   :  { %7238 = vmatmul.msk.f32.gmra.mxu0 %vm320_vm1, %v63_v12  ;;  %7352 = vmatmul.msk.f32.gmra.mxu1 %vm320_vm1, %v177_v13  ;;  %6817 = vst.msk [vmem:[#allocation4] sm:$0xff] %vm4816_vm4, %v8947_v24 }
  0x36   :  { %6818 = vst.msk [vmem:[#allocation4 + $0x8] sm:$0xff] %vm4816_vm4, %v8947_v24 }
  0x37   :  { %6819 = vst.msk [vmem:[#allocation4 + $0x10] sm:$0xff] %vm4816_vm4, %v8947_v24 }
  0x38   :  { %6820 = vst.msk [vmem:[#allocation4 + $0x18] sm:$0xff] %vm4816_vm4, %v8947_v24 }
  0x39   :  { %6821 = vst.msk [vmem:[#allocation4 + $0x20] sm:$0xff] %vm4816_vm4, %v8947_v24 }
  0x3a   :  { %6824 = vst.msk [vmem:[#allocation4 + $0x30] sm:$0xff] %vm4816_vm4, %v8947_v24 }
  0x3b   :  { %6825 = vst.msk [vmem:[#allocation4 + $0x60] sm:$0xff] %vm4816_vm4, %v8947_v24 }
  0x3c   :  { %6826 = vst.msk [vmem:[#allocation4 + $0x90] sm:$0xff] %vm4816_vm4, %v8947_v24 }
  0x3d   :  { %7239 = vmatmul.msk.f32.gmra.mxu0 %vm320_vm1, %v64_v14  ;;  %7353 = vmatmul.msk.f32.gmra.mxu1 %vm320_vm1, %v178_v15  ;;  %6827 = vst.msk [vmem:[#allocation4 + $0xc0] sm:$0xff] %vm4816_vm4, %v8947_v24 }
  0x3e   :  { %6823 = vst.msk [vmem:[#allocation4] sm:$0xff] %vm4816_vm4, %v8947_v24 }
  0x45   :  { %7240 = vmatmul.msk.f32.gmra.mxu0 %vm320_vm1, %v65_v16  ;;  %7354 = vmatmul.msk.f32.gmra.mxu1 %vm320_vm1, %v179_v17 }
  0x4d   :  { %7241 = vmatmul.msk.f32.gmra.mxu0 %vm320_vm1, %v66_v18  ;;  %7355 = vmatmul.msk.f32.gmra.mxu1 %vm320_vm1, %v180_v19  ;;  %v76_v18 = vld [vmem:[%s14040_s30 + $0x90] sm:$0xff]  ;;  %v190_v19 = vld [vmem:[%s14040_s30 + $0x420] sm:$0xff] }
  0x55   :  { %7242 = vmatmul.msk.f32.gmra.mxu0 %vm320_vm1, %v67_v20  ;;  %7356 = vmatmul.msk.f32.gmra.mxu1 %vm320_vm1, %v181_v21 }
  0x5d   :  { %7243 = vmatmul.msk.f32.gmra.mxu0 %vm320_vm1, %v68_v22  ;;  %7357 = vmatmul.msk.f32.gmra.mxu1 %vm320_vm1, %v182_v23 }
  0x65   :  { %7244 = vmatmul.msk.f32.gmra.mxu0 %vm320_vm1, %v69_v25  ;;  %7358 = vmatmul.msk.f32.gmra.mxu1 %vm320_vm1, %v183_v26  ;;  %v2701_v25 = vld [vmem:[#allocation2 + $0x90] sm:$0xff] }
  0x6d   :  { %7245 = vmatmul.msk.f32.gmra.mxu0 %vm320_vm1, %v70_v30  ;;  %7359 = vmatmul.msk.f32.gmra.mxu1 %vm320_vm1, %v184_v31  ;;  %v286_v30 = vld [vmem:[%s14040_s30 + $0x720] sm:$0xff] }
  0x6e   :  { %7461 = vmatmul.msk.f32.vlgmr.msra.gmra.mxu2 %vm320_vm1, %v286_v30 }
  0x75   :  { %7246 = vmatmul.msk.f32.gmra.mxu0 %vm320_vm1, %v71_v35  ;;  %7360 = vmatmul.msk.f32.gmra.mxu1 %vm320_vm1, %v185_v36 }
  0x7d   :  { %7247 = vmatmul.msk.f32.gmra.mxu0 %vm320_vm1, %v72_v44  ;;  %7361 = vmatmul.msk.f32.gmra.mxu1 %vm320_vm1, %v186_v45  ;;  %v287_v44 = vld [vmem:[%s14040_s30 + $0x728] sm:$0xff] }
  0x7e   :  { %7462 = vmatmul.msk.f32.gmra.mxu2 %vm320_vm1, %v287_v44 }
  0x85   :  { %7248 = vmatmul.msk.f32.gmra.mxu0 %vm320_vm1, %v73_v53  ;;  %7362 = vmatmul.msk.f32.gmra.mxu1 %vm320_vm1, %v187_v54 }
  0x86   :  { %7463 = vmatmul.msk.f32.gmra.mxu2 %vm320_vm1, %v288_v58 }
  0x8a   :  { %v1110_v59 = vpop.f32.mrf.mxu0  ;;  %v1452_v60 = vpop.f32.mrf.mxu1 }
  0x8b   :  { %v1111_v0 = vadd.f32 %v9257_v56, %v1110_v59  ;;  %v1453_v1 = vadd.f32 %v9257_v56, %v1452_v60 }
  0x8d   :  { %v1878_v2 = vmul.f32 0.2, %v1111_v0  ;;  %v1992_v3 = vmul.f32 0.2, %v1453_v1  ;;  %7249 = vmatmul.msk.f32.gmra.mxu0 %vm320_vm1, %v74_v61  ;;  %7363 = vmatmul.msk.f32.gmra.mxu1 %vm320_vm1, %v188_v62  ;;  %v79_v61 = vld [vmem:[%s14040_s30 + $0xa8] sm:$0xff]  ;;  %v193_v62 = vld [vmem:[%s14040_s30 + $0x438] sm:$0xff] }
  0x8f   :  { %v2134_v4 = vmax.f32 %v1111_v0, %v1878_v2  ;;  %v2248_v5 = vmax.f32 %v1453_v1, %v1992_v3 }
  0x91   :  { %2428 = vst.msk [vmem:[#allocation2 + $0x98] sm:$0xff] %vm2390_vm2, %v2134_v4 }
  0x92   :  { %2542 = vst.msk [vmem:[#allocation2 + $0x498] sm:$0xff] %vm2390_vm2, %v2248_v5  ;;  %v1113_v6 = vpop.f32.mrf.mxu0  ;;  %v1455_v7 = vpop.f32.mrf.mxu1 }
  0x93   :  { %v1114_v10 = vadd.f32 %v9257_v56, %v1113_v6  ;;  %v1456_v11 = vadd.f32 %v9257_v56, %v1455_v7  ;;  %v289_v7 = vld [vmem:[%s14040_s30 + $0x738] sm:$0xff] }
  0x94   :  { %7464 = vmatmul.msk.f32.gmra.mxu2 %vm320_vm1, %v289_v7 }
  0x95   :  { %v1879_v12 = vmul.f32 0.2, %v1114_v10  ;;  %v1993_v13 = vmul.f32 0.2, %v1456_v11  ;;  %7250 = vmatmul.msk.f32.gmra.mxu0 %vm320_vm1, %v75_v8  ;;  %7364 = vmatmul.msk.f32.gmra.mxu1 %vm320_vm1, %v189_v9 }
  0x97   :  { %v2135_v14 = vmax.f32 %v1114_v10, %v1879_v12  ;;  %v2249_v15 = vmax.f32 %v1456_v11, %v1993_v13  ;;  %v80_v11 = vld [vmem:[%s14040_s30 + $0xb0] sm:$0xff]  ;;  %v194_v12 = vld [vmem:[%s14040_s30 + $0x440] sm:$0xff] }
  0x98   :  { %v2702_v41 = vld [vmem:[#allocation2 + $0x98] sm:$0xff] }
  0x99   :  { %2429 = vst.msk [vmem:[#allocation2 + $0xa0] sm:$0xff] %vm2390_vm2, %v2135_v14 }
  0x9a   :  { %2543 = vst.msk [vmem:[#allocation2 + $0x4a0] sm:$0xff] %vm2390_vm2, %v2249_v15  ;;  %v1116_v16 = vpop.f32.mrf.mxu0  ;;  %v1458_v17 = vpop.f32.mrf.mxu1 }
  0x9b   :  { %v1117_v20 = vadd.f32 %v9257_v56, %v1116_v16  ;;  %v1459_v21 = vadd.f32 %v9257_v56, %v1458_v17 }
  0x9d   :  { %v1880_v22 = vmul.f32 0.2, %v1117_v20  ;;  %v1994_v23 = vmul.f32 0.2, %v1459_v21  ;;  %7251 = vmatmul.msk.f32.gmra.mxu0 %vm320_vm1, %v76_v18  ;;  %7365 = vmatmul.msk.f32.gmra.mxu1 %vm320_vm1, %v190_v19 }
  0x9f   :  { %v2136_v26 = vmax.f32 %v1117_v20, %v1880_v22  ;;  %v2250_v27 = vmax.f32 %v1459_v21, %v1994_v23  ;;  %v290_v21 = vld [vmem:[%s14040_s30 + $0x740] sm:$0xff] }
  0xa0   :  { %v2703_v28 = vld [vmem:[#allocation2 + $0xa0] sm:$0xff]  ;;  %7465 = vmatmul.msk.f32.gmra.mxu2 %vm320_vm1, %v290_v21 }
  0xa1   :  { %2430 = vst.msk [vmem:[#allocation2 + $0xa8] sm:$0xff] %vm2390_vm2, %v2136_v26  ;;  %v7641_v29 = vpack.i.bf16 %v2703_v28, %v2701_v25  ;;  %v81_v25 = vld [vmem:[%s14040_s30 + $0xb8] sm:$0xff]  ;;  %v195_v26 = vld [vmem:[%s14040_s30 + $0x448] sm:$0xff] }
  0xa2   :  { %2544 = vst.msk [vmem:[#allocation2 + $0x4a8] sm:$0xff] %vm2390_vm2, %v2250_v27  ;;  %v1119_v31 = vpop.f32.mrf.mxu0  ;;  %v1461_v32 = vpop.f32.mrf.mxu1 }
  0xa3   :  { %v1120_v35 = vadd.f32 %v9257_v56, %v1119_v31  ;;  %v1462_v36 = vadd.f32 %v9257_v56, %v1461_v32  ;;  %7642 = vrot.lane.b32.xlu2 %v7641_v29, %s8950_s21 }
  0xa5   :  { %v1881_v37 = vmul.f32 0.2, %v1120_v35  ;;  %v1995_v38 = vmul.f32 0.2, %v1462_v36  ;;  %7252 = vmatmul.msk.f32.gmra.mxu0 %vm320_vm1, %v77_v33  ;;  %7366 = vmatmul.msk.f32.gmra.mxu1 %vm320_vm1, %v191_v34 }
  0xa7   :  { %v2137_v39 = vmax.f32 %v1120_v35, %v1881_v37  ;;  %v2251_v40 = vmax.f32 %v1462_v36, %v1995_v38  ;;  %v291_v36 = vld [vmem:[%s14040_s30 + $0x748] sm:$0xff] }
  0xa8   :  { %v2704_v42 = vld [vmem:[#allocation2 + $0xa8] sm:$0xff]  ;;  %7466 = vmatmul.msk.f32.gmra.mxu2 %vm320_vm1, %v291_v36 }
  0xa9   :  { %2431 = vst.msk [vmem:[#allocation2 + $0xb0] sm:$0xff] %vm2390_vm2, %v2137_v39  ;;  %v7646_v43 = vpack.i.bf16 %v2704_v42, %v2702_v41  ;;  %v2825_v5 = vld [vmem:[#allocation2 + $0x4a8] sm:$0xff]  ;;  %v82_v39 = vld [vmem:[%s14040_s30 + $0xc0] sm:$0xff] }
  0xaa   :  { %2545 = vst.msk [vmem:[#allocation2 + $0x4b0] sm:$0xff] %vm2390_vm2, %v2251_v40  ;;  %v1122_v45 = vpop.f32.mrf.mxu0  ;;  %v1464_v46 = vpop.f32.mrf.mxu1  ;;  %v196_v40 = vld [vmem:[%s14040_s30 + $0x450] sm:$0xff] }
  0xab   :  { %v1123_v49 = vadd.f32 %v9257_v56, %v1122_v45  ;;  %v1465_v50 = vadd.f32 %v9257_v56, %v1464_v46  ;;  %7647 = vrot.lane.b32.xlu0 %v7646_v43, %s8951_s29 }
  0xad   :  { %v1882_v51 = vmul.f32 0.2, %v1123_v49  ;;  %v1996_v52 = vmul.f32 0.2, %v1465_v50  ;;  %7253 = vmatmul.msk.f32.gmra.mxu0 %vm320_vm1, %v78_v47  ;;  %7367 = vmatmul.msk.f32.gmra.mxu1 %vm320_vm1, %v192_v48 }
  0xaf   :  { %v2138_v53 = vmax.f32 %v1123_v49, %v1882_v51  ;;  %v2252_v54 = vmax.f32 %v1465_v50, %v1996_v52  ;;  %v292_v49 = vld [vmem:[%s14040_s30 + $0x750] sm:$0xff]  ;;  %v83_v52 = vld [vmem:[%s14040_s30 + $0xc8] sm:$0xff] }
  0xb0   :  { %v2705_v55 = vld [vmem:[#allocation2 + $0xb0] sm:$0xff]  ;;  %7467 = vmatmul.msk.f32.gmra.mxu2 %vm320_vm1, %v292_v49 }
  0xb1   :  { %2432 = vst.msk [vmem:[#allocation2 + $0xb8] sm:$0xff] %vm2390_vm2, %v2138_v53  ;;  %v7651_v57 = vpack.i.bf16 %v2705_v55, %v2703_v28  ;;  %v197_v53 = vld [vmem:[%s14040_s30 + $0x458] sm:$0xff] }
  0xb2   :  { %2546 = vst.msk [vmem:[#allocation2 + $0x4b8] sm:$0xff] %vm2390_vm2, %v2252_v54  ;;  %v1125_v59 = vpop.f32.mrf.mxu0  ;;  %v1467_v60 = vpop.f32.mrf.mxu1 }
  0xb3   :  { %v1126_v63 = vadd.f32 %v9257_v56, %v1125_v59  ;;  %v1468_v0 = vadd.f32 %v9257_v56, %v1467_v60  ;;  %7652 = vrot.lane.b32.xlu1 %v7651_v57, %s14007_s24 }
  0xb5   :  { %v1883_v1 = vmul.f32 0.2, %v1126_v63  ;;  %v1997_v2 = vmul.f32 0.2, %v1468_v0  ;;  %7254 = vmatmul.msk.f32.gmra.mxu0 %vm320_vm1, %v79_v61  ;;  %7368 = vmatmul.msk.f32.gmra.mxu1 %vm320_vm1, %v193_v62 }
  0xb7   :  { %v2139_v3 = vmax.f32 %v1126_v63, %v1883_v1  ;;  %v2253_v4 = vmax.f32 %v1468_v0, %v1997_v2  ;;  %v293_v63 = vld [vmem:[%s14040_s30 + $0x758] sm:$0xff] }
  0xb8   :  { %v2706_v33 = vld [vmem:[#allocation2 + $0xb8] sm:$0xff]  ;;  %7468 = vmatmul.msk.f32.gmra.mxu2 %vm320_vm1, %v293_v63 }
  0xb9   :  { %2433 = vst.msk [vmem:[#allocation2 + $0xc0] sm:$0xff] %vm2390_vm2, %v2139_v3  ;;  %v2827_v6 = vld [vmem:[#allocation2 + $0x4b8] sm:$0xff]  ;;  %v84_v3 = vld [vmem:[%s14040_s30 + $0xd0] sm:$0xff] }
  0xba   :  { %2547 = vst.msk [vmem:[#allocation2 + $0x4c0] sm:$0xff] %vm2390_vm2, %v2253_v4  ;;  %v1128_v8 = vpop.f32.mrf.mxu0  ;;  %v1470_v9 = vpop.f32.mrf.mxu1  ;;  %v9350_v10 = vpack.i.bf16 %v2827_v6, %v2825_v5  ;;  %v198_v4 = vld [vmem:[%s14040_s30 + $0x460] sm:$0xff] }
  0xbb   :  { %v1129_v13 = vadd.f32 %v9257_v56, %v1128_v8  ;;  %v1471_v14 = vadd.f32 %v9257_v56, %v1470_v9 }
  0xbc   :  { %7657 = vrot.lane.b32.xlu2 %v9350_v10, %s8948_s25 }
  0xbd   :  { %v1884_v15 = vmul.f32 0.2, %v1129_v13  ;;  %v1998_v16 = vmul.f32 0.2, %v1471_v14  ;;  %7255 = vmatmul.msk.f32.gmra.mxu0 %vm320_vm1, %v80_v11  ;;  %7369 = vmatmul.msk.f32.gmra.mxu1 %vm320_vm1, %v194_v12 }
  0xbf   :  { %v2140_v17 = vmax.f32 %v1129_v13, %v1884_v15  ;;  %v2254_v18 = vmax.f32 %v1471_v14, %v1998_v16  ;;  %v294_v14 = vld [vmem:[%s14040_s30 + $0x760] sm:$0xff] }
  0xc0   :  { %v2707_v19 = vld [vmem:[#allocation2 + $0xc0] sm:$0xff]  ;;  %7469 = vmatmul.msk.f32.gmra.mxu2 %vm320_vm1, %v294_v14 }
  0xc1   :  { %2434 = vst.msk [vmem:[#allocation2 + $0xc8] sm:$0xff] %vm2390_vm2, %v2140_v17  ;;  %v7661_v20 = vpack.i.bf16 %v2707_v19, %v2705_v55  ;;  %v85_v17 = vld [vmem:[%s14040_s30 + $0xd8] sm:$0xff] }
  0xc2   :  { %2548 = vst.msk [vmem:[#allocation2 + $0x4c8] sm:$0xff] %vm2390_vm2, %v2254_v18  ;;  %v1131_v22 = vpop.f32.mrf.mxu0  ;;  %v1473_v23 = vpop.f32.mrf.mxu1  ;;  %v199_v18 = vld [vmem:[%s14040_s30 + $0x468] sm:$0xff] }
  0xc3   :  { %v1132_v27 = vadd.f32 %v9257_v56, %v1131_v22  ;;  %v1474_v28 = vadd.f32 %v9257_v56, %v1473_v23  ;;  %7662 = vrot.lane.b32.xlu1 %v7661_v20, %s8950_s21 }
  0xc5   :  { %v1885_v29 = vmul.f32 0.2, %v1132_v27  ;;  %v1999_v30 = vmul.f32 0.2, %v1474_v28  ;;  %7256 = vmatmul.msk.f32.gmra.mxu0 %vm320_vm1, %v81_v25  ;;  %7370 = vmatmul.msk.f32.gmra.mxu1 %vm320_vm1, %v195_v26 }
  0xc7   :  { %v2141_v31 = vmax.f32 %v1132_v27, %v1885_v29  ;;  %v2255_v32 = vmax.f32 %v1474_v28, %v1999_v30  ;;  %v295_v29 = vld [vmem:[%s14040_s30 + $0x768] sm:$0xff] }
  0xc8   :  { %v2708_v34 = vld [vmem:[#allocation2 + $0xc8] sm:$0xff]  ;;  %7470 = vmatmul.msk.f32.gmra.mxu2 %vm320_vm1, %v295_v29 }
  0xc9   :  { %2435 = vst.msk [vmem:[#allocation2 + $0xd0] sm:$0xff] %vm2390_vm2, %v2141_v31  ;;  %v7666_v35 = vpack.i.bf16 %v2708_v34, %v2706_v33  ;;  %v2829_v61 = vld [vmem:[#allocation2 + $0x4c8] sm:$0xff]  ;;  %v200_v33 = vld [vmem:[%s14040_s30 + $0x470] sm:$0xff] }
  0xca   :  { %2549 = vst.msk [vmem:[#allocation2 + $0x4d0] sm:$0xff] %vm2390_vm2, %v2255_v32  ;;  %v1134_v37 = vpop.f32.mrf.mxu0  ;;  %v1476_v38 = vpop.f32.mrf.mxu1  ;;  %v86_v32 = vld [vmem:[%s14040_s30 + $0xe0] sm:$0xff] }
  0xcb   :  { %v1135_v41 = vadd.f32 %v9257_v56, %v1134_v37  ;;  %v1477_v42 = vadd.f32 %v9257_v56, %v1476_v38  ;;  %7667 = vrot.lane.b32.xlu2 %v7666_v35, %s8951_s29 }
  0xcd   :  { %v1886_v43 = vmul.f32 0.2, %v1135_v41  ;;  %v2000_v44 = vmul.f32 0.2, %v1477_v42  ;;  %7257 = vmatmul.msk.f32.gmra.mxu0 %vm320_vm1, %v82_v39  ;;  %7371 = vmatmul.msk.f32.gmra.mxu1 %vm320_vm1, %v196_v40 }
  0xcf   :  { %v2142_v45 = vmax.f32 %v1135_v41, %v1886_v43  ;;  %v2256_v46 = vmax.f32 %v1477_v42, %v2000_v44  ;;  %v296_v42 = vld [vmem:[%s14040_s30 + $0x770] sm:$0xff] }
  0xd0   :  { %v2709_v47 = vld [vmem:[#allocation2 + $0xd0] sm:$0xff]  ;;  %7471 = vmatmul.msk.f32.gmra.mxu2 %vm320_vm1, %v296_v42 }
  0xd1   :  { %2436 = vst.msk [vmem:[#allocation2 + $0xd8] sm:$0xff] %vm2390_vm2, %v2142_v45  ;;  %v7671_v48 = vpack.i.bf16 %v2709_v47, %v2707_v19  ;;  %v87_v45 = vld [vmem:[%s14040_s30 + $0xe8] sm:$0xff] }
  0xd2   :  { %2550 = vst.msk [vmem:[#allocation2 + $0x4d8] sm:$0xff] %vm2390_vm2, %v2256_v46  ;;  %v1137_v50 = vpop.f32.mrf.mxu0  ;;  %v1479_v51 = vpop.f32.mrf.mxu1  ;;  %v201_v46 = vld [vmem:[%s14040_s30 + $0x478] sm:$0xff] }
  0xd3   :  { %v1138_v54 = vadd.f32 %v9257_v56, %v1137_v50  ;;  %v1480_v55 = vadd.f32 %v9257_v56, %v1479_v51  ;;  %7672 = vrot.lane.b32.xlu0 %v7671_v48, %s14007_s24 }
  0xd5   :  { %v1887_v57 = vmul.f32 0.2, %v1138_v54  ;;  %v2001_v58 = vmul.f32 0.2, %v1480_v55  ;;  %7258 = vmatmul.msk.f32.gmra.mxu0 %vm320_vm1, %v83_v52  ;;  %7372 = vmatmul.msk.f32.gmra.mxu1 %vm320_vm1, %v197_v53 }
  0xd7   :  { %v2143_v59 = vmax.f32 %v1138_v54, %v1887_v57  ;;  %v2257_v60 = vmax.f32 %v1480_v55, %v2001_v58  ;;  %v297_v55 = vld [vmem:[%s14040_s30 + $0x778] sm:$0xff] }
  0xd8   :  { %v2710_v26 = vld [vmem:[#allocation2 + $0xd8] sm:$0xff]  ;;  %7472 = vmatmul.msk.f32.gmra.mxu2 %vm320_vm1, %v297_v55  ;;  %v2718_v55 = vld [vmem:[#allocation2 + $0x120] sm:$0xff] }
  0xd9   :  { %2437 = vst.msk [vmem:[#allocation2 + $0xe0] sm:$0xff] %vm2390_vm2, %v2143_v59  ;;  %v2831_v62 = vld [vmem:[#allocation2 + $0x4d8] sm:$0xff] }
  0xda   :  { %2551 = vst.msk [vmem:[#allocation2 + $0x4e0] sm:$0xff] %vm2390_vm2, %v2257_v60  ;;  %v1140_v0 = vpop.f32.mrf.mxu0  ;;  %v1482_v1 = vpop.f32.mrf.mxu1  ;;  %v9421_v2 = vpack.i.bf16 %v2831_v62, %v2829_v61  ;;  %v88_v60 = vld [vmem:[%s14040_s30 + $0xf0] sm:$0xff]  ;;  %v202_v61 = vld [vmem:[%s14040_s30 + $0x480] sm:$0xff] }
  0xdb   :  { %v1141_v5 = vadd.f32 %v9257_v56, %v1140_v0  ;;  %v1483_v6 = vadd.f32 %v9257_v56, %v1482_v1 }
  0xdc   :  { %7677 = vrot.lane.b32.xlu0 %v9421_v2, %s8948_s25 }
  0xdd   :  { %v1888_v7 = vmul.f32 0.2, %v1141_v5  ;;  %v2002_v8 = vmul.f32 0.2, %v1483_v6  ;;  %7259 = vmatmul.msk.f32.gmra.mxu0 %vm320_vm1, %v84_v3  ;;  %7373 = vmatmul.msk.f32.gmra.mxu1 %vm320_vm1, %v198_v4 }
  0xdf   :  { %v2144_v9 = vmax.f32 %v1141_v5, %v1888_v7  ;;  %v2258_v11 = vmax.f32 %v1483_v6, %v2002_v8  ;;  %v298_v7 = vld [vmem:[%s14040_s30 + $0x780] sm:$0xff] }
  0xe0   :  { %v9436_v12 = vld [vmem:[#allocation2 + $0xe0] sm:$0xff]  ;;  %7473 = vmatmul.msk.f32.gmra.mxu2 %vm320_vm1, %v298_v7 }
  0xe1   :  { %2438 = vst.msk [vmem:[#allocation2 + $0xe8] sm:$0xff] %vm2390_vm2, %v2144_v9  ;;  %v7681_v13 = vpack.i.bf16 %v9436_v12, %v2709_v47 }
  0xe2   :  { %2552 = vst.msk [vmem:[#allocation2 + $0x4e8] sm:$0xff] %vm2390_vm2, %v2258_v11  ;;  %v1143_v15 = vpop.f32.mrf.mxu0  ;;  %v1485_v16 = vpop.f32.mrf.mxu1  ;;  %v89_v11 = vld [vmem:[%s14040_s30 + $0xf8] sm:$0xff] }
  0xe3   :  { %v1144_v19 = vadd.f32 %v9257_v56, %v1143_v15  ;;  %v1486_v20 = vadd.f32 %v9257_v56, %v1485_v16 }
  0xe4   :  { %7682 = vrot.lane.b32.xlu0 %v7681_v13, %s8950_s21 }
  0xe5   :  { %v1889_v21 = vmul.f32 0.2, %v1144_v19  ;;  %v2003_v22 = vmul.f32 0.2, %v1486_v20  ;;  %7260 = vmatmul.msk.f32.gmra.mxu0 %vm320_vm1, %v85_v17  ;;  %7374 = vmatmul.msk.f32.gmra.mxu1 %vm320_vm1, %v199_v18 }
  0xe7   :  { %v2145_v23 = vmax.f32 %v1144_v19, %v1889_v21  ;;  %v2259_v25 = vmax.f32 %v1486_v20, %v2003_v22  ;;  %v299_v22 = vld [vmem:[%s14040_s30 + $0x788] sm:$0xff] }
  0xe8   :  { %v2712_v27 = vld [vmem:[#allocation2 + $0xe8] sm:$0xff]  ;;  %7474 = vmatmul.msk.f32.gmra.mxu2 %vm320_vm1, %v299_v22 }
  0xe9   :  { %2439 = vst.msk [vmem:[#allocation2 + $0xf0] sm:$0xff] %vm2390_vm2, %v2145_v23  ;;  %v7686_v28 = vpack.i.bf16 %v2712_v27, %v2710_v26  ;;  %v2833_v53 = vld [vmem:[#allocation2 + $0x4e8] sm:$0xff]  ;;  %v90_v26 = vld [vmem:[%s14040_s30 + $0x100] sm:$0xff]  ;;  %v204_v27 = vld [vmem:[%s14040_s30 + $0x490] sm:$0xff] }
  0xea   :  { %2553 = vst.msk [vmem:[#allocation2 + $0x4f0] sm:$0xff] %vm2390_vm2, %v2259_v25  ;;  %v1146_v30 = vpop.f32.mrf.mxu0  ;;  %v1488_v31 = vpop.f32.mrf.mxu1 }
  0xeb   :  { %v1147_v34 = vadd.f32 %v9257_v56, %v1146_v30  ;;  %v1489_v35 = vadd.f32 %v9257_v56, %v1488_v31  ;;  %7687 = vrot.lane.b32.xlu1 %v7686_v28, %s8951_s29 }
  0xed   :  { %v1890_v36 = vmul.f32 0.2, %v1147_v34  ;;  %v2004_v37 = vmul.f32 0.2, %v1489_v35  ;;  %7261 = vmatmul.msk.f32.gmra.mxu0 %vm320_vm1, %v86_v32  ;;  %7375 = vmatmul.msk.f32.gmra.mxu1 %vm320_vm1, %v200_v33 }
  0xef   :  { %v2146_v38 = vmax.f32 %v1147_v34, %v1890_v36  ;;  %v2260_v39 = vmax.f32 %v1489_v35, %v2004_v37  ;;  %v300_v36 = vld [vmem:[%s14040_s30 + $0x790] sm:$0xff] }
  0xf0   :  { %v2713_v40 = vld [vmem:[#allocation2 + $0xf0] sm:$0xff]  ;;  %7475 = vmatmul.msk.f32.gmra.mxu2 %vm320_vm1, %v300_v36 }
  0xf1   :  { %2440 = vst.msk [vmem:[#allocation2 + $0xf8] sm:$0xff] %vm2390_vm2, %v2146_v38  ;;  %v7691_v41 = vpack.i.bf16 %v2713_v40, %v9436_v12  ;;  %v203_v12 = vld [vmem:[%s14040_s30 + $0x488] sm:$0xff] }
  0xf2   :  { %2554 = vst.msk [vmem:[#allocation2 + $0x4f8] sm:$0xff] %vm2390_vm2, %v2260_v39  ;;  %v1149_v43 = vpop.f32.mrf.mxu0  ;;  %v1491_v44 = vpop.f32.mrf.mxu1  ;;  %v91_v39 = vld [vmem:[%s14040_s30 + $0x108] sm:$0xff] }
  0xf3   :  { %v1150_v47 = vadd.f32 %v9257_v56, %v1149_v43  ;;  %v1492_v48 = vadd.f32 %v9257_v56, %v1491_v44  ;;  %7692 = vrot.lane.b32.xlu2 %v7691_v41, %s14007_s24 }
  0xf5   :  { %v1891_v49 = vmul.f32 0.2, %v1150_v47  ;;  %v2005_v50 = vmul.f32 0.2, %v1492_v48  ;;  %7262 = vmatmul.msk.f32.gmra.mxu0 %vm320_vm1, %v87_v45  ;;  %7376 = vmatmul.msk.f32.gmra.mxu1 %vm320_vm1, %v201_v46  ;;  %v301_v46 = vld [vmem:[%s14040_s30 + $0x798] sm:$0xff] }
  0xf7   :  { %v2147_v51 = vmax.f32 %v1150_v47, %v1891_v49  ;;  %v2261_v52 = vmax.f32 %v1492_v48, %v2005_v50  ;;  %v92_v49 = vld [vmem:[%s14040_s30 + $0x110] sm:$0xff]  ;;  %v206_v50 = vld [vmem:[%s14040_s30 + $0x4a0] sm:$0xff] }
  0xf8   :  { %v2714_v19 = vld [vmem:[#allocation2 + $0xf8] sm:$0xff]  ;;  %7476 = vmatmul.msk.f32.gmra.mxu2 %vm320_vm1, %v301_v46 }
  0xf9   :  { %2441 = vst.msk [vmem:[#allocation2 + $0x100] sm:$0xff] %vm2390_vm2, %v2147_v51  ;;  %v2835_v54 = vld [vmem:[#allocation2 + $0x4f8] sm:$0xff] }
  0xfa   :  { %2555 = vst.msk [vmem:[#allocation2 + $0x500] sm:$0xff] %vm2390_vm2, %v2261_v52  ;;  %v1152_v57 = vpop.f32.mrf.mxu0  ;;  %v1494_v58 = vpop.f32.mrf.mxu1  ;;  %v9530_v59 = vpack.i.bf16 %v2835_v54, %v2833_v53 }
  0xfb   :  { %v1153_v62 = vadd.f32 %v9257_v56, %v1152_v57  ;;  %v1495_v63 = vadd.f32 %v9257_v56, %v1494_v58 }
  0xfc   :  { %7697 = vrot.lane.b32.xlu1 %v9530_v59, %s8948_s25 }
  0xfd   :  { %v1892_v0 = vmul.f32 0.2, %v1153_v62  ;;  %v2006_v1 = vmul.f32 0.2, %v1495_v63  ;;  %7263 = vmatmul.msk.f32.gmra.mxu0 %vm320_vm1, %v88_v60  ;;  %7377 = vmatmul.msk.f32.gmra.mxu1 %vm320_vm1, %v202_v61 }
  0xff   :  { %v2148_v3 = vmax.f32 %v1153_v62, %v1892_v0  ;;  %v2262_v4 = vmax.f32 %v1495_v63, %v2006_v1  ;;  %v302_v62 = vld [vmem:[%s14040_s30 + $0x7a0] sm:$0xff]  ;;  %v93_v1 = vld [vmem:[%s14040_s30 + $0x118] sm:$0xff] }
 0x100   :  { %v2715_v5 = vld [vmem:[#allocation2 + $0x100] sm:$0xff]  ;;  %7477 = vmatmul.msk.f32.gmra.mxu2 %vm320_vm1, %v302_v62 }
 0x101   :  { %2442 = vst.msk [vmem:[#allocation2 + $0x108] sm:$0xff] %vm2390_vm2, %v2148_v3  ;;  %v7701_v6 = vpack.i.bf16 %v2715_v5, %v2713_v40  ;;  %v205_v40 = vld [vmem:[%s14040_s30 + $0x498] sm:$0xff]  ;;  %v207_v3 = vld [vmem:[%s14040_s30 + $0x4a8] sm:$0xff] }
 0x102   :  { %2556 = vst.msk [vmem:[#allocation2 + $0x518] sm:$0xff] %vm2390_vm2, %v2262_v4  ;;  %v1155_v8 = vpop.f32.mrf.mxu0  ;;  %v1497_v9 = vpop.f32.mrf.mxu1 }
 0x103   :  { %v1156_v13 = vadd.f32 %v9257_v56, %v1155_v8  ;;  %v1498_v14 = vadd.f32 %v9257_v56, %v1497_v9  ;;  %7702 = vrot.lane.b32.xlu0 %v7701_v6, %s8950_s21  ;;  %v1794_v8 = vpop.f32.mrf.mxu2 }
 0x105   :  { %v1893_v15 = vmul.f32 0.2, %v1156_v13  ;;  %v2007_v16 = vmul.f32 0.2, %v1498_v14  ;;  %7264 = vmatmul.msk.f32.gmra.mxu0 %vm320_vm1, %v89_v11  ;;  %7378 = vmatmul.msk.f32.gmra.mxu1 %vm320_vm1, %v203_v12 }
 0x107   :  { %v2149_v17 = vmax.f32 %v1156_v13, %v1893_v15  ;;  %v2263_v18 = vmax.f32 %v1498_v14, %v2007_v16  ;;  %v303_v15 = vld [vmem:[%s14040_s30 + $0x7a8] sm:$0xff] }
 0x108   :  { %v2716_v20 = vld [vmem:[#allocation2 + $0x108] sm:$0xff]  ;;  %7478 = vmatmul.msk.f32.gmra.mxu2 %vm320_vm1, %v303_v15 }
 0x109   :  { %2443 = vst.msk [vmem:[#allocation2 + $0x110] sm:$0xff] %vm2390_vm2, %v2149_v17  ;;  %v7706_v21 = vpack.i.bf16 %v2716_v20, %v2714_v19  ;;  %v208_v19 = vld [vmem:[%s14040_s30 + $0x4b0] sm:$0xff]  ;;  %v1795_v20 = vadd.f32 %v9257_v56, %v1794_v8 }
 0x10a   :  { %2557 = vst.msk [vmem:[#allocation2 + $0x520] sm:$0xff] %vm2390_vm2, %v2263_v18  ;;  %v1158_v23 = vpop.f32.mrf.mxu0  ;;  %v1500_v25 = vpop.f32.mrf.mxu1  ;;  %v94_v18 = vld [vmem:[%s14040_s30 + $0x120] sm:$0xff] }
 0x10b   :  { %v1159_v28 = vadd.f32 %v9257_v56, %v1158_v23  ;;  %v1501_v29 = vadd.f32 %v9257_v56, %v1500_v25  ;;  %7707 = vrot.lane.b32.xlu1 %v7706_v21, %s8951_s29  ;;  %v2106_v23 = vmul.f32 0.2, %v1795_v20 }
 0x10d   :  { %v1894_v30 = vmul.f32 0.2, %v1159_v28  ;;  %v2008_v31 = vmul.f32 0.2, %v1501_v29  ;;  %7265 = vmatmul.msk.f32.gmra.mxu0 %vm320_vm1, %v90_v26  ;;  %7379 = vmatmul.msk.f32.gmra.mxu1 %vm320_vm1, %v204_v27  ;;  %v2362_v27 = vmax.f32 %v1795_v20, %v2106_v23 }
 0x10f   :  { %v2150_v32 = vmax.f32 %v1159_v28, %v1894_v30  ;;  %v2264_v33 = vmax.f32 %v1501_v29, %v2008_v31  ;;  %v1797_v28 = vpop.f32.mrf.mxu2  ;;  %2656 = vst.msk [vmem:[#allocation2 + $0x898] sm:$0xff] %vm2390_vm2, %v2362_v27  ;;  %v304_v31 = vld [vmem:[%s14040_s30 + $0x7b0] sm:$0xff]  ;;  %v9749_v27 = vld [vmem:[%s13989_s2] ss:$0 sm:$0xff] }
 0x110   :  { %v2717_v34 = vld [vmem:[#allocation2 + $0x110] sm:$0xff]  ;;  %v1798_v36 = vadd.f32 %v9257_v56, %v1797_v28  ;;  %7479 = vmatmul.msk.f32.gmra.mxu2 %vm320_vm1, %v304_v31 }
 0x111   :  { %2444 = vst.msk [vmem:[#allocation2 + $0x128] sm:$0xff] %vm2390_vm2, %v2150_v32  ;;  %v7711_v35 = vpack.i.bf16 %v2717_v34, %v2715_v5  ;;  %v95_v34 = vld [vmem:[%s14040_s30 + $0x128] sm:$0xff] }
 0x112   :  { %2558 = vst.msk [vmem:[#allocation2 + $0x528] sm:$0xff] %vm2390_vm2, %v2264_v33  ;;  %v1161_v37 = vpop.f32.mrf.mxu0  ;;  %v1503_v38 = vpop.f32.mrf.mxu1 }
 0x113   :  { %v1162_v24 = vadd.f32 %v9257_v56, %v1161_v37  ;;  %v1504_v41 = vadd.f32 %v9257_v56, %v1503_v38  ;;  %7712 = vrot.lane.b32.xlu2 %v7711_v35, %s14007_s24  ;;  %v209_v35 = vld [vmem:[%s14040_s30 + $0x4b8] sm:$0xff]  ;;  %s14044_s24 = smov 80  }
 0x115   :  { %v1895_v42 = vmul.f32 0.2, %v1162_v24  ;;  %v2009_v43 = vmul.f32 0.2, %v1504_v41  ;;  %7266 = vmatmul.msk.f32.gmra.mxu0 %vm320_vm1, %v91_v39  ;;  %7380 = vmatmul.msk.f32.gmra.mxu1 %vm320_vm1, %v205_v40  ;;  %v2107_v39 = vmul.f32 0.2, %v1798_v36 }
 0x117   :  { %v2151_v44 = vmax.f32 %v1162_v24, %v1895_v42  ;;  %v2265_v45 = vmax.f32 %v1504_v41, %v2009_v43  ;;  %v2363_v41 = vmax.f32 %v1798_v36, %v2107_v39  ;;  %v1800_v42 = vpop.f32.mrf.mxu2 }
 0x118   :  { %v2719_v12 = vld [vmem:[#allocation2 + $0x128] sm:$0xff] }
 0x119   :  { %2445 = vst.msk [vmem:[#allocation2 + $0x130] sm:$0xff] %vm2390_vm2, %v2151_v44 }
 0x11a   :  { %2559 = vst.msk [vmem:[#allocation2 + $0x530] sm:$0xff] %vm2390_vm2, %v2265_v45  ;;  %v1164_v47 = vpop.f32.mrf.mxu0  ;;  %v1506_v48 = vpop.f32.mrf.mxu1  ;;  %v305_v45 = vld [vmem:[%s14040_s30 + $0x7b8] sm:$0xff] }
 0x11b   :  { %v1165_v51 = vadd.f32 %v9257_v56, %v1164_v47  ;;  %v1507_v52 = vadd.f32 %v9257_v56, %v1506_v48  ;;  %2657 = vst.msk [vmem:[#allocation2 + $0x8a0] sm:$0xff] %vm2390_vm2, %v2363_v41  ;;  %v96_v48 = vld [vmem:[%s14040_s30 + $0x130] sm:$0xff]  ;;  %7480 = vmatmul.msk.f32.gmra.mxu2 %vm320_vm1, %v305_v45  ;;  %v213_v41 = vld [vmem:[%s14040_s30 + $0x4d8] sm:$0xff] }
 0x11d   :  { %v1896_v53 = vmul.f32 0.2, %v1165_v51  ;;  %v2010_v54 = vmul.f32 0.2, %v1507_v52  ;;  %7267 = vmatmul.msk.f32.gmra.mxu0 %vm320_vm1, %v92_v49  ;;  %7381 = vmatmul.msk.f32.gmra.mxu1 %vm320_vm1, %v206_v50  ;;  %v210_v49 = vld [vmem:[%s14040_s30 + $0x4c0] sm:$0xff]  ;;  %v1801_v50 = vadd.f32 %v9257_v56, %v1800_v42 }
 0x11f   :  { %v2152_v57 = vmax.f32 %v1165_v51, %v1896_v53  ;;  %v2266_v58 = vmax.f32 %v1507_v52, %v2010_v54  ;;  %v2108_v53 = vmul.f32 0.2, %v1801_v50 }
 0x120   :  { %v9634_v60 = vld [vmem:[#allocation2 + $0x130] sm:$0xff] }
 0x121   :  { %2446 = vst.msk [vmem:[#allocation2 + $0x138] sm:$0xff] %vm2390_vm2, %v2152_v57  ;;  %v7716_v61 = vpack.i.bf16 %v9634_v60, %v2718_v55  ;;  %v2364_v57 = vmax.f32 %v1801_v50, %v2108_v53 }
 0x122   :  { %2560 = vst.msk [vmem:[#allocation2 + $0x538] sm:$0xff] %vm2390_vm2, %v2266_v58  ;;  %v1167_v63 = vpop.f32.mrf.mxu0  ;;  %v1509_v0 = vpop.f32.mrf.mxu1 }
 0x123   :  { %v1168_v4 = vadd.f32 %v9257_v56, %v1167_v63  ;;  %v1510_v5 = vadd.f32 %v9257_v56, %v1509_v0  ;;  %7717 = vrot.lane.b32.xlu2 %v7716_v61, %s8953_s18  ;;  %v1803_v58 = vpop.f32.mrf.mxu2  ;;  %2658 = vst.msk [vmem:[#allocation2 + $0x8a8] sm:$0xff] %vm2390_vm2, %v2364_v57 }
 0x124   :  { %v1804_v8 = vadd.f32 %v9257_v56, %v1803_v58  ;;  %v100_v58 = vld [vmem:[%s14040_s30 + $0x150] sm:$0xff] }
 0x125   :  { %v1897_v6 = vmul.f32 0.2, %v1168_v4  ;;  %v2011_v7 = vmul.f32 0.2, %v1510_v5  ;;  %7268 = vmatmul.msk.f32.gmra.mxu0 %vm320_vm1, %v93_v1  ;;  %7382 = vmatmul.msk.f32.gmra.mxu1 %vm320_vm1, %v207_v3  ;;  %v306_v3 = vld [vmem:[%s14040_s30 + $0x7c0] sm:$0xff] }
 0x126   :  { %7481 = vmatmul.msk.f32.gmra.mxu2 %vm320_vm1, %v306_v3 }
 0x127   :  { %v2153_v9 = vmax.f32 %v1168_v4, %v1897_v6  ;;  %v2267_v11 = vmax.f32 %v1510_v5, %v2011_v7  ;;  %v97_v6 = vld [vmem:[%s14040_s30 + $0x138] sm:$0xff]  ;;  %v211_v7 = vld [vmem:[%s14040_s30 + $0x4c8] sm:$0xff] }
 0x128   :  { %v2721_v13 = vld [vmem:[#allocation2 + $0x138] sm:$0xff] }
 0x129   :  { %2447 = vst.msk [vmem:[#allocation2 + $0x140] sm:$0xff] %vm2390_vm2, %v2153_v9  ;;  %v7721_v14 = vpack.i.bf16 %v2721_v13, %v2719_v12  ;;  %v2109_v12 = vmul.f32 0.2, %v1804_v8 }
 0x12a   :  { %2561 = vst.msk [vmem:[#allocation2 + $0x540] sm:$0xff] %vm2390_vm2, %v2267_v11  ;;  %v1170_v16 = vpop.f32.mrf.mxu0  ;;  %v1512_v17 = vpop.f32.mrf.mxu1 }
 0x12b   :  { %v1171_v21 = vadd.f32 %v9257_v56, %v1170_v16  ;;  %v1513_v22 = vadd.f32 %v9257_v56, %v1512_v17  ;;  %7722 = vrot.lane.b32.xlu2 %v7721_v14, %s8948_s25  ;;  %7727 = vrot.lane.b32.xlu0 %v7721_v14, %s8954_s27  ;;  %v2365_v15 = vmax.f32 %v1804_v8, %v2109_v12  ;;  %v1806_v16 = vpop.f32.mrf.mxu2 }
 0x12c   :  { %v1807_v28 = vadd.f32 %v9749_v27, %v1806_v16  ;;  %v310_v16 = vld [vmem:[%s14040_s30 + $0x7e0] sm:$0xff] }
 0x12d   :  { %v1898_v25 = vmul.f32 0.2, %v1171_v21  ;;  %v2012_v26 = vmul.f32 0.2, %v1513_v22  ;;  %7269 = vmatmul.msk.f32.gmra.mxu0 %vm320_vm1, %v94_v18  ;;  %7383 = vmatmul.msk.f32.gmra.mxu1 %vm320_vm1, %v208_v19  ;;  %2659 = vst.msk [vmem:[#allocation2 + $0x8b0] sm:$0xff] %vm2390_vm2, %v2365_v15 }
 0x12e   :  { %v2110_v31 = vmul.f32 0.2, %v1807_v28 }
 0x12f   :  { %v2154_v29 = vmax.f32 %v1171_v21, %v1898_v25  ;;  %v2268_v30 = vmax.f32 %v1513_v22, %v2012_v26  ;;  %v307_v21 = vld [vmem:[%s14040_s30 + $0x7c8] sm:$0xff]  ;;  %v98_v25 = vld [vmem:[%s14040_s30 + $0x140] sm:$0xff]  ;;  %v212_v26 = vld [vmem:[%s14040_s30 + $0x4d0] sm:$0xff] }
 0x130   :  { %v9709_v63 = vld [vmem:[#allocation2 + $0x140] sm:$0xff]  ;;  %7482 = vmatmul.msk.f32.gmra.mxu2 %vm320_vm1, %v307_v21 }
 0x131   :  { %2448 = vst.msk [vmem:[#allocation2 + $0x148] sm:$0xff] %vm2390_vm2, %v2154_v29  ;;  %v7746_v53 = vpack.i.bf16 %v9709_v63, %v9634_v60  ;;  %v9795_v60 = vpop.permute.xlu2 %7622 }
 0x132   :  { %2562 = vst.msk [vmem:[#allocation2 + $0x548] sm:$0xff] %vm2390_vm2, %v2268_v30  ;;  %v1173_v32 = vpop.f32.mrf.mxu0  ;;  %v1515_v33 = vpop.f32.mrf.mxu1 }
 0x133   :  { %v1174_v37 = vadd.f32 %v9257_v56, %v1173_v32  ;;  %v1516_v38 = vadd.f32 %v9257_v56, %v1515_v33 }
 0x135   :  { %v1899_v40 = vmul.f32 0.2, %v1174_v37  ;;  %v2013_v24 = vmul.f32 0.2, %v1516_v38  ;;  %7270 = vmatmul.msk.f32.gmra.mxu0 %vm320_vm1, %v95_v34  ;;  %7384 = vmatmul.msk.f32.gmra.mxu1 %vm320_vm1, %v209_v35  ;;  %v2366_v34 = vmax.f32 %v1807_v28, %v2110_v31  ;;  %v1809_v35 = vpop.f32.mrf.mxu2 }
 0x136   :  { %v1810_v42 = vadd.f32 %v9749_v27, %v1809_v35 }
 0x137   :  { %v2155_v43 = vmax.f32 %v1174_v37, %v1899_v40  ;;  %v2269_v44 = vmax.f32 %v1516_v38, %v2013_v24  ;;  %2660 = vst.msk [vmem:[#allocation2 + $0x8b8] sm:$0xff] %vm2390_vm2, %v2366_v34  ;;  %v308_v38 = vld [vmem:[%s14040_s30 + $0x7d0] sm:$0xff]  ;;  %v99_v24 = vld [vmem:[%s14040_s30 + $0x148] sm:$0xff] }
 0x138   :  { %v2723_v19 = vld [vmem:[#allocation2 + $0x148] sm:$0xff]  ;;  %7483 = vmatmul.msk.f32.gmra.mxu2 %vm320_vm1, %v308_v38  ;;  %v2111_v45 = vmul.f32 0.2, %v1810_v42  ;;  %v2985_v38 = vld [vmem:[%s13990_s3 + $0x60] sm:$0xff] }
 0x139   :  { %2449 = vst.msk [vmem:[#allocation2 + $0x150] sm:$0xff] %vm2390_vm2, %v2155_v43 }
 0x13a   :  { %2563 = vst.msk [vmem:[#allocation2 + $0x550] sm:$0xff] %vm2390_vm2, %v2269_v44  ;;  %v1176_v46 = vpop.f32.mrf.mxu0  ;;  %v1518_v47 = vpop.f32.mrf.mxu1 }
 0x13b   :  { %v1177_v51 = vadd.f32 %v9257_v56, %v1176_v46  ;;  %v1519_v52 = vadd.f32 %v9257_v56, %v1518_v47  ;;  %v9775_v46 = vpop.permute.xlu0 %7602 }
 0x13d   :  { %v1900_v54 = vmul.f32 0.2, %v1177_v51  ;;  %v2014_v55 = vmul.f32 0.2, %v1519_v52  ;;  %7271 = vmatmul.msk.f32.gmra.mxu0 %vm320_vm1, %v96_v48  ;;  %7385 = vmatmul.msk.f32.gmra.mxu1 %vm320_vm1, %v210_v49  ;;  %v2367_v49 = vmax.f32 %v1810_v42, %v2111_v45  ;;  %v1812_v50 = vpop.f32.mrf.mxu2  ;;  %v102_v42 = vld [vmem:[%s14040_s30 + $0x160] sm:$0xff] }
 0x13f   :  { %v2156_v61 = vmax.f32 %v1177_v51, %v1900_v54  ;;  %v2270_v62 = vmax.f32 %v1519_v52, %v2014_v55  ;;  %2661 = vst.msk [vmem:[#allocation2 + $0x8c0] sm:$0xff] %vm2390_vm2, %v2367_v49  ;;  %v309_v54 = vld [vmem:[%s14040_s30 + $0x7d8] sm:$0xff] }
 0x140   :  { %v9711_v0 = vld [vmem:[#allocation2 + $0x150] sm:$0xff]  ;;  %7484 = vmatmul.msk.f32.gmra.mxu2 %vm320_vm1, %v309_v54 }
 0x141   :  { %2450 = vst.msk [vmem:[#allocation2 + $0x158] sm:$0xff] %vm2390_vm2, %v2156_v61  ;;  %v7731_v1 = vpack.i.bf16 %v9711_v0, %v9709_v63  ;;  %v214_v61 = vld [vmem:[%s14040_s30 + $0x4e0] sm:$0xff] }
 0x142   :  { %2564 = vst.msk [vmem:[#allocation2 + $0x558] sm:$0xff] %vm2390_vm2, %v2270_v62  ;;  %v1179_v4 = vpop.f32.mrf.mxu0  ;;  %v1521_v5 = vpop.f32.mrf.mxu1  ;;  %v1813_v62 = vadd.f32 %v9749_v27, %v1812_v50 }
 0x143   :  { %v1180_v9 = vadd.f32 %v9257_v56, %v1179_v4  ;;  %v1522_v11 = vadd.f32 %v9257_v56, %v1521_v5  ;;  %7732 = vrot.lane.b32.xlu1 %v7731_v1, %s8953_s18  ;;  %v9800_v4 = vpop.permute.xlu0 %7607 }
 0x144   :  { %v2112_v3 = vmul.f32 0.2, %v1813_v62 }
 0x145   :  { %v1901_v13 = vmul.f32 0.2, %v1180_v9  ;;  %v2015_v14 = vmul.f32 0.2, %v1522_v11  ;;  %7272 = vmatmul.msk.f32.gmra.mxu0 %vm320_vm1, %v97_v6  ;;  %7386 = vmatmul.msk.f32.gmra.mxu1 %vm320_vm1, %v211_v7 }
 0x146   :  { %v2368_v8 = vmax.f32 %v1813_v62, %v2112_v3  ;;  %v2982_v62 = vld [vmem:[%s13990_s3 + $0x48] sm:$0xff] }
 0x147   :  { %v2157_v17 = vmax.f32 %v1180_v9, %v1901_v13  ;;  %v2271_v18 = vmax.f32 %v1522_v11, %v2015_v14  ;;  %v1815_v9 = vpop.f32.mrf.mxu2 }
 0x148   :  { %v2725_v20 = vld [vmem:[#allocation2 + $0x158] sm:$0xff]  ;;  %2662 = vst.msk [vmem:[#allocation2 + $0x8c8] sm:$0xff] %vm2390_vm2, %v2368_v8  ;;  %7485 = vmatmul.msk.f32.gmra.mxu2 %vm320_vm1, %v310_v16  ;;  %v103_v8 = vld [vmem:[%s14040_s30 + $0x168] sm:$0xff] }
 0x149   :  { %2451 = vst.msk [vmem:[#allocation2 + $0x160] sm:$0xff] %vm2390_vm2, %v2157_v17  ;;  %v7736_v56 = vpack.i.bf16 %v2725_v20, %v2723_v19  ;;  %v101_v19 = vld [vmem:[%s14040_s30 + $0x158] sm:$0xff]  ;;  %v215_v20 = vld [vmem:[%s14040_s30 + $0x4e8] sm:$0xff] }
 0x14a   :  { %2565 = vst.msk [vmem:[#allocation2 + $0x560] sm:$0xff] %vm2390_vm2, %v2271_v18  ;;  %v1182_v22 = vpop.f32.mrf.mxu0  ;;  %v1524_v23 = vpop.f32.mrf.mxu1 }
 0x14b   :  { %v1183_v29 = vadd.f32 %v9749_v27, %v1182_v22  ;;  %v1525_v30 = vadd.f32 %v9749_v27, %v1524_v23  ;;  %7737 = vrot.lane.b32.xlu2 %v7736_v56, %s8948_s25 }
 0x14d   :  { %v1902_v32 = vmul.f32 0.2, %v1183_v29  ;;  %v2016_v33 = vmul.f32 0.2, %v1525_v30  ;;  %7273 = vmatmul.msk.f32.gmra.mxu0 %vm320_vm1, %v98_v25  ;;  %7387 = vmatmul.msk.f32.gmra.mxu1 %vm320_vm1, %v212_v26  ;;  %v2987_v25 = vld [vmem:[%s13990_s3 + $0x70] sm:$0xff]  ;;  %v9832_v26 = vpop.permute.xlu2 %7637 }
 0x14f   :  { %v2158_v36 = vmax.f32 %v1183_v29, %v1902_v32  ;;  %v2272_v37 = vmax.f32 %v1525_v30, %v2016_v33  ;;  %v1818_v31 = vpop.f32.mrf.mxu2  ;;  %v2986_v32 = vld [vmem:[%s13990_s3 + $0x68] sm:$0xff]  ;;  %v9839_v33 = vpop.permute.xlu0 %7627 }
 0x150   :  { %v2726_v7 = vld [vmem:[#allocation2 + $0x160] sm:$0xff] }
 0x151   :  { %2452 = vst.msk [vmem:[#allocation2 + $0x168] sm:$0xff] %vm2390_vm2, %v2158_v36  ;;  %v7751_v14 = vpack.i.bf16 %v2726_v7, %v9711_v0  ;;  %v1816_v0 = vadd.f32 %v9749_v27, %v1815_v9  ;;  %v217_v9 = vld [vmem:[%s14040_s30 + $0x4f8] sm:$0xff] }
 0x152   :  { %2566 = vst.msk [vmem:[#allocation2 + $0x568] sm:$0xff] %vm2390_vm2, %v2272_v37  ;;  %v1185_v39 = vpop.f32.mrf.mxu0  ;;  %v1527_v40 = vpop.f32.mrf.mxu1 }
 0x153   :  { %v1186_v43 = vadd.f32 %v9749_v27, %v1185_v39  ;;  %v1528_v44 = vadd.f32 %v9749_v27, %v1527_v40  ;;  %7742 = vrot.lane.b32.xlu2 %v7736_v56, %s8954_s27  ;;  %v2988_v56 = vld [vmem:[%s13990_s3 + $0x78] sm:$0xff]  ;;  %v2113_v23 = vmul.f32 0.2, %v1816_v0  ;;  %v311_v40 = vld [vmem:[%s14040_s30 + $0x7e8] sm:$0xff] }
 0x154   :  { %5209 = vmatpush.msrb.mxu2 %v2988_v56  ;;  %7577 = vmatpush.msra.mxu3 %v2988_v56 }
 0x155   :  { %v1903_v47 = vmul.f32 0.2, %v1186_v43  ;;  %v2017_v48 = vmul.f32 0.2, %v1528_v44  ;;  %7274 = vmatmul.msk.f32.gmra.mxu0 %vm320_vm1, %v99_v24  ;;  %7388 = vmatmul.msk.f32.gmra.mxu1 %vm320_vm1, %v213_v41  ;;  %v2369_v30 = vmax.f32 %v1816_v0, %v2113_v23  ;;  %v2978_v23 = vld [vmem:[%s13990_s3 + $0x28] sm:$0xff] }
 0x156   :  { %5210 = vmatpush.msrb.mxu2 %v2987_v25  ;;  %7578 = vmatpush.msra.mxu3 %v2987_v25 }
 0x157   :  { %v2159_v51 = vmax.f32 %v1186_v43, %v1903_v47  ;;  %v2273_v52 = vmax.f32 %v1528_v44, %v2017_v48  ;;  %2663 = vst.msk [vmem:[#allocation2 + $0x8d0] sm:$0xff] %vm2390_vm2, %v2369_v30  ;;  %v216_v43 = vld [vmem:[%s14040_s30 + $0x4f0] sm:$0xff]  ;;  %v1819_v44 = vadd.f32 %v9749_v27, %v1818_v31  ;;  %v2984_v48 = vld [vmem:[%s13990_s3 + $0x58] sm:$0xff]  ;;  %7486 = vmatmul.msk.f32.gmra.mxu2 %vm320_vm1, %v311_v40  ;;  %v1821_v54 = vpop.f32.mrf.mxu2 }
 0x158   :  { %v2727_v36 = vld [vmem:[#allocation2 + $0x168] sm:$0xff]  ;;  %5211 = vmatpush.msrb.mxu2 %v2986_v32  ;;  %7579 = vmatpush.msra.mxu3 %v2986_v32  ;;  %v104_v32 = vld [vmem:[%s14040_s30 + $0x170] sm:$0xff]  ;;  %v313_v40 = vld [vmem:[%s14040_s30 + $0x7f8] sm:$0xff] }
 0x159   :  { %2453 = vst.msk [vmem:[#allocation2 + $0x170] sm:$0xff] %vm2390_vm2, %v2159_v51  ;;  %v2114_v49 = vmul.f32 0.2, %v1819_v44 }
 0x15a   :  { %2567 = vst.msk [vmem:[#allocation2 + $0x570] sm:$0xff] %vm2390_vm2, %v2273_v52  ;;  %v1188_v55 = vpop.f32.mrf.mxu0  ;;  %v1530_v57 = vpop.f32.mrf.mxu1  ;;  %5212 = vmatpush.msrb.mxu2 %v2985_v38  ;;  %7580 = vmatpush.msra.mxu3 %v2985_v38  ;;  %v2983_v52 = vld [vmem:[%s13990_s3 + $0x50] sm:$0xff]  ;;  %v2976_v38 = vld [vmem:[%s13990_s3 + $0x18] sm:$0xff] }
 0x15b   :  { %v1189_v63 = vadd.f32 %v9749_v27, %v1188_v55  ;;  %v1531_v1 = vadd.f32 %v9749_v27, %v1530_v57  ;;  %7747 = vrot.lane.b32.xlu2 %v7746_v53, %s14009_s1  ;;  %v2370_v53 = vmax.f32 %v1819_v44, %v2114_v49  ;;  %v9870_v55 = vpop.permute.xlu2 %7642  ;;  %v9872_v57 = vpop.permute.xlu1 %7612  ;;  %v2974_v49 = vld [vmem:[%s13990_s3 + $0x8] sm:$0xff] }
 0x15c   :  { %7581 = vmatpush.msra.mxu3 %v2984_v48  ;;  %5213 = vmatpush.msrb.mxu2 %v2984_v48 }
 0x15d   :  { %v1904_v5 = vmul.f32 0.2, %v1189_v63  ;;  %v2018_v6 = vmul.f32 0.2, %v1531_v1  ;;  %7275 = vmatmul.msk.f32.gmra.mxu0 %vm320_vm1, %v100_v58  ;;  %7389 = vmatmul.msk.f32.gmra.mxu1 %vm320_vm1, %v214_v61  ;;  %2664 = vst.msk [vmem:[#allocation2 + $0x8d8] sm:$0xff] %vm2390_vm2, %v2370_v53 }
 0x15e   :  { %7582 = vmatpush.msra.mxu3 %v2983_v52  ;;  %5214 = vmatpush.msrb.mxu2 %v2983_v52  ;;  %v2973_v52 = vld [vmem:[%s13990_s3] sm:$0xff] }
 0x15f   :  { %v2160_v11 = vmax.f32 %v1189_v63, %v1904_v5  ;;  %v2274_v12 = vmax.f32 %v1531_v1, %v2018_v6  ;;  %v9880_v1 = vpop.permute.xlu0 %7647  ;;  %v2981_v5 = vld [vmem:[%s13990_s3 + $0x40] sm:$0xff]  ;;  %v1824_v0 = vpop.f32.mrf.mxu2 }
 0x160   :  { %v9804_v13 = vld [vmem:[#allocation2 + $0x170] sm:$0xff]  ;;  %7583 = vmatpush.msra.mxu3 %v2982_v62  ;;  %5215 = vmatpush.msrb.mxu2 %v2982_v62 }
 0x161   :  { %2454 = vst.msk [vmem:[#allocation2 + $0x178] sm:$0xff] %vm2390_vm2, %v2160_v11  ;;  %v7756_v15 = vpack.i.bf16 %v9804_v13, %v2726_v7  ;;  %v1822_v11 = vadd.f32 %v9749_v27, %v1821_v54 }
 0x162   :  { %2568 = vst.msk [vmem:[#allocation2 + $0x578] sm:$0xff] %vm2390_vm2, %v2274_v12  ;;  %v1191_v17 = vpop.f32.mrf.mxu0  ;;  %v1533_v18 = vpop.f32.mrf.mxu1  ;;  %7584 = vmatpush.msra.mxu3 %v2981_v5  ;;  %5216 = vmatpush.msrb.mxu2 %v2981_v5 }
 0x163   :  { %v1192_v21 = vadd.f32 %v9749_v27, %v1191_v17  ;;  %v1534_v22 = vadd.f32 %v9749_v27, %v1533_v18  ;;  %7752 = vrot.lane.b32.xlu2 %v7751_v14, %s14009_s1  ;;  %7757 = vrot.lane.b32.xlu0 %v7756_v15, %s8953_s18  ;;  %v312_v14 = vld [vmem:[%s14040_s30 + $0x7f0] sm:$0xff]  ;;  %v2980_v15 = vld [vmem:[%s13990_s3 + $0x38] sm:$0xff]  ;;  %v2115_v16 = vmul.f32 0.2, %v1822_v11  ;;  %v9911_v56 = vpop.permute.xlu2 %7657  ;;  %v9917_v25 = vpop.permute.xlu1 %7617 }
 0x164   :  { %7585 = vmatpush.msra.mxu3 %v2980_v15  ;;  %7487 = vmatmul.msk.f32.gmra.mxu2 %vm320_vm1, %v312_v14  ;;  %14041 = vst [vmem:[#allocation6_spill] sm:$0xff] %v9911_v56 }
 0x165   :  { %v1905_v28 = vmul.f32 0.2, %v1192_v21  ;;  %v2019_v29 = vmul.f32 0.2, %v1534_v22  ;;  %7276 = vmatmul.msk.f32.gmra.mxu0 %vm320_vm1, %v101_v19  ;;  %7390 = vmatmul.msk.f32.gmra.mxu1 %vm320_vm1, %v215_v20  ;;  %v2979_v19 = vld [vmem:[%s13990_s3 + $0x30] sm:$0xff]  ;;  %v2371_v20 = vmax.f32 %v1822_v11, %v2115_v16 }
 0x166   :  { %7586 = vmatpush.msra.mxu3 %v2979_v19  ;;  %5217 = vmatpush.msrb.mxu2 %v2980_v15 }
 0x167   :  { %v2161_v34 = vmax.f32 %v1192_v21, %v1905_v28  ;;  %v2275_v35 = vmax.f32 %v1534_v22, %v2019_v29  ;;  %2665 = vst.msk [vmem:[#allocation2 + $0x8e0] sm:$0xff] %vm2390_vm2, %v2371_v20  ;;  %v9919_v28 = vpop.permute.xlu0 %7672  ;;  %v2977_v29 = vld [vmem:[%s13990_s3 + $0x20] sm:$0xff] }
 0x168   :  { %v2729_v37 = vld [vmem:[#allocation2 + $0x178] sm:$0xff]  ;;  %7587 = vmatpush.msra.mxu3 %v2978_v23  ;;  %5218 = vmatpush.msrb.mxu2 %v2979_v19 }
 0x169   :  { %2455 = vst.msk [vmem:[#allocation2 + $0x180] sm:$0xff] %vm2390_vm2, %v2161_v34  ;;  %v7766_v39 = vpack.i.bf16 %v2729_v37, %v2727_v36  ;;  %v218_v34 = vld [vmem:[%s14040_s30 + $0x500] sm:$0xff] }
 0x16a   :  { %2569 = vst.msk [vmem:[#allocation2 + $0x580] sm:$0xff] %vm2390_vm2, %v2275_v35  ;;  %v1194_v24 = vpop.f32.mrf.mxu0  ;;  %v1536_v41 = vpop.f32.mrf.mxu1  ;;  %v1825_v35 = vadd.f32 %v9749_v27, %v1824_v0  ;;  %7588 = vmatpush.msra.mxu3 %v2977_v29  ;;  %5219 = vmatpush.msrb.mxu2 %v2978_v23  ;;  %v106_v0 = vld [vmem:[%s14040_s30 + $0x180] sm:$0xff] }
 0x16b   :  { %v1195_v45 = vadd.f32 %v9749_v27, %v1194_v24  ;;  %v1537_v47 = vadd.f32 %v9749_v27, %v1536_v41  ;;  %7767 = vrot.lane.b32.xlu1 %v7766_v39, %s8954_s27  ;;  %7762 = vrot.lane.b32.xlu0 %v7766_v39, %s8948_s25  ;;  %v9946_v44 = vpop.permute.xlu2 %7667 }
 0x16c   :  { %v2116_v39 = vmul.f32 0.2, %v1825_v35  ;;  %7589 = vmatpush.msra.mxu3 %v2976_v38  ;;  %5220 = vmatpush.msrb.mxu2 %v2977_v29 }
 0x16d   :  { %v1906_v50 = vmul.f32 0.2, %v1195_v45  ;;  %v2020_v51 = vmul.f32 0.2, %v1537_v47  ;;  %7277 = vmatmul.msk.f32.gmra.mxu0 %vm320_vm1, %v102_v42  ;;  %7391 = vmatmul.msk.f32.gmra.mxu1 %vm320_vm1, %v216_v43  ;;  %v2975_v42 = vld [vmem:[%s13990_s3 + $0x10] sm:$0xff]  ;;  %v1827_v43 = vpop.f32.mrf.mxu2 }
 0x16e   :  { %7590 = vmatpush.msra.mxu3 %v2975_v42  ;;  %v2372_v48 = vmax.f32 %v1825_v35, %v2116_v39  ;;  %7488 = vmatmul.msk.f32.gmra.mxu2 %vm320_vm1, %v313_v40  ;;  %v1828_v62 = vadd.f32 %v9749_v27, %v1827_v43 }
 0x16f   :  { %v2162_v58 = vmax.f32 %v1195_v45, %v1906_v50  ;;  %v2276_v61 = vmax.f32 %v1537_v47, %v2020_v51  ;;  %5221 = vmatpush.msrb.mxu2 %v2976_v38 }
 0x170   :  { %v9877_v63 = vld [vmem:[#allocation2 + $0x180] sm:$0xff]  ;;  %7591 = vmatpush.msra.mxu3 %v2974_v49  ;;  %2666 = vst.msk [vmem:[#allocation2 + $0x8e8] sm:$0xff] %vm2390_vm2, %v2372_v48  ;;  %v221_v48 = vld [vmem:[%s14040_s30 + $0x518] sm:$0xff] }
 0x171   :  { %2456 = vst.msk [vmem:[#allocation2 + $0x188] sm:$0xff] %vm2390_vm2, %v2162_v58  ;;  %v7771_v3 = vpack.i.bf16 %v9877_v63, %v9804_v13  ;;  %v105_v58 = vld [vmem:[%s14040_s30 + $0x178] sm:$0xff]  ;;  %5222 = vmatpush.msrb.mxu2 %v2975_v42  ;;  %v7604_v42 = vunpack.i.l.bf16 %v9775_v46  ;;  %v11740_v56 = vld [vmem:[#allocation2 + $0x580] sm:$0xff] }
 0x172   :  { %2570 = vst.msk [vmem:[#allocation2 + $0x588] sm:$0xff] %vm2390_vm2, %v2276_v61  ;;  %v1197_v6 = vpop.f32.mrf.mxu0  ;;  %v1539_v7 = vpop.f32.mrf.mxu1  ;;  %v219_v61 = vld [vmem:[%s14040_s30 + $0x508] sm:$0xff]  ;;  %7592 = vmatpush.msra.mxu3 %v2973_v52 }
 0x173   :  { %v1198_v12 = vadd.f32 %v9749_v27, %v1197_v6  ;;  %v1540_v13 = vadd.f32 %v9749_v27, %v1539_v7  ;;  %7772 = vrot.lane.b32.xlu2 %v7771_v3, %s14009_s1  ;;  %v9970_v3 = vpop.permute.xlu0 %7677  ;;  %v2117_v7 = vmul.f32 0.2, %v1828_v62  ;;  %5223 = vmatpush.msrb.mxu2 %v2974_v49 }
 0x174   :  { %14042 = vst [vmem:[#allocation7_spill] sm:$0xff] %v9970_v3 }
 0x175   :  { %v1907_v17 = vmul.f32 0.2, %v1198_v12  ;;  %v2021_v18 = vmul.f32 0.2, %v1540_v13  ;;  %7278 = vmatmul.msk.f32.gmra.mxu0 %vm320_vm1, %v103_v8  ;;  %7392 = vmatmul.msk.f32.gmra.mxu1 %vm320_vm1, %v217_v9  ;;  %v2373_v11 = vmax.f32 %v1828_v62, %v2117_v7 }
 0x176   :  { %5224 = vmatpush.msrb.mxu2 %v2973_v52 }
 0x177   :  { %v2163_v21 = vmax.f32 %v1198_v12, %v1907_v17  ;;  %v2277_v22 = vmax.f32 %v1540_v13, %v2021_v18  ;;  %v1830_v12 = vpop.f32.mrf.mxu2  ;;  %v9978_v13 = vpop.permute.xlu2 %7692  ;;  %2667 = vst.msk [vmem:[#allocation2 + $0x8f0] sm:$0xff] %vm2390_vm2, %v2373_v11 }
 0x178   :  { %v2731_v16 = vld [vmem:[#allocation2 + $0x188] sm:$0xff] }
 0x179   :  { %2457 = vst.msk [vmem:[#allocation2 + $0x190] sm:$0xff] %vm2390_vm2, %v2163_v21  ;;  %v220_v21 = vld [vmem:[%s14040_s30 + $0x510] sm:$0xff] }
 0x17a   :  { %2571 = vst.msk [vmem:[#allocation2 + $0x590] sm:$0xff] %vm2390_vm2, %v2277_v22  ;;  %v1200_v30 = vpop.f32.mrf.mxu0  ;;  %v1542_v31 = vpop.f32.mrf.mxu1  ;;  %v1831_v22 = vadd.f32 %v9749_v27, %v1830_v12 }
 0x17b   :  { %v1201_v36 = vadd.f32 %v9749_v27, %v1200_v30  ;;  %v1543_v37 = vadd.f32 %v9749_v27, %v1542_v31 }
 0x17c   :  { %v2118_v30 = vmul.f32 0.2, %v1831_v22 }
 0x17d   :  { %v1908_v24 = vmul.f32 0.2, %v1201_v36  ;;  %v2022_v41 = vmul.f32 0.2, %v1543_v37  ;;  %7279 = vmatmul.msk.f32.gmra.mxu0 %vm320_vm1, %v104_v32  ;;  %7393 = vmatmul.msk.f32.gmra.mxu1 %vm320_vm1, %v218_v34  ;;  %v9995_v32 = vpop.permute.xlu0 %7682 }
 0x17f   :  { %v2164_v45 = vmax.f32 %v1201_v36, %v1908_v24  ;;  %v2278_v47 = vmax.f32 %v1543_v37, %v2022_v41  ;;  %v2374_v36 = vmax.f32 %v1831_v22, %v2118_v30  ;;  %v1833_v37 = vpop.f32.mrf.mxu2  ;;  %v9999_v38 = vpop.permute.xlu2 %7712 }
 0x180   :  { %v9952_v50 = vld [vmem:[#allocation2 + $0x190] sm:$0xff]  ;;  %v1834_v49 = vadd.f32 %v9749_v27, %v1833_v37 }
 0x181   :  { %2458 = vst.msk [vmem:[#allocation2 + $0x198] sm:$0xff] %vm2390_vm2, %v2164_v45  ;;  %v7776_v51 = vpack.i.bf16 %v9952_v50, %v9877_v63  ;;  %v9968_v63 = vpop.permute.xlu1 %7632  ;;  %v2853_v3 = vld [vmem:[#allocation2 + $0x590] sm:$0xff] }
 0x182   :  { %2572 = vst.msk [vmem:[#allocation2 + $0x5a8] sm:$0xff] %vm2390_vm2, %v2278_v47  ;;  %v1203_v53 = vpop.f32.mrf.mxu0  ;;  %v1545_v54 = vpop.f32.mrf.mxu1  ;;  %v107_v47 = vld [vmem:[%s14040_s30 + $0x188] sm:$0xff] }
 0x183   :  { %v1204_v5 = vadd.f32 %v9749_v27, %v1203_v53  ;;  %v1546_v6 = vadd.f32 %v9749_v27, %v1545_v54  ;;  %7777 = vrot.lane.b32.xlu0 %v7776_v51, %s8953_s18  ;;  %2668 = vst.msk [vmem:[#allocation2 + $0x908] sm:$0xff] %vm2390_vm2, %v2374_v36  ;;  %v2684_v51 = vld [vmem:[#allocation2] sm:$0xff]  ;;  %v2119_v53 = vmul.f32 0.2, %v1834_v49  ;;  %v7624_v54 = vunpack.i.l.bf16 %v9795_v60 }
 0x184   :  { %v7625_v36 = vunpack.i.h.bf16 %v9795_v60  ;;  %v8832_v60 = vld [vmem:[#allocation2 + $0x10] sm:$0xff] }
 0x185   :  { %v1909_v8 = vmul.f32 0.2, %v1204_v5  ;;  %v2023_v9 = vmul.f32 0.2, %v1546_v6  ;;  %7280 = vmatmul.msk.f32.gmra.mxu0 %vm320_vm1, %v105_v58  ;;  %7394 = vmatmul.msk.f32.gmra.mxu1 %vm320_vm1, %v219_v61  ;;  %v10020_v61 = vpop.permute.xlu0 %7702  ;;  %v2375_v7 = vmax.f32 %v1834_v49, %v2119_v53  ;;  %v2735_v49 = vld [vmem:[#allocation2 + $0x1b0] sm:$0xff] }
 0x187   :  { %v2165_v14 = vmax.f32 %v1204_v5, %v1909_v8  ;;  %v2279_v15 = vmax.f32 %v1546_v6, %v2023_v9  ;;  %v4622_v6 = vsel %vm2390_vm2, %v2684_v51, %v7604_v42  ;;  %v1836_v8 = vpop.f32.mrf.mxu2  ;;  %v10025_v9 = vpop.permute.xlu2 %7717  ;;  %2669 = vst.msk [vmem:[#allocation2 + $0x910] sm:$0xff] %vm2390_vm2, %v2375_v7 }
 0x188   :  { %v2733_v17 = vld [vmem:[#allocation2 + $0x198] sm:$0xff]  ;;  %v7719_v30 = vunpack.i.l.bf16 %v10025_v9 }
 0x189   :  { %2459 = vst.msk [vmem:[#allocation2 + $0x1a0] sm:$0xff] %vm2390_vm2, %v2165_v14  ;;  %v7781_v18 = vpack.i.bf16 %v2733_v17, %v2731_v16  ;;  %v9993_v31 = vpop.permute.xlu1 %7652  ;;  %v2855_v14 = vld [vmem:[#allocation2 + $0x5a8] sm:$0xff]  ;;  %v7605_v16 = vunpack.i.h.bf16 %v9775_v46  ;;  %v4687_v17 = vsel %vm4686_vm3, %v4622_v6, %v7624_v54  ;;  %v108_v46 = vld [vmem:[%s14040_s30 + $0x190] sm:$0xff] }
 0x18a   :  { %2573 = vst.msk [vmem:[#allocation2 + $0x5b0] sm:$0xff] %vm2390_vm2, %v2279_v15  ;;  %v1206_v19 = vpop.f32.mrf.mxu0  ;;  %v1548_v20 = vpop.f32.mrf.mxu1  ;;  %v7644_v15 = vunpack.i.l.bf16 %v9870_v55 }
 0x18b   :  { %v1207_v23 = vadd.f32 %v9749_v27, %v1206_v19  ;;  %v1549_v29 = vadd.f32 %v9749_v27, %v1548_v20  ;;  %7782 = vrot.lane.b32.xlu1 %v7781_v18, %s8948_s25  ;;  %v7654_v20 = vunpack.i.l.bf16 %v9993_v31 }
 0x18c   :  { %v4752_v37 = vsel %vm4751_vm5, %v4687_v17, %v7644_v15 }
 0x18d   :  { %v1910_v34 = vmul.f32 0.2, %v1207_v23  ;;  %v2024_v35 = vmul.f32 0.2, %v1549_v29  ;;  %7281 = vmatmul.msk.f32.gmra.mxu0 %vm320_vm1, %v106_v0  ;;  %7395 = vmatmul.msk.f32.gmra.mxu1 %vm320_vm1, %v220_v21 }
 0x18f   :  { %v2166_v39 = vmax.f32 %v1207_v23, %v1910_v34  ;;  %v2280_v40 = vmax.f32 %v1549_v29, %v2024_v35  ;;  %v222_v23 = vld [vmem:[%s14040_s30 + $0x520] sm:$0xff]  ;;  %v1837_v29 = vadd.f32 %v9749_v27, %v1836_v8  ;;  %v7650_v8 = vunpack.i.h.bf16 %v9880_v1 }
 0x190   :  { %v2734_v24 = vld [vmem:[#allocation2 + $0x1a0] sm:$0xff] }
 0x191   :  { %2460 = vst.msk [vmem:[#allocation2 + $0x1b8] sm:$0xff] %vm2390_vm2, %v2166_v39  ;;  %v7791_v41 = vpack.i.bf16 %v2734_v24, %v9952_v50  ;;  %v10018_v58 = vpop.permute.xlu1 %7662  ;;  %v2120_v39 = vmul.f32 0.2, %v1837_v29 }
 0x192   :  { %2574 = vst.msk [vmem:[#allocation2 + $0x5b8] sm:$0xff] %vm2390_vm2, %v2280_v40  ;;  %v1209_v43 = vpop.f32.mrf.mxu0  ;;  %v1551_v45 = vpop.f32.mrf.mxu1 }
 0x193   :  { %v1210_v52 = vadd.f32 %v9749_v27, %v1209_v43  ;;  %v1552_v50 = vadd.f32 %v9749_v27, %v1551_v45  ;;  %7787 = vrot.lane.b32.xlu1 %v7781_v18, %s8954_s27  ;;  %7792 = vrot.lane.b32.xlu2 %v7791_v41, %s14009_s1  ;;  %v7649_v18 = vunpack.i.l.bf16 %v9880_v1  ;;  %v4623_v45 = vsel %vm2390_vm2, %v8832_v60, %v7605_v16  ;;  %v109_v16 = vld [vmem:[%s14040_s30 + $0x198] sm:$0xff]  ;;  %v223_v1 = vld [vmem:[%s14040_s30 + $0x528] sm:$0xff] }
 0x194   :  { %v2376_v51 = vmax.f32 %v1837_v29, %v2120_v39  ;;  %v4688_v7 = vsel %vm4686_vm3, %v4623_v45, %v7625_v36 }
 0x195   :  { %v1911_v62 = vmul.f32 0.2, %v1210_v52  ;;  %v2025_v5 = vmul.f32 0.2, %v1552_v50  ;;  %7282 = vmatmul.msk.f32.gmra.mxu0 %vm320_vm1, %v107_v47  ;;  %7396 = vmatmul.msk.f32.gmra.mxu1 %vm320_vm1, %v221_v48  ;;  %v4817_v40 = vsel %vm4816_vm4, %v4752_v37, %v7649_v18  ;;  %v7720_v18 = vunpack.i.h.bf16 %v10025_v9 }
 0x196   :  { %v4882_v48 = vsel %vm4881_vm6, %v4817_v40, %v7654_v20  ;;  %2670 = vst.msk [vmem:[#allocation2 + $0x918] sm:$0xff] %vm2390_vm2, %v2376_v51  ;;  %v7609_v40 = vunpack.i.l.bf16 %v9800_v4  ;;  %v224_v51 = vld [vmem:[%s14040_s30 + $0x530] sm:$0xff] }
 0x197   :  { %v2167_v11 = vmax.f32 %v1210_v52, %v1911_v62  ;;  %v2281_v12 = vmax.f32 %v1552_v50, %v2025_v5  ;;  %v1839_v52 = vpop.f32.mrf.mxu2  ;;  %v4947_v54 = vsel %vm4946_vm7, %v4882_v48, %v7719_v30  ;;  %v7645_v62 = vunpack.i.h.bf16 %v9870_v55 }
 0x198   :  { %v1840_v17 = vadd.f32 %v9749_v27, %v1839_v52 }
 0x199   :  { %2461 = vst.msk [vmem:[#allocation2 + $0x1c0] sm:$0xff] %vm2390_vm2, %v2167_v11  ;;  %v2857_v19 = vld [vmem:[#allocation2 + $0x5b8] sm:$0xff]  ;;  %v10052_v24 = vpop.permute.xlu1 %7687  ;;  %v10066_v11 = vpop.permute.xlu2 %7722  ;;  %v4753_v20 = vsel %vm4751_vm5, %v4688_v7, %v7645_v62  ;;  %v8833_v62 = vld [vmem:[#allocation2 + $0x20] sm:$0xff] }
 0x19a   :  { %2575 = vst.msk [vmem:[#allocation2 + $0x5c0] sm:$0xff] %vm2390_vm2, %v2281_v12  ;;  %v1212_v0 = vpop.f32.mrf.mxu0  ;;  %v1554_v21 = vpop.f32.mrf.mxu1  ;;  %v10035_v22 = vpack.i.bf16 %v2857_v19, %v2855_v14  ;;  %v7655_v14 = vunpack.i.h.bf16 %v9993_v31 }
 0x19b   :  { %v1213_v34 = vadd.f32 %v9749_v27, %v1212_v0  ;;  %v1555_v35 = vadd.f32 %v9749_v27, %v1554_v21  ;;  %v2121_v21 = vmul.f32 0.2, %v1840_v17 }
 0x19c   :  { %7797 = vrot.lane.b32.xlu2 %v10035_v22, %s8948_s25 }
 0x19d   :  { %v1912_v41 = vmul.f32 0.2, %v1213_v34  ;;  %v2026_v42 = vmul.f32 0.2, %v1555_v35  ;;  %7283 = vmatmul.msk.f32.gmra.mxu0 %vm320_vm1, %v108_v46  ;;  %7397 = vmatmul.msk.f32.gmra.mxu1 %vm320_vm1, %v222_v23  ;;  %v7728_v43 = vpop.permute.xlu0 %7727  ;;  %v4818_v46 = vsel %vm4816_vm4, %v4753_v20, %v7650_v8 }
 0x19e   :  { %v7729_v47 = vunpack.i.l.bf16 %v7728_v43  ;;  %v7730_v0 = vunpack.i.h.bf16 %v7728_v43  ;;  %v4883_v9 = vsel %vm4881_vm6, %v4818_v46, %v7655_v14  ;;  %v7674_v46 = vunpack.i.l.bf16 %v9919_v28 }
 0x19f   :  { %v2168_v50 = vmax.f32 %v1213_v34, %v1912_v41  ;;  %v2282_v53 = vmax.f32 %v1555_v35, %v2026_v42  ;;  %v2377_v34 = vmax.f32 %v1840_v17, %v2121_v21  ;;  %v1842_v35 = vpop.f32.mrf.mxu2  ;;  %v4948_v39 = vsel %vm4946_vm7, %v4883_v9, %v7720_v18  ;;  %v2736_v42 = vld [vmem:[#allocation2 + $0x1b8] sm:$0xff] }
 0x1a0   :  { %v5012_v5 = vsel %vm5011_vm8, %v4947_v54, %v7729_v47  ;;  %v10061_v6 = vld [vmem:[#allocation2 + $0x1c0] sm:$0xff]  ;;  %v5013_v41 = vsel %vm5011_vm8, %v4948_v39, %v7730_v0  ;;  %v1843_v52 = vadd.f32 %v9749_v27, %v1842_v35  ;;  %v7630_v0 = vunpack.i.h.bf16 %v9839_v33  ;;  %v225_v9 = vld [vmem:[%s14040_s30 + $0x538] sm:$0xff] }
 0x1a1   :  { %2462 = vst.msk [vmem:[#allocation2 + $0x1c8] sm:$0xff] %vm2390_vm2, %v2168_v50  ;;  %5225 = vmatmul.f32.vlgmr.msrb.gmra.mxu2 %v5012_v5  ;;  %v7801_v12 = vpack.i.bf16 %v10061_v6, %v2735_v49  ;;  %v10085_v23 = vpop.permute.xlu1 %7697  ;;  %v110_v49 = vld [vmem:[%s14040_s30 + $0x1a0] sm:$0xff]  ;;  %v7629_v50 = vunpack.i.l.bf16 %v9839_v33  ;;  %v4624_v5 = vsel %vm2390_vm2, %v8833_v62, %v7609_v40  ;;  %v7669_v35 = vunpack.i.l.bf16 %v9946_v44 }
 0x1a2   :  { %2576 = vst.msk [vmem:[#allocation2 + $0x5c8] sm:$0xff] %vm2390_vm2, %v2282_v53  ;;  %v1215_v55 = vpop.f32.mrf.mxu0  ;;  %v1557_v15 = vpop.f32.mrf.mxu1  ;;  %v2122_v7 = vmul.f32 0.2, %v1843_v52 }
 0x1a3   :  { %v1216_v19 = vadd.f32 %v9749_v27, %v1215_v55  ;;  %v1558_v31 = vadd.f32 %v9749_v27, %v1557_v15  ;;  %7802 = vrot.lane.b32.xlu0 %v7801_v12, %s8950_s21  ;;  %14043 = vst [vmem:[#allocation8_spill] sm:$0xff] %v10085_v23  ;;  %v7664_v55 = vunpack.i.l.bf16 %v10018_v58  ;;  %v4689_v17 = vsel %vm4686_vm3, %v4624_v5, %v7629_v50 }
 0x1a4   :  { %2671 = vst.msk [vmem:[#allocation2 + $0x920] sm:$0xff] %vm2390_vm2, %v2377_v34  ;;  %v2378_v15 = vmax.f32 %v1843_v52, %v2122_v7  ;;  %v8834_v34 = vld [vmem:[#allocation2 + $0x30] sm:$0xff]  ;;  %v7670_v7 = vunpack.i.h.bf16 %v9946_v44 }
 0x1a5   :  { %v1913_v29 = vmul.f32 0.2, %v1216_v19  ;;  %v2027_v30 = vmul.f32 0.2, %v1558_v31  ;;  %7284 = vmatmul.msk.f32.gmra.mxu0 %vm320_vm1, %v109_v16  ;;  %7398 = vmatmul.msk.f32.gmra.mxu1 %vm320_vm1, %v223_v1  ;;  %v10095_v60 = vpop.permute.xlu2 %7737  ;;  %v7610_v1 = vunpack.i.h.bf16 %v9800_v4  ;;  %v4754_v21 = vsel %vm4751_vm5, %v4689_v17, %v7664_v55  ;;  %v112_v44 = vld [vmem:[%s14040_s30 + $0x1b0] sm:$0xff] }
 0x1a6   :  { %2672 = vst.msk [vmem:[#allocation2 + $0x928] sm:$0xff] %vm2390_vm2, %v2378_v15 }
 0x1a7   :  { %v2169_v36 = vmax.f32 %v1216_v19, %v1913_v29  ;;  %v2283_v37 = vmax.f32 %v1558_v31, %v2027_v30  ;;  %v1845_v16 = vpop.f32.mrf.mxu2  ;;  %v111_v30 = vld [vmem:[%s14040_s30 + $0x1a8] sm:$0xff]  ;;  %v4625_v33 = vsel %vm2390_vm2, %v8834_v34, %v7610_v1 }
 0x1a8   :  { %v2738_v43 = vld [vmem:[#allocation2 + $0x1c8] sm:$0xff] }
 0x1a9   :  { %2463 = vst.msk [vmem:[#allocation2 + $0x1d0] sm:$0xff] %vm2390_vm2, %v2169_v36  ;;  %5228 = vmatmul.f32.gmra.mxu2 %v5013_v41  ;;  %v7806_v45 = vpack.i.bf16 %v2738_v43, %v2736_v42  ;;  %v10110_v8 = vpop.permute.xlu1 %7707  ;;  %v7665_v41 = vunpack.i.h.bf16 %v10018_v58  ;;  %v2859_v62 = vld [vmem:[#allocation2 + $0x5c8] sm:$0xff] }
 0x1aa   :  { %2577 = vst.msk [vmem:[#allocation2 + $0x5d0] sm:$0xff] %vm2390_vm2, %v2283_v37  ;;  %v1218_v47 = vpop.f32.mrf.mxu0  ;;  %v1560_v48 = vpop.f32.mrf.mxu1 }
 0x1ab   :  { %v1219_v53 = vadd.f32 %v9749_v27, %v1218_v47  ;;  %v1561_v54 = vadd.f32 %v9749_v27, %v1560_v48  ;;  %7807 = vrot.lane.b32.xlu1 %v7806_v45, %s8951_s29  ;;  %v4819_v47 = vsel %vm4816_vm4, %v4754_v21, %v7669_v35  ;;  %v4690_v48 = vsel %vm4686_vm3, %v4625_v33, %v7630_v0 }
 0x1ad   :  { %v1914_v12 = vmul.f32 0.2, %v1219_v53  ;;  %v2028_v14 = vmul.f32 0.2, %v1561_v54  ;;  %7285 = vmatmul.msk.f32.gmra.mxu0 %vm320_vm1, %v110_v49  ;;  %7399 = vmatmul.msk.f32.gmra.mxu1 %vm320_vm1, %v224_v51  ;;  %v7743_v39 = vpop.permute.xlu2 %7742  ;;  %v4884_v51 = vsel %vm4881_vm6, %v4819_v47, %v7674_v46 }
 0x1ae   :  { %v7744_v50 = vunpack.i.l.bf16 %v7743_v39  ;;  %v7745_v33 = vunpack.i.h.bf16 %v7743_v39  ;;  %v113_v39 = vld [vmem:[%s14040_s30 + $0x1b8] sm:$0xff] }
 0x1af   :  { %v2170_v18 = vmax.f32 %v1219_v53, %v1914_v12  ;;  %v2284_v19 = vmax.f32 %v1561_v54, %v2028_v14  ;;  %v1848_v52 = vpop.f32.mrf.mxu2  ;;  %v4755_v12 = vsel %vm4751_vm5, %v4690_v48, %v7665_v41  ;;  %v7675_v14 = vunpack.i.h.bf16 %v9919_v28  ;;  %v226_v28 = vld [vmem:[%s14040_s30 + $0x540] sm:$0xff] }
 0x1b0   :  { %v10117_v31 = vld [vmem:[#allocation2 + $0x1d0] sm:$0xff]  ;;  %v4820_v21 = vsel %vm4816_vm4, %v4755_v12, %v7670_v7 }
 0x1b1   :  { %2464 = vst.msk [vmem:[#allocation2 + $0x1d8] sm:$0xff] %vm2390_vm2, %v2170_v18  ;;  %v7811_v20 = vpack.i.bf16 %v10117_v31, %v10061_v6  ;;  %v1846_v6 = vadd.f32 %v9749_v27, %v1845_v16 }
 0x1b2   :  { %2578 = vst.msk [vmem:[#allocation2 + $0x5d8] sm:$0xff] %vm2390_vm2, %v2284_v19  ;;  %v1221_v4 = vpop.f32.mrf.mxu0  ;;  %v1563_v29 = vpop.f32.mrf.mxu1  ;;  %v1849_v19 = vadd.f32 %v9749_v27, %v1848_v52 }
 0x1b3   :  { %v1222_v36 = vadd.f32 %v9749_v27, %v1221_v4  ;;  %v1564_v37 = vadd.f32 %v9749_v27, %v1563_v29  ;;  %7812 = vrot.lane.b32.xlu2 %v7811_v20, %s14044_s24  ;;  %v2123_v40 = vmul.f32 0.2, %v1846_v6 }
 0x1b4   :  { %v2124_v46 = vmul.f32 0.2, %v1849_v19 }
 0x1b5   :  { %v1915_v42 = vmul.f32 0.2, %v1222_v36  ;;  %v2029_v43 = vmul.f32 0.2, %v1564_v37  ;;  %7286 = vmatmul.msk.f32.gmra.mxu0 %vm320_vm1, %v111_v30  ;;  %7400 = vmatmul.msk.f32.gmra.mxu1 %vm320_vm1, %v225_v9  ;;  %v7733_v45 = vpop.permute.xlu1 %7732  ;;  %v2379_v58 = vmax.f32 %v1846_v6, %v2123_v40  ;;  %v4885_v30 = vsel %vm4881_vm6, %v4820_v21, %v7675_v14  ;;  %v114_v14 = vld [vmem:[%s14040_s30 + $0x1c0] sm:$0xff] }
 0x1b6   :  { %v7734_v49 = vunpack.i.l.bf16 %v7733_v45  ;;  %v7735_v16 = vunpack.i.h.bf16 %v7733_v45  ;;  %v2380_v6 = vmax.f32 %v1849_v19, %v2124_v46  ;;  %v227_v45 = vld [vmem:[%s14040_s30 + $0x548] sm:$0xff] }
 0x1b7   :  { %v2171_v53 = vmax.f32 %v1222_v36, %v1915_v42  ;;  %v2285_v54 = vmax.f32 %v1564_v37, %v2029_v43  ;;  %2673 = vst.msk [vmem:[#allocation2 + $0x930] sm:$0xff] %vm2390_vm2, %v2379_v58  ;;  %v1851_v34 = vpop.f32.mrf.mxu2 }
 0x1b8   :  { %v4949_v5 = vsel %vm4946_vm7, %v4884_v51, %v7734_v49  ;;  %v4950_v9 = vsel %vm4946_vm7, %v4885_v30, %v7735_v16  ;;  %2674 = vst.msk [vmem:[#allocation2 + $0x938] sm:$0xff] %vm2390_vm2, %v2380_v6  ;;  %v1852_v47 = vadd.f32 %v9749_v27, %v1851_v34  ;;  %v2740_v58 = vld [vmem:[#allocation2 + $0x1d8] sm:$0xff]  ;;  %v115_v34 = vld [vmem:[%s14040_s30 + $0x1c8] sm:$0xff] }
 0x1b9   :  { %2465 = vst.msk [vmem:[#allocation2 + $0x1e0] sm:$0xff] %vm2390_vm2, %v2171_v53  ;;  %v5014_v55 = vsel %vm5011_vm8, %v4949_v5, %v7744_v50  ;;  %v2861_v15 = vld [vmem:[#allocation2 + $0x5d8] sm:$0xff]  ;;  %v5015_v40 = vsel %vm5011_vm8, %v4950_v9, %v7745_v33 }
 0x1ba   :  { %2579 = vst.msk [vmem:[#allocation2 + $0x5e0] sm:$0xff] %vm2390_vm2, %v2285_v54  ;;  %v1224_v1 = vpop.f32.mrf.mxu0  ;;  %v1566_v17 = vpop.f32.mrf.mxu1  ;;  %5231 = vmatmul.f32.gmra.mxu2 %v5014_v55  ;;  %v10152_v18 = vpack.i.bf16 %v2861_v15, %v2859_v62  ;;  %v228_v55 = vld [vmem:[%s14040_s30 + $0x550] sm:$0xff]  ;;  %v10200_v15 = vld [vmem:[%s13989_s2] ss:$0 sm:$0xff]  ;;  %v229_v33 = vld [vmem:[%s14040_s30 + $0x558] sm:$0xff] }
 0x1bb   :  { %v1225_v20 = vadd.f32 %v9749_v27, %v1224_v1  ;;  %v1567_v0 = vadd.f32 %v9749_v27, %v1566_v17 }
 0x1bc   :  { %7817 = vrot.lane.b32.xlu0 %v10152_v18, %s8948_s25 }
 0x1bd   :  { %v1916_v4 = vmul.f32 0.2, %v1225_v20  ;;  %v2030_v29 = vmul.f32 0.2, %v1567_v0  ;;  %7287 = vmatmul.msk.f32.gmra.mxu0 %vm320_vm1, %v112_v44  ;;  %7401 = vmatmul.msk.f32.gmra.mxu1 %vm320_vm1, %v226_v28 }
 0x1bf   :  { %v2172_v35 = vmax.f32 %v1225_v20, %v1916_v4  ;;  %v2286_v36 = vmax.f32 %v1567_v0, %v2030_v29  ;;  %v1854_v53 = vpop.f32.mrf.mxu2  ;;  %v7614_v4 = vunpack.i.l.bf16 %v9872_v57 }
 0x1c0   :  { %v2741_v37 = vld [vmem:[#allocation2 + $0x1e0] sm:$0xff]  ;;  %v1855_v16 = vadd.f32 %v10200_v15, %v1854_v53 }
 0x1c1   :  { %2466 = vst.msk [vmem:[#allocation2 + $0x1e8] sm:$0xff] %vm2390_vm2, %v2172_v35  ;;  %v7821_v41 = vpack.i.bf16 %v2741_v37, %v10117_v31  ;;  %v2125_v31 = vmul.f32 0.2, %v1852_v47 }
 0x1c2   :  { %2580 = vst.msk [vmem:[#allocation2 + $0x5e8] sm:$0xff] %vm2390_vm2, %v2286_v36  ;;  %v1227_v42 = vpop.f32.mrf.mxu0  ;;  %v1569_v43 = vpop.f32.mrf.mxu1  ;;  %5234 = vmatmul.f32.gmra.mxu2 %v5015_v40  ;;  %v2126_v44 = vmul.f32 0.2, %v1855_v16  ;;  %v7634_v36 = vunpack.i.l.bf16 %v9968_v63 }
 0x1c3   :  { %v1228_v48 = vadd.f32 %v9749_v27, %v1227_v42  ;;  %v1570_v49 = vadd.f32 %v9749_v27, %v1569_v43  ;;  %v2381_v50 = vmax.f32 %v1852_v47, %v2125_v31 }
 0x1c4   :  { %7822 = vrot.lane.b32.xlu0 %v7821_v41, %s8950_s21  ;;  %v2382_v20 = vmax.f32 %v1855_v16, %v2126_v44  ;;  %v8836_v41 = vld [vmem:[#allocation2 + $0x40] sm:$0xff]  ;;  %v116_v16 = vld [vmem:[%s14040_s30 + $0x1d0] sm:$0xff] }
 0x1c5   :  { %v1917_v51 = vmul.f32 0.2, %v1228_v48  ;;  %v2031_v52 = vmul.f32 0.2, %v1570_v49  ;;  %7288 = vmatmul.msk.f32.gmra.mxu0 %vm320_vm1, %v113_v39  ;;  %7402 = vmatmul.msk.f32.gmra.mxu1 %vm320_vm1, %v227_v45  ;;  %2675 = vst.msk [vmem:[#allocation2 + $0x940] sm:$0xff] %vm2390_vm2, %v2381_v50  ;;  %v4626_v42 = vsel %vm2390_vm2, %v8836_v41, %v7614_v4  ;;  %v7615_v39 = vunpack.i.h.bf16 %v9872_v57  ;;  %v8837_v57 = vld [vmem:[#allocation2 + $0x50] sm:$0xff] }
 0x1c6   :  { %2676 = vst.msk [vmem:[#allocation2 + $0x948] sm:$0xff] %vm2390_vm2, %v2382_v20  ;;  %v7694_v20 = vunpack.i.l.bf16 %v9978_v13 }
 0x1c7   :  { %v2173_v54 = vmax.f32 %v1228_v48, %v1917_v51  ;;  %v2287_v62 = vmax.f32 %v1570_v49, %v2031_v52  ;;  %v1857_v0 = vpop.f32.mrf.mxu2  ;;  %v7684_v48 = vunpack.i.l.bf16 %v9995_v32  ;;  %v4691_v51 = vsel %vm4686_vm3, %v4626_v42, %v7634_v36 }
 0x1c8   :  { %v2742_v5 = vld [vmem:[#allocation2 + $0x1e8] sm:$0xff]  ;;  %v1858_v35 = vadd.f32 %v10200_v15, %v1857_v0  ;;  %v7689_v52 = vunpack.i.l.bf16 %v10052_v24 }
 0x1c9   :  { %2467 = vst.msk [vmem:[#allocation2 + $0x1f0] sm:$0xff] %vm2390_vm2, %v2173_v54  ;;  %v7826_v27 = vpack.i.bf16 %v2742_v5, %v2740_v58  ;;  %v2863_v54 = vld [vmem:[#allocation2 + $0x5e8] sm:$0xff]  ;;  %v4627_v58 = vsel %vm2390_vm2, %v8837_v57, %v7615_v39  ;;  %v7635_v5 = vunpack.i.h.bf16 %v9968_v63 }
 0x1ca   :  { %2581 = vst.msk [vmem:[#allocation2 + $0x5f0] sm:$0xff] %vm2390_vm2, %v2287_v62  ;;  %v1230_v7 = vpop.f32.mrf.mxu0  ;;  %v1572_v12 = vpop.f32.mrf.mxu1  ;;  %v2127_v43 = vmul.f32 0.2, %v1858_v35 }
 0x1cb   :  { %v1231_v1 = vadd.f32 %v10200_v15, %v1230_v7  ;;  %v1573_v17 = vadd.f32 %v10200_v15, %v1572_v12  ;;  %7827 = vrot.lane.b32.xlu1 %v7826_v27, %s8951_s29  ;;  %v4756_v7 = vsel %vm4751_vm5, %v4691_v51, %v7684_v48  ;;  %v231_v48 = vld [vmem:[%s14040_s30 + $0x568] sm:$0xff] }
 0x1cc   :  { %v2383_v49 = vmax.f32 %v1858_v35, %v2127_v43 }
 0x1cd   :  { %v1918_v28 = vmul.f32 0.2, %v1231_v1  ;;  %v2032_v19 = vmul.f32 0.2, %v1573_v17  ;;  %7289 = vmatmul.msk.f32.gmra.mxu0 %vm320_vm1, %v114_v14  ;;  %7403 = vmatmul.msk.f32.gmra.mxu1 %vm320_vm1, %v228_v55 }
 0x1ce   :  { %2677 = vst.msk [vmem:[#allocation2 + $0x950] sm:$0xff] %vm2390_vm2, %v2383_v49 }
 0x1cf   :  { %v2174_v21 = vmax.f32 %v1231_v1, %v1918_v28  ;;  %v2288_v46 = vmax.f32 %v1573_v17, %v2032_v19  ;;  %v1860_v31 = vpop.f32.mrf.mxu2  ;;  %v230_v1 = vld [vmem:[%s14040_s30 + $0x560] sm:$0xff]  ;;  %v4821_v17 = vsel %vm4816_vm4, %v4756_v7, %v7689_v52 }
 0x1d0   :  { %v10209_v29 = vld [vmem:[#allocation2 + $0x1f0] sm:$0xff]  ;;  %v1861_v63 = vadd.f32 %v10200_v15, %v1860_v31 }
 0x1d1   :  { %2468 = vst.msk [vmem:[#allocation2 + $0x1f8] sm:$0xff] %vm2390_vm2, %v2174_v21  ;;  %v7831_v30 = vpack.i.bf16 %v10209_v29, %v2741_v37  ;;  %v4692_v21 = vsel %vm4686_vm3, %v4627_v58, %v7635_v5 }
 0x1d2   :  { %2582 = vst.msk [vmem:[#allocation2 + $0x5f8] sm:$0xff] %vm2390_vm2, %v2288_v46  ;;  %v1233_v9 = vpop.f32.mrf.mxu0  ;;  %v1575_v6 = vpop.f32.mrf.mxu1  ;;  %v2128_v0 = vmul.f32 0.2, %v1861_v63 }
 0x1d3   :  { %v1234_v40 = vadd.f32 %v10200_v15, %v1233_v9  ;;  %v1576_v37 = vadd.f32 %v10200_v15, %v1575_v6  ;;  %7832 = vrot.lane.b32.xlu2 %v7831_v30, %s14044_s24  ;;  %v7685_v9 = vunpack.i.h.bf16 %v9995_v32  ;;  %v7690_v6 = vunpack.i.h.bf16 %v10052_v24 }
 0x1d4   :  { %v2384_v41 = vmax.f32 %v1861_v63, %v2128_v0 }
 0x1d5   :  { %v1919_v45 = vmul.f32 0.2, %v1234_v40  ;;  %v2033_v47 = vmul.f32 0.2, %v1576_v37  ;;  %7290 = vmatmul.msk.f32.gmra.mxu0 %vm320_vm1, %v115_v34  ;;  %7404 = vmatmul.msk.f32.gmra.mxu1 %vm320_vm1, %v229_v33  ;;  %v10233_v62 = vpop.permute.xlu0 %7757  ;;  %v4886_v33 = vsel %vm4881_vm6, %v4821_v17, %v7694_v20  ;;  %v4757_v24 = vsel %vm4751_vm5, %v4692_v21, %v7685_v9 }
 0x1d6   :  { %v7759_v44 = vunpack.i.l.bf16 %v10233_v62  ;;  %v4822_v31 = vsel %vm4816_vm4, %v4757_v24, %v7690_v6  ;;  %2678 = vst.msk [vmem:[#allocation2 + $0x958] sm:$0xff] %vm2390_vm2, %v2384_v41  ;;  %v119_v41 = vld [vmem:[%s14040_s30 + $0x1e8] sm:$0xff] }
 0x1d7   :  { %v2175_v50 = vmax.f32 %v1234_v40, %v1919_v45  ;;  %v2289_v53 = vmax.f32 %v1576_v37, %v2033_v47  ;;  %v1863_v35 = vpop.f32.mrf.mxu2  ;;  %v117_v47 = vld [vmem:[%s14040_s30 + $0x1d8] sm:$0xff] }
 0x1d8   :  { %v4951_v37 = vsel %vm4946_vm7, %v4886_v33, %v7759_v44  ;;  %v1864_v49 = vadd.f32 %v10200_v15, %v1863_v35 }
 0x1d9   :  { %2469 = vst.msk [vmem:[#allocation2 + $0x200] sm:$0xff] %vm2390_vm2, %v2175_v50  ;;  %v2865_v27 = vld [vmem:[#allocation2 + $0x5f8] sm:$0xff]  ;;  %v7695_v50 = vunpack.i.h.bf16 %v9978_v13 }
 0x1da   :  { %2583 = vst.msk [vmem:[#allocation2 + $0x600] sm:$0xff] %vm2390_vm2, %v2289_v53  ;;  %v1236_v12 = vpop.f32.mrf.mxu0  ;;  %v1578_v14 = vpop.f32.mrf.mxu1  ;;  %v10241_v55 = vpack.i.bf16 %v2865_v27, %v2863_v54  ;;  %v2129_v54 = vmul.f32 0.2, %v1864_v49 }
 0x1db   :  { %v1237_v28 = vadd.f32 %v10200_v15, %v1236_v12  ;;  %v1579_v19 = vadd.f32 %v10200_v15, %v1578_v14 }
 0x1dc   :  { %7837 = vrot.lane.b32.xlu1 %v10241_v55, %s8948_s25  ;;  %v2385_v5 = vmax.f32 %v1864_v49, %v2129_v54 }
 0x1dd   :  { %v1920_v46 = vmul.f32 0.2, %v1237_v28  ;;  %v2034_v4 = vmul.f32 0.2, %v1579_v19  ;;  %7291 = vmatmul.msk.f32.gmra.mxu0 %vm320_vm1, %v116_v16  ;;  %7405 = vmatmul.msk.f32.gmra.mxu1 %vm320_vm1, %v230_v1  ;;  %v7768_v30 = vpop.permute.xlu1 %7767  ;;  %v2744_v1 = vld [vmem:[#allocation2 + $0x1f8] sm:$0xff] }
 0x1de   :  { %v7769_v34 = vunpack.i.l.bf16 %v7768_v30  ;;  %v7770_v53 = vunpack.i.h.bf16 %v7768_v30  ;;  %2679 = vst.msk [vmem:[#allocation2 + $0x960] sm:$0xff] %vm2390_vm2, %v2385_v5  ;;  %v234_v5 = vld [vmem:[%s14040_s30 + $0x580] sm:$0xff] }
 0x1df   :  { %v2176_v36 = vmax.f32 %v1237_v28, %v1920_v46  ;;  %v2290_v40 = vmax.f32 %v1579_v19, %v2034_v4  ;;  %v1866_v27 = vpop.f32.mrf.mxu2  ;;  %v118_v28 = vld [vmem:[%s14040_s30 + $0x1e0] sm:$0xff]  ;;  %v232_v19 = vld [vmem:[%s14040_s30 + $0x570] sm:$0xff] }
 0x1e0   :  { %v5016_v42 = vsel %vm5011_vm8, %v4951_v37, %v7769_v34  ;;  %v10265_v43 = vld [vmem:[#allocation2 + $0x200] sm:$0xff]  ;;  %v1867_v20 = vadd.f32 %v10200_v15, %v1866_v27 }
 0x1e1   :  { %2470 = vst.msk [vmem:[#allocation2 + $0x208] sm:$0xff] %vm2390_vm2, %v2176_v36  ;;  %5237 = vmatmul.f32.gmra.mxu2 %v5016_v42  ;;  %v7841_v32 = vpack.i.bf16 %v10265_v43, %v10209_v29  ;;  %v7760_v29 = vunpack.i.h.bf16 %v10233_v62  ;;  %v4887_v62 = vsel %vm4881_vm6, %v4822_v31, %v7695_v50  ;;  %v233_v42 = vld [vmem:[%s14040_s30 + $0x578] sm:$0xff] }
 0x1e2   :  { %2584 = vst.msk [vmem:[#allocation2 + $0x608] sm:$0xff] %vm2390_vm2, %v2290_v40  ;;  %v1239_v39 = vpop.f32.mrf.mxu0  ;;  %v1581_v45 = vpop.f32.mrf.mxu1  ;;  %v2130_v46 = vmul.f32 0.2, %v1867_v20 }
 0x1e3   :  { %v1240_v51 = vadd.f32 %v10200_v15, %v1239_v39  ;;  %v1582_v52 = vadd.f32 %v10200_v15, %v1581_v45  ;;  %7842 = vrot.lane.b32.xlu0 %v7841_v32, %s8950_s21  ;;  %v4952_v14 = vsel %vm4946_vm7, %v4887_v62, %v7760_v29  ;;  %v120_v62 = vld [vmem:[%s14040_s30 + $0x1f0] sm:$0xff] }
 0x1e4   :  { %v5017_v16 = vsel %vm5011_vm8, %v4952_v14, %v7770_v53  ;;  %v2386_v9 = vmax.f32 %v1867_v20, %v2130_v46 }
 0x1e5   :  { %v1921_v57 = vmul.f32 0.2, %v1240_v51  ;;  %v2035_v58 = vmul.f32 0.2, %v1582_v52  ;;  %7292 = vmatmul.msk.f32.gmra.mxu0 %vm320_vm1, %v117_v47  ;;  %7406 = vmatmul.msk.f32.gmra.mxu1 %vm320_vm1, %v231_v48 }
 0x1e6   :  { %2680 = vst.msk [vmem:[#allocation2 + $0x968] sm:$0xff] %vm2390_vm2, %v2386_v9 }
 0x1e7   :  { %v2177_v7 = vmax.f32 %v1240_v51, %v1921_v57  ;;  %v2291_v12 = vmax.f32 %v1582_v52, %v2035_v58  ;;  %v1869_v33 = vpop.f32.mrf.mxu2  ;;  %v7619_v51 = vunpack.i.l.bf16 %v9917_v25  ;;  %v10326_v52 = vpop.permute.xlu0 %7762 }
 0x1e8   :  { %v2746_v13 = vld [vmem:[#allocation2 + $0x208] sm:$0xff]  ;;  %v1870_v32 = vadd.f32 %v10200_v15, %v1869_v33 }
 0x1e9   :  { %2471 = vst.msk [vmem:[#allocation2 + $0x210] sm:$0xff] %vm2390_vm2, %v2177_v7  ;;  %5240 = vmatmul.f32.gmra.mxu2 %v5017_v16  ;;  %v7846_v63 = vpack.i.bf16 %v2746_v13, %v2744_v1  ;;  %v2867_v29 = vld [vmem:[#allocation2 + $0x608] sm:$0xff]  ;;  %v7639_v7 = vunpack.i.l.bf16 %v9832_v26  ;;  %v8838_v16 = vld [vmem:[#allocation2 + $0x60] sm:$0xff] }
 0x1ea   :  { %2585 = vst.msk [vmem:[#allocation2 + $0x610] sm:$0xff] %vm2390_vm2, %v2291_v12  ;;  %v1242_v17 = vpop.f32.mrf.mxu0  ;;  %v1584_v44 = vpop.f32.mrf.mxu1  ;;  %v4628_v1 = vsel %vm2390_vm2, %v8838_v16, %v7619_v51  ;;  %v236_v16 = vld [vmem:[%s14040_s30 + $0x590] sm:$0xff] }
 0x1eb   :  { %v1243_v0 = vadd.f32 %v10200_v15, %v1242_v17  ;;  %v1585_v21 = vadd.f32 %v10200_v15, %v1584_v44  ;;  %7847 = vrot.lane.b32.xlu1 %v7846_v63, %s8951_s29 }
 0x1ed   :  { %v1922_v4 = vmul.f32 0.2, %v1243_v0  ;;  %v2036_v30 = vmul.f32 0.2, %v1585_v21  ;;  %7293 = vmatmul.msk.f32.gmra.mxu0 %vm320_vm1, %v118_v28  ;;  %7407 = vmatmul.msk.f32.gmra.mxu1 %vm320_vm1, %v232_v19  ;;  %v7620_v28 = vunpack.i.h.bf16 %v9917_v25  ;;  %v7704_v19 = vunpack.i.l.bf16 %v10020_v61 }
 0x1ef   :  { %v2178_v6 = vmax.f32 %v1243_v0, %v1922_v4  ;;  %v2292_v34 = vmax.f32 %v1585_v21, %v2036_v30  ;;  %v1872_v53 = vpop.f32.mrf.mxu2  ;;  %v4693_v0 = vsel %vm4686_vm3, %v4628_v1, %v7639_v7  ;;  %v7709_v21 = vunpack.i.l.bf16 %v10110_v8 }
 0x1f0   :  { %v10306_v35 = vld [vmem:[#allocation2 + $0x210] sm:$0xff]  ;;  %v1873_v27 = vadd.f32 %v10200_v15, %v1872_v53 }
 0x1f1   :  { %2472 = vst.msk [vmem:[#allocation2 + $0x218] sm:$0xff] %vm2390_vm2, %v2178_v6  ;;  %v7851_v36 = vpack.i.bf16 %v10306_v35, %v10265_v43  ;;  %v2131_v43 = vmul.f32 0.2, %v1870_v32  ;;  %v7640_v6 = vunpack.i.h.bf16 %v9832_v26  ;;  %v235_v26 = vld [vmem:[%s14040_s30 + $0x588] sm:$0xff] }
 0x1f2   :  { %2586 = vst.msk [vmem:[#allocation2 + $0x618] sm:$0xff] %vm2390_vm2, %v2292_v34  ;;  %v1245_v40 = vpop.f32.mrf.mxu0  ;;  %v1587_v37 = vpop.f32.mrf.mxu1  ;;  %v2132_v13 = vmul.f32 0.2, %v1873_v27  ;;  %v8839_v34 = vld [vmem:[#allocation2 + $0x70] sm:$0xff] }
 0x1f3   :  { %v1246_v24 = vadd.f32 %v10200_v15, %v1245_v40  ;;  %v1588_v39 = vadd.f32 %v10200_v15, %v1587_v37  ;;  %7852 = vrot.lane.b32.xlu2 %v7851_v36, %s14044_s24  ;;  %v2387_v48 = vmax.f32 %v1870_v32, %v2131_v43  ;;  %v4629_v33 = vsel %vm2390_vm2, %v8839_v34, %v7620_v28  ;;  %v123_v34 = vld [vmem:[%s14040_s30 + $0x208] sm:$0xff] }
 0x1f4   :  { %v2388_v20 = vmax.f32 %v1873_v27, %v2132_v13  ;;  %v4758_v36 = vsel %vm4751_vm5, %v4693_v0, %v7704_v19  ;;  %v7714_v43 = vunpack.i.l.bf16 %v9999_v38  ;;  %v7715_v28 = vunpack.i.h.bf16 %v9999_v38 }
 0x1f5   :  { %v1923_v45 = vmul.f32 0.2, %v1246_v24  ;;  %v2037_v47 = vmul.f32 0.2, %v1588_v39  ;;  %7294 = vmatmul.msk.f32.gmra.mxu0 %vm320_vm1, %v119_v41  ;;  %7408 = vmatmul.msk.f32.gmra.mxu1 %vm320_vm1, %v233_v42  ;;  %2681 = vst.msk [vmem:[#allocation2 + $0x970] sm:$0xff] %vm2390_vm2, %v2387_v48  ;;  %v7778_v30 = vpop.permute.xlu0 %7777  ;;  %v121_v41 = vld [vmem:[%s14040_s30 + $0x1f8] sm:$0xff]  ;;  %v4823_v42 = vsel %vm4816_vm4, %v4758_v36, %v7709_v21 }
 0x1f6   :  { %2682 = vst.msk [vmem:[#allocation2 + $0x978] sm:$0xff] %vm2390_vm2, %v2388_v20  ;;  %v7780_v13 = vunpack.i.h.bf16 %v7778_v30 }
 0x1f7   :  { %v2179_v49 = vmax.f32 %v1246_v24, %v1923_v45  ;;  %v2293_v31 = vmax.f32 %v1588_v39, %v2037_v47  ;;  %v1875_v39 = vpop.f32.mrf.mxu2  ;;  %v4694_v47 = vsel %vm4686_vm3, %v4629_v33, %v7640_v6  ;;  %v237_v33 = vld [vmem:[%s14040_s30 + $0x598] sm:$0xff] }
 0x1f8   :  { %v1876_v45 = vadd.f32 %v10200_v15, %v1875_v39  ;;  %v238_v39 = vld [vmem:[%s14040_s30 + $0x5a0] sm:$0xff] }
 0x1f9   :  { %2473 = vst.msk [vmem:[#allocation2 + $0x220] sm:$0xff] %vm2390_vm2, %v2179_v49  ;;  %v2869_v50 = vld [vmem:[#allocation2 + $0x618] sm:$0xff] }
 0x1fa   :  { %2587 = vst.msk [vmem:[#allocation2 + $0x620] sm:$0xff] %vm2390_vm2, %v2293_v31  ;;  %v1248_v54 = vpop.f32.mrf.mxu0  ;;  %v1590_v57 = vpop.f32.mrf.mxu1  ;;  %v10331_v58 = vpack.i.bf16 %v2869_v50, %v2867_v29  ;;  %v7705_v29 = vunpack.i.h.bf16 %v10020_v61  ;;  %v4888_v50 = vsel %vm4881_vm6, %v4823_v42, %v7714_v43  ;;  %v2133_v53 = vmul.f32 0.2, %v1876_v45 }
 0x1fb   :  { %v1249_v12 = vadd.f32 %v10200_v15, %v1248_v54  ;;  %v1591_v14 = vadd.f32 %v10200_v15, %v1590_v57  ;;  %v7710_v54 = vunpack.i.h.bf16 %v10110_v8  ;;  %v122_v8 = vld [vmem:[%s14040_s30 + $0x200] sm:$0xff] }
 0x1fc   :  { %7857 = vrot.lane.b32.xlu2 %v10331_v58, %s8948_s25  ;;  %v2389_v7 = vmax.f32 %v1876_v45, %v2133_v53 }
 0x1fd   :  { %v1924_v63 = vmul.f32 0.2, %v1249_v12  ;;  %v2038_v17 = vmul.f32 0.2, %v1591_v14  ;;  %7295 = vmatmul.msk.f32.gmra.mxu0 %vm320_vm1, %v120_v62  ;;  %7409 = vmatmul.msk.f32.gmra.mxu1 %vm320_vm1, %v234_v5  ;;  %v10348_v44 = vpop.permute.xlu1 %7782 }
 0x1fe   :  { %2683 = vst.msk [vmem:[#allocation2 + $0x980] sm:$0xff] %vm2390_vm2, %v2389_v7 }
 0x1ff   :  { %v2180_v46 = vmax.f32 %v1249_v12, %v1924_v63  ;;  %v2294_v4 = vmax.f32 %v1591_v14, %v2038_v17  ;;  %v4759_v12 = vsel %vm4751_vm5, %v4694_v47, %v7705_v29 }
 0x200   :  { %v10354_v9 = vld [vmem:[#allocation2 + $0x220] sm:$0xff]  ;;  %v4824_v1 = vsel %vm4816_vm4, %v4759_v12, %v7710_v54 }
 0x201   :  { %2474 = vst.msk [vmem:[#allocation2 + $0x228] sm:$0xff] %vm2390_vm2, %v2180_v46  ;;  %v7861_v25 = vpack.i.bf16 %v10354_v9, %v10306_v35  ;;  %v7779_v35 = vunpack.i.l.bf16 %v7778_v30  ;;  %v4889_v21 = vsel %vm4881_vm6, %v4824_v1, %v7715_v28  ;;  %v240_v28 = vld [vmem:[%s14040_s30 + $0x5b0] sm:$0xff] }
 0x202   :  { %2588 = vst.msk [vmem:[#allocation2 + $0x638] sm:$0xff] %vm2390_vm2, %v2294_v4  ;;  %v1251_v40 = vpop.f32.mrf.mxu0  ;;  %v1593_v37 = vpop.f32.mrf.mxu1  ;;  %v4954_v30 = vsel %vm4946_vm7, %v4889_v21, %v7780_v13 }
 0x203   :  { %v1252_v32 = vadd.f32 %v10200_v15, %v1251_v40  ;;  %v1594_v24 = vadd.f32 %v10200_v15, %v1593_v37  ;;  %7862 = vrot.lane.b32.xlu0 %v7861_v25, %s8950_s21  ;;  %v4953_v5 = vsel %vm4946_vm7, %v4888_v50, %v7779_v35 }
 0x205   :  { %v1925_v48 = vmul.f32 0.2, %v1252_v32  ;;  %v2039_v49 = vmul.f32 0.2, %v1594_v24  ;;  %7296 = vmatmul.msk.f32.gmra.mxu0 %vm320_vm1, %v121_v41  ;;  %7410 = vmatmul.msk.f32.gmra.mxu1 %vm320_vm1, %v235_v26  ;;  %v7788_v31 = vpop.permute.xlu1 %7787 }
 0x206   :  { %v7789_v51 = vunpack.i.l.bf16 %v7788_v31  ;;  %v7790_v19 = vunpack.i.h.bf16 %v7788_v31 }
 0x207   :  { %v2181_v57 = vmax.f32 %v1252_v32, %v1925_v48  ;;  %v2295_v62 = vmax.f32 %v1594_v24, %v2039_v49  ;;  %v124_v24 = vld [vmem:[%s14040_s30 + $0x210] sm:$0xff]  ;;  %v2752_v49 = vld [vmem:[#allocation2 + $0x240] sm:$0xff] }
 0x208   :  { %v5018_v27 = vsel %vm5011_vm8, %v4953_v5, %v7789_v51  ;;  %v5019_v6 = vsel %vm5011_vm8, %v4954_v30, %v7790_v19 }
 0x209   :  { %2475 = vst.msk [vmem:[#allocation2 + $0x230] sm:$0xff] %vm2390_vm2, %v2181_v57  ;;  %5243 = vmatmul.f32.gmra.mxu2 %v5018_v27  ;;  %v125_v57 = vld [vmem:[%s14040_s30 + $0x218] sm:$0xff] }
 0x20a   :  { %2589 = vst.msk [vmem:[#allocation2 + $0x640] sm:$0xff] %vm2390_vm2, %v2295_v62  ;;  %v1254_v61 = vpop.f32.mrf.mxu0  ;;  %v1596_v14 = vpop.f32.mrf.mxu1  ;;  %v239_v62 = vld [vmem:[%s14040_s30 + $0x5a8] sm:$0xff] }
 0x20b   :  { %v1255_v63 = vadd.f32 %v10200_v15, %v1254_v61  ;;  %v1597_v17 = vadd.f32 %v10200_v15, %v1596_v14 }
 0x20d   :  { %v1926_v20 = vmul.f32 0.2, %v1255_v63  ;;  %v2040_v0 = vmul.f32 0.2, %v1597_v17  ;;  %7297 = vmatmul.msk.f32.gmra.mxu0 %vm320_vm1, %v122_v8  ;;  %7411 = vmatmul.msk.f32.gmra.mxu1 %vm320_vm1, %v236_v16 }
 0x20f   :  { %v2182_v46 = vmax.f32 %v1255_v63, %v1926_v20  ;;  %v2296_v4 = vmax.f32 %v1597_v17, %v2040_v0  ;;  %v126_v17 = vld [vmem:[%s14040_s30 + $0x220] sm:$0xff] }
 0x211   :  { %2476 = vst.msk [vmem:[#allocation2 + $0x248] sm:$0xff] %vm2390_vm2, %v2182_v46  ;;  %5246 = vmatmul.f32.gmra.mxu2 %v5019_v6  ;;  %v2750_v46 = vld [vmem:[#allocation2 + $0x228] sm:$0xff] }
 0x212   :  { %2590 = vst.msk [vmem:[#allocation2 + $0x648] sm:$0xff] %vm2390_vm2, %v2296_v4  ;;  %v1257_v38 = vpop.f32.mrf.mxu0  ;;  %v1599_v25 = vpop.f32.mrf.mxu1  ;;  %v2751_v4 = vld [vmem:[#allocation2 + $0x230] sm:$0xff] }
 0x213   :  { %v1258_v36 = vadd.f32 %v10200_v15, %v1257_v38  ;;  %v1600_v40 = vadd.f32 %v10200_v15, %v1599_v25  ;;  %v2748_v38 = vld [vmem:[#allocation2 + $0x218] sm:$0xff] }
 0x214   :  { %v7881_v25 = vpack.i.bf16 %v2750_v46, %v2748_v38 }
 0x215   :  { %v1927_v37 = vmul.f32 0.2, %v1258_v36  ;;  %v2041_v41 = vmul.f32 0.2, %v1600_v40  ;;  %7298 = vmatmul.msk.f32.gmra.mxu0 %vm320_vm1, %v123_v34  ;;  %7412 = vmatmul.msk.f32.gmra.mxu1 %vm320_vm1, %v237_v33  ;;  %v7886_v34 = vpack.i.bf16 %v2751_v4, %v10354_v9 }
 0x217   :  { %v2183_v26 = vmax.f32 %v1258_v36, %v1927_v37  ;;  %v2297_v42 = vmax.f32 %v1600_v40, %v2041_v41  ;;  %v127_v40 = vld [vmem:[%s14040_s30 + $0x228] sm:$0xff]  ;;  %v241_v37 = vld [vmem:[%s14040_s30 + $0x5b8] sm:$0xff] }
 0x218   :  { %v2753_v8 = vld [vmem:[#allocation2 + $0x248] sm:$0xff] }
 0x219   :  { %2477 = vst.msk [vmem:[#allocation2 + $0x250] sm:$0xff] %vm2390_vm2, %v2183_v26 }
 0x21a   :  { %2591 = vst.msk [vmem:[#allocation2 + $0x650] sm:$0xff] %vm2390_vm2, %v2297_v42  ;;  %v1260_v35 = vpop.f32.mrf.mxu0  ;;  %v1602_v32 = vpop.f32.mrf.mxu1 }
 0x21b   :  { %v1261_v43 = vadd.f32 %v10200_v15, %v1260_v35  ;;  %v1603_v45 = vadd.f32 %v10200_v15, %v1602_v32 }
 0x21d   :  { %v1928_v47 = vmul.f32 0.2, %v1261_v43  ;;  %v2042_v48 = vmul.f32 0.2, %v1603_v45  ;;  %7299 = vmatmul.msk.f32.gmra.mxu0 %vm320_vm1, %v124_v24  ;;  %7413 = vmatmul.msk.f32.gmra.mxu1 %vm320_vm1, %v238_v39 }
 0x21f   :  { %v2184_v31 = vmax.f32 %v1261_v43, %v1928_v47  ;;  %v2298_v29 = vmax.f32 %v1603_v45, %v2042_v48  ;;  %v128_v47 = vld [vmem:[%s14040_s30 + $0x230] sm:$0xff]  ;;  %v242_v48 = vld [vmem:[%s14040_s30 + $0x5c0] sm:$0xff] }
 0x220   :  { %v10427_v51 = vld [vmem:[#allocation2 + $0x250] sm:$0xff] }
 0x221   :  { %2478 = vst.msk [vmem:[#allocation2 + $0x258] sm:$0xff] %vm2390_vm2, %v2184_v31  ;;  %v7866_v50 = vpack.i.bf16 %v10427_v51, %v2752_v49 }
 0x222   :  { %2592 = vst.msk [vmem:[#allocation2 + $0x658] sm:$0xff] %vm2390_vm2, %v2298_v29  ;;  %v1263_v53 = vpop.f32.mrf.mxu0  ;;  %v1605_v54 = vpop.f32.mrf.mxu1 }
 0x223   :  { %v1264_v5 = vadd.f32 %v10200_v15, %v1263_v53  ;;  %v1606_v27 = vadd.f32 %v10200_v15, %v1605_v54  ;;  %7867 = vrot.lane.b32.xlu0 %v7866_v50, %s8953_s18 }
 0x225   :  { %v1929_v7 = vmul.f32 0.2, %v1264_v5  ;;  %v2043_v12 = vmul.f32 0.2, %v1606_v27  ;;  %7300 = vmatmul.msk.f32.gmra.mxu0 %vm320_vm1, %v125_v57  ;;  %7414 = vmatmul.msk.f32.gmra.mxu1 %vm320_vm1, %v239_v62 }
 0x227   :  { %v2185_v61 = vmax.f32 %v1264_v5, %v1929_v7  ;;  %v2299_v14 = vmax.f32 %v1606_v27, %v2043_v12  ;;  %v129_v27 = vld [vmem:[%s14040_s30 + $0x238] sm:$0xff]  ;;  %v243_v7 = vld [vmem:[%s14040_s30 + $0x5c8] sm:$0xff] }
 0x228   :  { %v2755_v16 = vld [vmem:[#allocation2 + $0x258] sm:$0xff] }
 0x229   :  { %2479 = vst.msk [vmem:[#allocation2 + $0x260] sm:$0xff] %vm2390_vm2, %v2185_v61  ;;  %v7876_v1 = vpack.i.bf16 %v2755_v16, %v2753_v8 }
 0x22a   :  { %2593 = vst.msk [vmem:[#allocation2 + $0x660] sm:$0xff] %vm2390_vm2, %v2299_v14  ;;  %v1266_v13 = vpop.f32.mrf.mxu0  ;;  %v1608_v63 = vpop.f32.mrf.mxu1 }
 0x22b   :  { %v1267_v19 = vadd.f32 %v10200_v15, %v1266_v13  ;;  %v1609_v20 = vadd.f32 %v10200_v15, %v1608_v63  ;;  %7877 = vrot.lane.b32.xlu1 %v7876_v1, %s8954_s27  ;;  %7872 = vrot.lane.b32.xlu2 %v7876_v1, %s8948_s25 }
 0x22d   :  { %v1930_v0 = vmul.f32 0.2, %v1267_v19  ;;  %v2044_v21 = vmul.f32 0.2, %v1609_v20  ;;  %7301 = vmatmul.msk.f32.gmra.mxu0 %vm320_vm1, %v126_v17  ;;  %7415 = vmatmul.msk.f32.gmra.mxu1 %vm320_vm1, %v240_v28 }
 0x22f   :  { %v2186_v30 = vmax.f32 %v1267_v19, %v1930_v0  ;;  %v2300_v6 = vmax.f32 %v1609_v20, %v2044_v21  ;;  %v130_v20 = vld [vmem:[%s14040_s30 + $0x240] sm:$0xff]  ;;  %v244_v0 = vld [vmem:[%s14040_s30 + $0x5d0] sm:$0xff] }
 0x230   :  { %v2756_v35 = vld [vmem:[#allocation2 + $0x260] sm:$0xff] }
 0x231   :  { %2480 = vst.msk [vmem:[#allocation2 + $0x268] sm:$0xff] %vm2390_vm2, %v2186_v30  ;;  %v7891_v39 = vpack.i.bf16 %v2756_v35, %v10427_v51 }
 0x232   :  { %2594 = vst.msk [vmem:[#allocation2 + $0x668] sm:$0xff] %vm2390_vm2, %v2300_v6  ;;  %v1269_v33 = vpop.f32.mrf.mxu0  ;;  %v1611_v36 = vpop.f32.mrf.mxu1 }
 0x233   :  { %v1270_v41 = vadd.f32 %v10200_v15, %v1269_v33  ;;  %v1612_v26 = vadd.f32 %v10200_v15, %v1611_v36  ;;  %7882 = vrot.lane.b32.xlu1 %v7881_v25, %s8951_s29  ;;  %7887 = vrot.lane.b32.xlu2 %v7886_v34, %s14044_s24  ;;  %v131_v33 = vld [vmem:[%s14040_s30 + $0x248] sm:$0xff]  ;;  %v245_v36 = vld [vmem:[%s14040_s30 + $0x5d8] sm:$0xff] }
 0x235   :  { %v1931_v9 = vmul.f32 0.2, %v1270_v41  ;;  %v2045_v42 = vmul.f32 0.2, %v1612_v26  ;;  %7302 = vmatmul.msk.f32.gmra.mxu0 %vm320_vm1, %v127_v40  ;;  %7416 = vmatmul.msk.f32.gmra.mxu1 %vm320_vm1, %v241_v37 }
 0x237   :  { %v2187_v32 = vmax.f32 %v1270_v41, %v1931_v9  ;;  %v2301_v24 = vmax.f32 %v1612_v26, %v2045_v42 }
 0x238   :  { %v2757_v13 = vld [vmem:[#allocation2 + $0x268] sm:$0xff] }
 0x239   :  { %2481 = vst.msk [vmem:[#allocation2 + $0x270] sm:$0xff] %vm2390_vm2, %v2187_v32 }
 0x23a   :  { %2595 = vst.msk [vmem:[#allocation2 + $0x670] sm:$0xff] %vm2390_vm2, %v2301_v24  ;;  %v1272_v43 = vpop.f32.mrf.mxu0  ;;  %v1614_v45 = vpop.f32.mrf.mxu1  ;;  %v132_v24 = vld [vmem:[%s14040_s30 + $0x250] sm:$0xff] }
 0x23b   :  { %v1273_v49 = vadd.f32 %v10200_v15, %v1272_v43  ;;  %v1615_v31 = vadd.f32 %v10200_v15, %v1614_v45  ;;  %7892 = vrot.lane.b32.xlu2 %v7891_v39, %s14009_s1  ;;  %v246_v39 = vld [vmem:[%s14040_s30 + $0x5e0] sm:$0xff] }
 0x23d   :  { %v1932_v29 = vmul.f32 0.2, %v1273_v49  ;;  %v2046_v51 = vmul.f32 0.2, %v1615_v31  ;;  %7303 = vmatmul.msk.f32.gmra.mxu0 %vm320_vm1, %v128_v47  ;;  %7417 = vmatmul.msk.f32.gmra.mxu1 %vm320_vm1, %v242_v48 }
 0x23f   :  { %v2188_v50 = vmax.f32 %v1273_v49, %v1932_v29  ;;  %v2302_v53 = vmax.f32 %v1615_v31, %v2046_v51 }
 0x240   :  { %v10486_v54 = vld [vmem:[#allocation2 + $0x270] sm:$0xff] }
 0x241   :  { %2482 = vst.msk [vmem:[#allocation2 + $0x278] sm:$0xff] %vm2390_vm2, %v2188_v50  ;;  %v7896_v57 = vpack.i.bf16 %v10486_v54, %v2756_v35 }
 0x242   :  { %2596 = vst.msk [vmem:[#allocation2 + $0x678] sm:$0xff] %vm2390_vm2, %v2302_v53  ;;  %v1275_v62 = vpop.f32.mrf.mxu0  ;;  %v1617_v5 = vpop.f32.mrf.mxu1 }
 0x243   :  { %v1276_v12 = vadd.f32 %v10200_v15, %v1275_v62  ;;  %v1618_v61 = vadd.f32 %v10200_v15, %v1617_v5  ;;  %7897 = vrot.lane.b32.xlu0 %v7896_v57, %s8953_s18  ;;  %v133_v62 = vld [vmem:[%s14040_s30 + $0x258] sm:$0xff]  ;;  %v247_v5 = vld [vmem:[%s14040_s30 + $0x5e8] sm:$0xff] }
 0x245   :  { %v1933_v14 = vmul.f32 0.2, %v1276_v12  ;;  %v2047_v8 = vmul.f32 0.2, %v1618_v61  ;;  %7304 = vmatmul.msk.f32.gmra.mxu0 %vm320_vm1, %v129_v27  ;;  %7418 = vmatmul.msk.f32.gmra.mxu1 %vm320_vm1, %v243_v7 }
 0x247   :  { %v2189_v16 = vmax.f32 %v1276_v12, %v1933_v14  ;;  %v2303_v1 = vmax.f32 %v1618_v61, %v2047_v8 }
 0x248   :  { %v2759_v63 = vld [vmem:[#allocation2 + $0x278] sm:$0xff] }
 0x249   :  { %2483 = vst.msk [vmem:[#allocation2 + $0x280] sm:$0xff] %vm2390_vm2, %v2189_v16  ;;  %v7906_v17 = vpack.i.bf16 %v2759_v63, %v2757_v13 }
 0x24a   :  { %2597 = vst.msk [vmem:[#allocation2 + $0x680] sm:$0xff] %vm2390_vm2, %v2303_v1  ;;  %v1278_v28 = vpop.f32.mrf.mxu0  ;;  %v1620_v19 = vpop.f32.mrf.mxu1 }
 0x24b   :  { %v1279_v21 = vadd.f32 %v10200_v15, %v1278_v28  ;;  %v1621_v46 = vadd.f32 %v10200_v15, %v1620_v19  ;;  %7907 = vrot.lane.b32.xlu1 %v7906_v17, %s8954_s27  ;;  %7902 = vrot.lane.b32.xlu0 %v7906_v17, %s8948_s25  ;;  %v134_v28 = vld [vmem:[%s14040_s30 + $0x260] sm:$0xff]  ;;  %v248_v19 = vld [vmem:[%s14040_s30 + $0x5f0] sm:$0xff] }
 0x24d   :  { %v1934_v4 = vmul.f32 0.2, %v1279_v21  ;;  %v2048_v30 = vmul.f32 0.2, %v1621_v46  ;;  %7305 = vmatmul.msk.f32.gmra.mxu0 %vm320_vm1, %v130_v20  ;;  %7419 = vmatmul.msk.f32.gmra.mxu1 %vm320_vm1, %v244_v0 }
 0x24f   :  { %v2190_v6 = vmax.f32 %v1279_v21, %v1934_v4  ;;  %v2304_v38 = vmax.f32 %v1621_v46, %v2048_v30  ;;  %v10570_v21 = vpop.permute.xlu2 %7747  ;;  %v10574_v30 = vpop.permute.xlu0 %7802 }
 0x250   :  { %v10540_v29 = vld [vmem:[#allocation2 + $0x280] sm:$0xff] }
 0x251   :  { %2484 = vst.msk [vmem:[#allocation2 + $0x288] sm:$0xff] %vm2390_vm2, %v2190_v6 }
 0x252   :  { %2598 = vst.msk [vmem:[#allocation2 + $0x688] sm:$0xff] %vm2390_vm2, %v2304_v38  ;;  %v1281_v25 = vpop.f32.mrf.mxu0  ;;  %v1623_v34 = vpop.f32.mrf.mxu1 }
 0x253   :  { %v1282_v40 = vadd.f32 %v10200_v15, %v1281_v25  ;;  %v1624_v37 = vadd.f32 %v10200_v15, %v1623_v34 }
 0x255   :  { %v1935_v41 = vmul.f32 0.2, %v1282_v40  ;;  %v2049_v26 = vmul.f32 0.2, %v1624_v37  ;;  %7306 = vmatmul.msk.f32.gmra.mxu0 %vm320_vm1, %v131_v33  ;;  %7420 = vmatmul.msk.f32.gmra.mxu1 %vm320_vm1, %v245_v36  ;;  %v135_v33 = vld [vmem:[%s14040_s30 + $0x268] sm:$0xff]  ;;  %v249_v36 = vld [vmem:[%s14040_s30 + $0x5f8] sm:$0xff] }
 0x257   :  { %v2191_v9 = vmax.f32 %v1282_v40, %v1935_v41  ;;  %v2305_v42 = vmax.f32 %v1624_v37, %v2049_v26 }
 0x258   :  { %v2761_v16 = vld [vmem:[#allocation2 + $0x288] sm:$0xff] }
 0x259   :  { %2485 = vst.msk [vmem:[#allocation2 + $0x290] sm:$0xff] %vm2390_vm2, %v2191_v9  ;;  %v10589_v9 = vpop.permute.xlu0 %7817 }
 0x25a   :  { %2599 = vst.msk [vmem:[#allocation2 + $0x690] sm:$0xff] %vm2390_vm2, %v2305_v42  ;;  %v1284_v35 = vpop.f32.mrf.mxu0  ;;  %v1626_v32 = vpop.f32.mrf.mxu1 }
 0x25b   :  { %v1285_v43 = vadd.f32 %v10200_v15, %v1284_v35  ;;  %v1627_v45 = vadd.f32 %v10200_v15, %v1626_v32  ;;  %14045 = vst [vmem:[#allocation9_spill] sm:$0xff] %v10589_v9  ;;  %v10591_v42 = vpop.permute.xlu2 %7752 }
 0x25d   :  { %v1936_v47 = vmul.f32 0.2, %v1285_v43  ;;  %v2050_v48 = vmul.f32 0.2, %v1627_v45  ;;  %7307 = vmatmul.msk.f32.gmra.mxu0 %vm320_vm1, %v132_v24  ;;  %7421 = vmatmul.msk.f32.gmra.mxu1 %vm320_vm1, %v246_v39 }
 0x25f   :  { %v2192_v49 = vmax.f32 %v1285_v43, %v1936_v47  ;;  %v2306_v31 = vmax.f32 %v1627_v45, %v2050_v48  ;;  %v136_v43 = vld [vmem:[%s14040_s30 + $0x270] sm:$0xff]  ;;  %v250_v45 = vld [vmem:[%s14040_s30 + $0x600] sm:$0xff] }
 0x260   :  { %v10542_v51 = vld [vmem:[#allocation2 + $0x290] sm:$0xff] }
 0x261   :  { %2486 = vst.msk [vmem:[#allocation2 + $0x298] sm:$0xff] %vm2390_vm2, %v2192_v49  ;;  %v7911_v50 = vpack.i.bf16 %v10542_v51, %v10540_v29  ;;  %v10603_v49 = vpop.permute.xlu1 %7807 }
 0x262   :  { %2600 = vst.msk [vmem:[#allocation2 + $0x698] sm:$0xff] %vm2390_vm2, %v2306_v31  ;;  %v1287_v53 = vpop.f32.mrf.mxu0  ;;  %v1629_v57 = vpop.f32.mrf.mxu1 }
 0x263   :  { %v1288_v27 = vadd.f32 %v10200_v15, %v1287_v53  ;;  %v1630_v7 = vadd.f32 %v10200_v15, %v1629_v57  ;;  %7912 = vrot.lane.b32.xlu0 %v7911_v50, %s8953_s18  ;;  %v10607_v53 = vpop.permute.xlu2 %7772 }
 0x265   :  { %v1937_v12 = vmul.f32 0.2, %v1288_v27  ;;  %v2051_v61 = vmul.f32 0.2, %v1630_v7  ;;  %7308 = vmatmul.msk.f32.gmra.mxu0 %vm320_vm1, %v133_v62  ;;  %7422 = vmatmul.msk.f32.gmra.mxu1 %vm320_vm1, %v247_v5  ;;  %v10609_v5 = vpop.permute.xlu0 %7822 }
 0x267   :  { %v2193_v14 = vmax.f32 %v1288_v27, %v1937_v12  ;;  %v2307_v8 = vmax.f32 %v1630_v7, %v2051_v61 }
 0x268   :  { %v2763_v1 = vld [vmem:[#allocation2 + $0x298] sm:$0xff] }
 0x269   :  { %2487 = vst.msk [vmem:[#allocation2 + $0x2a0] sm:$0xff] %vm2390_vm2, %v2193_v14  ;;  %v7916_v13 = vpack.i.bf16 %v2763_v1, %v2761_v16  ;;  %v251_v16 = vld [vmem:[%s14040_s30 + $0x608] sm:$0xff] }
 0x26a   :  { %2601 = vst.msk [vmem:[#allocation2 + $0x6a0] sm:$0xff] %vm2390_vm2, %v2307_v8  ;;  %v1290_v63 = vpop.f32.mrf.mxu0  ;;  %v1632_v17 = vpop.f32.mrf.mxu1  ;;  %v137_v8 = vld [vmem:[%s14040_s30 + $0x278] sm:$0xff] }
 0x26b   :  { %v1291_v20 = vadd.f32 %v10200_v15, %v1290_v63  ;;  %v1633_v0 = vadd.f32 %v10200_v15, %v1632_v17  ;;  %7917 = vrot.lane.b32.xlu1 %v7916_v13, %s8948_s25  ;;  %v10628_v63 = vpop.permute.xlu1 %7827 }
 0x26d   :  { %v1938_v46 = vmul.f32 0.2, %v1291_v20  ;;  %v2052_v4 = vmul.f32 0.2, %v1633_v0  ;;  %7309 = vmatmul.msk.f32.gmra.mxu0 %vm320_vm1, %v134_v28  ;;  %7423 = vmatmul.msk.f32.gmra.mxu1 %vm320_vm1, %v248_v19  ;;  %v10632_v19 = vpop.permute.xlu2 %7792 }
 0x26f   :  { %v2194_v6 = vmax.f32 %v1291_v20, %v1938_v46  ;;  %v2308_v38 = vmax.f32 %v1633_v0, %v2052_v4  ;;  %v10634_v46 = vpop.permute.xlu0 %7842 }
 0x270   :  { %v10611_v27 = vld [vmem:[#allocation2 + $0x2a0] sm:$0xff] }
 0x271   :  { %2488 = vst.msk [vmem:[#allocation2 + $0x2a8] sm:$0xff] %vm2390_vm2, %v2194_v6 }
 0x272   :  { %2602 = vst.msk [vmem:[#allocation2 + $0x6a8] sm:$0xff] %vm2390_vm2, %v2308_v38  ;;  %v1293_v25 = vpop.f32.mrf.mxu0  ;;  %v1635_v34 = vpop.f32.mrf.mxu1 }
 0x273   :  { %v1294_v40 = vadd.f32 %v10200_v15, %v1293_v25  ;;  %v1636_v37 = vadd.f32 %v10200_v15, %v1635_v34  ;;  %7922 = vrot.lane.b32.xlu1 %v7916_v13, %s8954_s27  ;;  %v138_v34 = vld [vmem:[%s14040_s30 + $0x280] sm:$0xff] }
 0x275   :  { %v1939_v41 = vmul.f32 0.2, %v1294_v40  ;;  %v2053_v26 = vmul.f32 0.2, %v1636_v37  ;;  %7310 = vmatmul.msk.f32.gmra.mxu0 %vm320_vm1, %v135_v33  ;;  %7424 = vmatmul.msk.f32.gmra.mxu1 %vm320_vm1, %v249_v36  ;;  %v252_v33 = vld [vmem:[%s14040_s30 + $0x610] sm:$0xff] }
 0x276   :  { %v10647_v36 = vld [vmem:[%s13989_s2] ss:$0 sm:$0xff] }
 0x277   :  { %v2195_v35 = vmax.f32 %v1294_v40, %v1939_v41  ;;  %v2309_v32 = vmax.f32 %v1636_v37, %v2053_v26  ;;  %v10653_v41 = vpop.permute.xlu1 %7837 }
 0x278   :  { %v2765_v4 = vld [vmem:[#allocation2 + $0x2a8] sm:$0xff]  ;;  %14046 = vst [vmem:[#allocation10_spill] sm:$0xff] %v10653_v41 }
 0x279   :  { %2489 = vst.msk [vmem:[#allocation2 + $0x2b0] sm:$0xff] %vm2390_vm2, %v2195_v35 }
 0x27a   :  { %2603 = vst.msk [vmem:[#allocation2 + $0x6b0] sm:$0xff] %vm2390_vm2, %v2309_v32  ;;  %v1296_v24 = vpop.f32.mrf.mxu0  ;;  %v1638_v39 = vpop.f32.mrf.mxu1 }
 0x27b   :  { %v1297_v47 = vadd.f32 %v10200_v15, %v1296_v24  ;;  %v1639_v48 = vadd.f32 %v10200_v15, %v1638_v39  ;;  %v10657_v39 = vpop.permute.xlu0 %7862 }
 0x27d   :  { %v1940_v31 = vmul.f32 0.2, %v1297_v47  ;;  %v2054_v50 = vmul.f32 0.2, %v1639_v48  ;;  %7311 = vmatmul.msk.f32.gmra.mxu0 %vm320_vm1, %v136_v43  ;;  %7425 = vmatmul.msk.f32.gmra.mxu1 %vm320_vm1, %v250_v45  ;;  %v10659_v43 = vpop.permute.xlu2 %7797 }
 0x27e   :  { %14047 = vst [vmem:[#allocation11_spill] sm:$0xff] %v10659_v43 }
 0x27f   :  { %v2196_v57 = vmax.f32 %v1297_v47, %v1940_v31  ;;  %v2310_v62 = vmax.f32 %v1639_v48, %v2054_v50  ;;  %v139_v48 = vld [vmem:[%s14040_s30 + $0x288] sm:$0xff]  ;;  %v253_v31 = vld [vmem:[%s14040_s30 + $0x618] sm:$0xff] }
 0x280   :  { %v10613_v7 = vld [vmem:[#allocation2 + $0x2b0] sm:$0xff] }
 0x281   :  { %2490 = vst.msk [vmem:[#allocation2 + $0x2b8] sm:$0xff] %vm2390_vm2, %v2196_v57  ;;  %v7926_v12 = vpack.i.bf16 %v10613_v7, %v10611_v27 }
 0x282   :  { %2604 = vst.msk [vmem:[#allocation2 + $0x6c8] sm:$0xff] %vm2390_vm2, %v2310_v62  ;;  %v1299_v61 = vpop.f32.mrf.mxu0  ;;  %v1641_v14 = vpop.f32.mrf.mxu1  ;;  %v7724_v62 = vunpack.i.l.bf16 %v10066_v11 }
 0x283   :  { %v1300_v1 = vadd.f32 %v10200_v15, %v1299_v61  ;;  %v1642_v13 = vadd.f32 %v10200_v15, %v1641_v14  ;;  %7927 = vrot.lane.b32.xlu0 %v7926_v12, %s8953_s18  ;;  %v7749_v12 = vunpack.i.l.bf16 %v10570_v21  ;;  %v10673_v61 = vpop.permute.xlu1 %7847 }
 0x285   :  { %v1941_v17 = vmul.f32 0.2, %v1300_v1  ;;  %v2055_v28 = vmul.f32 0.2, %v1642_v13  ;;  %7312 = vmatmul.msk.f32.gmra.mxu0 %vm320_vm1, %v137_v8  ;;  %7426 = vmatmul.msk.f32.gmra.mxu1 %vm320_vm1, %v251_v16  ;;  %v7804_v16 = vunpack.i.l.bf16 %v10574_v30 }
 0x287   :  { %v2197_v20 = vmax.f32 %v1300_v1, %v1941_v17  ;;  %v2311_v0 = vmax.f32 %v1642_v13, %v2055_v28  ;;  %v7809_v1 = vunpack.i.l.bf16 %v10603_v49 }
 0x288   :  { %v2767_v6 = vld [vmem:[#allocation2 + $0x2b8] sm:$0xff] }
 0x289   :  { %2491 = vst.msk [vmem:[#allocation2 + $0x2c0] sm:$0xff] %vm2390_vm2, %v2197_v20  ;;  %v7936_v15 = vpack.i.bf16 %v2767_v6, %v2765_v4  ;;  %v2889_v28 = vld [vmem:[#allocation2 + $0x6c8] sm:$0xff]  ;;  %v8841_v20 = vld [vmem:[#allocation2 + $0x120] sm:$0xff] }
 0x28a   :  { %2605 = vst.msk [vmem:[#allocation2 + $0x6d0] sm:$0xff] %vm2390_vm2, %v2311_v0  ;;  %v1302_v38 = vpop.f32.mrf.mxu0  ;;  %v1644_v25 = vpop.f32.mrf.mxu1  ;;  %v4630_v0 = vsel %vm2390_vm2, %v8841_v20, %v7724_v62 }
 0x28b   :  { %v1303_v40 = vadd.f32 %v10647_v36, %v1302_v38  ;;  %v1645_v37 = vadd.f32 %v10647_v36, %v1644_v25  ;;  %7937 = vrot.lane.b32.xlu1 %v7936_v15, %s8954_s27  ;;  %7932 = vrot.lane.b32.xlu2 %v7936_v15, %s8948_s25  ;;  %v4695_v6 = vsel %vm4686_vm3, %v4630_v0, %v7749_v12  ;;  %v7813_v15 = vpop.permute.xlu2 %7812  ;;  %v7805_v12 = vunpack.i.h.bf16 %v10574_v30 }
 0x28c   :  { %v4760_v25 = vsel %vm4751_vm5, %v4695_v6, %v7804_v16  ;;  %v2769_v16 = vld [vmem:[#allocation2 + $0x2d0] sm:$0xff] }
 0x28d   :  { %v1942_v26 = vmul.f32 0.2, %v1303_v40  ;;  %v2056_v35 = vmul.f32 0.2, %v1645_v37  ;;  %7313 = vmatmul.msk.f32.gmra.mxu0 %vm320_vm1, %v138_v34  ;;  %7427 = vmatmul.msk.f32.gmra.mxu1 %vm320_vm1, %v252_v33 }
 0x28f   :  { %v2198_v32 = vmax.f32 %v1303_v40, %v1942_v26  ;;  %v2312_v24 = vmax.f32 %v1645_v37, %v2056_v35  ;;  %v140_v37 = vld [vmem:[%s14040_s30 + $0x290] sm:$0xff]  ;;  %v254_v26 = vld [vmem:[%s14040_s30 + $0x620] sm:$0xff]  ;;  %v4825_v35 = vsel %vm4816_vm4, %v4760_v25, %v7809_v1 }
 0x291   :  { %2492 = vst.msk [vmem:[#allocation2 + $0x2d8] sm:$0xff] %vm2390_vm2, %v2198_v32 }
 0x292   :  { %2606 = vst.msk [vmem:[#allocation2 + $0x6d8] sm:$0xff] %vm2390_vm2, %v2312_v24  ;;  %v1305_v45 = vpop.f32.mrf.mxu0  ;;  %v1647_v47 = vpop.f32.mrf.mxu1 }
 0x293   :  { %v1306_v50 = vadd.f32 %v10647_v36, %v1305_v45  ;;  %v1648_v57 = vadd.f32 %v10647_v36, %v1647_v47  ;;  %v7725_v47 = vunpack.i.h.bf16 %v10066_v11  ;;  %v7810_v11 = vunpack.i.h.bf16 %v10603_v49 }
 0x295   :  { %v1943_v14 = vmul.f32 0.2, %v1306_v50  ;;  %v2057_v8 = vmul.f32 0.2, %v1648_v57  ;;  %7314 = vmatmul.msk.f32.gmra.mxu0 %vm320_vm1, %v139_v48  ;;  %7428 = vmatmul.msk.f32.gmra.mxu1 %vm320_vm1, %v253_v31  ;;  %v10680_v4 = vpop.permute.xlu0 %7867  ;;  %v7814_v48 = vunpack.i.l.bf16 %v7813_v15  ;;  %v7750_v31 = vunpack.i.h.bf16 %v10570_v21  ;;  %v8842_v21 = vld [vmem:[#allocation2 + $0x130] sm:$0xff] }
 0x296   :  { %v7869_v32 = vunpack.i.l.bf16 %v10680_v4 }
 0x297   :  { %v2199_v13 = vmax.f32 %v1306_v50, %v1943_v14  ;;  %v2313_v17 = vmax.f32 %v1648_v57, %v2057_v8  ;;  %v4890_v8 = vsel %vm4881_vm6, %v4825_v35, %v7814_v48 }
 0x299   :  { %2493 = vst.msk [vmem:[#allocation2 + $0x2e0] sm:$0xff] %vm2390_vm2, %v2199_v13  ;;  %v2891_v38 = vld [vmem:[#allocation2 + $0x6d8] sm:$0xff] }
 0x29a   :  { %2607 = vst.msk [vmem:[#allocation2 + $0x6e0] sm:$0xff] %vm2390_vm2, %v2313_v17  ;;  %v1308_v34 = vpop.f32.mrf.mxu0  ;;  %v1650_v33 = vpop.f32.mrf.mxu1  ;;  %v10686_v40 = vpack.i.bf16 %v2891_v38, %v2889_v28  ;;  %v4955_v17 = vsel %vm4946_vm7, %v4890_v8, %v7869_v32  ;;  %v4631_v28 = vsel %vm2390_vm2, %v8842_v21, %v7725_v47 }
 0x29b   :  { %v1309_v24 = vadd.f32 %v10647_v36, %v1308_v34  ;;  %v1651_v45 = vadd.f32 %v10647_v36, %v1650_v33  ;;  %v4696_v6 = vsel %vm4686_vm3, %v4631_v28, %v7750_v31  ;;  %v141_v34 = vld [vmem:[%s14040_s30 + $0x298] sm:$0xff]  ;;  %v255_v33 = vld [vmem:[%s14040_s30 + $0x628] sm:$0xff] }
 0x29c   :  { %7942 = vrot.lane.b32.xlu0 %v10686_v40, %s8948_s25  ;;  %v4761_v38 = vsel %vm4751_vm5, %v4696_v6, %v7805_v12 }
 0x29d   :  { %v1944_v50 = vmul.f32 0.2, %v1309_v24  ;;  %v2058_v57 = vmul.f32 0.2, %v1651_v45  ;;  %7315 = vmatmul.msk.f32.gmra.mxu0 %vm320_vm1, %v140_v37  ;;  %7429 = vmatmul.msk.f32.gmra.mxu1 %vm320_vm1, %v254_v26  ;;  %v7878_v62 = vpop.permute.xlu1 %7877  ;;  %v4826_v37 = vsel %vm4816_vm4, %v4761_v38, %v7810_v11  ;;  %v7870_v26 = vunpack.i.h.bf16 %v10680_v4  ;;  %v142_v11 = vld [vmem:[%s14040_s30 + $0x2a0] sm:$0xff] }
 0x29e   :  { %v7879_v14 = vunpack.i.l.bf16 %v7878_v62 }
 0x29f   :  { %v2200_v1 = vmax.f32 %v1309_v24, %v1944_v50  ;;  %v2314_v13 = vmax.f32 %v1651_v45, %v2058_v57  ;;  %v7815_v24 = vunpack.i.h.bf16 %v7813_v15  ;;  %v7880_v45 = vunpack.i.h.bf16 %v7878_v62 }
 0x2a0   :  { %v5020_v20 = vsel %vm5011_vm8, %v4955_v17, %v7879_v14  ;;  %v2771_v0 = vld [vmem:[#allocation2 + $0x2e0] sm:$0xff]  ;;  %v2770_v14 = vld [vmem:[#allocation2 + $0x2d8] sm:$0xff] }
 0x2a1   :  { %2494 = vst.msk [vmem:[#allocation2 + $0x2e8] sm:$0xff] %vm2390_vm2, %v2200_v1  ;;  %5249 = vmatmul.f32.gmra.mxu2 %v5020_v20  ;;  %v7946_v30 = vpack.i.bf16 %v2771_v0, %v2769_v16  ;;  %v4891_v31 = vsel %vm4881_vm6, %v4826_v37, %v7815_v24  ;;  %v256_v1 = vld [vmem:[%s14040_s30 + $0x630] sm:$0xff] }
 0x2a2   :  { %2608 = vst.msk [vmem:[#allocation2 + $0x6e8] sm:$0xff] %vm2390_vm2, %v2314_v13  ;;  %v1311_v49 = vpop.f32.mrf.mxu0  ;;  %v1653_v25 = vpop.f32.mrf.mxu1  ;;  %v4956_v4 = vsel %vm4946_vm7, %v4891_v31, %v7870_v26 }
 0x2a3   :  { %v1312_v35 = vadd.f32 %v10647_v36, %v1311_v49  ;;  %v1654_v32 = vadd.f32 %v10647_v36, %v1653_v25  ;;  %v5021_v12 = vsel %vm5011_vm8, %v4956_v4, %v7880_v45  ;;  %v8843_v4 = vld [vmem:[#allocation2 + $0x140] sm:$0xff] }
 0x2a4   :  { %7947 = vrot.lane.b32.xlu0 %v7946_v30, %s8950_s21 }
 0x2a5   :  { %v1945_v47 = vmul.f32 0.2, %v1312_v35  ;;  %v2059_v48 = vmul.f32 0.2, %v1654_v32  ;;  %7316 = vmatmul.msk.f32.gmra.mxu0 %vm320_vm1, %v141_v34  ;;  %7430 = vmatmul.msk.f32.gmra.mxu1 %vm320_vm1, %v255_v33  ;;  %v143_v34 = vld [vmem:[%s14040_s30 + $0x2a8] sm:$0xff]  ;;  %v257_v33 = vld [vmem:[%s14040_s30 + $0x638] sm:$0xff] }
 0x2a7   :  { %v2201_v50 = vmax.f32 %v1312_v35, %v1945_v47  ;;  %v2315_v57 = vmax.f32 %v1654_v32, %v2059_v48  ;;  %v7754_v35 = vunpack.i.l.bf16 %v10591_v42  ;;  %v10759_v32 = vpop.permute.xlu1 %7882  ;;  %v7824_v47 = vunpack.i.l.bf16 %v10609_v5 }
 0x2a8   :  { %v2772_v8 = vld [vmem:[#allocation2 + $0x2e8] sm:$0xff]  ;;  %v7829_v48 = vunpack.i.l.bf16 %v10628_v63 }
 0x2a9   :  { %2495 = vst.msk [vmem:[#allocation2 + $0x2f0] sm:$0xff] %vm2390_vm2, %v2201_v50  ;;  %5252 = vmatmul.f32.gmra.mxu2 %v5021_v12  ;;  %v7951_v15 = vpack.i.bf16 %v2772_v8, %v2770_v14 }
 0x2aa   :  { %2609 = vst.msk [vmem:[#allocation2 + $0x6f0] sm:$0xff] %vm2390_vm2, %v2315_v57  ;;  %v1314_v62 = vpop.f32.mrf.mxu0  ;;  %v1656_v16 = vpop.f32.mrf.mxu1  ;;  %v2893_v57 = vld [vmem:[#allocation2 + $0x6e8] sm:$0xff] }
 0x2ab   :  { %v1315_v13 = vadd.f32 %v10647_v36, %v1314_v62  ;;  %v1657_v17 = vadd.f32 %v10647_v36, %v1656_v16  ;;  %7952 = vrot.lane.b32.xlu1 %v7951_v15, %s8951_s29  ;;  %v7833_v15 = vpop.permute.xlu2 %7832 }
 0x2ad   :  { %v1946_v21 = vmul.f32 0.2, %v1315_v13  ;;  %v2060_v28 = vmul.f32 0.2, %v1657_v17  ;;  %7317 = vmatmul.msk.f32.gmra.mxu0 %vm320_vm1, %v142_v11  ;;  %7431 = vmatmul.msk.f32.gmra.mxu1 %vm320_vm1, %v256_v1 }
 0x2af   :  { %v2202_v20 = vmax.f32 %v1315_v13, %v1946_v21  ;;  %v2316_v6 = vmax.f32 %v1657_v17, %v2060_v28  ;;  %v144_v17 = vld [vmem:[%s14040_s30 + $0x2b0] sm:$0xff]  ;;  %v258_v21 = vld [vmem:[%s14040_s30 + $0x640] sm:$0xff] }
 0x2b0   :  { %v10743_v30 = vld [vmem:[#allocation2 + $0x2f0] sm:$0xff] }
 0x2b1   :  { %2496 = vst.msk [vmem:[#allocation2 + $0x2f8] sm:$0xff] %vm2390_vm2, %v2202_v20  ;;  %v7956_v38 = vpack.i.bf16 %v10743_v30, %v2771_v0  ;;  %v7739_v0 = vunpack.i.l.bf16 %v10095_v60 }
 0x2b2   :  { %2610 = vst.msk [vmem:[#allocation2 + $0x6f8] sm:$0xff] %vm2390_vm2, %v2316_v6  ;;  %v1317_v49 = vpop.f32.mrf.mxu0  ;;  %v1659_v25 = vpop.f32.mrf.mxu1 }
 0x2b3   :  { %v1318_v37 = vadd.f32 %v10647_v36, %v1317_v49  ;;  %v1660_v26 = vadd.f32 %v10647_v36, %v1659_v25  ;;  %7957 = vrot.lane.b32.xlu2 %v7956_v38, %s14044_s24  ;;  %v4632_v12 = vsel %vm2390_vm2, %v8843_v4, %v7739_v0  ;;  %v7740_v49 = vunpack.i.h.bf16 %v10095_v60 }
 0x2b4   :  { %v4697_v8 = vsel %vm4686_vm3, %v4632_v12, %v7754_v35  ;;  %v7834_v25 = vunpack.i.l.bf16 %v7833_v15  ;;  %v7825_v0 = vunpack.i.h.bf16 %v10609_v5  ;;  %v7830_v60 = vunpack.i.h.bf16 %v10628_v63 }
 0x2b5   :  { %v1947_v24 = vmul.f32 0.2, %v1318_v37  ;;  %v2061_v45 = vmul.f32 0.2, %v1660_v26  ;;  %7318 = vmatmul.msk.f32.gmra.mxu0 %vm320_vm1, %v143_v34  ;;  %7432 = vmatmul.msk.f32.gmra.mxu1 %vm320_vm1, %v257_v33  ;;  %v7898_v14 = vpop.permute.xlu0 %7897  ;;  %v4762_v16 = vsel %vm4751_vm5, %v4697_v8, %v7824_v47  ;;  %v7755_v34 = vunpack.i.h.bf16 %v10591_v42 }
 0x2b6   :  { %v4827_v28 = vsel %vm4816_vm4, %v4762_v16, %v7829_v48  ;;  %v7899_v20 = vunpack.i.l.bf16 %v7898_v14  ;;  %v259_v16 = vld [vmem:[%s14040_s30 + $0x648] sm:$0xff] }
 0x2b7   :  { %v2203_v31 = vmax.f32 %v1318_v37, %v1947_v24  ;;  %v2317_v50 = vmax.f32 %v1660_v26, %v2061_v45  ;;  %v4892_v24 = vsel %vm4881_vm6, %v4827_v28, %v7834_v25  ;;  %v7835_v28 = vunpack.i.h.bf16 %v7833_v15 }
 0x2b8   :  { %v4957_v48 = vsel %vm4946_vm7, %v4892_v24, %v7899_v20 }
 0x2b9   :  { %2497 = vst.msk [vmem:[#allocation2 + $0x300] sm:$0xff] %vm2390_vm2, %v2203_v31  ;;  %v2895_v62 = vld [vmem:[#allocation2 + $0x6f8] sm:$0xff]  ;;  %v8844_v31 = vld [vmem:[#allocation2 + $0x150] sm:$0xff] }
 0x2ba   :  { %2611 = vst.msk [vmem:[#allocation2 + $0x700] sm:$0xff] %vm2390_vm2, %v2317_v50  ;;  %v1320_v11 = vpop.f32.mrf.mxu0  ;;  %v1662_v1 = vpop.f32.mrf.mxu1  ;;  %v10770_v13 = vpack.i.bf16 %v2895_v62, %v2893_v57  ;;  %v4633_v42 = vsel %vm2390_vm2, %v8844_v31, %v7740_v49  ;;  %v145_v62 = vld [vmem:[%s14040_s30 + $0x2b8] sm:$0xff] }
 0x2bb   :  { %v1321_v6 = vadd.f32 %v10647_v36, %v1320_v11  ;;  %v1663_v38 = vadd.f32 %v10647_v36, %v1662_v1  ;;  %v4698_v4 = vsel %vm4686_vm3, %v4633_v42, %v7755_v34  ;;  %v7900_v1 = vunpack.i.h.bf16 %v7898_v14 }
 0x2bc   :  { %7962 = vrot.lane.b32.xlu1 %v10770_v13, %s8948_s25  ;;  %v4763_v63 = vsel %vm4751_vm5, %v4698_v4, %v7825_v0  ;;  %v260_v0 = vld [vmem:[%s14040_s30 + $0x650] sm:$0xff]  ;;  %v261_v4 = vld [vmem:[%s14040_s30 + $0x658] sm:$0xff] }
 0x2bd   :  { %v1948_v33 = vmul.f32 0.2, %v1321_v6  ;;  %v2062_v37 = vmul.f32 0.2, %v1663_v38  ;;  %7319 = vmatmul.msk.f32.gmra.mxu0 %vm320_vm1, %v144_v17  ;;  %7433 = vmatmul.msk.f32.gmra.mxu1 %vm320_vm1, %v258_v21  ;;  %v7908_v26 = vpop.permute.xlu1 %7907  ;;  %v4828_v11 = vsel %vm4816_vm4, %v4763_v63, %v7830_v60 }
 0x2be   :  { %v7909_v35 = vunpack.i.l.bf16 %v7908_v26  ;;  %v7910_v20 = vunpack.i.h.bf16 %v7908_v26  ;;  %v4893_v49 = vsel %vm4881_vm6, %v4828_v11, %v7835_v28  ;;  %v146_v26 = vld [vmem:[%s14040_s30 + $0x2c0] sm:$0xff]  ;;  %v7764_v28 = vunpack.i.l.bf16 %v10326_v52 }
 0x2bf   :  { %v2204_v45 = vmax.f32 %v1321_v6, %v1948_v33  ;;  %v2318_v47 = vmax.f32 %v1663_v38, %v2062_v37  ;;  %v4958_v33 = vsel %vm4946_vm7, %v4893_v49, %v7900_v1  ;;  %v148_v49 = vld [vmem:[%s14040_s30 + $0x2d0] sm:$0xff] }
 0x2c0   :  { %v5022_v50 = vsel %vm5011_vm8, %v4957_v48, %v7909_v35  ;;  %v10793_v57 = vld [vmem:[#allocation2 + $0x300] sm:$0xff]  ;;  %v5023_v14 = vsel %vm5011_vm8, %v4958_v33, %v7910_v20 }
 0x2c1   :  { %2498 = vst.msk [vmem:[#allocation2 + $0x308] sm:$0xff] %vm2390_vm2, %v2204_v45  ;;  %5255 = vmatmul.f32.gmra.mxu2 %v5022_v50  ;;  %v7996_v5 = vpack.i.bf16 %v10793_v57, %v10743_v30  ;;  %v147_v50 = vld [vmem:[%s14040_s30 + $0x2c8] sm:$0xff]  ;;  %v160_v30 = vld [vmem:[%s14040_s30 + $0x330] sm:$0xff] }
 0x2c2   :  { %2612 = vst.msk [vmem:[#allocation2 + $0x708] sm:$0xff] %vm2390_vm2, %v2318_v47  ;;  %v1323_v12 = vpop.f32.mrf.mxu0  ;;  %v1665_v8 = vpop.f32.mrf.mxu1 }
 0x2c3   :  { %v1324_v17 = vadd.f32 %v10647_v36, %v1323_v12  ;;  %v1666_v21 = vadd.f32 %v10647_v36, %v1665_v8 }
 0x2c5   :  { %v1949_v6 = vmul.f32 0.2, %v1324_v17  ;;  %v2063_v38 = vmul.f32 0.2, %v1666_v21  ;;  %7320 = vmatmul.msk.f32.gmra.mxu0 %vm320_vm1, %v145_v62  ;;  %7434 = vmatmul.msk.f32.gmra.mxu1 %vm320_vm1, %v259_v16 }
 0x2c7   :  { %v2205_v25 = vmax.f32 %v1324_v17, %v1949_v6  ;;  %v2319_v34 = vmax.f32 %v1666_v21, %v2063_v38  ;;  %v10839_v17 = vpop.permute.xlu0 %7902 }
 0x2c9   :  { %2499 = vst.msk [vmem:[#allocation2 + $0x310] sm:$0xff] %vm2390_vm2, %v2205_v25  ;;  %5258 = vmatmul.f32.gmra.mxu2 %v5023_v14  ;;  %v2897_v1 = vld [vmem:[#allocation2 + $0x708] sm:$0xff]  ;;  %v262_v25 = vld [vmem:[%s14040_s30 + $0x660] sm:$0xff]  ;;  %v10856_v14 = vpop.permute.xlu2 %7852 }
 0x2ca   :  { %2613 = vst.msk [vmem:[#allocation2 + $0x710] sm:$0xff] %vm2390_vm2, %v2319_v34  ;;  %v1326_v15 = vpop.f32.mrf.mxu0  ;;  %v1668_v37 = vpop.f32.mrf.mxu1 }
 0x2cb   :  { %v1327_v35 = vadd.f32 %v10647_v36, %v1326_v15  ;;  %v1669_v24 = vadd.f32 %v10647_v36, %v1668_v37 }
 0x2cd   :  { %v1950_v60 = vmul.f32 0.2, %v1327_v35  ;;  %v2064_v45 = vmul.f32 0.2, %v1669_v24  ;;  %7321 = vmatmul.msk.f32.gmra.mxu0 %vm320_vm1, %v146_v26  ;;  %7435 = vmatmul.msk.f32.gmra.mxu1 %vm320_vm1, %v260_v0  ;;  %v8845_v0 = vld [vmem:[#allocation2 + $0x160] sm:$0xff] }
 0x2cf   :  { %v2206_v47 = vmax.f32 %v1327_v35, %v1950_v60  ;;  %v2320_v48 = vmax.f32 %v1669_v24, %v2064_v45  ;;  %v4634_v35 = vsel %vm2390_vm2, %v8845_v0, %v7764_v28  ;;  %v7844_v24 = vunpack.i.l.bf16 %v10634_v46 }
 0x2d0   :  { %v7774_v60 = vunpack.i.l.bf16 %v10607_v53  ;;  %v7849_v45 = vunpack.i.l.bf16 %v10673_v61 }
 0x2d1   :  { %2500 = vst.msk [vmem:[#allocation2 + $0x318] sm:$0xff] %vm2390_vm2, %v2206_v47 }
 0x2d2   :  { %2614 = vst.msk [vmem:[#allocation2 + $0x718] sm:$0xff] %vm2390_vm2, %v2320_v48  ;;  %v1329_v31 = vpop.f32.mrf.mxu0  ;;  %v1671_v42 = vpop.f32.mrf.mxu1 }
 0x2d3   :  { %v1330_v63 = vadd.f32 %v10647_v36, %v1329_v31  ;;  %v1672_v12 = vadd.f32 %v10647_v36, %v1671_v42  ;;  %v10868_v42 = vld [vmem:[#allocation2 + $0x310] sm:$0xff] }
 0x2d5   :  { %v1951_v8 = vmul.f32 0.2, %v1330_v63  ;;  %v2065_v62 = vmul.f32 0.2, %v1672_v12  ;;  %7322 = vmatmul.msk.f32.gmra.mxu0 %vm320_vm1, %v147_v50  ;;  %7436 = vmatmul.msk.f32.gmra.mxu1 %vm320_vm1, %v261_v4  ;;  %v10866_v31 = vpop.permute.xlu0 %7912  ;;  %v4699_v4 = vsel %vm4686_vm3, %v4634_v35, %v7774_v60  ;;  %v7850_v60 = vunpack.i.h.bf16 %v10673_v61 }
 0x2d6   :  { %v8006_v61 = vpack.i.bf16 %v10868_v42, %v10793_v57  ;;  %v274_v57 = vld [vmem:[%s14040_s30 + $0x6c0] sm:$0xff] }
 0x2d7   :  { %v2207_v16 = vmax.f32 %v1330_v63, %v1951_v8  ;;  %v2321_v11 = vmax.f32 %v1672_v12, %v2065_v62  ;;  %v7765_v12 = vunpack.i.h.bf16 %v10326_v52  ;;  %v4764_v8 = vsel %vm4751_vm5, %v4699_v4, %v7844_v24  ;;  %v10899_v24 = vpop.permute.xlu2 %7857 }
 0x2d8   :  { %v4829_v28 = vsel %vm4816_vm4, %v4764_v8, %v7849_v45  ;;  %v7914_v52 = vunpack.i.l.bf16 %v10866_v31  ;;  %14048 = vst [vmem:[#allocation12_spill] sm:$0xff] %v10899_v24 }
 0x2d9   :  { %2501 = vst.msk [vmem:[#allocation2 + $0x320] sm:$0xff] %vm2390_vm2, %v2207_v16  ;;  %v2899_v21 = vld [vmem:[#allocation2 + $0x718] sm:$0xff] }
 0x2da   :  { %2615 = vst.msk [vmem:[#allocation2 + $0x720] sm:$0xff] %vm2390_vm2, %v2321_v11  ;;  %v1332_v20 = vpop.f32.mrf.mxu0  ;;  %v1674_v6 = vpop.f32.mrf.mxu1  ;;  %v10844_v38 = vpack.i.bf16 %v2899_v21, %v2897_v1  ;;  %v7991_v11 = vpack.i.bf16 %v10540_v29, %v10486_v54  ;;  %v149_v1 = vld [vmem:[%s14040_s30 + $0x2d8] sm:$0xff]  ;;  %v263_v21 = vld [vmem:[%s14040_s30 + $0x668] sm:$0xff]  ;;  %v7775_v54 = vunpack.i.h.bf16 %v10607_v53 }
 0x2db   :  { %v1333_v34 = vadd.f32 %v10647_v36, %v1332_v20  ;;  %v1675_v33 = vadd.f32 %v10647_v36, %v1674_v6 }
 0x2dc   :  { %7967 = vrot.lane.b32.xlu2 %v10844_v38, %s8948_s25 }
 0x2dd   :  { %v1952_v15 = vmul.f32 0.2, %v1333_v34  ;;  %v2066_v37 = vmul.f32 0.2, %v1675_v33  ;;  %7323 = vmatmul.msk.f32.gmra.mxu0 %vm320_vm1, %v148_v49  ;;  %7437 = vmatmul.msk.f32.gmra.mxu1 %vm320_vm1, %v262_v25  ;;  %v10860_v26 = vpop.permute.xlu1 %7917  ;;  %v7854_v49 = vunpack.i.l.bf16 %v10856_v14 }
 0x2df   :  { %v2208_v47 = vmax.f32 %v1333_v34, %v1952_v15  ;;  %v2322_v48 = vmax.f32 %v1675_v33, %v2066_v37  ;;  %v8846_v33 = vld [vmem:[#allocation2 + $0x170] sm:$0xff]  ;;  %v7845_v37 = vunpack.i.h.bf16 %v10634_v46  ;;  %v4894_v35 = vsel %vm4881_vm6, %v4829_v28, %v7854_v49 }
 0x2e0   :  { %v10870_v50 = vld [vmem:[#allocation2 + $0x320] sm:$0xff]  ;;  %v4635_v15 = vsel %vm2390_vm2, %v8846_v33, %v7765_v12 }
 0x2e1   :  { %2502 = vst.msk [vmem:[#allocation2 + $0x328] sm:$0xff] %vm2390_vm2, %v2208_v47  ;;  %v8016_v63 = vpack.i.bf16 %v10870_v50, %v10868_v42  ;;  %v4959_v47 = vsel %vm4946_vm7, %v4894_v35, %v7914_v52  ;;  %v4700_v4 = vsel %vm4686_vm3, %v4635_v15, %v7775_v54  ;;  %v7855_v52 = vunpack.i.h.bf16 %v10856_v14  ;;  %v151_v35 = vld [vmem:[%s14040_s30 + $0x2e8] sm:$0xff] }
 0x2e2   :  { %2616 = vst.msk [vmem:[#allocation2 + $0x728] sm:$0xff] %vm2390_vm2, %v2322_v48  ;;  %v1335_v62 = vpop.f32.mrf.mxu0  ;;  %v1677_v16 = vpop.f32.mrf.mxu1  ;;  %v4765_v46 = vsel %vm4751_vm5, %v4700_v4, %v7845_v37  ;;  %v7784_v14 = vunpack.i.l.bf16 %v10348_v44  ;;  %v7864_v4 = vunpack.i.l.bf16 %v10657_v39 }
 0x2e3   :  { %v1336_v20 = vadd.f32 %v10647_v36, %v1335_v62  ;;  %v1678_v6 = vadd.f32 %v10647_v36, %v1677_v16  ;;  %v150_v62 = vld [vmem:[%s14040_s30 + $0x2e0] sm:$0xff]  ;;  %v264_v16 = vld [vmem:[%s14040_s30 + $0x670] sm:$0xff] }
 0x2e4   :  { %7992 = vrot.lane.b32.xlu2 %v7991_v11, %s14009_s1  ;;  %v4830_v11 = vsel %vm4816_vm4, %v4765_v46, %v7850_v60  ;;  %v265_v60 = vld [vmem:[%s14040_s30 + $0x678] sm:$0xff]  ;;  %v7794_v46 = vunpack.i.l.bf16 %v10632_v19 }
 0x2e5   :  { %v1953_v29 = vmul.f32 0.2, %v1336_v20  ;;  %v2067_v25 = vmul.f32 0.2, %v1678_v6  ;;  %7324 = vmatmul.msk.f32.gmra.mxu0 %vm320_vm1, %v149_v1  ;;  %7438 = vmatmul.msk.f32.gmra.mxu1 %vm320_vm1, %v263_v21  ;;  %v7923_v34 = vpop.permute.xlu1 %7922  ;;  %v7915_v1 = vunpack.i.h.bf16 %v10866_v31  ;;  %v4895_v54 = vsel %vm4881_vm6, %v4830_v11, %v7855_v52 }
 0x2e6   :  { %v7924_v0 = vunpack.i.l.bf16 %v7923_v34 }
 0x2e7   :  { %v2209_v53 = vmax.f32 %v1336_v20, %v1953_v29  ;;  %v2323_v45 = vmax.f32 %v1678_v6, %v2067_v25  ;;  %v7925_v20 = vunpack.i.h.bf16 %v7923_v34  ;;  %v10925_v29 = vpop.permute.xlu2 %7872  ;;  %v4960_v33 = vsel %vm4946_vm7, %v4895_v54, %v7915_v1 }
 0x2e8   :  { %v5024_v48 = vsel %vm5011_vm8, %v4959_v47, %v7924_v0  ;;  %v8011_v0 = vpack.i.bf16 %v10611_v27, %v10542_v51  ;;  %v8847_v51 = vld [vmem:[#allocation2 + $0x180] sm:$0xff]  ;;  %v7785_v1 = vunpack.i.h.bf16 %v10348_v44  ;;  %v152_v44 = vld [vmem:[%s14040_s30 + $0x2f0] sm:$0xff] }
 0x2e9   :  { %2503 = vst.msk [vmem:[#allocation2 + $0x330] sm:$0xff] %vm2390_vm2, %v2209_v53  ;;  %5261 = vmatmul.f32.gmra.mxu2 %v5024_v48  ;;  %v5025_v15 = vsel %vm5011_vm8, %v4960_v33, %v7925_v20  ;;  %v4636_v27 = vsel %vm2390_vm2, %v8847_v51, %v7784_v14 }
 0x2ea   :  { %2617 = vst.msk [vmem:[#allocation2 + $0x730] sm:$0xff] %vm2390_vm2, %v2323_v45  ;;  %v1338_v12 = vpop.f32.mrf.mxu0  ;;  %v1680_v8 = vpop.f32.mrf.mxu1 }
 0x2eb   :  { %v1339_v21 = vadd.f32 %v10647_v36, %v1338_v12  ;;  %v1681_v28 = vadd.f32 %v10647_v36, %v1680_v8  ;;  %v7884_v12 = vunpack.i.l.bf16 %v10759_v32 }
 0x2ec   :  { %8007 = vrot.lane.b32.xlu2 %v8006_v61, %s14044_s24 }
 0x2ed   :  { %v1954_v6 = vmul.f32 0.2, %v1339_v21  ;;  %v2068_v49 = vmul.f32 0.2, %v1681_v28  ;;  %7325 = vmatmul.msk.f32.gmra.mxu0 %vm320_vm1, %v150_v62  ;;  %7439 = vmatmul.msk.f32.gmra.mxu1 %vm320_vm1, %v264_v16  ;;  %v2901_v16 = vld [vmem:[#allocation2 + $0x728] sm:$0xff] }
 0x2ef   :  { %v2210_v31 = vmax.f32 %v1339_v21, %v1954_v6  ;;  %v2324_v25 = vmax.f32 %v1681_v28, %v2068_v49  ;;  %v4701_v21 = vsel %vm4686_vm3, %v4636_v27, %v7794_v46  ;;  %v7888_v28 = vpop.permute.xlu2 %7887 }
 0x2f0   :  { %v10949_v62 = vld [vmem:[#allocation2 + $0x330] sm:$0xff]  ;;  %v4766_v20 = vsel %vm4751_vm5, %v4701_v21, %v7864_v4  ;;  %v7885_v4 = vunpack.i.h.bf16 %v10759_v32 }
 0x2f1   :  { %2504 = vst.msk [vmem:[#allocation2 + $0x338] sm:$0xff] %vm2390_vm2, %v2210_v31  ;;  %5264 = vmatmul.f32.gmra.mxu2 %v5025_v15  ;;  %v8026_v54 = vpack.i.bf16 %v10949_v62, %v10870_v50  ;;  %v4831_v33 = vsel %vm4816_vm4, %v4766_v20, %v7884_v12  ;;  %v267_v20 = vld [vmem:[%s14040_s30 + $0x688] sm:$0xff]  ;;  %v161_v50 = vld [vmem:[%s14040_s30 + $0x338] sm:$0xff] }
 0x2f2   :  { %2618 = vst.msk [vmem:[#allocation2 + $0x738] sm:$0xff] %vm2390_vm2, %v2324_v25  ;;  %v1341_v34 = vpop.f32.mrf.mxu0  ;;  %v1683_v37 = vpop.f32.mrf.mxu1  ;;  %v266_v25 = vld [vmem:[%s14040_s30 + $0x680] sm:$0xff] }
 0x2f3   :  { %v1342_v53 = vadd.f32 %v10647_v36, %v1341_v34  ;;  %v1684_v45 = vadd.f32 %v10647_v36, %v1683_v37  ;;  %v7889_v37 = vunpack.i.l.bf16 %v7888_v28 }
 0x2f4   :  { %8012 = vrot.lane.b32.xlu2 %v8011_v0, %s14009_s1  ;;  %v7795_v0 = vunpack.i.h.bf16 %v10632_v19 }
 0x2f5   :  { %v1955_v47 = vmul.f32 0.2, %v1342_v53  ;;  %v2069_v48 = vmul.f32 0.2, %v1684_v45  ;;  %7326 = vmatmul.msk.f32.gmra.mxu0 %vm320_vm1, %v151_v35  ;;  %7440 = vmatmul.msk.f32.gmra.mxu1 %vm320_vm1, %v265_v60  ;;  %v10951_v11 = vpop.permute.xlu0 %7927  ;;  %v4896_v27 = vsel %vm4881_vm6, %v4831_v33, %v7889_v37 }
 0x2f6   :  { %v7929_v15 = vunpack.i.l.bf16 %v10951_v11 }
 0x2f7   :  { %v2211_v8 = vmax.f32 %v1342_v53, %v1955_v47  ;;  %v2325_v61 = vmax.f32 %v1684_v45, %v2069_v48  ;;  %v8848_v45 = vld [vmem:[#allocation2 + $0x190] sm:$0xff]  ;;  %v7865_v48 = vunpack.i.h.bf16 %v10657_v39 }
 0x2f8   :  { %v4637_v47 = vsel %vm2390_vm2, %v8848_v45, %v7785_v1  ;;  %v4961_v19 = vsel %vm4946_vm7, %v4896_v27, %v7929_v15 }
 0x2f9   :  { %2505 = vst.msk [vmem:[#allocation2 + $0x340] sm:$0xff] %vm2390_vm2, %v2211_v8  ;;  %v2903_v52 = vld [vmem:[#allocation2 + $0x738] sm:$0xff]  ;;  %v2768_v8 = vld [vmem:[#allocation2 + $0x2c0] sm:$0xff] }
 0x2fa   :  { %2619 = vst.msk [vmem:[#allocation2 + $0x740] sm:$0xff] %vm2390_vm2, %v2325_v61  ;;  %v1344_v6 = vpop.f32.mrf.mxu0  ;;  %v1686_v49 = vpop.f32.mrf.mxu1  ;;  %v10960_v31 = vpack.i.bf16 %v2903_v52, %v2901_v16  ;;  %v4702_v16 = vsel %vm4686_vm3, %v4637_v47, %v7795_v0  ;;  %v8031_v32 = vpack.i.bf16 %v2768_v8, %v10613_v7  ;;  %v153_v52 = vld [vmem:[%s14040_s30 + $0x2f8] sm:$0xff] }
 0x2fb   :  { %v1345_v14 = vadd.f32 %v10647_v36, %v1344_v6  ;;  %v1687_v34 = vadd.f32 %v10647_v36, %v1686_v49  ;;  %v4767_v1 = vsel %vm4751_vm5, %v4702_v16, %v7865_v48  ;;  %v7930_v49 = vunpack.i.h.bf16 %v10951_v11  ;;  %v155_v16 = vld [vmem:[%s14040_s30 + $0x308] sm:$0xff] }
 0x2fc   :  { %14049 = vst [vmem:[#allocation13_spill] sm:$0xff] %v10960_v31  ;;  %8027 = vrot.lane.b32.xlu2 %v8026_v54, %s14044_s24  ;;  %7972 = vrot.lane.b32.xlu0 %v10960_v31, %s8948_s25  ;;  %v4832_v6 = vsel %vm4816_vm4, %v4767_v1, %v7885_v4  ;;  %v269_v1 = vld [vmem:[%s14040_s30 + $0x698] sm:$0xff] }
 0x2fd   :  { %v1956_v35 = vmul.f32 0.2, %v1345_v14  ;;  %v2070_v60 = vmul.f32 0.2, %v1687_v34  ;;  %7327 = vmatmul.msk.f32.gmra.mxu0 %vm320_vm1, %v152_v44  ;;  %7441 = vmatmul.msk.f32.gmra.mxu1 %vm320_vm1, %v266_v25  ;;  %v7938_v53 = vpop.permute.xlu1 %7937  ;;  %v7890_v25 = vunpack.i.h.bf16 %v7888_v28 }
 0x2fe   :  { %v7939_v51 = vunpack.i.l.bf16 %v7938_v53  ;;  %v7940_v33 = vunpack.i.h.bf16 %v7938_v53  ;;  %v268_v53 = vld [vmem:[%s14040_s30 + $0x690] sm:$0xff] }
 0x2ff   :  { %v2212_v46 = vmax.f32 %v1345_v14, %v1956_v35  ;;  %v2326_v12 = vmax.f32 %v1687_v34, %v2070_v60  ;;  %v4897_v14 = vsel %vm4881_vm6, %v4832_v6, %v7890_v25  ;;  %v154_v60 = vld [vmem:[%s14040_s30 + $0x300] sm:$0xff] }
 0x300   :  { %v5026_v61 = vsel %vm5011_vm8, %v4961_v19, %v7939_v51  ;;  %v4962_v11 = vsel %vm4946_vm7, %v4897_v14, %v7930_v49  ;;  %v270_v25 = vld [vmem:[%s14040_s30 + $0x6a0] sm:$0xff] }
 0x301   :  { %2506 = vst.msk [vmem:[#allocation2 + $0x348] sm:$0xff] %vm2390_vm2, %v2212_v46  ;;  %5267 = vmatmul.f32.gmra.mxu2 %v5026_v61  ;;  %v5027_v0 = vsel %vm5011_vm8, %v4962_v11, %v7940_v33  ;;  %v11017_v46 = vld [vmem:[#allocation2 + $0x340] sm:$0xff] }
 0x302   :  { %2620 = vst.msk [vmem:[#allocation2 + $0x758] sm:$0xff] %vm2390_vm2, %v2326_v12  ;;  %v1347_v39 = vpop.f32.mrf.mxu0  ;;  %v1689_v21 = vpop.f32.mrf.mxu1  ;;  %v8036_v42 = vpack.i.bf16 %v11017_v46, %v10949_v62 }
 0x303   :  { %v1348_v54 = vadd.f32 %v10647_v36, %v1347_v39  ;;  %v1690_v44 = vadd.f32 %v10647_v36, %v1689_v21 }
 0x304   :  { %8032 = vrot.lane.b32.xlu2 %v8031_v32, %s14009_s1 }
 0x305   :  { %v1957_v7 = vmul.f32 0.2, %v1348_v54  ;;  %v2071_v15 = vmul.f32 0.2, %v1690_v44  ;;  %7328 = vmatmul.msk.f32.gmra.mxu0 %vm320_vm1, %v153_v52  ;;  %7442 = vmatmul.msk.f32.gmra.mxu1 %vm320_vm1, %v267_v20 }
 0x307   :  { %v2213_v34 = vmax.f32 %v1348_v54, %v1957_v7  ;;  %v2327_v37 = vmax.f32 %v1690_v44, %v2071_v15  ;;  %v156_v44 = vld [vmem:[%s14040_s30 + $0x310] sm:$0xff] }
 0x309   :  { %2507 = vst.msk [vmem:[#allocation2 + $0x350] sm:$0xff] %vm2390_vm2, %v2213_v34  ;;  %5270 = vmatmul.f32.gmra.mxu2 %v5027_v0  ;;  %v2786_v34 = vld [vmem:[#allocation2 + $0x360] sm:$0xff] }
 0x30a   :  { %2621 = vst.msk [vmem:[#allocation2 + $0x760] sm:$0xff] %vm2390_vm2, %v2327_v37  ;;  %v1350_v28 = vpop.f32.mrf.mxu0  ;;  %v1692_v35 = vpop.f32.mrf.mxu1 }
 0x30b   :  { %v1351_v45 = vadd.f32 %v10647_v36, %v1350_v28  ;;  %v1693_v47 = vadd.f32 %v10647_v36, %v1692_v35 }
 0x30d   :  { %v1958_v48 = vmul.f32 0.2, %v1351_v45  ;;  %v2072_v51 = vmul.f32 0.2, %v1693_v47  ;;  %7329 = vmatmul.msk.f32.gmra.mxu0 %vm320_vm1, %v154_v60  ;;  %7443 = vmatmul.msk.f32.gmra.mxu1 %vm320_vm1, %v268_v53  ;;  %v157_v53 = vld [vmem:[%s14040_s30 + $0x318] sm:$0xff] }
 0x30f   :  { %v2214_v27 = vmax.f32 %v1351_v45, %v1958_v48  ;;  %v2328_v4 = vmax.f32 %v1693_v47, %v2072_v51  ;;  %v271_v45 = vld [vmem:[%s14040_s30 + $0x6a8] sm:$0xff] }
 0x310   :  { %v2785_v12 = vld [vmem:[#allocation2 + $0x350] sm:$0xff] }
 0x311   :  { %2508 = vst.msk [vmem:[#allocation2 + $0x368] sm:$0xff] %vm2390_vm2, %v2214_v27  ;;  %v8046_v19 = vpack.i.bf16 %v2785_v12, %v11017_v46 }
 0x312   :  { %2622 = vst.msk [vmem:[#allocation2 + $0x768] sm:$0xff] %vm2390_vm2, %v2328_v4  ;;  %v1353_v8 = vpop.f32.mrf.mxu0  ;;  %v1695_v61 = vpop.f32.mrf.mxu1 }
 0x313   :  { %v1354_v39 = vadd.f32 %v10647_v36, %v1353_v8  ;;  %v1696_v21 = vadd.f32 %v10647_v36, %v1695_v61  ;;  %8047 = vrot.lane.b32.xlu2 %v8046_v19, %s14044_s24 }
 0x315   :  { %v1959_v32 = vmul.f32 0.2, %v1354_v39  ;;  %v2073_v52 = vmul.f32 0.2, %v1696_v21  ;;  %7330 = vmatmul.msk.f32.gmra.mxu0 %vm320_vm1, %v155_v16  ;;  %7444 = vmatmul.msk.f32.gmra.mxu1 %vm320_vm1, %v269_v1 }
 0x317   :  { %v2215_v20 = vmax.f32 %v1354_v39, %v1959_v32  ;;  %v2329_v6 = vmax.f32 %v1696_v21, %v2073_v52  ;;  %v158_v39 = vld [vmem:[%s14040_s30 + $0x320] sm:$0xff]  ;;  %v272_v21 = vld [vmem:[%s14040_s30 + $0x6b0] sm:$0xff] }
 0x318   :  { %v2787_v19 = vld [vmem:[#allocation2 + $0x368] sm:$0xff] }
 0x319   :  { %2509 = vst.msk [vmem:[#allocation2 + $0x370] sm:$0xff] %vm2390_vm2, %v2215_v20 }
 0x31a   :  { %2623 = vst.msk [vmem:[#allocation2 + $0x770] sm:$0xff] %vm2390_vm2, %v2329_v6  ;;  %v1356_v49 = vpop.f32.mrf.mxu0  ;;  %v1698_v54 = vpop.f32.mrf.mxu1 }
 0x31b   :  { %v1357_v33 = vadd.f32 %v10647_v36, %v1356_v49  ;;  %v1699_v7 = vadd.f32 %v10647_v36, %v1698_v54  ;;  %v2776_v49 = vld [vmem:[#allocation2 + $0x308] sm:$0xff] }
 0x31d   :  { %v1960_v15 = vmul.f32 0.2, %v1357_v33  ;;  %v2074_v14 = vmul.f32 0.2, %v1699_v7  ;;  %7331 = vmatmul.msk.f32.gmra.mxu0 %vm320_vm1, %v156_v44  ;;  %7445 = vmatmul.msk.f32.gmra.mxu1 %vm320_vm1, %v270_v25  ;;  %v2774_v25 = vld [vmem:[#allocation2 + $0x2f8] sm:$0xff] }
 0x31f   :  { %v2216_v37 = vmax.f32 %v1357_v33, %v1960_v15  ;;  %v2330_v11 = vmax.f32 %v1699_v7, %v2074_v14  ;;  %v8001_v7 = vpack.i.bf16 %v2776_v49, %v2774_v25 }
 0x320   :  { %v2788_v0 = vld [vmem:[#allocation2 + $0x370] sm:$0xff] }
 0x321   :  { %2510 = vst.msk [vmem:[#allocation2 + $0x378] sm:$0xff] %vm2390_vm2, %v2216_v37  ;;  %v7976_v28 = vpack.i.bf16 %v2788_v0, %v2786_v34  ;;  %v159_v37 = vld [vmem:[%s14040_s30 + $0x328] sm:$0xff] }
 0x322   :  { %2624 = vst.msk [vmem:[#allocation2 + $0x778] sm:$0xff] %vm2390_vm2, %v2330_v11  ;;  %v1359_v35 = vpop.f32.mrf.mxu0  ;;  %v1701_v60 = vpop.f32.mrf.mxu1  ;;  %v273_v11 = vld [vmem:[%s14040_s30 + $0x6b8] sm:$0xff] }
 0x323   :  { %v1360_v47 = vadd.f32 %v10647_v36, %v1359_v35  ;;  %v1702_v48 = vadd.f32 %v10647_v36, %v1701_v60  ;;  %7977 = vrot.lane.b32.xlu0 %v7976_v28, %s8953_s18 }
 0x325   :  { %v1961_v51 = vmul.f32 0.2, %v1360_v47  ;;  %v2075_v27 = vmul.f32 0.2, %v1702_v48  ;;  %7332 = vmatmul.msk.f32.gmra.mxu0 %vm320_vm1, %v157_v53  ;;  %7446 = vmatmul.msk.f32.gmra.mxu1 %vm320_vm1, %v271_v45  ;;  %v2780_v53 = vld [vmem:[#allocation2 + $0x328] sm:$0xff] }
 0x327   :  { %v2217_v4 = vmax.f32 %v1360_v47, %v1961_v51  ;;  %v2331_v12 = vmax.f32 %v1702_v48, %v2075_v27  ;;  %v2778_v48 = vld [vmem:[#allocation2 + $0x318] sm:$0xff] }
 0x328   :  { %v2789_v8 = vld [vmem:[#allocation2 + $0x378] sm:$0xff] }
 0x329   :  { %2511 = vst.msk [vmem:[#allocation2 + $0x380] sm:$0xff] %vm2390_vm2, %v2217_v4  ;;  %v7986_v61 = vpack.i.bf16 %v2789_v8, %v2787_v19  ;;  %v11107_v4 = vld [vmem:[%s13989_s2] ss:$0 sm:$0xff] }
 0x32a   :  { %2625 = vst.msk [vmem:[#allocation2 + $0x780] sm:$0xff] %vm2390_vm2, %v2331_v12  ;;  %v1362_v16 = vpop.f32.mrf.mxu0  ;;  %v1704_v1 = vpop.f32.mrf.mxu1 }
 0x32b   :  { %v1363_v32 = vadd.f32 %v10647_v36, %v1362_v16  ;;  %v1705_v52 = vadd.f32 %v10647_v36, %v1704_v1  ;;  %7987 = vrot.lane.b32.xlu1 %v7986_v61, %s8954_s27  ;;  %7982 = vrot.lane.b32.xlu0 %v7986_v61, %s8948_s25  ;;  %v2784_v16 = vld [vmem:[#allocation2 + $0x348] sm:$0xff] }
 0x32d   :  { %v1962_v20 = vmul.f32 0.2, %v1363_v32  ;;  %v2076_v6 = vmul.f32 0.2, %v1705_v52  ;;  %7333 = vmatmul.msk.f32.gmra.mxu0 %vm320_vm1, %v158_v39  ;;  %7447 = vmatmul.msk.f32.gmra.mxu1 %vm320_vm1, %v272_v21  ;;  %v2782_v21 = vld [vmem:[#allocation2 + $0x338] sm:$0xff] }
 0x32f   :  { %v2218_v54 = vmax.f32 %v1363_v32, %v1962_v20  ;;  %v2332_v44 = vmax.f32 %v1705_v52, %v2076_v6  ;;  %v8041_v32 = vpack.i.bf16 %v2784_v16, %v2782_v21  ;;  %v164_v21 = vld [vmem:[%s14040_s30 + $0x350] sm:$0xff] }
 0x330   :  { %v11072_v33 = vld [vmem:[#allocation2 + $0x380] sm:$0xff] }
 0x331   :  { %2512 = vst.msk [vmem:[#allocation2 + $0x388] sm:$0xff] %vm2390_vm2, %v2218_v54  ;;  %v8051_v15 = vpack.i.bf16 %v11072_v33, %v2788_v0 }
 0x332   :  { %2626 = vst.msk [vmem:[#allocation2 + $0x788] sm:$0xff] %vm2390_vm2, %v2332_v44  ;;  %v1365_v14 = vpop.f32.mrf.mxu0  ;;  %v1707_v34 = vpop.f32.mrf.mxu1 }
 0x333   :  { %v1366_v28 = vadd.f32 %v10647_v36, %v1365_v14  ;;  %v1708_v35 = vadd.f32 %v10647_v36, %v1707_v34  ;;  %8002 = vrot.lane.b32.xlu1 %v8001_v7, %s8951_s29  ;;  %8052 = vrot.lane.b32.xlu2 %v8051_v15, %s14009_s1  ;;  %v8021_v36 = vpack.i.bf16 %v2780_v53, %v2778_v48 }
 0x334   :  { %7997 = vrot.lane.b32.xlu0 %v7996_v5, %s8950_s21  ;;  %v2990_v5 = vld [vmem:[%s13990_s3 + $0x88] sm:$0xff] }
 0x335   :  { %v1963_v0 = vmul.f32 0.2, %v1366_v28  ;;  %v2077_v60 = vmul.f32 0.2, %v1708_v35  ;;  %7334 = vmatmul.msk.f32.gmra.mxu0 %vm320_vm1, %v159_v37  ;;  %7448 = vmatmul.msk.f32.gmra.mxu1 %vm320_vm1, %v273_v11 }
 0x336   :  { %5432 = vmatpush.msra.mxu2 %v2990_v5 }
 0x337   :  { %v2219_v45 = vmax.f32 %v1366_v28, %v1963_v0  ;;  %v2333_v47 = vmax.f32 %v1708_v35, %v2077_v60  ;;  %v162_v28 = vld [vmem:[%s14040_s30 + $0x340] sm:$0xff]  ;;  %v276_v35 = vld [vmem:[%s14040_s30 + $0x6d0] sm:$0xff] }
 0x338   :  { %v2791_v7 = vld [vmem:[#allocation2 + $0x388] sm:$0xff] }
 0x339   :  { %2513 = vst.msk [vmem:[#allocation2 + $0x390] sm:$0xff] %vm2390_vm2, %v2219_v45 }
 0x33a   :  { %2627 = vst.msk [vmem:[#allocation2 + $0x790] sm:$0xff] %vm2390_vm2, %v2333_v47  ;;  %v1368_v51 = vpop.f32.mrf.mxu0  ;;  %v1710_v27 = vpop.f32.mrf.mxu1 }
 0x33b   :  { %v1369_v12 = vadd.f32 %v11107_v4, %v1368_v51  ;;  %v1711_v19 = vadd.f32 %v11107_v4, %v1710_v27  ;;  %8022 = vrot.lane.b32.xlu1 %v8021_v36, %s8951_s29 }
 0x33c   :  { %8017 = vrot.lane.b32.xlu0 %v8016_v63, %s8950_s21  ;;  %v275_v63 = vld [vmem:[%s14040_s30 + $0x6c8] sm:$0xff] }
 0x33d   :  { %v1964_v8 = vmul.f32 0.2, %v1369_v12  ;;  %v2078_v61 = vmul.f32 0.2, %v1711_v19  ;;  %7335 = vmatmul.msk.f32.gmra.mxu0 %vm320_vm1, %v160_v30  ;;  %7449 = vmatmul.msk.f32.gmra.mxu1 %vm320_vm1, %v274_v57  ;;  %v163_v30 = vld [vmem:[%s14040_s30 + $0x348] sm:$0xff]  ;;  %v277_v57 = vld [vmem:[%s14040_s30 + $0x6d8] sm:$0xff] }
 0x33f   :  { %v2220_v1 = vmax.f32 %v1369_v12, %v1964_v8  ;;  %v2334_v39 = vmax.f32 %v1711_v19, %v2078_v61 }
 0x340   :  { %v2792_v25 = vld [vmem:[#allocation2 + $0x390] sm:$0xff] }
 0x341   :  { %2514 = vst.msk [vmem:[#allocation2 + $0x398] sm:$0xff] %vm2390_vm2, %v2220_v1  ;;  %v8056_v11 = vpack.i.bf16 %v2792_v25, %v11072_v33 }
 0x342   :  { %2628 = vst.msk [vmem:[#allocation2 + $0x798] sm:$0xff] %vm2390_vm2, %v2334_v39  ;;  %v1371_v52 = vpop.f32.mrf.mxu0  ;;  %v1713_v20 = vpop.f32.mrf.mxu1 }
 0x343   :  { %v1372_v6 = vadd.f32 %v11107_v4, %v1371_v52  ;;  %v1714_v49 = vadd.f32 %v11107_v4, %v1713_v20  ;;  %8042 = vrot.lane.b32.xlu1 %v8041_v32, %s8951_s29  ;;  %v278_v32 = vld [vmem:[%s14040_s30 + $0x6e0] sm:$0xff] }
 0x344   :  { %8037 = vrot.lane.b32.xlu0 %v8036_v42, %s8950_s21 }
 0x345   :  { %v1965_v54 = vmul.f32 0.2, %v1372_v6  ;;  %v2079_v44 = vmul.f32 0.2, %v1714_v49  ;;  %7336 = vmatmul.msk.f32.gmra.mxu0 %vm320_vm1, %v161_v50  ;;  %7450 = vmatmul.msk.f32.gmra.mxu1 %vm320_vm1, %v275_v63 }
 0x347   :  { %v2221_v62 = vmax.f32 %v1372_v6, %v1965_v54  ;;  %v2335_v46 = vmax.f32 %v1714_v49, %v2079_v44 }
 0x348   :  { %v2793_v15 = vld [vmem:[#allocation2 + $0x398] sm:$0xff] }
 0x349   :  { %2515 = vst.msk [vmem:[#allocation2 + $0x3a0] sm:$0xff] %vm2390_vm2, %v2221_v62  ;;  %v8061_v14 = vpack.i.bf16 %v2793_v15, %v2791_v7 }
 0x34a   :  { %2629 = vst.msk [vmem:[#allocation2 + $0x7a0] sm:$0xff] %vm2390_vm2, %v2335_v46  ;;  %v1374_v34 = vpop.f32.mrf.mxu0  ;;  %v1716_v37 = vpop.f32.mrf.mxu1  ;;  %v165_v46 = vld [vmem:[%s14040_s30 + $0x358] sm:$0xff] }
 0x34b   :  { %v1375_v0 = vadd.f32 %v11107_v4, %v1374_v34  ;;  %v1717_v60 = vadd.f32 %v11107_v4, %v1716_v37  ;;  %8062 = vrot.lane.b32.xlu1 %v8061_v14, %s8948_s25 }
 0x34c   :  { %8057 = vrot.lane.b32.xlu0 %v8056_v11, %s8953_s18 }
 0x34d   :  { %v1966_v53 = vmul.f32 0.2, %v1375_v0  ;;  %v2080_v45 = vmul.f32 0.2, %v1717_v60  ;;  %7337 = vmatmul.msk.f32.gmra.mxu0 %vm320_vm1, %v162_v28  ;;  %7451 = vmatmul.msk.f32.gmra.mxu1 %vm320_vm1, %v276_v35 }
 0x34f   :  { %v2222_v33 = vmax.f32 %v1375_v0, %v1966_v53  ;;  %v2336_v47 = vmax.f32 %v1717_v60, %v2080_v45  ;;  %v166_v45 = vld [vmem:[%s14040_s30 + $0x360] sm:$0xff] }
 0x350   :  { %v2794_v48 = vld [vmem:[#allocation2 + $0x3a0] sm:$0xff] }
 0x351   :  { %2516 = vst.msk [vmem:[#allocation2 + $0x3a8] sm:$0xff] %vm2390_vm2, %v2222_v33  ;;  %v8071_v36 = vpack.i.bf16 %v2794_v48, %v2792_v25  ;;  %v279_v25 = vld [vmem:[%s14040_s30 + $0x6e8] sm:$0xff]  ;;  %v280_v33 = vld [vmem:[%s14040_s30 + $0x6f0] sm:$0xff] }
 0x352   :  { %2630 = vst.msk [vmem:[#allocation2 + $0x7a8] sm:$0xff] %vm2390_vm2, %v2336_v47  ;;  %v1377_v51 = vpop.f32.mrf.mxu0  ;;  %v1719_v27 = vpop.f32.mrf.mxu1 }
 0x353   :  { %v1378_v5 = vadd.f32 %v11107_v4, %v1377_v51  ;;  %v1720_v12 = vadd.f32 %v11107_v4, %v1719_v27  ;;  %8067 = vrot.lane.b32.xlu1 %v8061_v14, %s8954_s27  ;;  %8072 = vrot.lane.b32.xlu2 %v8071_v36, %s14050_s28 }
 0x355   :  { %v1967_v19 = vmul.f32 0.2, %v1378_v5  ;;  %v2081_v8 = vmul.f32 0.2, %v1720_v12  ;;  %7338 = vmatmul.msk.f32.gmra.mxu0 %vm320_vm1, %v163_v30  ;;  %7452 = vmatmul.msk.f32.gmra.mxu1 %vm320_vm1, %v277_v57 }
 0x357   :  { %v2223_v61 = vmax.f32 %v1378_v5, %v1967_v19  ;;  %v2337_v16 = vmax.f32 %v1720_v12, %v2081_v8  ;;  %v167_v12 = vld [vmem:[%s14040_s30 + $0x368] sm:$0xff]  ;;  %v281_v19 = vld [vmem:[%s14040_s30 + $0x6f8] sm:$0xff] }
 0x358   :  { %v2795_v28 = vld [vmem:[#allocation2 + $0x3a8] sm:$0xff] }
 0x359   :  { %2517 = vst.msk [vmem:[#allocation2 + $0x3b0] sm:$0xff] %vm2390_vm2, %v2223_v61 }
 0x35a   :  { %2631 = vst.msk [vmem:[#allocation2 + $0x7b0] sm:$0xff] %vm2390_vm2, %v2337_v16  ;;  %v1380_v1 = vpop.f32.mrf.mxu0  ;;  %v1722_v39 = vpop.f32.mrf.mxu1 }
 0x35b   :  { %v1381_v52 = vadd.f32 %v11107_v4, %v1380_v1  ;;  %v1723_v20 = vadd.f32 %v11107_v4, %v1722_v39 }
 0x35d   :  { %v1968_v42 = vmul.f32 0.2, %v1381_v52  ;;  %v2082_v50 = vmul.f32 0.2, %v1723_v20  ;;  %7339 = vmatmul.msk.f32.gmra.mxu0 %vm320_vm1, %v164_v21  ;;  %7453 = vmatmul.msk.f32.gmra.mxu1 %vm320_vm1, %v278_v32 }
 0x35f   :  { %v2224_v63 = vmax.f32 %v1381_v52, %v1968_v42  ;;  %v2338_v6 = vmax.f32 %v1723_v20, %v2082_v50  ;;  %v168_v20 = vld [vmem:[%s14040_s30 + $0x370] sm:$0xff]  ;;  %v282_v42 = vld [vmem:[%s14040_s30 + $0x700] sm:$0xff] }
 0x360   :  { %v11175_v49 = vld [vmem:[#allocation2 + $0x3b0] sm:$0xff]  ;;  %v2989_v50 = vld [vmem:[%s13990_s3 + $0x80] sm:$0xff] }
 0x361   :  { %2518 = vst.msk [vmem:[#allocation2 + $0x3b8] sm:$0xff] %vm2390_vm2, %v2224_v63  ;;  %v8076_v54 = vpack.i.bf16 %v11175_v49, %v2794_v48  ;;  %v11228_v63 = vpop.permute.xlu0 %7942  ;;  %5433 = vmatpush.msra.mxu2 %v2989_v50 }
 0x362   :  { %2632 = vst.msk [vmem:[#allocation2 + $0x7b8] sm:$0xff] %vm2390_vm2, %v2338_v6  ;;  %v1383_v44 = vpop.f32.mrf.mxu0  ;;  %v1725_v62 = vpop.f32.mrf.mxu1 }
 0x363   :  { %v1384_v7 = vadd.f32 %v11107_v4, %v1383_v44  ;;  %v1726_v15 = vadd.f32 %v11107_v4, %v1725_v62  ;;  %8077 = vrot.lane.b32.xlu0 %v8076_v54, %s8953_s18  ;;  %14051 = vst [vmem:[#allocation14_spill] sm:$0xff] %v11228_v63 }
 0x365   :  { %v1969_v14 = vmul.f32 0.2, %v1384_v7  ;;  %v2083_v34 = vmul.f32 0.2, %v1726_v15  ;;  %7340 = vmatmul.msk.f32.gmra.mxu0 %vm320_vm1, %v165_v46  ;;  %7454 = vmatmul.msk.f32.gmra.mxu1 %vm320_vm1, %v279_v25 }
 0x367   :  { %v2225_v37 = vmax.f32 %v1384_v7, %v1969_v14  ;;  %v2339_v11 = vmax.f32 %v1726_v15, %v2083_v34 }
 0x368   :  { %v2797_v35 = vld [vmem:[#allocation2 + $0x3b8] sm:$0xff] }
 0x369   :  { %2519 = vst.msk [vmem:[#allocation2 + $0x3c0] sm:$0xff] %vm2390_vm2, %v2225_v37  ;;  %v8086_v0 = vpack.i.bf16 %v2797_v35, %v2795_v28  ;;  %v283_v28 = vld [vmem:[%s14040_s30 + $0x708] sm:$0xff] }
 0x36a   :  { %2633 = vst.msk [vmem:[#allocation2 + $0x7c0] sm:$0xff] %vm2390_vm2, %v2339_v11  ;;  %v1386_v60 = vpop.f32.mrf.mxu0  ;;  %v1728_v53 = vpop.f32.mrf.mxu1  ;;  %v169_v11 = vld [vmem:[%s14040_s30 + $0x378] sm:$0xff] }
 0x36b   :  { %v1387_v47 = vadd.f32 %v11107_v4, %v1386_v60  ;;  %v1729_v48 = vadd.f32 %v11107_v4, %v1728_v53  ;;  %8087 = vrot.lane.b32.xlu1 %v8086_v0, %s8954_s27  ;;  %8082 = vrot.lane.b32.xlu2 %v8086_v0, %s8948_s25  ;;  %v11251_v60 = vpop.permute.xlu0 %7947 }
 0x36d   :  { %v1970_v36 = vmul.f32 0.2, %v1387_v47  ;;  %v2084_v51 = vmul.f32 0.2, %v1729_v48  ;;  %7341 = vmatmul.msk.f32.gmra.mxu0 %vm320_vm1, %v166_v45  ;;  %7455 = vmatmul.msk.f32.gmra.mxu1 %vm320_vm1, %v280_v33 }
 0x36f   :  { %v2226_v27 = vmax.f32 %v1387_v47, %v1970_v36  ;;  %v2340_v30 = vmax.f32 %v1729_v48, %v2084_v51  ;;  %v7893_v51 = vpop.permute.xlu2 %7892 }
 0x370   :  { %v11234_v7 = vld [vmem:[#allocation2 + $0x3c0] sm:$0xff] }
 0x371   :  { %2520 = vst.msk [vmem:[#allocation2 + $0x3c8] sm:$0xff] %vm2390_vm2, %v2226_v27 }
 0x372   :  { %2634 = vst.msk [vmem:[#allocation2 + $0x7c8] sm:$0xff] %vm2390_vm2, %v2340_v30  ;;  %v1389_v57 = vpop.f32.mrf.mxu0  ;;  %v1731_v5 = vpop.f32.mrf.mxu1 }
 0x373   :  { %v1390_v8 = vadd.f32 %v11107_v4, %v1389_v57  ;;  %v1732_v61 = vadd.f32 %v11107_v4, %v1731_v5  ;;  %v170_v5 = vld [vmem:[%s14040_s30 + $0x380] sm:$0xff] }
 0x375   :  { %v1971_v16 = vmul.f32 0.2, %v1390_v8  ;;  %v2085_v1 = vmul.f32 0.2, %v1732_v61  ;;  %7342 = vmatmul.msk.f32.gmra.mxu0 %vm320_vm1, %v167_v12  ;;  %7456 = vmatmul.msk.f32.gmra.mxu1 %vm320_vm1, %v281_v19  ;;  %v284_v12 = vld [vmem:[%s14040_s30 + $0x710] sm:$0xff] }
 0x377   :  { %v2227_v39 = vmax.f32 %v1390_v8, %v1971_v16  ;;  %v2341_v21 = vmax.f32 %v1732_v61, %v2085_v1  ;;  %v7953_v61 = vpop.permute.xlu1 %7952  ;;  %v11267_v16 = vpop.permute.xlu0 %7972 }
 0x378   :  { %v2799_v48 = vld [vmem:[#allocation2 + $0x3c8] sm:$0xff]  ;;  %14052 = vst [vmem:[#allocation15_spill] sm:$0xff] %v11267_v16  ;;  %v7905_v16 = vunpack.i.h.bf16 %v10839_v17 }
 0x379   :  { %2521 = vst.msk [vmem:[#allocation2 + $0x3d0] sm:$0xff] %vm2390_vm2, %v2227_v39 }
 0x37a   :  { %2635 = vst.msk [vmem:[#allocation2 + $0x7d0] sm:$0xff] %vm2390_vm2, %v2341_v21  ;;  %v1392_v32 = vpop.f32.mrf.mxu0  ;;  %v1734_v52 = vpop.f32.mrf.mxu1 }
 0x37b   :  { %v1393_v6 = vadd.f32 %v11107_v4, %v1392_v32  ;;  %v1735_v54 = vadd.f32 %v11107_v4, %v1734_v52  ;;  %v11271_v52 = vpop.f32.mrf.mxu2 }
 0x37d   :  { %v1972_v44 = vmul.f32 0.2, %v1393_v6  ;;  %v2086_v62 = vmul.f32 0.2, %v1735_v54  ;;  %7343 = vmatmul.msk.f32.gmra.mxu0 %vm320_vm1, %v168_v20  ;;  %7457 = vmatmul.msk.f32.gmra.mxu1 %vm320_vm1, %v282_v42  ;;  %v11273_v20 = vpop.permute.xlu2 %7932 }
 0x37f   :  { %v2228_v46 = vmax.f32 %v1393_v6, %v1972_v44  ;;  %v2342_v25 = vmax.f32 %v1735_v54, %v2086_v62  ;;  %v171_v6 = vld [vmem:[%s14040_s30 + $0x388] sm:$0xff]  ;;  %v285_v54 = vld [vmem:[%s14040_s30 + $0x718] sm:$0xff]  ;;  %v7875_v44 = vunpack.i.h.bf16 %v10925_v29  ;;  %v7874_v62 = vunpack.i.l.bf16 %v10925_v29 }
 0x380   :  { %v11236_v15 = vld [vmem:[#allocation2 + $0x3d0] sm:$0xff]  ;;  %v7955_v29 = vunpack.i.h.bf16 %v7953_v61 }
 0x381   :  { %2522 = vst.msk [vmem:[#allocation2 + $0x3d8] sm:$0xff] %vm2390_vm2, %v2228_v46  ;;  %v8091_v14 = vpack.i.bf16 %v11236_v15, %v11234_v7  ;;  %v11744_v31 = vld [vmem:[#allocation2 + $0x3d0] sm:$0xff] }
 0x382   :  { %2636 = vst.msk [vmem:[#allocation2 + $0x7e8] sm:$0xff] %vm2390_vm2, %v2342_v25  ;;  %v1395_v34 = vpop.f32.mrf.mxu0  ;;  %v1737_v37 = vpop.f32.mrf.mxu1 }
 0x383   :  { %v1396_v35 = vadd.f32 %v11107_v4, %v1395_v34  ;;  %v1738_v0 = vadd.f32 %v11107_v4, %v1737_v37  ;;  %8092 = vrot.lane.b32.xlu0 %v8091_v14, %s8953_s18  ;;  %v7895_v14 = vunpack.i.h.bf16 %v7893_v51  ;;  %v7894_v34 = vunpack.i.l.bf16 %v7893_v51 }
 0x384   :  { %v7950_v37 = vunpack.i.h.bf16 %v11251_v60 }
 0x385   :  { %v1973_v53 = vmul.f32 0.2, %v1396_v35  ;;  %v2087_v45 = vmul.f32 0.2, %v1738_v0  ;;  %7344 = vmatmul.msk.f32.gmra.mxu0 %vm320_vm1, %v169_v11  ;;  %7458 = vmatmul.msk.f32.gmra.mxu1 %vm320_vm1, %v283_v28  ;;  %v7949_v11 = vunpack.i.l.bf16 %v11251_v60  ;;  %v11289_v28 = vpop.permute.xlu1 %7962 }
 0x386   :  { %14053 = vst [vmem:[#allocation16_spill] sm:$0xff] %v11289_v28  ;;  %v8856_v28 = vld [vmem:[#allocation2 + $0x160] sm:$0xff] }
 0x387   :  { %v2229_v33 = vmax.f32 %v1396_v35, %v1973_v53  ;;  %v2343_v47 = vmax.f32 %v1738_v0, %v2087_v45  ;;  %v7954_v45 = vunpack.i.l.bf16 %v7953_v61 }
 0x388   :  { %v2801_v36 = vld [vmem:[#allocation2 + $0x3d8] sm:$0xff] }
 0x389   :  { %2523 = vst.msk [vmem:[#allocation2 + $0x3e0] sm:$0xff] %vm2390_vm2, %v2229_v33  ;;  %v8101_v27 = vpack.i.bf16 %v2801_v36, %v2799_v48  ;;  %v11293_v33 = vld [vmem:[#allocation2 + $0x250] sm:$0xff]  ;;  %v8851_v48 = vld [vmem:[#allocation2 + $0x240] sm:$0xff] }
 0x38a   :  { %2637 = vst.msk [vmem:[#allocation2 + $0x7f0] sm:$0xff] %vm2390_vm2, %v2343_v47  ;;  %v1398_v30 = vpop.f32.mrf.mxu0  ;;  %v1740_v57 = vpop.f32.mrf.mxu1  ;;  %v4639_v47 = vsel %vm2390_vm2, %v11293_v33, %v7875_v44  ;;  %v4638_v36 = vsel %vm2390_vm2, %v8851_v48, %v7874_v62 }
 0x38b   :  { %v1399_v19 = vadd.f32 %v11107_v4, %v1398_v30  ;;  %v1741_v8 = vadd.f32 %v11107_v4, %v1740_v57  ;;  %8102 = vrot.lane.b32.xlu1 %v8101_v27, %s8954_s27  ;;  %8097 = vrot.lane.b32.xlu0 %v8101_v27, %s8948_s25  ;;  %v2923_v27 = vld [vmem:[#allocation2 + $0x7e8] sm:$0xff]  ;;  %v4703_v30 = vsel %vm4686_vm3, %v4638_v36, %v7894_v34  ;;  %v11310_v44 = vpop.f32.mrf.mxu2 }
 0x38c   :  { %v4704_v57 = vsel %vm4686_vm3, %v4639_v47, %v7895_v14 }
 0x38d   :  { %v1974_v1 = vmul.f32 0.2, %v1399_v19  ;;  %v2088_v39 = vmul.f32 0.2, %v1741_v8  ;;  %7345 = vmatmul.msk.f32.gmra.mxu0 %vm320_vm1, %v170_v5  ;;  %7459 = vmatmul.msk.f32.gmra.mxu1 %vm320_vm1, %v284_v12  ;;  %v7958_v5 = vpop.permute.xlu2 %7957  ;;  %v4769_v12 = vsel %vm4751_vm5, %v4704_v57, %v7950_v37 }
 0x38e   :  { %v7960_v62 = vunpack.i.h.bf16 %v7958_v5 }
 0x38f   :  { %v2230_v21 = vmax.f32 %v1399_v19, %v1974_v1  ;;  %v2344_v32 = vmax.f32 %v1741_v8, %v2088_v39  ;;  %v4768_v19 = vsel %vm4751_vm5, %v4703_v30, %v7949_v11 }
 0x390   :  { %v4833_v61 = vsel %vm4816_vm4, %v4768_v19, %v7954_v45 }
 0x391   :  { %2524 = vst.msk [vmem:[#allocation2 + $0x3f8] sm:$0xff] %vm2390_vm2, %v2230_v21 }
 0x392   :  { %2638 = vst.msk [vmem:[#allocation2 + $0x7f8] sm:$0xff] %vm2390_vm2, %v2344_v32  ;;  %v1401_v42 = vpop.f32.mrf.mxu0  ;;  %v1743_v50 = vpop.f32.mrf.mxu1  ;;  %v4834_v32 = vsel %vm4816_vm4, %v4769_v12, %v7955_v29  ;;  %v2803_v29 = vld [vmem:[#allocation2 + $0x3f0] sm:$0xff] }
 0x393   :  { %v1402_v46 = vadd.f32 %v11107_v4, %v1401_v42  ;;  %v1744_v25 = vadd.f32 %v11107_v4, %v1743_v50 }
 0x395   :  { %v1975_v35 = vmul.f32 0.2, %v1402_v46  ;;  %v2089_v0 = vmul.f32 0.2, %v1744_v25  ;;  %7346 = vmatmul.msk.f32.gmra.mxu0 %vm320_vm1, %v171_v6  ;;  %7460 = vmatmul.msk.f32.gmra.mxu1 %vm320_vm1, %v285_v54  ;;  %v7978_v53 = vpop.permute.xlu0 %7977 }
 0x396   :  { %v7980_v42 = vunpack.i.h.bf16 %v7978_v53  ;;  %v7979_v50 = vunpack.i.l.bf16 %v7978_v53  ;;  %v4899_v53 = vsel %vm4881_vm6, %v4834_v32, %v7960_v62  ;;  %v8852_v62 = vld [vmem:[#allocation2 + $0x130] sm:$0xff] }
 0x397   :  { %v2231_v60 = vmax.f32 %v1402_v46, %v1975_v35  ;;  %v2345_v51 = vmax.f32 %v1744_v25, %v2089_v0  ;;  %v7959_v46 = vunpack.i.l.bf16 %v7958_v5 }
 0x398   :  { %v4964_v36 = vsel %vm4946_vm7, %v4899_v53, %v7980_v42 }
 0x399   :  { %2525 = vst.msk [vmem:[#allocation2 + $0x400] sm:$0xff] %vm2390_vm2, %v2231_v60  ;;  %v2925_v8 = vld [vmem:[#allocation2 + $0x7f8] sm:$0xff]  ;;  %v4898_v0 = vsel %vm4881_vm6, %v4833_v61, %v7959_v46 }
 0x39a   :  { %2639 = vst.msk [vmem:[#allocation2 + $0x800] sm:$0xff] %vm2390_vm2, %v2345_v51  ;;  %v1404_v1 = vpop.f32.mrf.mxu0  ;;  %v1746_v39 = vpop.f32.mrf.mxu1  ;;  %v11305_v21 = vpack.i.bf16 %v2925_v8, %v2923_v27  ;;  %v4963_v48 = vsel %vm4946_vm7, %v4898_v0, %v7979_v50 }
 0x39b   :  { %v1405_v6 = vadd.f32 %v11107_v4, %v1404_v1  ;;  %v1747_v54 = vadd.f32 %v11107_v4, %v1746_v39  ;;  %v11327_v8 = vpop.f32.mrf.mxu2 }
 0x39c   :  { %14054 = vst [vmem:[#allocation17_spill] sm:$0xff] %v11305_v21  ;;  %8107 = vrot.lane.b32.xlu1 %v11305_v21, %s8948_s25 }
 0x39d   :  { %v1976_v25 = vmul.f32 0.2, %v1405_v6  ;;  %v2090_v14 = vmul.f32 0.2, %v1747_v54  ;;  %v7988_v34 = vpop.permute.xlu1 %7987  ;;  %v11314_v37 = vpop.permute.xlu0 %7982 }
 0x39e   :  { %v7990_v11 = vunpack.i.h.bf16 %v7988_v34  ;;  %v7989_v35 = vunpack.i.l.bf16 %v7988_v34 }
 0x39f   :  { %v2232_v45 = vmax.f32 %v1405_v6, %v1976_v25  ;;  %v2346_v47 = vmax.f32 %v1747_v54, %v2090_v14  ;;  %v2804_v6 = vld [vmem:[#allocation2 + $0x3f8] sm:$0xff] }
 0x3a0   :  { %v5028_v60 = vsel %vm5011_vm8, %v4963_v48, %v7989_v35  ;;  %v5029_v51 = vsel %vm5011_vm8, %v4964_v36, %v7990_v11  ;;  %v2805_v27 = vld [vmem:[#allocation2 + $0x400] sm:$0xff]  ;;  %v11339_v35 = vpop.permute.xlu2 %7967 }
 0x3a1   :  { %2526 = vst.msk [vmem:[#allocation2 + $0x408] sm:$0xff] %vm2390_vm2, %v2232_v45  ;;  %5273 = vmatmul.f32.gmra.mxu2 %v5028_v60  ;;  %5276 = vmatmul.f32.vlgmr.msra.gmra.mxu3 %v5029_v51  ;;  %v8111_v30 = vpack.i.bf16 %v2805_v27, %v2803_v29  ;;  %v8853_v51 = vld [vmem:[#allocation2 + $0x140] sm:$0xff] }
 0x3a2   :  { %2640 = vst.msk [vmem:[#allocation2 + $0x808] sm:$0xff] %vm2390_vm2, %v2346_v47  ;;  %v1407_v57 = vpop.f32.mrf.mxu0  ;;  %v1749_v5 = vpop.f32.mrf.mxu1 }
 0x3a3   :  { %v1408_v12 = vadd.f32 %v11107_v4, %v1407_v57  ;;  %v1750_v19 = vadd.f32 %v11107_v4, %v1749_v5  ;;  %8112 = vrot.lane.b32.xlu0 %v8111_v30, %s8950_s21  ;;  %14055 = vst [vmem:[#allocation18_spill] sm:$0xff] %v11339_v35  ;;  %v11345_v47 = vpop.f32.mrf.mxu2 }
 0x3a5   :  { %v1977_v61 = vmul.f32 0.2, %v1408_v12  ;;  %v2091_v1 = vmul.f32 0.2, %v1750_v19  ;;  %v11329_v39 = vpop.permute.xlu1 %8002 }
 0x3a6   :  { %v11331_v32 = vpop.permute.xlu0 %7997 }
 0x3a7   :  { %v2233_v42 = vmax.f32 %v1408_v12, %v1977_v61  ;;  %v2347_v50 = vmax.f32 %v1750_v19, %v2091_v1 }
 0x3a8   :  { %v2806_v54 = vld [vmem:[#allocation2 + $0x408] sm:$0xff] }
 0x3a9   :  { %2527 = vst.msk [vmem:[#allocation2 + $0x410] sm:$0xff] %vm2390_vm2, %v2233_v42  ;;  %7489 = vmatmul.msk.f32.vlgmr.msra.gmra.mxu2 %vm2390_vm2, %v8852_v62  ;;  %v8116_v46 = vpack.i.bf16 %v2806_v54, %v2804_v6  ;;  %v7993_v54 = vpop.permute.xlu2 %7992 }
 0x3aa   :  { %2641 = vst.msk [vmem:[#allocation2 + $0x810] sm:$0xff] %vm2390_vm2, %v2347_v50  ;;  %v1410_v25 = vpop.f32.mrf.mxu0  ;;  %v1752_v14 = vpop.f32.mrf.mxu1 }
 0x3ab   :  { %v1411_v34 = vadd.f32 %v11107_v4, %v1410_v25  ;;  %v1753_v11 = vadd.f32 %v11107_v4, %v1752_v14  ;;  %8117 = vrot.lane.b32.xlu1 %v8116_v46, %s8951_s29  ;;  %v11360_v6 = vpop.f32.mrf.mxu2  ;;  %v2927_v46 = vld [vmem:[#allocation2 + $0x808] sm:$0xff]  ;;  %v8854_v25 = vld [vmem:[#allocation2 + $0x150] sm:$0xff] }
 0x3ad   :  { %v1978_v0 = vmul.f32 0.2, %v1411_v34  ;;  %v2092_v53 = vmul.f32 0.2, %v1753_v11  ;;  %v11341_v29 = vpop.permute.xlu1 %8022 }
 0x3ae   :  { %v11343_v45 = vpop.permute.xlu0 %8017 }
 0x3af   :  { %v2234_v48 = vmax.f32 %v1411_v34, %v1978_v0  ;;  %v2348_v36 = vmax.f32 %v1753_v11, %v2092_v53  ;;  %v7904_v34 = vunpack.i.l.bf16 %v10839_v17 }
 0x3b0   :  { %v11347_v60 = vld [vmem:[#allocation2 + $0x410] sm:$0xff] }
 0x3b1   :  { %2528 = vst.msk [vmem:[#allocation2 + $0x418] sm:$0xff] %vm2390_vm2, %v2234_v48  ;;  %7490 = vmatmul.msk.f32.gmra.mxu2 %vm2390_vm2, %v8853_v51  ;;  %v8121_v30 = vpack.i.bf16 %v11347_v60, %v2805_v27  ;;  %v7994_v48 = vunpack.i.l.bf16 %v7993_v54  ;;  %v8008_v35 = vpop.permute.xlu2 %8007 }
 0x3b2   :  { %2642 = vst.msk [vmem:[#allocation2 + $0x818] sm:$0xff] %vm2390_vm2, %v2348_v36  ;;  %v1413_v57 = vpop.f32.mrf.mxu0  ;;  %v1755_v5 = vpop.f32.mrf.mxu1 }
 0x3b3   :  { %v1414_v12 = vadd.f32 %v11107_v4, %v1413_v57  ;;  %v1756_v19 = vadd.f32 %v11107_v4, %v1755_v5  ;;  %8122 = vrot.lane.b32.xlu2 %v8121_v30, %s14044_s24  ;;  %v7999_v30 = vunpack.i.l.bf16 %v11331_v32 }
 0x3b5   :  { %v1979_v61 = vmul.f32 0.2, %v1414_v12  ;;  %v2093_v1 = vmul.f32 0.2, %v1756_v19  ;;  %v11356_v42 = vpop.permute.xlu1 %8042 }
 0x3b6   :  { %v11358_v50 = vpop.permute.xlu0 %8037 }
 0x3b7   :  { %v2235_v27 = vmax.f32 %v1414_v12, %v1979_v61  ;;  %v2349_v62 = vmax.f32 %v1756_v19, %v2093_v1  ;;  %v11375_v19 = vld [vmem:[#allocation2 + $0x260] sm:$0xff] }
 0x3b8   :  { %v4640_v61 = vsel %vm2390_vm2, %v11375_v19, %v7904_v34 }
 0x3b9   :  { %2529 = vst.msk [vmem:[#allocation2 + $0x420] sm:$0xff] %vm2390_vm2, %v2235_v27  ;;  %7491 = vmatmul.msk.f32.gmra.mxu2 %vm2390_vm2, %v8854_v25  ;;  %v2929_v14 = vld [vmem:[#allocation2 + $0x818] sm:$0xff]  ;;  %v4705_v1 = vsel %vm4686_vm3, %v4640_v61, %v7994_v48  ;;  %v8004_v27 = vunpack.i.l.bf16 %v11329_v39  ;;  %v7995_v48 = vunpack.i.h.bf16 %v7993_v54  ;;  %v8009_v61 = vunpack.i.l.bf16 %v8008_v35 }
 0x3ba   :  { %2643 = vst.msk [vmem:[#allocation2 + $0x820] sm:$0xff] %vm2390_vm2, %v2349_v62  ;;  %v1416_v11 = vpop.f32.mrf.mxu0  ;;  %v1758_v0 = vpop.f32.mrf.mxu1  ;;  %v11366_v53 = vpack.i.bf16 %v2929_v14, %v2927_v46  ;;  %v4770_v25 = vsel %vm4751_vm5, %v4705_v1, %v7999_v30  ;;  %v8000_v1 = vunpack.i.h.bf16 %v11331_v32 }
 0x3bb   :  { %v1417_v36 = vadd.f32 %v11107_v4, %v1416_v11  ;;  %v1759_v51 = vadd.f32 %v11107_v4, %v1758_v0  ;;  %v11384_v0 = vpop.f32.mrf.mxu2  ;;  %v4835_v17 = vsel %vm4816_vm4, %v4770_v25, %v8004_v27 }
 0x3bc   :  { %14056 = vst [vmem:[#allocation19_spill] sm:$0xff] %v11366_v53  ;;  %8127 = vrot.lane.b32.xlu2 %v11366_v53, %s8948_s25  ;;  %v11701_v53 = vld [vmem:[#allocation2 + $0x3b0] sm:$0xff] }
 0x3bd   :  { %v1980_v57 = vmul.f32 0.2, %v1417_v36  ;;  %v2094_v5 = vmul.f32 0.2, %v1759_v51  ;;  %v11373_v12 = vpop.permute.xlu1 %8062 }
 0x3be   :  { %v8058_v14 = vpop.permute.xlu0 %8057 }
 0x3bf   :  { %v2236_v62 = vmax.f32 %v1417_v36, %v1980_v57  ;;  %v2350_v46 = vmax.f32 %v1759_v51, %v2094_v5  ;;  %v8059_v30 = vunpack.i.l.bf16 %v8058_v14 }
 0x3c0   :  { %v11382_v11 = vld [vmem:[#allocation2 + $0x420] sm:$0xff] }
 0x3c1   :  { %2530 = vst.msk [vmem:[#allocation2 + $0x428] sm:$0xff] %vm2390_vm2, %v2236_v62  ;;  %7492 = vmatmul.msk.f32.gmra.mxu2 %vm2390_vm2, %v8856_v28  ;;  %v11396_v62 = vld [vmem:[#allocation2 + $0x270] sm:$0xff] }
 0x3c2   :  { %2644 = vst.msk [vmem:[#allocation2 + $0x828] sm:$0xff] %vm2390_vm2, %v2350_v46  ;;  %v1419_v36 = vpop.f32.mrf.mxu0  ;;  %v1761_v51 = vpop.f32.mrf.mxu1  ;;  %v4641_v28 = vsel %vm2390_vm2, %v11396_v62, %v7905_v16  ;;  %v8858_v16 = vld [vmem:[#allocation2 + $0x170] sm:$0xff] }
 0x3c3   :  { %v1420_v57 = vadd.f32 %v11107_v4, %v1419_v36  ;;  %v1762_v5 = vadd.f32 %v11107_v4, %v1761_v51  ;;  %v4706_v63 = vsel %vm4686_vm3, %v4641_v28, %v7995_v48  ;;  %v4900_v36 = vsel %vm4881_vm6, %v4835_v17, %v8009_v61  ;;  %v11406_v43 = vpop.f32.mrf.mxu2 }
 0x3c4   :  { %v8005_v51 = vunpack.i.h.bf16 %v11329_v39  ;;  %v4965_v25 = vsel %vm4946_vm7, %v4900_v36, %v8059_v30  ;;  %v4771_v32 = vsel %vm4751_vm5, %v4706_v63, %v8000_v1 }
 0x3c5   :  { %v1981_v54 = vmul.f32 0.2, %v1420_v57  ;;  %v2095_v34 = vmul.f32 0.2, %v1762_v5  ;;  %v8068_v46 = vpop.permute.xlu1 %8067 }
 0x3c6   :  { %v8069_v24 = vunpack.i.l.bf16 %v8068_v46  ;;  %v4836_v63 = vsel %vm4816_vm4, %v4771_v32, %v8005_v51 }
 0x3c7   :  { %v2237_v41 = vmax.f32 %v1420_v57, %v1981_v54  ;;  %v2351_v27 = vmax.f32 %v1762_v5, %v2095_v34  ;;  %v8060_v57 = vunpack.i.h.bf16 %v8058_v14  ;;  %v8070_v5 = vunpack.i.h.bf16 %v8068_v46 }
 0x3c8   :  { %v5030_v9 = vsel %vm5011_vm8, %v4965_v25, %v8069_v24  ;;  %v8010_v24 = vunpack.i.h.bf16 %v8008_v35  ;;  %v7919_v46 = vunpack.i.l.bf16 %v10860_v26 }
 0x3c9   :  { %2531 = vst.msk [vmem:[#allocation2 + $0x430] sm:$0xff] %vm2390_vm2, %v2237_v41  ;;  %5279 = vmatmul.f32.gmra.mxu3 %v5030_v9  ;;  %7493 = vmatmul.msk.f32.gmra.mxu2 %vm2390_vm2, %v8858_v16  ;;  %v8013_v41 = vpop.permute.xlu2 %8012 }
 0x3ca   :  { %2645 = vst.msk [vmem:[#allocation2 + $0x830] sm:$0xff] %vm2390_vm2, %v2351_v27  ;;  %v1422_v48 = vpop.f32.mrf.mxu0  ;;  %v1764_v39 = vpop.f32.mrf.mxu1  ;;  %v4901_v9 = vsel %vm4881_vm6, %v4836_v63, %v8010_v24  ;;  %v8859_v27 = vld [vmem:[#allocation2 + $0x180] sm:$0xff]  ;;  %v8014_v16 = vunpack.i.l.bf16 %v8013_v41 }
 0x3cb   :  { %v1423_v34 = vadd.f32 %v11107_v4, %v1422_v48  ;;  %v1765_v30 = vadd.f32 %v11107_v4, %v1764_v39  ;;  %v4966_v54 = vsel %vm4946_vm7, %v4901_v9, %v8060_v57  ;;  %v11425_v32 = vpop.f32.mrf.mxu2  ;;  %v8019_v57 = vunpack.i.l.bf16 %v11343_v45  ;;  %v11431_v63 = vld [vmem:[#allocation2 + $0x280] sm:$0xff] }
 0x3cc   :  { %v5031_v36 = vsel %vm5011_vm8, %v4966_v54, %v8070_v5  ;;  %v4642_v24 = vsel %vm2390_vm2, %v11431_v63, %v7919_v46  ;;  %v8181_v46 = vpack.i.bf16 %v11234_v7, %v11175_v49  ;;  %v8020_v7 = vunpack.i.h.bf16 %v11343_v45 }
 0x3cd   :  { %v1982_v17 = vmul.f32 0.2, %v1423_v34  ;;  %v2096_v61 = vmul.f32 0.2, %v1765_v30  ;;  %v4707_v5 = vsel %vm4686_vm3, %v4642_v24, %v8014_v16 }
 0x3cf   :  { %v2238_v1 = vmax.f32 %v1423_v34, %v1982_v17  ;;  %v2352_v28 = vmax.f32 %v1765_v30, %v2096_v61  ;;  %v8024_v17 = vunpack.i.l.bf16 %v11341_v29 }
 0x3d0   :  { %v11417_v14 = vld [vmem:[#allocation2 + $0x430] sm:$0xff] }
 0x3d1   :  { %2532 = vst.msk [vmem:[#allocation2 + $0x438] sm:$0xff] %vm2390_vm2, %v2238_v1  ;;  %5282 = vmatmul.f32.gmra.mxu3 %v5031_v36  ;;  %7494 = vmatmul.msk.f32.gmra.mxu2 %vm2390_vm2, %v8859_v27  ;;  %v8166_v35 = vpack.i.bf16 %v11417_v14, %v11382_v11  ;;  %v2931_v1 = vld [vmem:[#allocation2 + $0x828] sm:$0xff]  ;;  %v7920_v36 = vunpack.i.h.bf16 %v10860_v26  ;;  %v8028_v27 = vpop.permute.xlu2 %8027 }
 0x3d2   :  { %2646 = vst.msk [vmem:[#allocation2 + $0x838] sm:$0xff] %vm2390_vm2, %v2352_v28  ;;  %v1425_v51 = vpop.f32.mrf.mxu0  ;;  %v1767_v25 = vpop.f32.mrf.mxu1  ;;  %v4772_v28 = vsel %vm4751_vm5, %v4707_v5, %v8019_v57  ;;  %v8029_v49 = vunpack.i.l.bf16 %v8028_v27 }
 0x3d3   :  { %v1426_v48 = vadd.f32 %v11107_v4, %v1425_v51  ;;  %v1768_v39 = vadd.f32 %v11107_v4, %v1767_v25  ;;  %8167 = vrot.lane.b32.xlu2 %v8166_v35, %s14044_s24  ;;  %v8861_v35 = vld [vmem:[#allocation2 + $0x190] sm:$0xff]  ;;  %v8015_v25 = vunpack.i.h.bf16 %v8013_v41  ;;  %v11446_v57 = vpop.f32.mrf.mxu2  ;;  %v4837_v24 = vsel %vm4816_vm4, %v4772_v28, %v8024_v17 }
 0x3d4   :  { %v11455_v41 = vld [vmem:[#allocation2 + $0x290] sm:$0xff]  ;;  %v8025_v17 = vunpack.i.h.bf16 %v11341_v29 }
 0x3d5   :  { %v1983_v34 = vmul.f32 0.2, %v1426_v48  ;;  %v2097_v30 = vmul.f32 0.2, %v1768_v39  ;;  %v8078_v54 = vpop.permute.xlu0 %8077  ;;  %v4643_v5 = vsel %vm2390_vm2, %v11455_v41, %v7920_v36  ;;  %v8863_v36 = vld [vmem:[#allocation2 + $0x1a0] sm:$0xff] }
 0x3d6   :  { %v8079_v26 = vunpack.i.l.bf16 %v8078_v54 }
 0x3d7   :  { %v2239_v61 = vmax.f32 %v1426_v48, %v1983_v34  ;;  %v2353_v9 = vmax.f32 %v1768_v39, %v2097_v30 }
 0x3d9   :  { %2533 = vst.msk [vmem:[#allocation2 + $0x440] sm:$0xff] %vm2390_vm2, %v2239_v61  ;;  %7495 = vmatmul.msk.f32.gmra.mxu2 %vm2390_vm2, %v8861_v35  ;;  %v2933_v51 = vld [vmem:[#allocation2 + $0x838] sm:$0xff]  ;;  %v4708_v35 = vsel %vm4686_vm3, %v4643_v5, %v8015_v25 }
 0x3da   :  { %2647 = vst.msk [vmem:[#allocation2 + $0x840] sm:$0xff] %vm2390_vm2, %v2353_v9  ;;  %v1428_v16 = vpop.f32.mrf.mxu0  ;;  %v1770_v48 = vpop.f32.mrf.mxu1  ;;  %v11444_v39 = vpack.i.bf16 %v2933_v51, %v2931_v1 }
 0x3db   :  { %v1429_v34 = vadd.f32 %v11107_v4, %v1428_v16  ;;  %v1771_v30 = vadd.f32 %v11107_v4, %v1770_v48  ;;  %8182 = vrot.lane.b32.xlu2 %v8181_v46, %s14050_s28  ;;  %v4902_v46 = vsel %vm4881_vm6, %v4837_v24, %v8029_v49  ;;  %v4773_v48 = vsel %vm4751_vm5, %v4708_v35, %v8020_v7 }
 0x3dc   :  { %14057 = vst [vmem:[#allocation20_spill] sm:$0xff] %v11444_v39  ;;  %8132 = vrot.lane.b32.xlu0 %v11444_v39, %s8948_s25  ;;  %v4967_v16 = vsel %vm4946_vm7, %v4902_v46, %v8079_v26  ;;  %v8080_v26 = vunpack.i.h.bf16 %v8078_v54  ;;  %v4838_v49 = vsel %vm4816_vm4, %v4773_v48, %v8025_v17  ;;  %v8030_v7 = vunpack.i.h.bf16 %v8028_v27 }
 0x3dd   :  { %v1984_v61 = vmul.f32 0.2, %v1429_v34  ;;  %v2098_v9 = vmul.f32 0.2, %v1771_v30  ;;  %v8088_v1 = vpop.permute.xlu1 %8087 }
 0x3de   :  { %v8089_v51 = vunpack.i.l.bf16 %v8088_v1  ;;  %v8090_v5 = vunpack.i.h.bf16 %v8088_v1  ;;  %v4903_v35 = vsel %vm4881_vm6, %v4838_v49, %v8030_v7 }
 0x3df   :  { %v2240_v28 = vmax.f32 %v1429_v34, %v1984_v61  ;;  %v2354_v45 = vmax.f32 %v1771_v30, %v2098_v9 }
 0x3e0   :  { %v5032_v39 = vsel %vm5011_vm8, %v4967_v16, %v8089_v51  ;;  %v11465_v23 = vld [vmem:[#allocation2 + $0x440] sm:$0xff] }
 0x3e1   :  { %2534 = vst.msk [vmem:[#allocation2 + $0x448] sm:$0xff] %vm2390_vm2, %v2240_v28  ;;  %5285 = vmatmul.f32.gmra.mxu3 %v5032_v39  ;;  %7496 = vmatmul.msk.f32.gmra.mxu2 %vm2390_vm2, %v8863_v36  ;;  %v11475_v39 = vpop.f32.mrf.mxu2  ;;  %v4968_v28 = vsel %vm4946_vm7, %v4903_v35, %v8080_v26  ;;  %v8033_v26 = vpop.permute.xlu2 %8032  ;;  %v8039_v35 = vunpack.i.l.bf16 %v11358_v50 }
 0x3e2   :  { %2648 = vst.msk [vmem:[#allocation2 + $0x848] sm:$0xff] %vm2390_vm2, %v2354_v45  ;;  %v1431_v29 = vpop.f32.mrf.mxu0  ;;  %v1773_v34 = vpop.f32.mrf.mxu1  ;;  %v5033_v54 = vsel %vm5011_vm8, %v4968_v28, %v8090_v5  ;;  %v8034_v5 = vunpack.i.l.bf16 %v8033_v26 }
 0x3e3   :  { %v1432_v30 = vadd.f32 %v11107_v4, %v1431_v29  ;;  %v1774_v24 = vadd.f32 %v11107_v4, %v1773_v34 }
 0x3e5   :  { %v1985_v61 = vmul.f32 0.2, %v1432_v30  ;;  %v2099_v9 = vmul.f32 0.2, %v1774_v24 }
 0x3e7   :  { %v2241_v51 = vmax.f32 %v1432_v30, %v1985_v61  ;;  %v2355_v46 = vmax.f32 %v1774_v24, %v2099_v9  ;;  %v7934_v24 = vunpack.i.l.bf16 %v11273_v20 }
 0x3e9   :  { %2535 = vst.msk [vmem:[#allocation2 + $0x450] sm:$0xff] %vm2390_vm2, %v2241_v51  ;;  %5288 = vmatmul.f32.gmra.mxu3 %v5033_v54  ;;  %7497 = vmatmul.msk.f32.gmra.mxu2 %vm2390_vm2, %v11293_v33  ;;  %v11486_v16 = vpop.f32.mrf.mxu2  ;;  %v11505_v54 = vld [vmem:[#allocation2 + $0x3e0] sm:$0xff] }
 0x3ea   :  { %2649 = vst.msk [vmem:[#allocation2 + $0x850] sm:$0xff] %vm2390_vm2, %v2355_v46  ;;  %v1434_v27 = vpop.f32.mrf.mxu0  ;;  %v1776_v1 = vpop.f32.mrf.mxu1  ;;  %v11501_v46 = vld [vmem:[#allocation2 + $0x2a0] sm:$0xff] }
 0x3eb   :  { %v1435_v17 = vadd.f32 %v11107_v4, %v1434_v27  ;;  %v1777_v45 = vadd.f32 %v11107_v4, %v1776_v1  ;;  %v4644_v28 = vsel %vm2390_vm2, %v11501_v46, %v7934_v24 }
 0x3ec   :  { %v4709_v1 = vsel %vm4686_vm3, %v4644_v28, %v8034_v5  ;;  %v11533_v28 = vld [vmem:[#allocation2 + $0x2b0] sm:$0xff] }
 0x3ed   :  { %v1986_v48 = vmul.f32 0.2, %v1435_v17  ;;  %v2100_v36 = vmul.f32 0.2, %v1777_v45 }
 0x3ef   :  { %v2242_v29 = vmax.f32 %v1435_v17, %v1986_v48  ;;  %v2356_v34 = vmax.f32 %v1777_v45, %v2100_v36  ;;  %v8044_v17 = vunpack.i.l.bf16 %v11356_v42  ;;  %v2935_v48 = vld [vmem:[#allocation2 + $0x848] sm:$0xff]  ;;  %v4774_v36 = vsel %vm4751_vm5, %v4709_v1, %v8039_v35 }
 0x3f0   :  { %v11488_v30 = vld [vmem:[#allocation2 + $0x450] sm:$0xff] }
 0x3f1   :  { %2536 = vst.msk [vmem:[#allocation2 + $0x458] sm:$0xff] %vm2390_vm2, %v2242_v29  ;;  %7498 = vmatmul.msk.f32.gmra.mxu2 %vm2390_vm2, %v11375_v19  ;;  %v8196_v33 = vpack.i.bf16 %v11488_v30, %v11465_v23  ;;  %v11507_v27 = vpop.f32.mrf.mxu2 }
 0x3f2   :  { %2650 = vst.msk [vmem:[#allocation2 + $0x858] sm:$0xff] %vm2390_vm2, %v2356_v34  ;;  %v1437_v49 = vpop.f32.mrf.mxu0  ;;  %v1779_v7 = vpop.f32.mrf.mxu1  ;;  %v7935_v34 = vunpack.i.h.bf16 %v11273_v20  ;;  %v11524_v20 = vld [vmem:[%s13989_s2] ss:$0 sm:$0xff] }
 0x3f3   :  { %v1438_v61 = vadd.f32 %v11107_v4, %v1437_v49  ;;  %v1780_v9 = vadd.f32 %v11107_v4, %v1779_v7  ;;  %8197 = vrot.lane.b32.xlu2 %v8196_v33, %s14044_s24  ;;  %v8048_v33 = vpop.permute.xlu2 %8047  ;;  %v8211_v49 = vpack.i.bf16 %v11505_v54, %v11236_v15  ;;  %v8035_v7 = vunpack.i.h.bf16 %v8033_v26 }
 0x3f4   :  { %v4839_v15 = vsel %vm4816_vm4, %v4774_v36, %v8044_v17  ;;  %v8049_v26 = vunpack.i.l.bf16 %v8048_v33  ;;  %v4645_v1 = vsel %vm2390_vm2, %v11533_v28, %v7935_v34 }
 0x3f5   :  { %v1987_v51 = vmul.f32 0.2, %v1438_v61  ;;  %v2101_v19 = vmul.f32 0.2, %v1780_v9  ;;  %v8093_v29 = vpop.permute.xlu0 %8092 }
 0x3f6   :  { %v8094_v35 = vunpack.i.l.bf16 %v8093_v29 }
 0x3f7   :  { %v2243_v4 = vmax.f32 %v1438_v61, %v1987_v51  ;;  %v2357_v45 = vmax.f32 %v1780_v9, %v2101_v19  ;;  %v8040_v19 = vunpack.i.h.bf16 %v11358_v50  ;;  %v8045_v50 = vunpack.i.h.bf16 %v11356_v42 }
 0x3f9   :  { %2537 = vst.msk [vmem:[#allocation2 + $0x460] sm:$0xff] %vm2390_vm2, %v2243_v4  ;;  %7499 = vmatmul.msk.f32.gmra.mxu2 %vm2390_vm2, %v11396_v62  ;;  %v2937_v24 = vld [vmem:[#allocation2 + $0x858] sm:$0xff]  ;;  %v11539_v17 = vpop.f32.mrf.mxu2 }
 0x3fa   :  { %2651 = vst.msk [vmem:[#allocation2 + $0x860] sm:$0xff] %vm2390_vm2, %v2357_v45  ;;  %v1440_v5 = vpop.f32.mrf.mxu0  ;;  %v1782_v61 = vpop.f32.mrf.mxu1  ;;  %v11519_v9 = vpack.i.bf16 %v2937_v24, %v2935_v48  ;;  %v4710_v24 = vsel %vm4686_vm3, %v4645_v1, %v8035_v7 }
 0x3fb   :  { %v1441_v51 = vadd.f32 %v11524_v20, %v1440_v5  ;;  %v1783_v62 = vadd.f32 %v11524_v20, %v1782_v61  ;;  %8212 = vrot.lane.b32.xlu2 %v8211_v49, %s14050_s28  ;;  %v4904_v49 = vsel %vm4881_vm6, %v4839_v15, %v8049_v26  ;;  %v8095_v26 = vunpack.i.h.bf16 %v8093_v29 }
 0x3fc   :  { %14058 = vst [vmem:[#allocation21_spill] sm:$0xff] %v11519_v9  ;;  %8137 = vrot.lane.b32.xlu1 %v11519_v9, %s8948_s25  ;;  %v4969_v25 = vsel %vm4946_vm7, %v4904_v49, %v8094_v35  ;;  %v4775_v9 = vsel %vm4751_vm5, %v4710_v24, %v8040_v19 }
 0x3fd   :  { %v1988_v4 = vmul.f32 0.2, %v1441_v51  ;;  %v2102_v45 = vmul.f32 0.2, %v1783_v62  ;;  %v8103_v48 = vpop.permute.xlu1 %8102  ;;  %v4840_v35 = vsel %vm4816_vm4, %v4775_v9, %v8045_v50 }
 0x3fe   :  { %v8104_v5 = vunpack.i.l.bf16 %v8103_v48  ;;  %v8105_v19 = vunpack.i.h.bf16 %v8103_v48 }
 0x3ff   :  { %v2244_v36 = vmax.f32 %v1441_v51, %v1988_v4  ;;  %v2358_v61 = vmax.f32 %v1783_v62, %v2102_v45  ;;  %v8050_v62 = vunpack.i.h.bf16 %v8048_v33 }
 0x400   :  { %v5034_v34 = vsel %vm5011_vm8, %v4969_v25, %v8104_v5 }
 0x401   :  { %2538 = vst.msk [vmem:[#allocation2 + $0x468] sm:$0xff] %vm2390_vm2, %v2244_v36  ;;  %5291 = vmatmul.f32.gmra.mxu3 %v5034_v34  ;;  %7500 = vmatmul.msk.f32.gmra.mxu2 %vm2390_vm2, %v11431_v63  ;;  %v4905_v4 = vsel %vm4881_vm6, %v4840_v35, %v8050_v62  ;;  %v11555_v49 = vpop.f32.mrf.mxu2 }
 0x402   :  { %2652 = vst.msk [vmem:[#allocation2 + $0x878] sm:$0xff] %vm2390_vm2, %v2358_v61  ;;  %v1443_v7 = vpop.f32.mrf.mxu0  ;;  %v1785_v15 = vpop.f32.mrf.mxu1  ;;  %v4970_v63 = vsel %vm4946_vm7, %v4905_v4, %v8095_v26 }
 0x403   :  { %v1444_v42 = vadd.f32 %v11524_v20, %v1443_v7  ;;  %v1786_v51 = vadd.f32 %v11524_v20, %v1785_v15  ;;  %v5035_v5 = vsel %vm5011_vm8, %v4970_v63, %v8105_v19  ;;  %v11563_v7 = vld [vmem:[#allocation2 + $0x460] sm:$0xff] }
 0x405   :  { %v1989_v25 = vmul.f32 0.2, %v1444_v42  ;;  %v2103_v1 = vmul.f32 0.2, %v1786_v51 }
 0x407   :  { %v2245_v45 = vmax.f32 %v1444_v42, %v1989_v25  ;;  %v2359_v24 = vmax.f32 %v1786_v51, %v2103_v1 }
 0x409   :  { %2539 = vst.msk [vmem:[#allocation2 + $0x470] sm:$0xff] %vm2390_vm2, %v2245_v45  ;;  %5294 = vmatmul.f32.gmra.mxu3 %v5035_v5  ;;  %7501 = vmatmul.msk.f32.gmra.mxu2 %vm2390_vm2, %v11455_v41  ;;  %v11565_v26 = vpop.f32.mrf.mxu2  ;;  %v11582_v5 = vld [vmem:[#allocation2 + $0x4a0] sm:$0xff] }
 0x40a   :  { %2653 = vst.msk [vmem:[#allocation2 + $0x880] sm:$0xff] %vm2390_vm2, %v2359_v24  ;;  %v1446_v29 = vpop.f32.mrf.mxu0  ;;  %v1788_v33 = vpop.f32.mrf.mxu1  ;;  %v2823_v24 = vld [vmem:[#allocation2 + $0x498] sm:$0xff] }
 0x40b   :  { %v1447_v9 = vadd.f32 %v11524_v20, %v1446_v29  ;;  %v1789_v48 = vadd.f32 %v11524_v20, %v1788_v33  ;;  %v8867_v33 = vld [vmem:[#allocation2 + $0x2c0] sm:$0xff] }
 0x40d   :  { %v1990_v50 = vmul.f32 0.2, %v1447_v9  ;;  %v2104_v36 = vmul.f32 0.2, %v1789_v48 }
 0x40f   :  { %v2246_v61 = vmax.f32 %v1447_v9, %v1990_v50  ;;  %v2360_v34 = vmax.f32 %v1789_v48, %v2104_v36  ;;  %v2810_v50 = vld [vmem:[#allocation2 + $0x428] sm:$0xff]  ;;  %v11595_v36 = vld [vmem:[#allocation2 + $0x520] sm:$0xff] }
 0x410   :  { %v2819_v15 = vld [vmem:[#allocation2 + $0x470] sm:$0xff] }
 0x411   :  { %2540 = vst.msk [vmem:[#allocation2 + $0x488] sm:$0xff] %vm2390_vm2, %v2246_v61  ;;  %7502 = vmatmul.msk.f32.gmra.mxu2 %vm2390_vm2, %v11501_v46  ;;  %v8226_v41 = vpack.i.bf16 %v2819_v15, %v11563_v7  ;;  %v11580_v63 = vpop.f32.mrf.mxu2  ;;  %v11597_v61 = vld [vmem:[#allocation2 + $0x530] sm:$0xff]  ;;  %v2808_v15 = vld [vmem:[#allocation2 + $0x418] sm:$0xff] }
 0x412   :  { %2654 = vst.msk [vmem:[#allocation2 + $0x888] sm:$0xff] %vm2390_vm2, %v2360_v34  ;;  %v1449_v42 = vpop.f32.mrf.mxu0  ;;  %v1791_v51 = vpop.f32.mrf.mxu1  ;;  %v11602_v34 = vld [vmem:[%s13991_s4] ss:$0 sm:$0xff] }
 0x413   :  { %v1450_v35 = vadd.f32 %v11524_v20, %v1449_v42  ;;  %v1792_v62 = vadd.f32 %v11524_v20, %v1791_v51  ;;  %8227 = vrot.lane.b32.xlu2 %v8226_v41, %s14044_s24  ;;  %v2820_v20 = vld [vmem:[#allocation2 + $0x480] sm:$0xff]  ;;  %v11604_v41 = vld [vmem:[#allocation2 + $0x370] sm:$0xff]  ;;  %v8161_v42 = vpack.i.bf16 %v2810_v50, %v2808_v15  ;;  %v8256_v51 = vpack.i.bf16 %v11597_v61, %v11595_v36 }
 0x415   :  { %v1991_v19 = vmul.f32 0.2, %v1450_v35  ;;  %v2105_v25 = vmul.f32 0.2, %v1792_v62 }
 0x417   :  { %v2247_v1 = vmax.f32 %v1450_v35, %v1991_v19  ;;  %v2361_v4 = vmax.f32 %v1792_v62, %v2105_v25  ;;  %v5227_v35 = vadd.f32 %v11602_v34, %v11271_v52  ;;  %v14059_v62 = vpack.i.bf16 %v11382_v11, %v11347_v60  ;;  %v11625_v52 = vld [vmem:[%s13992_s5] ss:$0 sm:$0xff] }
 0x418   :  { %v2821_v45 = vld [vmem:[#allocation2 + $0x488] sm:$0xff]  ;;  %v11632_v60 = vld [vmem:[#allocation2 + $0x380] sm:$0xff] }
 0x419   :  { %2541 = vst.msk [vmem:[#allocation2 + $0x490] sm:$0xff] %vm2390_vm2, %v2247_v1  ;;  %7503 = vmatmul.msk.f32.gmra.mxu2 %vm2390_vm2, %v11533_v28  ;;  %v8141_v46 = vpack.i.bf16 %v2823_v24, %v2821_v45  ;;  %v11618_v1 = vld [vmem:[#allocation2 + $0x4c0] sm:$0xff] }
 0x41a   :  { %2655 = vst.msk [vmem:[#allocation2 + $0x890] sm:$0xff] %vm2390_vm2, %v2361_v4  ;;  %v11620_v4 = vld [vmem:[#allocation2 + $0x4b0] sm:$0xff] }
 0x41b   :  { %8142 = vrot.lane.b32.xlu1 %v8141_v46, %s8948_s25  ;;  %v8271_v11 = vpack.i.bf16 %v11618_v1, %v11620_v4 }
 0x420   :  { %v11584_v29 = vld [vmem:[#allocation2 + $0x490] sm:$0xff] }
 0x421   :  { %7504 = vmatmul.msk.f32.gmra.mxu2 %vm2390_vm2, %v8867_v33  ;;  %v8251_v9 = vpack.i.bf16 %v11582_v5, %v11584_v29  ;;  %v8151_v28 = vpack.i.bf16 %v11584_v29, %v2820_v20  ;;  %v8171_v20 = vpack.i.bf16 %v11620_v4, %v11582_v5  ;;  %v5230_v33 = vadd.f32 %v11602_v34, %v11310_v44 }
 0x423   :  { %8147 = vrot.lane.b32.xlu1 %v8141_v46, %s8954_s27  ;;  %8252 = vrot.lane.b32.xlu2 %v8251_v9, %s14050_s28  ;;  %v11630_v46 = vld [vmem:[%s13993_s6] ss:$0 sm:$0xff] }
 0x424   :  { %8152 = vrot.lane.b32.xlu0 %v8151_v28, %s8953_s18  ;;  %v11593_v48 = vpop.f32.mrf.mxu2 }
 0x429   :  { %7505 = vmatmul.msk.f32.gmra.mxu2 %vm2390_vm2, %v11604_v41 }
 0x42b   :  { %8162 = vrot.lane.b32.xlu1 %v8161_v42, %s8951_s29  ;;  %8257 = vrot.lane.b32.xlu2 %v8256_v51, %s14044_s24  ;;  %v2814_v42 = vld [vmem:[#allocation2 + $0x448] sm:$0xff]  ;;  %v11648_v51 = vld [vmem:[#allocation2 + $0x550] sm:$0xff] }
 0x42c   :  { %8157 = vrot.lane.b32.xlu0 %v14059_v62, %s8950_s21  ;;  %v5435_v19 = vpop.f32.mrf.mxu2  ;;  %v2812_v62 = vld [vmem:[#allocation2 + $0x438] sm:$0xff] }
 0x42d   :  { %v5436_v25 = vadd.f32 %v5435_v19, %v5227_v35  ;;  %v11650_v35 = vpop.permute.xlu2 %8052  ;;  %v11653_v19 = vld [vmem:[#allocation2 + $0x540] sm:$0xff] }
 0x42f   :  { %v5627_v45 = vmul.f32 0.2, %v5436_v25 }
 0x431   :  { %v5691_v24 = vmax.f32 %v5436_v25, %v5627_v45  ;;  %7506 = vmatmul.msk.f32.gmra.mxu2 %vm2390_vm2, %v11632_v60  ;;  %v11655_v25 = vld [vmem:[#allocation2 + $0x390] sm:$0xff]  ;;  %v8191_v45 = vpack.i.bf16 %v2814_v42, %v2812_v62 }
 0x432   :  { %v11673_v42 = vld [vmem:[#allocation2 + $0x4d0] sm:$0xff] }
 0x433   :  { %v5759_v9 = vmul.f32 %v11625_v52, %v5691_v24  ;;  %8177 = vrot.lane.b32.xlu1 %v9350_v10, %s8954_s27  ;;  %8272 = vrot.lane.b32.xlu2 %v8271_v11, %s14050_s28  ;;  %v8286_v24 = vpack.i.bf16 %v11648_v51, %v11653_v19  ;;  %v5233_v11 = vadd.f32 %v11602_v34, %v11327_v8 }
 0x434   :  { %8172 = vrot.lane.b32.xlu0 %v8171_v20, %s8953_s18  ;;  %v5438_v28 = vpop.f32.mrf.mxu2 }
 0x435   :  { %v5827_v50 = vadd.f32 %v11630_v46, %v5759_v9  ;;  %v5439_v15 = vadd.f32 %v5438_v28, %v5230_v33  ;;  %v14060_v33 = vpack.i.bf16 %v11465_v23, %v11417_v14  ;;  %v11675_v8 = vpop.permute.xlu2 %8072  ;;  %v8201_v14 = vpack.i.bf16 %v11673_v42, %v11618_v1 }
 0x437   :  { %5912 = vst.msk [vmem:[#allocation3 + $0x58] sm:$0xff] %vm4686_vm3, %v5827_v50  ;;  %v5628_v44 = vmul.f32 0.2, %v5439_v15 }
 0x439   :  { %v5692_v10 = vmax.f32 %v5439_v15, %v5628_v44  ;;  %7507 = vmatmul.msk.f32.gmra.mxu2 %vm2390_vm2, %v11655_v25  ;;  %v11671_v15 = vld [vmem:[#allocation2 + $0x4e0] sm:$0xff] }
 0x43a   :  { %v8301_v23 = vpack.i.bf16 %v11671_v15, %v11673_v42 }
 0x43b   :  { %v5760_v20 = vmul.f32 %v11625_v52, %v5692_v10  ;;  %8192 = vrot.lane.b32.xlu1 %v8191_v45, %s8951_s29  ;;  %8287 = vrot.lane.b32.xlu2 %v8286_v24, %s14044_s24  ;;  %v11678_v10 = vld [vmem:[#allocation2 + $0x3a0] sm:$0xff]  ;;  %v5236_v45 = vadd.f32 %v11602_v34, %v11345_v47 }
 0x43c   :  { %8187 = vrot.lane.b32.xlu0 %v14060_v33, %s8950_s21  ;;  %v5441_v9 = vpop.f32.mrf.mxu2 }
 0x43d   :  { %v5828_v28 = vadd.f32 %v11630_v46, %v5760_v20  ;;  %v5442_v50 = vadd.f32 %v5441_v9, %v5233_v11  ;;  %v2818_v9 = vld [vmem:[#allocation2 + $0x468] sm:$0xff] }
 0x43f   :  { %5913 = vst.msk [vmem:[#allocation3 + $0x60] sm:$0xff] %vm4686_vm3, %v5828_v28  ;;  %v5629_v44 = vmul.f32 0.2, %v5442_v50  ;;  %v11694_v28 = vld [vmem:[#allocation2 + $0x570] sm:$0xff] }
 0x441   :  { %v5693_v62 = vmax.f32 %v5442_v50, %v5629_v44  ;;  %7508 = vmatmul.msk.f32.gmra.mxu2 %vm2390_vm2, %v11678_v10  ;;  %v11696_v50 = vpop.permute.xlu2 %8082  ;;  %v2816_v44 = vld [vmem:[#allocation2 + $0x458] sm:$0xff] }
 0x443   :  { %v5761_v24 = vmul.f32 %v11625_v52, %v5693_v62  ;;  %8207 = vrot.lane.b32.xlu1 %v9421_v2, %s8954_s27  ;;  %8302 = vrot.lane.b32.xlu2 %v8301_v23, %s14050_s28  ;;  %v11699_v62 = vld [vmem:[#allocation2 + $0x560] sm:$0xff]  ;;  %v8221_v23 = vpack.i.bf16 %v2818_v9, %v2816_v44  ;;  %v11718_v44 = vld [vmem:[#allocation2 + $0x4f0] sm:$0xff] }
 0x444   :  { %8202 = vrot.lane.b32.xlu0 %v8201_v14, %s8953_s18  ;;  %v5444_v11 = vpop.f32.mrf.mxu2  ;;  %v8316_v14 = vpack.i.bf16 %v11694_v28, %v11699_v62 }
 0x445   :  { %v5829_v20 = vadd.f32 %v11630_v46, %v5761_v24  ;;  %v5445_v33 = vadd.f32 %v5444_v11, %v5236_v45  ;;  %v8216_v45 = vpack.i.bf16 %v11563_v7, %v11488_v30  ;;  %v5239_v24 = vadd.f32 %v11602_v34, %v11360_v6 }
 0x447   :  { %5914 = vst.msk [vmem:[#allocation3 + $0x68] sm:$0xff] %vm4686_vm3, %v5829_v20  ;;  %v5630_v47 = vmul.f32 0.2, %v5445_v33 }
 0x449   :  { %v5694_v2 = vmax.f32 %v5445_v33, %v5630_v47  ;;  %7509 = vmatmul.msk.f32.gmra.mxu2 %vm2390_vm2, %v11701_v53  ;;  %v11716_v47 = vld [vmem:[#allocation2 + $0x500] sm:$0xff]  ;;  %v11720_v30 = vpop.permute.xlu2 %8122 }
 0x44b   :  { %v5762_v11 = vmul.f32 %v11625_v52, %v5694_v2  ;;  %8222 = vrot.lane.b32.xlu1 %v8221_v23, %s8951_s29  ;;  %8317 = vrot.lane.b32.xlu2 %v8316_v14, %s14044_s24  ;;  %v11723_v2 = vld [vmem:[#allocation2 + $0x3c0] sm:$0xff]  ;;  %v8331_v23 = vpack.i.bf16 %v11716_v47, %v11718_v44  ;;  %v8231_v14 = vpack.i.bf16 %v11718_v44, %v11671_v15 }
 0x44c   :  { %8217 = vrot.lane.b32.xlu0 %v8216_v45, %s8950_s21  ;;  %v5447_v20 = vpop.f32.mrf.mxu2  ;;  %v5242_v45 = vadd.f32 %v11602_v34, %v11384_v0  ;;  %v2837_v0 = vld [vmem:[#allocation2 + $0x510] sm:$0xff] }
 0x44d   :  { %v5830_v33 = vadd.f32 %v11630_v46, %v5762_v11  ;;  %v5448_v9 = vadd.f32 %v5447_v20, %v5239_v24 }
 0x44f   :  { %5915 = vst.msk [vmem:[#allocation3 + $0x70] sm:$0xff] %vm4686_vm3, %v5830_v33  ;;  %v5631_v6 = vmul.f32 0.2, %v5448_v9 }
 0x451   :  { %v5695_v7 = vmax.f32 %v5448_v9, %v5631_v6  ;;  %7510 = vmatmul.msk.f32.gmra.mxu2 %vm2390_vm2, %v11723_v2  ;;  %v2838_v9 = vld [vmem:[#allocation2 + $0x518] sm:$0xff]  ;;  %v2840_v6 = vld [vmem:[#allocation2 + $0x528] sm:$0xff] }
 0x453   :  { %v5763_v24 = vmul.f32 %v11625_v52, %v5695_v7  ;;  %8237 = vrot.lane.b32.xlu1 %v9530_v59, %s8954_s27  ;;  %8332 = vrot.lane.b32.xlu2 %v8331_v23, %s14050_s28  ;;  %v11742_v7 = vpop.permute.xlu2 %8127  ;;  %v8246_v23 = vpack.i.bf16 %v2840_v6, %v2838_v9  ;;  %v11757_v9 = vld [vmem:[#allocation2 + $0x5b0] sm:$0xff] }
 0x454   :  { %8232 = vrot.lane.b32.xlu0 %v8231_v14, %s8953_s18  ;;  %v5450_v11 = vpop.f32.mrf.mxu2  ;;  %14061 = vst [vmem:[#allocation22_spill] sm:$0xff] %v11742_v7  ;;  %v8346_v14 = vpack.i.bf16 %v2853_v3, %v11740_v56  ;;  %v11759_v3 = vld [vmem:[#allocation2 + $0x5c0] sm:$0xff]  ;;  %v8054_v7 = vunpack.i.l.bf16 %v11650_v35 }
 0x455   :  { %v5831_v20 = vadd.f32 %v11630_v46, %v5763_v24  ;;  %v5451_v33 = vadd.f32 %v5450_v11, %v5242_v45  ;;  %v8241_v45 = vpack.i.bf16 %v11595_v36, %v2837_v0  ;;  %v5245_v24 = vadd.f32 %v11602_v34, %v11406_v43  ;;  %v2854_v43 = vld [vmem:[#allocation2 + $0x5a0] sm:$0xff] }
 0x457   :  { %5916 = vst.msk [vmem:[#allocation3 + $0x78] sm:$0xff] %vm4686_vm3, %v5831_v20  ;;  %v5632_v21 = vmul.f32 0.2, %v5451_v33 }
 0x459   :  { %v5696_v59 = vmax.f32 %v5451_v33, %v5632_v21  ;;  %7511 = vmatmul.msk.f32.gmra.mxu2 %vm2390_vm2, %v11744_v31 }
 0x45b   :  { %v5764_v11 = vmul.f32 %v11625_v52, %v5696_v59  ;;  %8247 = vrot.lane.b32.xlu1 %v8246_v23, %s8951_s29  ;;  %8347 = vrot.lane.b32.xlu2 %v8346_v14, %s14044_s24  ;;  %v11762_v6 = vpop.permute.xlu2 %8167  ;;  %v8361_v59 = vpack.i.bf16 %v11759_v3, %v11757_v9  ;;  %v8261_v23 = vpack.i.bf16 %v11757_v9, %v2854_v43 }
 0x45c   :  { %8242 = vrot.lane.b32.xlu0 %v8241_v45, %s8950_s21  ;;  %v5453_v21 = vpop.f32.mrf.mxu2  ;;  %v5248_v14 = vadd.f32 %v11602_v34, %v11425_v32 }
 0x45d   :  { %v5832_v20 = vadd.f32 %v11630_v46, %v5764_v11  ;;  %v5454_v33 = vadd.f32 %v5453_v21, %v5245_v24  ;;  %v2842_v21 = vld [vmem:[#allocation2 + $0x538] sm:$0xff] }
 0x45f   :  { %5917 = vst.msk [vmem:[#allocation3 + $0x80] sm:$0xff] %vm4686_vm3, %v5832_v20  ;;  %v5633_v36 = vmul.f32 0.2, %v5454_v33  ;;  %v2844_v20 = vld [vmem:[#allocation2 + $0x548] sm:$0xff] }
 0x461   :  { %v5697_v0 = vmax.f32 %v5454_v33, %v5633_v36  ;;  %7512 = vmatmul.msk.f32.gmra.mxu2 %vm2390_vm2, %v11505_v54  ;;  %v11777_v33 = vld [vmem:[#allocation2 + $0x640] sm:$0xff]  ;;  %v11779_v36 = vld [vmem:[#allocation2 + $0x650] sm:$0xff] }
 0x463   :  { %v5765_v45 = vmul.f32 %v11625_v52, %v5697_v0  ;;  %8267 = vrot.lane.b32.xlu1 %v10035_v22, %s8954_s27  ;;  %8362 = vrot.lane.b32.xlu2 %v8361_v59, %s14050_s28  ;;  %v8281_v22 = vpack.i.bf16 %v2844_v20, %v2842_v21  ;;  %v8376_v0 = vpack.i.bf16 %v11779_v36, %v11777_v33 }
 0x464   :  { %8262 = vrot.lane.b32.xlu0 %v8261_v23, %s8953_s18  ;;  %v5456_v24 = vpop.f32.mrf.mxu2  ;;  %v8276_v59 = vpack.i.bf16 %v11653_v19, %v11597_v61  ;;  %v5251_v23 = vadd.f32 %v11602_v34, %v11446_v57  ;;  %v11799_v61 = vld [vmem:[#allocation2 + $0x5d0] sm:$0xff] }
 0x465   :  { %v5833_v54 = vadd.f32 %v11630_v46, %v5765_v45  ;;  %v5457_v11 = vadd.f32 %v5456_v24, %v5248_v14  ;;  %v11790_v14 = vpop.permute.xlu2 %8182  ;;  %v8291_v20 = vpack.i.bf16 %v11799_v61, %v11759_v3 }
 0x467   :  { %5918 = vst.msk [vmem:[#allocation3 + $0x88] sm:$0xff] %vm4686_vm3, %v5833_v54  ;;  %v5634_v32 = vmul.f32 0.2, %v5457_v11 }
 0x469   :  { %v5698_v43 = vmax.f32 %v5457_v11, %v5634_v32  ;;  %7513 = vmatmul.msk.f32.gmra.mxu2 %vm2390_vm2, %v11584_v29  ;;  %v11797_v11 = vld [vmem:[#allocation2 + $0x5e0] sm:$0xff]  ;;  %v5254_v32 = vadd.f32 %v11602_v34, %v11475_v39  ;;  %v11820_v39 = vld [vmem:[#allocation2 + $0x670] sm:$0xff] }
 0x46a   :  { %v8391_v21 = vpack.i.bf16 %v11797_v11, %v11799_v61 }
 0x46b   :  { %v5766_v45 = vmul.f32 %v11625_v52, %v5698_v43  ;;  %8282 = vrot.lane.b32.xlu1 %v8281_v22, %s8951_s29  ;;  %8377 = vrot.lane.b32.xlu2 %v8376_v0, %s14044_s24  ;;  %v11817_v0 = vpop.permute.xlu1 %8107 }
 0x46c   :  { %8277 = vrot.lane.b32.xlu0 %v8276_v59, %s8950_s21  ;;  %v5459_v29 = vpop.f32.mrf.mxu2  ;;  %14062 = vst [vmem:[#allocation23_spill] sm:$0xff] %v11817_v0 }
 0x46d   :  { %v5834_v24 = vadd.f32 %v11630_v46, %v5766_v45  ;;  %v5460_v54 = vadd.f32 %v5459_v29, %v5251_v23  ;;  %v11810_v43 = vpop.permute.xlu2 %8197  ;;  %v2846_v45 = vld [vmem:[#allocation2 + $0x558] sm:$0xff]  ;;  %v2848_v29 = vld [vmem:[#allocation2 + $0x568] sm:$0xff] }
 0x46f   :  { %5919 = vst.msk [vmem:[#allocation3 + $0x90] sm:$0xff] %vm4686_vm3, %v5834_v24  ;;  %v5635_v57 = vmul.f32 0.2, %v5460_v54 }
 0x471   :  { %v5699_v19 = vmax.f32 %v5460_v54, %v5635_v57  ;;  %7514 = vmatmul.msk.f32.gmra.mxu2 %vm2390_vm2, %v11582_v5  ;;  %v11823_v54 = vld [vmem:[#allocation2 + $0x660] sm:$0xff]  ;;  %v8311_v57 = vpack.i.bf16 %v2848_v29, %v2846_v45 }
 0x473   :  { %v5767_v22 = vmul.f32 %v11625_v52, %v5699_v19  ;;  %8297 = vrot.lane.b32.xlu1 %v10152_v18, %s8954_s27  ;;  %8392 = vrot.lane.b32.xlu2 %v8391_v21, %s14050_s28  ;;  %v8406_v19 = vpack.i.bf16 %v11820_v39, %v11823_v54  ;;  %v8306_v21 = vpack.i.bf16 %v11699_v62, %v11648_v51  ;;  %v11842_v51 = vld [vmem:[#allocation2 + $0x600] sm:$0xff]  ;;  %v11844_v62 = vpop.permute.xlu0 %8097 }
 0x474   :  { %8292 = vrot.lane.b32.xlu0 %v8291_v20, %s8953_s18  ;;  %v5462_v5 = vpop.f32.mrf.mxu2  ;;  %v5257_v20 = vadd.f32 %v11602_v34, %v11486_v16  ;;  %14063 = vst [vmem:[#allocation24_spill] sm:$0xff] %v11842_v51  ;;  %v11846_v16 = vld [vmem:[#allocation2 + $0x5f0] sm:$0xff] }
 0x475   :  { %v5835_v59 = vadd.f32 %v11630_v46, %v5767_v22  ;;  %v5463_v23 = vadd.f32 %v5462_v5, %v5254_v32  ;;  %v11839_v5 = vpop.permute.xlu2 %8212 }
 0x477   :  { %5920 = vst.msk [vmem:[#allocation3 + $0xa8] sm:$0xff] %vm4686_vm3, %v5835_v59  ;;  %v5636_v24 = vmul.f32 0.2, %v5463_v23 }
 0x479   :  { %v5700_v18 = vmax.f32 %v5463_v23, %v5636_v24  ;;  %7515 = vmatmul.msk.f32.gmra.mxu2 %vm2390_vm2, %v11620_v4  ;;  %v11837_v4 = vpop.permute.xlu1 %8117  ;;  %v8421_v24 = vpack.i.bf16 %v11842_v51, %v11846_v16 }
 0x47b   :  { %v5768_v32 = vmul.f32 %v11625_v52, %v5700_v18  ;;  %8312 = vrot.lane.b32.xlu1 %v8311_v57, %s8951_s29  ;;  %8407 = vrot.lane.b32.xlu2 %v8406_v19, %s14044_s24  ;;  %v8321_v18 = vpack.i.bf16 %v11846_v16, %v11797_v11  ;;  %v5260_v57 = vadd.f32 %v11602_v34, %v11507_v27  ;;  %v2850_v27 = vld [vmem:[#allocation2 + $0x578] sm:$0xff] }
 0x47c   :  { %8307 = vrot.lane.b32.xlu0 %v8306_v21, %s8950_s21  ;;  %v5465_v22 = vpop.f32.mrf.mxu2 }
 0x47d   :  { %v5836_v59 = vadd.f32 %v11630_v46, %v5768_v32  ;;  %v5466_v23 = vadd.f32 %v5465_v22, %v5257_v20  ;;  %v11864_v20 = vpop.permute.xlu2 %8227 }
 0x47f   :  { %5921 = vst.msk [vmem:[#allocation3 + $0xb0] sm:$0xff] %vm4686_vm3, %v5836_v59  ;;  %v5637_v45 = vmul.f32 0.2, %v5466_v23  ;;  %v11867_v59 = vpop.permute.xlu0 %8112 }
 0x481   :  { %v5701_v29 = vmax.f32 %v5466_v23, %v5637_v45  ;;  %7516 = vmatmul.msk.f32.gmra.mxu2 %vm2390_vm2, %v11618_v1  ;;  %v11862_v1 = vpop.permute.xlu1 %8137  ;;  %v2852_v23 = vld [vmem:[#allocation2 + $0x588] sm:$0xff]  ;;  %v11869_v45 = vld [vmem:[#allocation2 + $0x690] sm:$0xff] }
 0x482   :  { %14064 = vst [vmem:[#allocation25_spill] sm:$0xff] %v11862_v1 }
 0x483   :  { %v5769_v19 = vmul.f32 %v11625_v52, %v5701_v29  ;;  %8327 = vrot.lane.b32.xlu1 %v10241_v55, %s8954_s27  ;;  %8422 = vrot.lane.b32.xlu2 %v8421_v24, %s14050_s28  ;;  %14065 = vst [vmem:[#allocation26_spill] sm:$0xff] %v11869_v45  ;;  %v6072_v29 = vld [vmem:[%s13994_s7 + $0x78] sm:$0xff]  ;;  %v11875_v24 = vld [vmem:[#allocation2 + $0x680] sm:$0xff] }
 0x484   :  { %8322 = vrot.lane.b32.xlu0 %v8321_v18, %s8953_s18  ;;  %v5468_v21 = vpop.f32.mrf.mxu2  ;;  %6550 = vmatpush.msrb.mxu3 %v6072_v29  ;;  %v11899_v29 = vld [vmem:[#allocation2 + $0x610] sm:$0xff] }
 0x485   :  { %v5837_v32 = vadd.f32 %v11630_v46, %v5769_v19  ;;  %v5469_v22 = vadd.f32 %v5468_v21, %v5260_v57  ;;  %v8341_v57 = vpack.i.bf16 %v2852_v23, %v2850_v27  ;;  %v8436_v19 = vpack.i.bf16 %v11869_v45, %v11875_v24  ;;  %v11890_v27 = vpop.permute.xlu2 %8252  ;;  %14069 = vst [vmem:[#allocation30_spill] sm:$0xff] %v11899_v29 }
 0x486   :  { %v8336_v21 = vpack.i.bf16 %v11740_v56, %v11694_v28  ;;  %14066 = vst [vmem:[#allocation27_spill] sm:$0xff] %v11890_v27  ;;  %v11942_v27 = vld [vmem:[#allocation2 + $0x6a0] sm:$0xff] }
 0x487   :  { %5922 = vst.msk [vmem:[#allocation3 + $0xb8] sm:$0xff] %vm4686_vm3, %v5837_v32  ;;  %v5638_v55 = vmul.f32 0.2, %v5469_v22  ;;  %v5263_v32 = vadd.f32 %v11602_v34, %v11539_v17  ;;  %v11895_v28 = vpop.permute.xlu0 %8132  ;;  %v11897_v17 = vld [vmem:[#allocation2 + $0x620] sm:$0xff] }
 0x488   :  { %14067 = vst [vmem:[#allocation28_spill] sm:$0xff] %v11895_v28  ;;  %v7985_v28 = vunpack.i.h.bf16 %v11314_v37 }
 0x489   :  { %v5702_v18 = vmax.f32 %v5469_v22, %v5638_v55  ;;  %7517 = vmatmul.msk.f32.gmra.mxu2 %vm2390_vm2, %v11673_v42  ;;  %v7984_v22 = vunpack.i.l.bf16 %v11314_v37  ;;  %14068 = vst [vmem:[#allocation29_spill] sm:$0xff] %v11897_v17 }
 0x48b   :  { %v5770_v1 = vmul.f32 %v11625_v52, %v5702_v18  ;;  %8342 = vrot.lane.b32.xlu1 %v8341_v57, %s8951_s29  ;;  %8437 = vrot.lane.b32.xlu2 %v8436_v19, %s14044_s24  ;;  %v8875_v57 = vld [vmem:[#allocation2 + $0x360] sm:$0xff] }
 0x48c   :  { %8337 = vrot.lane.b32.xlu0 %v8336_v21, %s8950_s21  ;;  %v5471_v42 = vpop.f32.mrf.mxu2  ;;  %v4646_v19 = vsel %vm2390_vm2, %v8875_v57, %v7984_v22  ;;  %v8114_v21 = vunpack.i.l.bf16 %v11867_v59  ;;  %v5266_v22 = vadd.f32 %v11602_v34, %v11555_v49 }
 0x48d   :  { %v5838_v23 = vadd.f32 %v11630_v46, %v5770_v1  ;;  %v5472_v55 = vadd.f32 %v5471_v42, %v5263_v32  ;;  %v11893_v56 = vpop.permute.xlu1 %8142  ;;  %v8119_v1 = vunpack.i.l.bf16 %v11837_v4  ;;  %v8451_v42 = vpack.i.bf16 %v11897_v17, %v11899_v29 }
 0x48e   :  { %v4711_v57 = vsel %vm4686_vm3, %v4646_v19, %v8054_v7  ;;  %v2871_v7 = vld [vmem:[#allocation2 + $0x630] sm:$0xff]  ;;  %v4647_v19 = vsel %vm2390_vm2, %v11604_v41, %v7985_v28 }
 0x48f   :  { %5923 = vst.msk [vmem:[#allocation3 + $0xc0] sm:$0xff] %vm4686_vm3, %v5838_v23  ;;  %v5639_v18 = vmul.f32 0.2, %v5472_v55  ;;  %v8351_v23 = vpack.i.bf16 %v11899_v29, %v11842_v51  ;;  %v2887_v41 = vld [vmem:[#allocation2 + $0x6b0] sm:$0xff] }
 0x491   :  { %v5703_v32 = vmax.f32 %v5472_v55, %v5639_v18  ;;  %7518 = vmatmul.msk.f32.gmra.mxu2 %vm2390_vm2, %v11671_v15  ;;  %v4776_v15 = vsel %vm4751_vm5, %v4711_v57, %v8114_v21  ;;  %v2874_v57 = vld [vmem:[#allocation2 + $0x648] sm:$0xff] }
 0x492   :  { %v4841_v49 = vsel %vm4816_vm4, %v4776_v15, %v8119_v1 }
 0x493   :  { %v5771_v0 = vmul.f32 %v11625_v52, %v5703_v32  ;;  %8357 = vrot.lane.b32.xlu1 %v10331_v58, %s8954_s27  ;;  %8452 = vrot.lane.b32.xlu2 %v8451_v42, %s14050_s28  ;;  %v8124_v58 = vunpack.i.l.bf16 %v11720_v30  ;;  %v8115_v32 = vunpack.i.h.bf16 %v11867_v59  ;;  %v8366_v59 = vpack.i.bf16 %v11777_v33, %v2871_v7 }
 0x494   :  { %8352 = vrot.lane.b32.xlu0 %v8351_v23, %s8953_s18  ;;  %v5474_v37 = vpop.f32.mrf.mxu2  ;;  %v2872_v23 = vld [vmem:[#allocation2 + $0x638] sm:$0xff]  ;;  %v5269_v33 = vadd.f32 %v11602_v34, %v11565_v26  ;;  %v2888_v26 = vld [vmem:[#allocation2 + $0x6c0] sm:$0xff] }
 0x495   :  { %v5839_v55 = vadd.f32 %v11630_v46, %v5771_v0  ;;  %v5475_v18 = vadd.f32 %v5474_v37, %v5266_v22  ;;  %v11923_v17 = vpop.permute.xlu1 %8147  ;;  %v8055_v0 = vunpack.i.h.bf16 %v11650_v35  ;;  %v8120_v22 = vunpack.i.h.bf16 %v11837_v4  ;;  %v11933_v37 = vpop.permute.xlu2 %8257 }
 0x496   :  { %v8149_v21 = vunpack.i.l.bf16 %v11923_v17  ;;  %v8153_v42 = vpop.permute.xlu0 %8152  ;;  %14070 = vst [vmem:[#allocation31_spill] sm:$0xff] %v11933_v37  ;;  %v4906_v28 = vsel %vm4881_vm6, %v4841_v49, %v8124_v58  ;;  %v8371_v4 = vpack.i.bf16 %v2874_v57, %v2872_v23  ;;  %v8466_v49 = vpack.i.bf16 %v2887_v41, %v11942_v27  ;;  %v11965_v57 = vld [vmem:[#allocation2 + $0x6e0] sm:$0xff] }
 0x497   :  { %5924 = vst.msk [vmem:[#allocation3 + $0xc8] sm:$0xff] %vm4686_vm3, %v5839_v55  ;;  %v5640_v1 = vmul.f32 0.2, %v5475_v18  ;;  %v8154_v15 = vunpack.i.l.bf16 %v8153_v42  ;;  %v4712_v29 = vsel %vm4686_vm3, %v4647_v19, %v8055_v0  ;;  %v8064_v55 = vunpack.i.l.bf16 %v11373_v12 }
 0x498   :  { %v4777_v37 = vsel %vm4751_vm5, %v4712_v29, %v8115_v32  ;;  %v8155_v7 = vunpack.i.h.bf16 %v8153_v42  ;;  %v8125_v19 = vunpack.i.h.bf16 %v11720_v30  ;;  %v11963_v30 = vld [vmem:[#allocation2 + $0x6d0] sm:$0xff]  ;;  %v8074_v0 = vunpack.i.l.bf16 %v11675_v8 }
 0x499   :  { %v5704_v51 = vmax.f32 %v5475_v18, %v5640_v1  ;;  %7519 = vmatmul.msk.f32.gmra.mxu2 %vm2390_vm2, %v11718_v44  ;;  %v4971_v35 = vsel %vm4946_vm7, %v4906_v28, %v8154_v15  ;;  %v4842_v44 = vsel %vm4816_vm4, %v4777_v37, %v8120_v22 }
 0x49a   :  { %v5036_v45 = vsel %vm5011_vm8, %v4971_v35, %v8149_v21  ;;  %v4907_v23 = vsel %vm4881_vm6, %v4842_v44, %v8125_v19  ;;  %v8075_v44 = vunpack.i.h.bf16 %v11675_v8 }
 0x49b   :  { %v5772_v18 = vmul.f32 %v11625_v52, %v5704_v51  ;;  %5297 = vmatmul.f32.gmra.mxu3 %v5036_v45  ;;  %8372 = vrot.lane.b32.xlu1 %v8371_v4, %s8951_s29  ;;  %v4648_v51 = vsel %vm2390_vm2, %v11632_v60, %v8064_v55  ;;  %v8150_v45 = vunpack.i.h.bf16 %v11923_v17  ;;  %v4972_v1 = vsel %vm4946_vm7, %v4907_v23, %v8155_v7  ;;  %v6071_v60 = vld [vmem:[%s13994_s7 + $0x70] sm:$0xff] }
 0x49c   :  { %8467 = vrot.lane.b32.xlu2 %v8466_v49, %s14044_s24  ;;  %8367 = vrot.lane.b32.xlu0 %v8366_v59, %s8950_s21  ;;  %v5477_v29 = vpop.f32.mrf.mxu2  ;;  %v8065_v17 = vunpack.i.h.bf16 %v11373_v12  ;;  %v4713_v59 = vsel %vm4686_vm3, %v4648_v51, %v8074_v0  ;;  %v8481_v55 = vpack.i.bf16 %v11965_v57, %v11963_v30  ;;  %v8381_v12 = vpack.i.bf16 %v11963_v30, %v2888_v26  ;;  %v2876_v51 = vld [vmem:[#allocation2 + $0x658] sm:$0xff]  ;;  %v12001_v0 = vld [vmem:[#allocation2 + $0x760] sm:$0xff] }
 0x49d   :  { %v5840_v58 = vadd.f32 %v11630_v46, %v5772_v18  ;;  %v5478_v32 = vadd.f32 %v5477_v29, %v5269_v33  ;;  %v11957_v21 = vpop.permute.xlu1 %8162  ;;  %6551 = vmatpush.msrb.mxu3 %v6071_v60  ;;  %v11974_v15 = vpop.permute.xlu2 %8272  ;;  %v5037_v4 = vsel %vm5011_vm8, %v4972_v1, %v8150_v45  ;;  %v5272_v49 = vadd.f32 %v11602_v34, %v11580_v63 }
 0x49e   :  { %v8158_v42 = vpop.permute.xlu0 %8157  ;;  %v8164_v28 = vunpack.i.l.bf16 %v11957_v21  ;;  %v8165_v45 = vunpack.i.h.bf16 %v11957_v21  ;;  %v5277_v21 = vpop.f32.mrf.mxu3 }
 0x49f   :  { %5925 = vst.msk [vmem:[#allocation3 + $0xd0] sm:$0xff] %vm4686_vm3, %v5840_v58  ;;  %v5641_v22 = vmul.f32 0.2, %v5478_v32  ;;  %v8159_v37 = vunpack.i.l.bf16 %v8158_v42  ;;  %v8160_v18 = vunpack.i.h.bf16 %v8158_v42 }
 0x4a1   :  { %v5705_v41 = vmax.f32 %v5478_v32, %v5641_v22  ;;  %7520 = vmatmul.msk.f32.gmra.mxu2 %vm2390_vm2, %v11716_v47  ;;  %v4778_v35 = vsel %vm4751_vm5, %v4713_v59, %v8159_v37  ;;  %v4649_v47 = vsel %vm2390_vm2, %v11655_v25, %v8065_v17  ;;  %v8169_v32 = vunpack.i.l.bf16 %v11762_v6  ;;  %v2878_v25 = vld [vmem:[#allocation2 + $0x668] sm:$0xff]  ;;  %v12003_v22 = vld [vmem:[#allocation2 + $0x770] sm:$0xff] }
 0x4a2   :  { %v4843_v58 = vsel %vm4816_vm4, %v4778_v35, %v8164_v28  ;;  %v4714_v42 = vsel %vm4686_vm3, %v4649_v47, %v8075_v44  ;;  %v8496_v59 = vpack.i.bf16 %v12003_v22, %v12001_v0  ;;  %v8396_v35 = vpack.i.bf16 %v11823_v54, %v11779_v36  ;;  %v12030_v44 = vld [vmem:[#allocation2 + $0x6f0] sm:$0xff] }
 0x4a3   :  { %v5773_v33 = vmul.f32 %v11625_v52, %v5705_v41  ;;  %5300 = vmatmul.f32.gmra.mxu3 %v5037_v4  ;;  %8387 = vrot.lane.b32.xlu1 %v10686_v40, %s8954_s27  ;;  %v4779_v37 = vsel %vm4751_vm5, %v4714_v42, %v8160_v18  ;;  %v4908_v1 = vsel %vm4881_vm6, %v4843_v58, %v8169_v32  ;;  %v8170_v47 = vunpack.i.h.bf16 %v11762_v6  ;;  %v12033_v32 = vld [vmem:[#allocation2 + $0x700] sm:$0xff] }
 0x4a4   :  { %8482 = vrot.lane.b32.xlu2 %v8481_v55, %s14050_s28  ;;  %8382 = vrot.lane.b32.xlu0 %v8381_v12, %s8953_s18  ;;  %v5480_v7 = vpop.f32.mrf.mxu2  ;;  %v8401_v41 = vpack.i.bf16 %v2878_v25, %v2876_v51  ;;  %v5275_v4 = vadd.f32 %v11602_v34, %v11593_v48  ;;  %v8184_v48 = vunpack.i.l.bf16 %v11790_v14 }
 0x4a5   :  { %v5841_v19 = vadd.f32 %v11630_v46, %v5773_v33  ;;  %v5481_v63 = vadd.f32 %v5480_v7, %v5272_v49  ;;  %v8178_v29 = vpop.permute.xlu1 %8177  ;;  %v12017_v55 = vpop.permute.xlu2 %8287  ;;  %v4844_v49 = vsel %vm4816_vm4, %v4779_v37, %v8165_v45  ;;  %v8084_v33 = vunpack.i.l.bf16 %v11696_v50 }
 0x4a6   :  { %v8179_v40 = vunpack.i.l.bf16 %v8178_v29  ;;  %v8173_v26 = vpop.permute.xlu0 %8172  ;;  %v4909_v58 = vsel %vm4881_vm6, %v4844_v49, %v8170_v47  ;;  %v2880_v49 = vld [vmem:[#allocation2 + $0x678] sm:$0xff] }
 0x4a7   :  { %5926 = vst.msk [vmem:[#allocation3 + $0xd8] sm:$0xff] %vm4686_vm3, %v5841_v19  ;;  %v5642_v23 = vmul.f32 0.2, %v5481_v63  ;;  %v8174_v8 = vunpack.i.l.bf16 %v8173_v26  ;;  %v8180_v19 = vunpack.i.h.bf16 %v8178_v29  ;;  %v4650_v51 = vsel %vm2390_vm2, %v11678_v10, %v8084_v33  ;;  %v2882_v33 = vld [vmem:[#allocation2 + $0x688] sm:$0xff] }
 0x4a8   :  { %v4715_v25 = vsel %vm4686_vm3, %v4650_v51, %v8184_v48  ;;  %v8411_v29 = vpack.i.bf16 %v12030_v44, %v11965_v57  ;;  %v8511_v10 = vpack.i.bf16 %v12033_v32, %v12030_v44 }
 0x4a9   :  { %v5706_v60 = vmax.f32 %v5481_v63, %v5642_v23  ;;  %7521 = vmatmul.msk.f32.gmra.mxu2 %vm2390_vm2, %v11757_v9  ;;  %v4973_v17 = vsel %vm4946_vm7, %v4908_v1, %v8174_v8  ;;  %v8175_v9 = vunpack.i.h.bf16 %v8173_v26  ;;  %v8085_v23 = vunpack.i.h.bf16 %v11696_v50  ;;  %v5280_v8 = vpop.f32.mrf.mxu3 }
 0x4aa   :  { %v5038_v28 = vsel %vm5011_vm8, %v4973_v17, %v8179_v40  ;;  %v8185_v17 = vunpack.i.h.bf16 %v11790_v14 }
 0x4ab   :  { %v5774_v12 = vmul.f32 %v11625_v52, %v5706_v60  ;;  %5303 = vmatmul.f32.gmra.mxu3 %v5038_v28  ;;  %8402 = vrot.lane.b32.xlu1 %v8401_v41, %s8951_s29  ;;  %v4974_v26 = vsel %vm4946_vm7, %v4909_v58, %v8175_v9  ;;  %v5278_v60 = vadd.f32 %v11602_v34, %v5277_v21 }
 0x4ac   :  { %8497 = vrot.lane.b32.xlu2 %v8496_v59, %s14044_s24  ;;  %8397 = vrot.lane.b32.xlu0 %v8396_v35, %s8950_s21  ;;  %v5483_v36 = vpop.f32.mrf.mxu2  ;;  %v5039_v1 = vsel %vm5011_vm8, %v4974_v26, %v8180_v19 }
 0x4ad   :  { %v5842_v54 = vadd.f32 %v11630_v46, %v5774_v12  ;;  %v5484_v18 = vadd.f32 %v5483_v36, %v5275_v4  ;;  %v12028_v7 = vpop.permute.xlu1 %8192  ;;  %v12057_v28 = vpop.permute.xlu2 %8302  ;;  %v4651_v4 = vsel %vm2390_vm2, %v11701_v53, %v8085_v23  ;;  %v8199_v12 = vunpack.i.l.bf16 %v11810_v43  ;;  %v6070_v53 = vld [vmem:[%s13994_s7 + $0x68] sm:$0xff] }
 0x4ae   :  { %v8188_v63 = vpop.permute.xlu0 %8187  ;;  %v8194_v42 = vunpack.i.l.bf16 %v12028_v7  ;;  %v4716_v47 = vsel %vm4686_vm3, %v4651_v4, %v8185_v17  ;;  %v8195_v36 = vunpack.i.h.bf16 %v12028_v7  ;;  %6552 = vmatpush.msrb.mxu3 %v6070_v53  ;;  %v8431_v7 = vpack.i.bf16 %v2882_v33, %v2880_v49  ;;  %v12096_v17 = vld [vmem:[#allocation2 + $0x710] sm:$0xff] }
 0x4af   :  { %5927 = vst.msk [vmem:[#allocation3 + $0xe0] sm:$0xff] %vm4686_vm3, %v5842_v54  ;;  %v5643_v6 = vmul.f32 0.2, %v5484_v18  ;;  %v8189_v40 = vunpack.i.l.bf16 %v8188_v63  ;;  %v8099_v23 = vunpack.i.l.bf16 %v11844_v62  ;;  %v8441_v49 = vpack.i.bf16 %v12096_v17, %v12033_v32 }
 0x4b0   :  { %v8100_v33 = vunpack.i.h.bf16 %v11844_v62 }
 0x4b1   :  { %v5707_v45 = vmax.f32 %v5484_v18, %v5643_v6  ;;  %7522 = vmatmul.msk.f32.gmra.mxu2 %vm2390_vm2, %v11759_v3  ;;  %v4780_v37 = vsel %vm4751_vm5, %v4715_v25, %v8189_v40  ;;  %v8190_v3 = vunpack.i.h.bf16 %v8188_v63  ;;  %v12067_v18 = vld [vmem:[#allocation2 + $0x790] sm:$0xff]  ;;  %v12077_v40 = vld [vmem:[#allocation2 + $0x780] sm:$0xff]  ;;  %v8426_v25 = vpack.i.bf16 %v11875_v24, %v11820_v39 }
 0x4b2   :  { %v4845_v14 = vsel %vm4816_vm4, %v4780_v37, %v8194_v42  ;;  %v8526_v51 = vpack.i.bf16 %v12067_v18, %v12077_v40  ;;  %v8200_v37 = vunpack.i.h.bf16 %v11810_v43  ;;  %v8214_v24 = vunpack.i.l.bf16 %v11839_v5  ;;  %v12099_v43 = vld [vmem:[#allocation2 + $0x720] sm:$0xff] }
 0x4b3   :  { %v5775_v41 = vmul.f32 %v11625_v52, %v5707_v45  ;;  %5306 = vmatmul.f32.gmra.mxu3 %v5039_v1  ;;  %8417 = vrot.lane.b32.xlu1 %v10770_v13, %s8954_s27  ;;  %v4781_v19 = vsel %vm4751_vm5, %v4716_v47, %v8190_v3  ;;  %v4910_v63 = vsel %vm4881_vm6, %v4845_v14, %v8199_v12  ;;  %v5283_v1 = vpop.f32.mrf.mxu3 }
 0x4b4   :  { %8512 = vrot.lane.b32.xlu2 %v8511_v10, %s14050_s28  ;;  %8412 = vrot.lane.b32.xlu0 %v8411_v29, %s8953_s18  ;;  %v5486_v50 = vpop.f32.mrf.mxu2  ;;  %v5281_v45 = vadd.f32 %v11602_v34, %v5280_v8  ;;  %v4652_v12 = vsel %vm2390_vm2, %v11723_v2, %v8099_v23  ;;  %v8541_v2 = vpack.i.bf16 %v12099_v43, %v12096_v17 }
 0x4b5   :  { %v5843_v59 = vadd.f32 %v11630_v46, %v5775_v41  ;;  %v5487_v35 = vadd.f32 %v5486_v50, %v5278_v60  ;;  %v8208_v21 = vpop.permute.xlu1 %8207 }
 0x4b6   :  { %v8209_v13 = vunpack.i.l.bf16 %v8208_v21  ;;  %v8203_v9 = vpop.permute.xlu0 %8202  ;;  %v8210_v41 = vunpack.i.h.bf16 %v8208_v21 }
 0x4b7   :  { %5928 = vst.msk [vmem:[#allocation3 + $0xf8] sm:$0xff] %vm4686_vm3, %v5843_v59  ;;  %v5644_v48 = vmul.f32 0.2, %v5487_v35  ;;  %v8204_v54 = vunpack.i.l.bf16 %v8203_v9  ;;  %v8205_v29 = vunpack.i.h.bf16 %v8203_v9  ;;  %v12101_v59 = vpop.permute.xlu2 %8317 }
 0x4b9   :  { %v5708_v58 = vmax.f32 %v5487_v35, %v5644_v48  ;;  %7523 = vmatmul.msk.f32.gmra.mxu2 %vm2390_vm2, %v11799_v61  ;;  %v4975_v6 = vsel %vm4946_vm7, %v4910_v63, %v8204_v54  ;;  %v4846_v61 = vsel %vm4816_vm4, %v4781_v19, %v8195_v36  ;;  %v5284_v48 = vadd.f32 %v11602_v34, %v5283_v1 }
 0x4ba   :  { %v5040_v26 = vsel %vm5011_vm8, %v4975_v6, %v8209_v13  ;;  %v4911_v50 = vsel %vm4881_vm6, %v4846_v61, %v8200_v37  ;;  %v4717_v13 = vsel %vm4686_vm3, %v4652_v12, %v8214_v24  ;;  %v8215_v54 = vunpack.i.h.bf16 %v11839_v5  ;;  %v12136_v61 = vld [vmem:[#allocation2 + $0x7b0] sm:$0xff] }
 0x4bb   :  { %v5776_v42 = vmul.f32 %v11625_v52, %v5708_v58  ;;  %5309 = vmatmul.f32.gmra.mxu3 %v5040_v26  ;;  %8432 = vrot.lane.b32.xlu1 %v8431_v7, %s8951_s29  ;;  %v4976_v4 = vsel %vm4946_vm7, %v4911_v50, %v8205_v29  ;;  %v4653_v5 = vsel %vm2390_vm2, %v11744_v31, %v8100_v33  ;;  %v8229_v7 = vunpack.i.l.bf16 %v11864_v20 }
 0x4bc   :  { %8527 = vrot.lane.b32.xlu2 %v8526_v51, %s14044_s24  ;;  %8427 = vrot.lane.b32.xlu0 %v8426_v25, %s8950_s21  ;;  %v5489_v39 = vpop.f32.mrf.mxu2  ;;  %v5041_v36 = vsel %vm5011_vm8, %v4976_v4, %v8210_v41  ;;  %v2884_v51 = vld [vmem:[#allocation2 + $0x698] sm:$0xff]  ;;  %v2886_v25 = vld [vmem:[#allocation2 + $0x6a8] sm:$0xff] }
 0x4bd   :  { %v5844_v8 = vadd.f32 %v11630_v46, %v5776_v42  ;;  %v5490_v10 = vadd.f32 %v5489_v39, %v5281_v45  ;;  %v12094_v60 = vpop.permute.xlu1 %8222  ;;  %v4718_v45 = vsel %vm4686_vm3, %v4653_v5, %v8215_v54  ;;  %v8461_v24 = vpack.i.bf16 %v2886_v25, %v2884_v51  ;;  %v12176_v54 = vld [vmem:[#allocation2 + $0x730] sm:$0xff] }
 0x4be   :  { %v8218_v3 = vpop.permute.xlu0 %8217  ;;  %v8224_v21 = vunpack.i.l.bf16 %v12094_v60 }
 0x4bf   :  { %5929 = vst.msk [vmem:[#allocation3 + $0x100] sm:$0xff] %vm4686_vm3, %v5844_v8  ;;  %v5645_v35 = vmul.f32 0.2, %v5490_v10  ;;  %v8219_v14 = vunpack.i.l.bf16 %v8218_v3  ;;  %v8220_v19 = vunpack.i.h.bf16 %v8218_v3  ;;  %v12140_v37 = vpop.permute.xlu2 %8332  ;;  %v12145_v8 = vld [vmem:[#allocation2 + $0x7a0] sm:$0xff] }
 0x4c0   :  { %v8556_v41 = vpack.i.bf16 %v12136_v61, %v12145_v8  ;;  %v14071_v3 = vld [vmem:[#allocation26_spill] sm:$0xff] }
 0x4c1   :  { %v5709_v9 = vmax.f32 %v5490_v10, %v5645_v35  ;;  %7524 = vmatmul.msk.f32.gmra.mxu2 %vm2390_vm2, %v11797_v11  ;;  %v4782_v47 = vsel %vm4751_vm5, %v4717_v13, %v8219_v14  ;;  %v5286_v11 = vpop.f32.mrf.mxu3  ;;  %v4783_v23 = vsel %vm4751_vm5, %v4718_v45, %v8220_v19  ;;  %v8144_v10 = vunpack.i.l.bf16 %v11893_v56  ;;  %v12156_v35 = vld [vmem:[%s13991_s4] ss:$0 sm:$0xff] }
 0x4c2   :  { %v4847_v34 = vsel %vm4816_vm4, %v4782_v47, %v8224_v21  ;;  %v8456_v50 = vpack.i.bf16 %v11942_v27, %v14071_v3  ;;  %v8230_v13 = vunpack.i.h.bf16 %v11864_v20  ;;  %v8878_v47 = vld [vmem:[#allocation2 + $0x480] sm:$0xff] }
 0x4c3   :  { %v5777_v53 = vmul.f32 %v11625_v52, %v5709_v9  ;;  %5312 = vmatmul.f32.gmra.mxu3 %v5041_v36  ;;  %8447 = vrot.lane.b32.xlu1 %v10844_v38, %s8954_s27  ;;  %v4912_v31 = vsel %vm4881_vm6, %v4847_v34, %v8229_v7  ;;  %v12168_v9 = vld [vmem:[%s13993_s6] ss:$0 sm:$0xff]  ;;  %v4654_v36 = vsel %vm2390_vm2, %v8878_v47, %v8144_v10 }
 0x4c4   :  { %8542 = vrot.lane.b32.xlu2 %v8541_v2, %s14050_s28  ;;  %8442 = vrot.lane.b32.xlu0 %v8441_v49, %s8953_s18  ;;  %v5492_v62 = vpop.f32.mrf.mxu2  ;;  %v6069_v34 = vld [vmem:[%s13994_s7 + $0x60] sm:$0xff] }
 0x4c5   :  { %v5845_v63 = vadd.f32 %v11630_v46, %v5777_v53  ;;  %v5493_v58 = vadd.f32 %v5492_v62, %v5284_v48  ;;  %v12126_v6 = vpop.permute.xlu1 %8237  ;;  %v8225_v46 = vunpack.i.h.bf16 %v12094_v60  ;;  %v14072_v53 = vld [vmem:[#allocation27_spill] sm:$0xff]  ;;  %6553 = vmatpush.msrb.mxu3 %v6069_v34 }
 0x4c6   :  { %v8239_v38 = vunpack.i.l.bf16 %v12126_v6  ;;  %v8233_v26 = vpop.permute.xlu0 %8232  ;;  %v8240_v20 = vunpack.i.h.bf16 %v12126_v6  ;;  %v8145_v6 = vunpack.i.h.bf16 %v11893_v56 }
 0x4c7   :  { %5930 = vst.msk [vmem:[#allocation3 + $0x108] sm:$0xff] %vm4686_vm3, %v5845_v63  ;;  %v5646_v42 = vmul.f32 0.2, %v5493_v58  ;;  %v8234_v29 = vunpack.i.l.bf16 %v8233_v26  ;;  %v8235_v4 = vunpack.i.h.bf16 %v8233_v26  ;;  %v4848_v12 = vsel %vm4816_vm4, %v4783_v23, %v8225_v46  ;;  %v14073_v26 = vld [vmem:[#allocation24_spill] sm:$0xff] }
 0x4c8   :  { %v4913_v48 = vsel %vm4881_vm6, %v4848_v12, %v8230_v13  ;;  %v8471_v46 = vpack.i.bf16 %v12176_v54, %v12099_v43 }
 0x4c9   :  { %v5710_v1 = vmax.f32 %v5493_v58, %v5646_v42  ;;  %7525 = vmatmul.msk.f32.gmra.mxu2 %vm2390_vm2, %v11846_v16  ;;  %v4977_v39 = vsel %vm4946_vm7, %v4912_v31, %v8234_v29  ;;  %v5287_v16 = vadd.f32 %v12156_v35, %v5286_v11  ;;  %v5289_v33 = vpop.f32.mrf.mxu3  ;;  %v8254_v11 = vunpack.i.l.bf16 %v14072_v53  ;;  %v12181_v58 = vld [vmem:[#allocation2 + $0x740] sm:$0xff]  ;;  %v12198_v42 = vpop.permute.xlu2 %8347 }
 0x4ca   :  { %v5042_v60 = vsel %vm5011_vm8, %v4977_v39, %v8239_v38  ;;  %v4978_v63 = vsel %vm4946_vm7, %v4913_v48, %v8235_v4  ;;  %v8571_v45 = vpack.i.bf16 %v12181_v58, %v12176_v54  ;;  %v5290_v56 = vadd.f32 %v12156_v35, %v5289_v33  ;;  %v12203_v29 = vld [vmem:[%s13992_s5] ss:$0 sm:$0xff]  ;;  %v14075_v4 = vld [vmem:[#allocation31_spill] sm:$0xff] }
 0x4cb   :  { %v5778_v14 = vmul.f32 %v11625_v52, %v5710_v1  ;;  %5315 = vmatmul.f32.gmra.mxu3 %v5042_v60  ;;  %8462 = vrot.lane.b32.xlu1 %v8461_v24, %s8951_s29  ;;  %v4719_v38 = vsel %vm4686_vm3, %v4654_v36, %v8254_v11  ;;  %v5043_v25 = vsel %vm5011_vm8, %v4978_v63, %v8240_v20  ;;  %v14074_v31 = vld [vmem:[#allocation13_spill] sm:$0xff]  ;;  %v8880_v1 = vld [vmem:[#allocation2 + $0x490] sm:$0xff]  ;;  %v8255_v60 = vunpack.i.h.bf16 %v14072_v53 }
 0x4cc   :  { %8557 = vrot.lane.b32.xlu2 %v8556_v41, %s14044_s24  ;;  %8457 = vrot.lane.b32.xlu0 %v8456_v50, %s8950_s21  ;;  %v5495_v27 = vpop.f32.mrf.mxu2  ;;  %v4655_v39 = vsel %vm2390_vm2, %v8880_v1, %v8145_v6  ;;  %v8259_v12 = vunpack.i.l.bf16 %v14075_v4  ;;  %v2905_v48 = vld [vmem:[#allocation2 + $0x750] sm:$0xff]  ;;  %v12226_v6 = vld [vmem:[#allocation2 + $0x7c0] sm:$0xff] }
 0x4cd   :  { %v5846_v52 = vadd.f32 %v12168_v9, %v5778_v14  ;;  %v5496_v21 = vadd.f32 %v5495_v27, %v5287_v16  ;;  %v12171_v49 = vpop.permute.xlu1 %8247  ;;  %v4720_v47 = vsel %vm4686_vm3, %v4655_v39, %v8255_v60 }
 0x4ce   :  { %v8243_v2 = vpop.permute.xlu0 %8242  ;;  %v8249_v7 = vunpack.i.l.bf16 %v12171_v49  ;;  %v8250_v33 = vunpack.i.h.bf16 %v12171_v49 }
 0x4cf   :  { %5931 = vst.msk [vmem:[#allocation3 + $0x110] sm:$0xff] %vm4686_vm3, %v5846_v52  ;;  %v5647_v19 = vmul.f32 0.2, %v5496_v21  ;;  %v8244_v62 = vunpack.i.l.bf16 %v8243_v2  ;;  %v8245_v24 = vunpack.i.h.bf16 %v8243_v2  ;;  %v2906_v52 = vld [vmem:[#allocation2 + $0x758] sm:$0xff]  ;;  %v2921_v2 = vld [vmem:[#allocation2 + $0x7d0] sm:$0xff] }
 0x4d1   :  { %v5711_v5 = vmax.f32 %v5496_v21, %v5647_v19  ;;  %7526 = vmatmul.msk.f32.gmra.mxu2 %vm2390_vm2, %v14073_v26  ;;  %v4784_v51 = vsel %vm4751_vm5, %v4719_v38, %v8244_v62  ;;  %v5292_v14 = vpop.f32.mrf.mxu3  ;;  %v2908_v21 = vld [vmem:[#allocation2 + $0x768] sm:$0xff]  ;;  %v4785_v53 = vsel %vm4751_vm5, %v4720_v47, %v8245_v24  ;;  %v12243_v1 = vpop.permute.xlu2 %8362 }
 0x4d2   :  { %v4849_v16 = vsel %vm4816_vm4, %v4784_v51, %v8249_v7  ;;  %v14076_v62 = vld [vmem:[#allocation30_spill] sm:$0xff]  ;;  %v8491_v34 = vpack.i.bf16 %v2908_v21, %v2906_v52  ;;  %v8486_v7 = vpack.i.bf16 %v12001_v0, %v2905_v48  ;;  %v5293_v38 = vadd.f32 %v12156_v35, %v5292_v14  ;;  %v6068_v0 = vld [vmem:[%s13994_s7 + $0x58] sm:$0xff]  ;;  %v12250_v14 = vld [vmem:[#allocation2 + $0x7f0] sm:$0xff] }
 0x4d3   :  { %v5779_v23 = vmul.f32 %v12203_v29, %v5711_v5  ;;  %5318 = vmatmul.f32.gmra.mxu3 %v5043_v25  ;;  %8477 = vrot.lane.b32.xlu1 %v14074_v31, %s8954_s27  ;;  %v4914_v11 = vsel %vm4881_vm6, %v4849_v16, %v8259_v12  ;;  %v8586_v5 = vpack.i.bf16 %v2921_v2, %v12226_v6  ;;  %v8274_v31 = vunpack.i.l.bf16 %v11974_v15  ;;  %v2922_v16 = vld [vmem:[#allocation2 + $0x7e0] sm:$0xff] }
 0x4d4   :  { %8572 = vrot.lane.b32.xlu2 %v8571_v45, %s14050_s28  ;;  %8472 = vrot.lane.b32.xlu0 %v8471_v46, %s8953_s18  ;;  %v5498_v10 = vpop.f32.mrf.mxu2  ;;  %v4850_v25 = vsel %vm4816_vm4, %v4785_v53, %v8250_v33  ;;  %v14077_v45 = vld [vmem:[#allocation6_spill] sm:$0xff]  ;;  %v14078_v2 = vld [vmem:[#allocation29_spill] sm:$0xff] }
 0x4d5   :  { %v5847_v41 = vadd.f32 %v12168_v9, %v5779_v23  ;;  %v5499_v3 = vadd.f32 %v5498_v10, %v5290_v56  ;;  %v12213_v50 = vpop.permute.xlu1 %8267  ;;  %v7659_v46 = vunpack.i.l.bf16 %v14077_v45  ;;  %v8260_v56 = vunpack.i.h.bf16 %v14075_v4  ;;  %6554 = vmatpush.msrb.mxu3 %v6068_v0  ;;  %v12252_v4 = vld [vmem:[#allocation2 + $0x800] sm:$0xff] }
 0x4d6   :  { %v8269_v13 = vunpack.i.l.bf16 %v12213_v50  ;;  %v8263_v27 = vpop.permute.xlu0 %8262  ;;  %v8270_v60 = vunpack.i.h.bf16 %v12213_v50  ;;  %v8881_v52 = vld [vmem:[#allocation2 + $0x4a0] sm:$0xff]  ;;  %v7660_v50 = vunpack.i.h.bf16 %v14077_v45 }
 0x4d7   :  { %5932 = vst.msk [vmem:[#allocation3 + $0x118] sm:$0xff] %vm4686_vm3, %v5847_v41  ;;  %v5648_v36 = vmul.f32 0.2, %v5499_v3  ;;  %v8264_v20 = vunpack.i.l.bf16 %v8263_v27  ;;  %v8265_v51 = vunpack.i.h.bf16 %v8263_v27  ;;  %v4656_v21 = vsel %vm2390_vm2, %v8881_v52, %v7659_v46  ;;  %v12276_v45 = vld [vmem:[#allocation2 + $0x880] sm:$0xff] }
 0x4d8   :  { %v4721_v47 = vsel %vm4686_vm3, %v4656_v21, %v8274_v31  ;;  %v2910_v31 = vld [vmem:[#allocation2 + $0x778] sm:$0xff] }
 0x4d9   :  { %v5712_v19 = vmax.f32 %v5499_v3, %v5648_v36  ;;  %7527 = vmatmul.msk.f32.gmra.mxu2 %vm2390_vm2, %v14076_v62  ;;  %v4979_v63 = vsel %vm4946_vm7, %v4914_v11, %v8264_v20  ;;  %v4915_v3 = vsel %vm4881_vm6, %v4850_v25, %v8260_v56  ;;  %v5295_v33 = vpop.f32.mrf.mxu3  ;;  %v8601_v11 = vpack.i.bf16 %v12252_v4, %v12250_v14 }
 0x4da   :  { %v5044_v49 = vsel %vm5011_vm8, %v4979_v63, %v8269_v13  ;;  %v4980_v27 = vsel %vm4946_vm7, %v4915_v3, %v8265_v51  ;;  %v5296_v62 = vadd.f32 %v12156_v35, %v5295_v33  ;;  %v8275_v63 = vunpack.i.h.bf16 %v11974_v15  ;;  %v8882_v15 = vld [vmem:[#allocation2 + $0x4b0] sm:$0xff] }
 0x4db   :  { %v5780_v26 = vmul.f32 %v12203_v29, %v5712_v19  ;;  %5321 = vmatmul.f32.gmra.mxu3 %v5044_v49  ;;  %8492 = vrot.lane.b32.xlu1 %v8491_v34, %s8951_s29  ;;  %v5045_v53 = vsel %vm5011_vm8, %v4980_v27, %v8270_v60  ;;  %v8501_v19 = vpack.i.bf16 %v12250_v14, %v2922_v16  ;;  %v14079_v49 = vld [vmem:[#allocation17_spill] sm:$0xff]  ;;  %v8289_v56 = vunpack.i.l.bf16 %v12017_v55  ;;  %v12281_v60 = vpop.permute.xlu2 %8377 }
 0x4dc   :  { %8587 = vrot.lane.b32.xlu2 %v8586_v5, %s14044_s24  ;;  %8487 = vrot.lane.b32.xlu0 %v8486_v7, %s8950_s21  ;;  %v5501_v23 = vpop.f32.mrf.mxu2  ;;  %v4657_v46 = vsel %vm2390_vm2, %v8882_v15, %v7660_v50 }
 0x4dd   :  { %v5848_v39 = vadd.f32 %v12168_v9, %v5780_v26  ;;  %v5502_v24 = vadd.f32 %v5501_v23, %v5293_v38  ;;  %v12246_v10 = vpop.permute.xlu1 %8282 }
 0x4de   :  { %v8278_v41 = vpop.permute.xlu0 %8277  ;;  %v8284_v20 = vunpack.i.l.bf16 %v12246_v10 }
 0x4df   :  { %5933 = vst.msk [vmem:[#allocation3 + $0x120] sm:$0xff] %vm4686_vm3, %v5848_v39  ;;  %v5649_v12 = vmul.f32 0.2, %v5502_v24  ;;  %v8279_v13 = vunpack.i.l.bf16 %v8278_v41  ;;  %v8280_v5 = vunpack.i.h.bf16 %v8278_v41  ;;  %v2912_v39 = vld [vmem:[#allocation2 + $0x788] sm:$0xff]  ;;  %v8285_v41 = vunpack.i.h.bf16 %v12246_v10 }
 0x4e0   :  { %v8521_v50 = vpack.i.bf16 %v2912_v39, %v2910_v31  ;;  %v8305_v39 = vunpack.i.h.bf16 %v12057_v28 }
 0x4e1   :  { %v5713_v36 = vmax.f32 %v5502_v24, %v5649_v12  ;;  %7528 = vmatmul.msk.f32.gmra.mxu2 %vm2390_vm2, %v14078_v2  ;;  %v4786_v48 = vsel %vm4751_vm5, %v4721_v47, %v8279_v13  ;;  %v4722_v24 = vsel %vm4686_vm3, %v4657_v46, %v8275_v63  ;;  %v12285_v12 = vld [vmem:[#allocation2 + $0x890] sm:$0xff]  ;;  %v8516_v47 = vpack.i.bf16 %v12077_v40, %v12003_v22 }
 0x4e2   :  { %v4851_v25 = vsel %vm4816_vm4, %v4786_v48, %v8284_v20  ;;  %v4787_v13 = vsel %vm4751_vm5, %v4722_v24, %v8280_v5  ;;  %v8626_v52 = vpack.i.bf16 %v12285_v12, %v12276_v45  ;;  %v14080_v48 = vld [vmem:[#allocation7_spill] sm:$0xff]  ;;  %v8304_v22 = vunpack.i.l.bf16 %v12057_v28  ;;  %v12311_v5 = vld [vmem:[#allocation2 + $0x820] sm:$0xff] }
 0x4e3   :  { %v5781_v34 = vmul.f32 %v12203_v29, %v5713_v36  ;;  %5324 = vmatmul.f32.gmra.mxu3 %v5045_v53  ;;  %8507 = vrot.lane.b32.xlu1 %v14079_v49, %s8954_s27  ;;  %v4916_v27 = vsel %vm4881_vm6, %v4851_v25, %v8289_v56  ;;  %v4852_v2 = vsel %vm4816_vm4, %v4787_v13, %v8285_v41  ;;  %v7679_v53 = vunpack.i.l.bf16 %v14080_v48  ;;  %v12309_v49 = vld [vmem:[#allocation2 + $0x810] sm:$0xff] }
 0x4e4   :  { %8602 = vrot.lane.b32.xlu2 %v8601_v11, %s14050_s28  ;;  %8502 = vrot.lane.b32.xlu0 %v8501_v19, %s8953_s18  ;;  %v5504_v7 = vpop.f32.mrf.mxu2  ;;  %v7680_v25 = vunpack.i.h.bf16 %v14080_v48  ;;  %v8531_v31 = vpack.i.bf16 %v12309_v49, %v12252_v4  ;;  %v14081_v24 = vld [vmem:[#allocation19_spill] sm:$0xff] }
 0x4e5   :  { %v5849_v38 = vadd.f32 %v12168_v9, %v5781_v34  ;;  %v5505_v26 = vadd.f32 %v5504_v7, %v5296_v62  ;;  %v8298_v51 = vpop.permute.xlu1 %8297  ;;  %v8884_v28 = vld [vmem:[#allocation2 + $0x4d0] sm:$0xff] }
 0x4e6   :  { %v8299_v23 = vunpack.i.l.bf16 %v8298_v51  ;;  %v8293_v0 = vpop.permute.xlu0 %8292  ;;  %v8300_v62 = vunpack.i.h.bf16 %v8298_v51  ;;  %v12318_v51 = vpop.permute.xlu2 %8392  ;;  %v12344_v48 = vld [vmem:[#allocation2 + $0x8b0] sm:$0xff] }
 0x4e7   :  { %5934 = vst.msk [vmem:[#allocation3 + $0x128] sm:$0xff] %vm4686_vm3, %v5849_v38  ;;  %v5650_v3 = vmul.f32 0.2, %v5505_v26  ;;  %v8294_v16 = vunpack.i.l.bf16 %v8293_v0  ;;  %v8295_v20 = vunpack.i.h.bf16 %v8293_v0  ;;  %v8883_v38 = vld [vmem:[#allocation2 + $0x4c0] sm:$0xff]  ;;  %v8631_v0 = vpack.i.bf16 %v12311_v5, %v12309_v49 }
 0x4e9   :  { %v5714_v21 = vmax.f32 %v5505_v26, %v5650_v3  ;;  %7529 = vmatmul.msk.f32.gmra.mxu2 %vm2390_vm2, %v11963_v30  ;;  %v4981_v33 = vsel %vm4946_vm7, %v4916_v27, %v8294_v16  ;;  %v8290_v30 = vunpack.i.h.bf16 %v12017_v55  ;;  %v4658_v26 = vsel %vm2390_vm2, %v8883_v38, %v7679_v53  ;;  %v6067_v3 = vld [vmem:[%s13994_s7 + $0x50] sm:$0xff] }
 0x4ea   :  { %v5046_v10 = vsel %vm5011_vm8, %v4981_v33, %v8299_v23  ;;  %v4723_v15 = vsel %vm4686_vm3, %v4658_v26, %v8304_v22  ;;  %6555 = vmatpush.msrb.mxu3 %v6067_v3  ;;  %v4659_v27 = vsel %vm2390_vm2, %v8884_v28, %v7680_v25  ;;  %v8320_v26 = vunpack.i.h.bf16 %v12101_v59 }
 0x4eb   :  { %v5782_v36 = vmul.f32 %v12203_v29, %v5714_v21  ;;  %5327 = vmatmul.f32.gmra.mxu3 %v5046_v10  ;;  %8522 = vrot.lane.b32.xlu1 %v8521_v50, %s8951_s29  ;;  %v4917_v34 = vsel %vm4881_vm6, %v4852_v2, %v8290_v30  ;;  %v2914_v50 = vld [vmem:[#allocation2 + $0x798] sm:$0xff]  ;;  %v2916_v10 = vld [vmem:[#allocation2 + $0x7a8] sm:$0xff]  ;;  %v12342_v2 = vld [vmem:[#allocation2 + $0x8a0] sm:$0xff] }
 0x4ec   :  { %8627 = vrot.lane.b32.xlu2 %v8626_v52, %s14044_s24  ;;  %8517 = vrot.lane.b32.xlu0 %v8516_v47, %s8950_s21  ;;  %v12304_v11 = vpop.f32.mrf.mxu2  ;;  %v4982_v7 = vsel %vm4946_vm7, %v4917_v34, %v8295_v20  ;;  %v8319_v52 = vunpack.i.l.bf16 %v12101_v59  ;;  %v4724_v47 = vsel %vm4686_vm3, %v4659_v27, %v8305_v39  ;;  %v8885_v39 = vld [vmem:[#allocation2 + $0x4e0] sm:$0xff] }
 0x4ed   :  { %v5850_v40 = vadd.f32 %v12168_v9, %v5782_v36  ;;  %v8313_v19 = vpop.permute.xlu1 %8312  ;;  %v5047_v23 = vsel %vm5011_vm8, %v4982_v7, %v8300_v62 }
 0x4ee   :  { %v8308_v63 = vpop.permute.xlu0 %8307  ;;  %v8314_v46 = vunpack.i.l.bf16 %v8313_v19  ;;  %v8315_v36 = vunpack.i.h.bf16 %v8313_v19  ;;  %v8641_v19 = vpack.i.bf16 %v12344_v48, %v12342_v2  ;;  %v12356_v34 = vpop.permute.xlu2 %8407 }
 0x4ef   :  { %5935 = vst.msk [vmem:[#allocation3 + $0x130] sm:$0xff] %vm4686_vm3, %v5850_v40  ;;  %v8309_v55 = vunpack.i.l.bf16 %v8308_v63  ;;  %v8310_v41 = vunpack.i.h.bf16 %v8308_v63  ;;  %v8551_v40 = vpack.i.bf16 %v2916_v10, %v2914_v50  ;;  %v8546_v63 = vpack.i.bf16 %v12145_v8, %v12067_v18 }
 0x4f0   :  { %v8334_v18 = vunpack.i.l.bf16 %v12140_v37 }
 0x4f1   :  { %7530 = vmatmul.msk.f32.gmra.mxu2 %vm2390_vm2, %v11965_v57  ;;  %v4788_v56 = vsel %vm4751_vm5, %v4723_v15, %v8309_v55  ;;  %v4789_v53 = vsel %vm4751_vm5, %v4724_v47, %v8310_v41 }
 0x4f2   :  { %v4853_v13 = vsel %vm4816_vm4, %v4788_v56, %v8314_v46  ;;  %v4854_v7 = vsel %vm4816_vm4, %v4789_v53, %v8315_v36 }
 0x4f3   :  { %5330 = vmatmul.f32.gmra.mxu3 %v5047_v23  ;;  %8537 = vrot.lane.b32.xlu1 %v14081_v24, %s8954_s27  ;;  %v4918_v30 = vsel %vm4881_vm6, %v4853_v13, %v8319_v52  ;;  %v4919_v56 = vsel %vm4881_vm6, %v4854_v7, %v8320_v26  ;;  %v12368_v23 = vld [vmem:[#allocation2 + $0x830] sm:$0xff] }
 0x4f4   :  { %8632 = vrot.lane.b32.xlu2 %v8631_v0, %s14050_s28  ;;  %8532 = vrot.lane.b32.xlu0 %v8531_v31, %s8953_s18  ;;  %v12333_v57 = vpop.f32.mrf.mxu2  ;;  %v12370_v0 = vld [vmem:[#allocation2 + $0x840] sm:$0xff]  ;;  %v8561_v52 = vpack.i.bf16 %v12368_v23, %v12311_v5  ;;  %v12397_v7 = vld [vmem:[#allocation2 + $0x8d0] sm:$0xff] }
 0x4f5   :  { %v8328_v16 = vpop.permute.xlu1 %8327  ;;  %v8661_v27 = vpack.i.bf16 %v12370_v0, %v12368_v23 }
 0x4f6   :  { %v8329_v21 = vunpack.i.l.bf16 %v8328_v16  ;;  %v8323_v33 = vpop.permute.xlu0 %8322  ;;  %v8330_v15 = vunpack.i.h.bf16 %v8328_v16  ;;  %v12391_v10 = vpop.permute.xlu2 %8422 }
 0x4f7   :  { %v8324_v20 = vunpack.i.l.bf16 %v8323_v33  ;;  %v8325_v55 = vunpack.i.h.bf16 %v8323_v33  ;;  %v14083_v33 = vld [vmem:[#allocation20_spill] sm:$0xff] }
 0x4f9   :  { %7531 = vmatmul.msk.f32.gmra.mxu2 %vm2390_vm2, %v12030_v44  ;;  %v4983_v22 = vsel %vm4946_vm7, %v4918_v30, %v8324_v20  ;;  %v14082_v44 = vld [vmem:[#allocation8_spill] sm:$0xff]  ;;  %v4984_v59 = vsel %vm4946_vm7, %v4919_v56, %v8325_v55  ;;  %v8576_v56 = vpack.i.bf16 %v12226_v6, %v12136_v61 }
 0x4fa   :  { %v5048_v62 = vsel %vm5011_vm8, %v4983_v22, %v8329_v21  ;;  %v7699_v38 = vunpack.i.l.bf16 %v14082_v44  ;;  %v7700_v41 = vunpack.i.h.bf16 %v14082_v44  ;;  %v5049_v28 = vsel %vm5011_vm8, %v4984_v59, %v8330_v15  ;;  %v8886_v20 = vld [vmem:[#allocation2 + $0x4f0] sm:$0xff]  ;;  %v12404_v15 = vld [vmem:[#allocation2 + $0x8c0] sm:$0xff] }
 0x4fb   :  { %5333 = vmatmul.f32.gmra.mxu3 %v5048_v62  ;;  %8552 = vrot.lane.b32.xlu1 %v8551_v40, %s8951_s29  ;;  %v8335_v21 = vunpack.i.h.bf16 %v12140_v37  ;;  %v8349_v37 = vunpack.i.l.bf16 %v12198_v42  ;;  %v2918_v40 = vld [vmem:[#allocation2 + $0x7b8] sm:$0xff]  ;;  %v2920_v62 = vld [vmem:[#allocation2 + $0x7c8] sm:$0xff] }
 0x4fc   :  { %8642 = vrot.lane.b32.xlu2 %v8641_v19, %s14044_s24  ;;  %8547 = vrot.lane.b32.xlu0 %v8546_v63, %s8950_s21  ;;  %v12364_v25 = vpop.f32.mrf.mxu2  ;;  %v4660_v24 = vsel %vm2390_vm2, %v8885_v39, %v7699_v38  ;;  %v4661_v53 = vsel %vm2390_vm2, %v8886_v20, %v7700_v41 }
 0x4fd   :  { %v8343_v8 = vpop.permute.xlu1 %8342  ;;  %v4725_v3 = vsel %vm4686_vm3, %v4660_v24, %v8334_v18  ;;  %v4726_v19 = vsel %vm4686_vm3, %v4661_v53, %v8335_v21  ;;  %v8581_v18 = vpack.i.bf16 %v2920_v62, %v2918_v40  ;;  %v8350_v24 = vunpack.i.h.bf16 %v12198_v42  ;;  %v12426_v21 = vld [vmem:[#allocation2 + $0x860] sm:$0xff] }
 0x4fe   :  { %v8338_v46 = vpop.permute.xlu0 %8337  ;;  %v8344_v13 = vunpack.i.l.bf16 %v8343_v8  ;;  %v8345_v63 = vunpack.i.h.bf16 %v8343_v8  ;;  %v8676_v8 = vpack.i.bf16 %v12397_v7, %v12404_v15  ;;  %v8365_v40 = vunpack.i.h.bf16 %v12243_v1  ;;  %v14085_v62 = vld [vmem:[#allocation21_spill] sm:$0xff] }
 0x4ff   :  { %v8339_v31 = vunpack.i.l.bf16 %v8338_v46  ;;  %v8340_v50 = vunpack.i.h.bf16 %v8338_v46 }
 0x501   :  { %7532 = vmatmul.msk.f32.gmra.mxu2 %vm2390_vm2, %v12033_v32  ;;  %v4790_v16 = vsel %vm4751_vm5, %v4725_v3, %v8339_v31  ;;  %v4791_v44 = vsel %vm4751_vm5, %v4726_v19, %v8340_v50  ;;  %v8364_v3 = vunpack.i.l.bf16 %v12243_v1 }
 0x502   :  { %v4855_v36 = vsel %vm4816_vm4, %v4790_v16, %v8344_v13  ;;  %v4856_v59 = vsel %vm4816_vm4, %v4791_v44, %v8345_v63  ;;  %v2940_v63 = vld [vmem:[#allocation2 + $0x878] sm:$0xff]  ;;  %v6066_v44 = vld [vmem:[%s13994_s7 + $0x48] sm:$0xff] }
 0x503   :  { %5336 = vmatmul.f32.gmra.mxu3 %v5049_v28  ;;  %8567 = vrot.lane.b32.xlu1 %v14083_v33, %s8954_s27  ;;  %v4920_v38 = vsel %vm4881_vm6, %v4855_v36, %v8349_v37  ;;  %v4921_v16 = vsel %vm4881_vm6, %v4856_v59, %v8350_v24  ;;  %v12421_v28 = vld [vmem:[#allocation2 + $0x850] sm:$0xff]  ;;  %v8887_v33 = vld [vmem:[#allocation2 + $0x5a0] sm:$0xff] }
 0x504   :  { %8662 = vrot.lane.b32.xlu2 %v8661_v27, %s14050_s28  ;;  %8562 = vrot.lane.b32.xlu0 %v8561_v52, %s8953_s18  ;;  %v12389_v32 = vpop.f32.mrf.mxu2  ;;  %v12423_v27 = vpop.permute.xlu2 %8437 }
 0x505   :  { %v8358_v47 = vpop.permute.xlu1 %8357  ;;  %6556 = vmatpush.msrb.mxu3 %v6066_v44  ;;  %v2959_v44 = vld [vmem:[#allocation2 + $0x918] sm:$0xff] }
 0x506   :  { %v8359_v30 = vunpack.i.l.bf16 %v8358_v47  ;;  %v8353_v22 = vpop.permute.xlu0 %8352  ;;  %v8360_v61 = vunpack.i.h.bf16 %v8358_v47 }
 0x507   :  { %v8354_v55 = vunpack.i.l.bf16 %v8353_v22  ;;  %v8355_v31 = vunpack.i.h.bf16 %v8353_v22  ;;  %v8591_v22 = vpack.i.bf16 %v12421_v28, %v12370_v0 }
 0x509   :  { %7533 = vmatmul.msk.f32.gmra.mxu2 %vm2390_vm2, %v12096_v17  ;;  %v4985_v26 = vsel %vm4946_vm7, %v4920_v38, %v8354_v55  ;;  %v14084_v17 = vld [vmem:[#allocation11_spill] sm:$0xff]  ;;  %v4986_v42 = vsel %vm4946_vm7, %v4921_v16, %v8355_v31 }
 0x50a   :  { %v5050_v46 = vsel %vm5011_vm8, %v4985_v26, %v8359_v30  ;;  %v7799_v39 = vunpack.i.l.bf16 %v14084_v17  ;;  %v7800_v36 = vunpack.i.h.bf16 %v14084_v17  ;;  %v5051_v37 = vsel %vm5011_vm8, %v4986_v42, %v8360_v61  ;;  %v2942_v55 = vld [vmem:[#allocation2 + $0x888] sm:$0xff]  ;;  %v2939_v26 = vld [vmem:[#allocation2 + $0x870] sm:$0xff] }
 0x50b   :  { %5339 = vmatmul.f32.gmra.mxu3 %v5050_v46  ;;  %8582 = vrot.lane.b32.xlu1 %v8581_v18, %s8951_s29  ;;  %v8691_v30 = vpack.i.bf16 %v12426_v21, %v12421_v28  ;;  %v8888_v18 = vld [vmem:[#allocation2 + $0x5b0] sm:$0xff]  ;;  %v8611_v24 = vpack.i.bf16 %v2942_v55, %v2940_v63  ;;  %v8606_v16 = vpack.i.bf16 %v12276_v45, %v2939_v26  ;;  %v14086_v45 = vld [vmem:[#allocation9_spill] sm:$0xff]  ;;  %v2957_v55 = vld [vmem:[#allocation2 + $0x908] sm:$0xff] }
 0x50c   :  { %8677 = vrot.lane.b32.xlu2 %v8676_v8, %s14044_s24  ;;  %8577 = vrot.lane.b32.xlu0 %v8576_v56, %s8950_s21  ;;  %v12417_v41 = vpop.f32.mrf.mxu2  ;;  %v4662_v50 = vsel %vm2390_vm2, %v8887_v33, %v7799_v39  ;;  %v4663_v46 = vsel %vm2390_vm2, %v8888_v18, %v7800_v36  ;;  %v8379_v8 = vunpack.i.l.bf16 %v12281_v60  ;;  %v12461_v33 = vld [vmem:[#allocation2 + $0x8e0] sm:$0xff] }
 0x50d   :  { %v8373_v13 = vpop.permute.xlu1 %8372  ;;  %v4727_v20 = vsel %vm4686_vm3, %v4662_v50, %v8364_v3  ;;  %v4728_v59 = vsel %vm4686_vm3, %v4663_v46, %v8365_v40  ;;  %v2955_v3 = vld [vmem:[#allocation2 + $0x8f0] sm:$0xff]  ;;  %v5979_v40 = vld [vmem:[#allocation3 + $0x18] sm:$0xff]  ;;  %v2956_v18 = vld [vmem:[#allocation2 + $0x900] sm:$0xff] }
 0x50e   :  { %v8368_v6 = vpop.permute.xlu0 %8367  ;;  %v8374_v47 = vunpack.i.l.bf16 %v8373_v13  ;;  %v8375_v17 = vunpack.i.h.bf16 %v8373_v13  ;;  %v8706_v50 = vpack.i.bf16 %v2955_v3, %v12461_v33  ;;  %v12478_v46 = vld [vmem:[#allocation2 + $0x910] sm:$0xff] }
 0x50f   :  { %v8369_v52 = vunpack.i.l.bf16 %v8368_v6  ;;  %v8370_v19 = vunpack.i.h.bf16 %v8368_v6 }
 0x511   :  { %7534 = vmatmul.msk.f32.gmra.mxu2 %vm2390_vm2, %v12099_v43  ;;  %v4792_v53 = vsel %vm4751_vm5, %v4727_v20, %v8369_v52  ;;  %v4793_v61 = vsel %vm4751_vm5, %v4728_v59, %v8370_v19  ;;  %v12456_v52 = vpop.permute.xlu2 %8452 }
 0x512   :  { %v4857_v1 = vsel %vm4816_vm4, %v4792_v53, %v8374_v47  ;;  %v4858_v20 = vsel %vm4816_vm4, %v4793_v61, %v8375_v17  ;;  %v7819_v47 = vunpack.i.l.bf16 %v14086_v45  ;;  %v8380_v53 = vunpack.i.h.bf16 %v12281_v60 }
 0x513   :  { %5342 = vmatmul.f32.gmra.mxu3 %v5051_v37  ;;  %8597 = vrot.lane.b32.xlu1 %v14085_v62, %s8954_s27  ;;  %v4922_v6 = vsel %vm4881_vm6, %v4857_v1, %v8379_v8  ;;  %v8394_v37 = vunpack.i.l.bf16 %v12318_v51  ;;  %v8889_v8 = vld [vmem:[#allocation2 + $0x5c0] sm:$0xff] }
 0x514   :  { %8692 = vrot.lane.b32.xlu2 %v8691_v30, %s14050_s28  ;;  %8592 = vrot.lane.b32.xlu0 %v8591_v22, %s8953_s18  ;;  %v12444_v43 = vpop.f32.mrf.mxu2  ;;  %v5977_v22 = vld [vmem:[#allocation3 + $0x8] sm:$0xff]  ;;  %v4923_v63 = vsel %vm4881_vm6, %v4858_v20, %v8380_v53  ;;  %v5983_v20 = vld [vmem:[#allocation3 + $0x38] sm:$0xff] }
 0x515   :  { %v8388_v38 = vpop.permute.xlu1 %8387  ;;  %v8721_v59 = vpack.i.bf16 %v5979_v40, %v5977_v22 }
 0x516   :  { %v8389_v56 = vunpack.i.l.bf16 %v8388_v38  ;;  %v8383_v31 = vpop.permute.xlu0 %8382  ;;  %v8390_v62 = vunpack.i.h.bf16 %v8388_v38  ;;  %v7820_v38 = vunpack.i.h.bf16 %v14086_v45 }
 0x517   :  { %v8384_v39 = vunpack.i.l.bf16 %v8383_v31  ;;  %v8385_v36 = vunpack.i.h.bf16 %v8383_v31 }
 0x519   :  { %7535 = vmatmul.msk.f32.gmra.mxu2 %vm2390_vm2, %v12176_v54  ;;  %v4987_v42 = vsel %vm4946_vm7, %v4922_v6, %v8384_v39  ;;  %v4988_v26 = vsel %vm4946_vm7, %v4923_v63, %v8385_v36  ;;  %v2946_v63 = vld [vmem:[#allocation2 + $0x8a8] sm:$0xff] }
 0x51a   :  { %v5052_v13 = vsel %vm5011_vm8, %v4987_v42, %v8389_v56  ;;  %v4664_v56 = vsel %vm2390_vm2, %v8889_v8, %v7819_v47  ;;  %v5053_v6 = vsel %vm5011_vm8, %v4988_v26, %v8390_v62  ;;  %v8395_v42 = vunpack.i.h.bf16 %v12318_v51  ;;  %v8890_v51 = vld [vmem:[#allocation2 + $0x5d0] sm:$0xff] }
 0x51b   :  { %5345 = vmatmul.f32.gmra.mxu3 %v5052_v13  ;;  %8612 = vrot.lane.b32.xlu1 %v8611_v24, %s8951_s29  ;;  %v4729_v17 = vsel %vm4686_vm3, %v4664_v56, %v8394_v37  ;;  %v8621_v24 = vpack.i.bf16 %v2959_v44, %v2957_v55  ;;  %v12492_v13 = vpop.permute.xlu2 %8467  ;;  %v4665_v53 = vsel %vm2390_vm2, %v8890_v51, %v7820_v38  ;;  %v8409_v37 = vunpack.i.l.bf16 %v12356_v34 }
 0x51c   :  { %8707 = vrot.lane.b32.xlu2 %v8706_v50, %s14044_s24  ;;  %8607 = vrot.lane.b32.xlu0 %v8606_v16, %s8950_s21  ;;  %v12471_v54 = vpop.f32.mrf.mxu2  ;;  %v8616_v16 = vpack.i.bf16 %v12478_v46, %v2956_v18  ;;  %v4730_v55 = vsel %vm4686_vm3, %v4665_v53, %v8395_v42 }
 0x51d   :  { %v12474_v30 = vpop.permute.xlu1 %8402 }
 0x51e   :  { %v8398_v19 = vpop.permute.xlu0 %8397  ;;  %v5298_v60 = vpop.f32.mrf.mxu3  ;;  %v8404_v39 = vunpack.i.l.bf16 %v12474_v30  ;;  %v8405_v44 = vunpack.i.h.bf16 %v12474_v30 }
 0x51f   :  { %v8399_v1 = vunpack.i.l.bf16 %v8398_v19  ;;  %v5299_v31 = vadd.f32 %v12156_v35, %v5298_v60  ;;  %v8400_v50 = vunpack.i.h.bf16 %v8398_v19  ;;  %v2944_v19 = vld [vmem:[#allocation2 + $0x898] sm:$0xff] }
 0x520   :  { %v8636_v38 = vpack.i.bf16 %v2946_v63, %v2944_v19 }
 0x521   :  { %7536 = vmatmul.msk.f32.gmra.mxu2 %vm2390_vm2, %v12181_v58  ;;  %v4794_v3 = vsel %vm4751_vm5, %v4729_v17, %v8399_v1  ;;  %v5508_v61 = vadd.f32 %v12304_v11, %v5299_v31  ;;  %v5981_v11 = vld [vmem:[#allocation3 + $0x28] sm:$0xff]  ;;  %v4795_v18 = vsel %vm4751_vm5, %v4730_v55, %v8400_v50 }
 0x522   :  { %v4859_v47 = vsel %vm4816_vm4, %v4794_v3, %v8404_v39  ;;  %v8736_v26 = vpack.i.bf16 %v5983_v20, %v5981_v11  ;;  %v12538_v11 = vld [vmem:[#allocation2 + $0x930] sm:$0xff] }
 0x523   :  { %5348 = vmatmul.f32.gmra.mxu3 %v5053_v6  ;;  %8622 = vrot.lane.b32.xlu1 %v8621_v24, %s8954_s27  ;;  %v5651_v36 = vmul.f32 0.2, %v5508_v61  ;;  %v4924_v31 = vsel %vm4881_vm6, %v4859_v47, %v8409_v37  ;;  %v8646_v24 = vpack.i.bf16 %v12342_v2, %v12285_v12  ;;  %v14087_v6 = vld [vmem:[#allocation10_spill] sm:$0xff]  ;;  %v8424_v2 = vunpack.i.l.bf16 %v12391_v10  ;;  %v12532_v50 = vpop.permute.xlu2 %8482 }
 0x524   :  { %8722 = vrot.lane.b32.xlu2 %v8721_v59, %s14050_s28  ;;  %8617 = vrot.lane.b32.xlu0 %v8616_v16, %s8953_s18  ;;  %v12497_v58 = vpop.f32.mrf.mxu2  ;;  %v8410_v16 = vunpack.i.h.bf16 %v12356_v34  ;;  %v6065_v12 = vld [vmem:[%s13994_s7 + $0x40] sm:$0xff]  ;;  %v2961_v37 = vld [vmem:[#allocation2 + $0x928] sm:$0xff] }
 0x525   :  { %v12499_v45 = vpop.permute.xlu1 %8417  ;;  %v5715_v22 = vmax.f32 %v5508_v61, %v5651_v36  ;;  %v4860_v61 = vsel %vm4816_vm4, %v4795_v18, %v8405_v44  ;;  %v12536_v34 = vld [vmem:[#allocation2 + $0x920] sm:$0xff]  ;;  %6557 = vmatpush.msrb.mxu3 %v6065_v12  ;;  %v5995_v18 = vld [vmem:[#allocation3 + $0xa8] sm:$0xff] }
 0x526   :  { %v8419_v40 = vunpack.i.l.bf16 %v12499_v45  ;;  %v8413_v62 = vpop.permute.xlu0 %8412  ;;  %v5301_v60 = vpop.f32.mrf.mxu3  ;;  %v8420_v20 = vunpack.i.h.bf16 %v12499_v45  ;;  %v4925_v53 = vsel %vm4881_vm6, %v4860_v61, %v8410_v16  ;;  %v8891_v44 = vld [vmem:[#allocation2 + $0x5e0] sm:$0xff]  ;;  %v8439_v16 = vunpack.i.l.bf16 %v12423_v27 }
 0x527   :  { %v8414_v1 = vunpack.i.l.bf16 %v8413_v62  ;;  %v5783_v8 = vmul.f32 %v12203_v29, %v5715_v22  ;;  %v5302_v56 = vadd.f32 %v12156_v35, %v5301_v60  ;;  %v8415_v3 = vunpack.i.h.bf16 %v8413_v62  ;;  %v2963_v22 = vld [vmem:[#allocation2 + $0x938] sm:$0xff] }
 0x528   :  { %v7840_v62 = vunpack.i.h.bf16 %v14087_v6 }
 0x529   :  { %7537 = vmatmul.msk.f32.gmra.mxu2 %vm2390_vm2, %v12250_v14  ;;  %v4989_v59 = vsel %vm4946_vm7, %v4924_v31, %v8414_v1  ;;  %v5851_v17 = vadd.f32 %v12168_v9, %v5783_v8  ;;  %v5511_v30 = vadd.f32 %v12333_v57, %v5302_v56  ;;  %v7839_v14 = vunpack.i.l.bf16 %v14087_v6 }
 0x52a   :  { %v5054_v39 = vsel %vm5011_vm8, %v4989_v59, %v8419_v40  ;;  %v5997_v40 = vld [vmem:[#allocation3 + $0xb8] sm:$0xff]  ;;  %v4990_v55 = vsel %vm4946_vm7, %v4925_v53, %v8415_v3  ;;  %v8656_v31 = vpack.i.bf16 %v2963_v22, %v2961_v37 }
 0x52b   :  { %5351 = vmatmul.f32.gmra.mxu3 %v5054_v39  ;;  %8637 = vrot.lane.b32.xlu1 %v8636_v38, %s8951_s29  ;;  %5936 = vst.msk [vmem:[#allocation3 + $0x148] sm:$0xff] %vm4686_vm3, %v5851_v17  ;;  %v5652_v42 = vmul.f32 0.2, %v5511_v30  ;;  %v4666_v1 = vsel %vm2390_vm2, %v8891_v44, %v7839_v14  ;;  %v8751_v59 = vpack.i.bf16 %v5997_v40, %v5995_v18  ;;  %v8892_v14 = vld [vmem:[#allocation2 + $0x5f0] sm:$0xff]  ;;  %v12571_v53 = vpop.permute.xlu2 %8497 }
 0x52c   :  { %8737 = vrot.lane.b32.xlu2 %v8736_v26, %s14050_s28  ;;  %8647 = vrot.lane.b32.xlu0 %v8646_v24, %s8950_s21  ;;  %v12526_v57 = vpop.f32.mrf.mxu2  ;;  %v8651_v26 = vpack.i.bf16 %v12538_v11, %v12536_v34  ;;  %v4731_v8 = vsel %vm4686_vm3, %v4666_v1, %v8424_v2  ;;  %v5055_v39 = vsel %vm5011_vm8, %v4990_v55, %v8420_v20  ;;  %v8425_v24 = vunpack.i.h.bf16 %v12391_v10  ;;  %v2948_v20 = vld [vmem:[#allocation2 + $0x8b8] sm:$0xff] }
 0x52d   :  { %v12534_v36 = vpop.permute.xlu1 %8432  ;;  %v5716_v47 = vmax.f32 %v5511_v30, %v5652_v42  ;;  %v4667_v10 = vsel %vm2390_vm2, %v8892_v14, %v7840_v62  ;;  %v2967_v14 = vld [vmem:[#allocation2 + $0x958] sm:$0xff] }
 0x52e   :  { %v8428_v51 = vpop.permute.xlu0 %8427  ;;  %v5304_v63 = vpop.f32.mrf.mxu3  ;;  %v8434_v56 = vunpack.i.l.bf16 %v12534_v36  ;;  %v8435_v37 = vunpack.i.h.bf16 %v12534_v36  ;;  %v8666_v36 = vpack.i.bf16 %v12404_v15, %v12344_v48  ;;  %v8454_v15 = vunpack.i.l.bf16 %v12456_v52 }
 0x52f   :  { %v8429_v19 = vunpack.i.l.bf16 %v8428_v51  ;;  %v5784_v60 = vmul.f32 %v12203_v29, %v5716_v47  ;;  %v5305_v45 = vadd.f32 %v12156_v35, %v5304_v63  ;;  %v8430_v3 = vunpack.i.h.bf16 %v8428_v51  ;;  %v2950_v47 = vld [vmem:[#allocation2 + $0x8c8] sm:$0xff] }
 0x530   :  { %v4732_v51 = vsel %vm4686_vm3, %v4667_v10, %v8425_v24  ;;  %v12602_v10 = vld [vmem:[#allocation2 + $0x950] sm:$0xff] }
 0x531   :  { %7538 = vmatmul.msk.f32.gmra.mxu2 %vm2390_vm2, %v12252_v4  ;;  %v5852_v38 = vadd.f32 %v12168_v9, %v5784_v60  ;;  %v4796_v17 = vsel %vm4751_vm5, %v4731_v8, %v8429_v19  ;;  %v5514_v30 = vadd.f32 %v12364_v25, %v5305_v45  ;;  %v6001_v19 = vld [vmem:[#allocation3 + $0xd8] sm:$0xff]  ;;  %v4797_v63 = vsel %vm4751_vm5, %v4732_v51, %v8430_v3  ;;  %v5999_v45 = vld [vmem:[#allocation3 + $0xc8] sm:$0xff] }
 0x532   :  { %v4861_v25 = vsel %vm4816_vm4, %v4796_v17, %v8434_v56  ;;  %v8671_v60 = vpack.i.bf16 %v2950_v47, %v2948_v20  ;;  %v8766_v56 = vpack.i.bf16 %v6001_v19, %v5999_v45  ;;  %v8440_v17 = vunpack.i.h.bf16 %v12423_v27  ;;  %v8893_v20 = vld [vmem:[#allocation2 + $0x600] sm:$0xff] }
 0x533   :  { %5354 = vmatmul.f32.gmra.mxu3 %v5055_v39  ;;  %8657 = vrot.lane.b32.xlu1 %v8656_v31, %s8954_s27  ;;  %5937 = vst.msk [vmem:[#allocation3 + $0x150] sm:$0xff] %vm4686_vm3, %v5852_v38  ;;  %v5653_v61 = vmul.f32 0.2, %v5514_v30  ;;  %v4926_v44 = vsel %vm4881_vm6, %v4861_v25, %v8439_v16  ;;  %v12598_v39 = vld [vmem:[#allocation2 + $0x940] sm:$0xff]  ;;  %v2965_v25 = vld [vmem:[#allocation2 + $0x948] sm:$0xff] }
 0x534   :  { %8652 = vrot.lane.b32.xlu0 %v8651_v26, %s8953_s18  ;;  %8752 = vrot.lane.b32.xlu2 %v8751_v59, %s14050_s28  ;;  %v12562_v4 = vpop.f32.mrf.mxu2  ;;  %v14088_v59 = vld [vmem:[#allocation12_spill] sm:$0xff]  ;;  %v8686_v19 = vpack.i.bf16 %v2967_v14, %v2965_v25  ;;  %v12644_v14 = vld [vmem:[%s13991_s4] ss:$0 sm:$0xff] }
 0x535   :  { %v12564_v6 = vpop.permute.xlu1 %8447  ;;  %v5717_v42 = vmax.f32 %v5514_v30, %v5653_v61  ;;  %v7859_v38 = vunpack.i.l.bf16 %v14088_v59 }
 0x536   :  { %v8449_v12 = vunpack.i.l.bf16 %v12564_v6  ;;  %v8443_v2 = vpop.permute.xlu0 %8442  ;;  %v5307_v40 = vpop.f32.mrf.mxu3  ;;  %v8450_v24 = vunpack.i.h.bf16 %v12564_v6 }
 0x537   :  { %v8444_v22 = vunpack.i.l.bf16 %v8443_v2  ;;  %v5785_v62 = vmul.f32 %v12203_v29, %v5717_v42  ;;  %v5308_v55 = vadd.f32 %v12156_v35, %v5307_v40  ;;  %v8445_v31 = vunpack.i.h.bf16 %v8443_v2 }
 0x538   :  { %v7860_v2 = vunpack.i.h.bf16 %v14088_v59  ;;  %v4668_v47 = vsel %vm2390_vm2, %v8893_v20, %v7859_v38 }
 0x539   :  { %7539 = vmatmul.msk.f32.gmra.mxu2 %vm2390_vm2, %v12309_v49  ;;  %v4991_v1 = vsel %vm4946_vm7, %v4926_v44, %v8444_v22  ;;  %v5853_v26 = vadd.f32 %v12168_v9, %v5785_v62  ;;  %v5517_v18 = vadd.f32 %v12389_v32, %v5308_v55  ;;  %v4862_v49 = vsel %vm4816_vm4, %v4797_v63, %v8435_v37  ;;  %v12610_v22 = vpop.permute.xlu2 %8512 }
 0x53a   :  { %v5056_v8 = vsel %vm5011_vm8, %v4991_v1, %v8449_v12  ;;  %v4927_v27 = vsel %vm4881_vm6, %v4862_v49, %v8440_v17  ;;  %v4733_v37 = vsel %vm4686_vm3, %v4668_v47, %v8454_v15  ;;  %v8681_v63 = vpack.i.bf16 %v12602_v10, %v12598_v39  ;;  %v2952_v17 = vld [vmem:[#allocation2 + $0x8d8] sm:$0xff] }
 0x53b   :  { %5357 = vmatmul.f32.gmra.mxu3 %v5056_v8  ;;  %8672 = vrot.lane.b32.xlu1 %v8671_v60, %s8951_s29  ;;  %5938 = vst.msk [vmem:[#allocation3 + $0x158] sm:$0xff] %vm4686_vm3, %v5853_v26  ;;  %v5654_v48 = vmul.f32 0.2, %v5517_v18  ;;  %v4992_v12 = vsel %vm4946_vm7, %v4927_v27, %v8445_v31  ;;  %v8455_v1 = vunpack.i.h.bf16 %v12456_v52  ;;  %v6013_v60 = vld [vmem:[#allocation3 + $0x148] sm:$0xff]  ;;  %v8894_v8 = vld [vmem:[#allocation2 + $0x610] sm:$0xff]  ;;  %v8469_v31 = vunpack.i.l.bf16 %v12492_v13 }
 0x53c   :  { %8667 = vrot.lane.b32.xlu0 %v8666_v36, %s8950_s21  ;;  %8767 = vrot.lane.b32.xlu2 %v8766_v56, %s14050_s28  ;;  %v12593_v32 = vpop.f32.mrf.mxu2  ;;  %v4669_v56 = vsel %vm2390_vm2, %v8894_v8, %v7860_v2  ;;  %v12654_v2 = vld [vmem:[%s13993_s6] ss:$0 sm:$0xff] }
 0x53d   :  { %v12596_v30 = vpop.permute.xlu1 %8462  ;;  %v5718_v3 = vmax.f32 %v5517_v18, %v5654_v48  ;;  %v2954_v48 = vld [vmem:[#allocation2 + $0x8e8] sm:$0xff]  ;;  %v4734_v15 = vsel %vm4686_vm3, %v4669_v56, %v8455_v1  ;;  %v8897_v8 = vld [vmem:[#allocation2 + $0x6c0] sm:$0xff] }
 0x53e   :  { %v8458_v61 = vpop.permute.xlu0 %8457  ;;  %v5310_v42 = vpop.f32.mrf.mxu3  ;;  %v8464_v40 = vunpack.i.l.bf16 %v12596_v30 }
 0x53f   :  { %v8459_v16 = vunpack.i.l.bf16 %v8458_v61  ;;  %v5786_v51 = vmul.f32 %v12203_v29, %v5718_v3  ;;  %v5311_v6 = vadd.f32 %v12156_v35, %v5310_v42  ;;  %v5057_v35 = vsel %vm5011_vm8, %v4992_v12, %v8450_v24 }
 0x540   :  { %v8465_v24 = vunpack.i.h.bf16 %v12596_v30  ;;  %v8701_v12 = vpack.i.bf16 %v2954_v48, %v2952_v17 }
 0x541   :  { %7540 = vmatmul.msk.f32.gmra.mxu2 %vm2390_vm2, %v12311_v5  ;;  %v5854_v62 = vadd.f32 %v12168_v9, %v5786_v51  ;;  %v4798_v55 = vsel %vm4751_vm5, %v4733_v37, %v8459_v16  ;;  %v5520_v44 = vadd.f32 %v12417_v41, %v5311_v6  ;;  %v8460_v5 = vunpack.i.h.bf16 %v8458_v61  ;;  %v6064_v41 = vld [vmem:[%s13994_s7 + $0x38] sm:$0xff]  ;;  %v12661_v6 = vpop.permute.xlu2 %8527 }
 0x542   :  { %v6015_v36 = vld [vmem:[#allocation3 + $0x158] sm:$0xff]  ;;  %v4863_v52 = vsel %vm4816_vm4, %v4798_v55, %v8464_v40  ;;  %6558 = vmatpush.msrb.mxu3 %v6064_v41  ;;  %v8696_v51 = vpack.i.bf16 %v12461_v33, %v12397_v7  ;;  %v14089_v40 = vld [vmem:[#allocation14_spill] sm:$0xff]  ;;  %v8484_v7 = vunpack.i.l.bf16 %v12532_v50 }
 0x543   :  { %5360 = vmatmul.f32.gmra.mxu3 %v5057_v35  ;;  %8687 = vrot.lane.b32.xlu1 %v8686_v19, %s8954_s27  ;;  %5939 = vst.msk [vmem:[#allocation3 + $0x160] sm:$0xff] %vm4686_vm3, %v5854_v62  ;;  %v5655_v45 = vmul.f32 0.2, %v5520_v44  ;;  %v8781_v26 = vpack.i.bf16 %v6015_v36, %v6013_v60  ;;  %v4799_v27 = vsel %vm4751_vm5, %v4734_v15, %v8460_v5  ;;  %v7944_v19 = vunpack.i.l.bf16 %v14089_v40  ;;  %v12674_v55 = vld [vmem:[#allocation2 + $0x960] sm:$0xff]  ;;  %v2971_v36 = vld [vmem:[#allocation2 + $0x978] sm:$0xff]  ;;  %v12678_v5 = vld [vmem:[#allocation2 + $0x970] sm:$0xff] }
 0x544   :  { %8682 = vrot.lane.b32.xlu0 %v8681_v63, %s8953_s18  ;;  %v12625_v9 = vpop.f32.mrf.mxu2  ;;  %v4928_v42 = vsel %vm4881_vm6, %v4863_v52, %v8469_v31  ;;  %v4864_v37 = vsel %vm4816_vm4, %v4799_v27, %v8465_v24  ;;  %v8470_v63 = vunpack.i.h.bf16 %v12492_v13  ;;  %v2969_v13 = vld [vmem:[#allocation2 + $0x968] sm:$0xff]  ;;  %v7945_v52 = vunpack.i.h.bf16 %v14089_v40  ;;  %v5985_v40 = vld [vmem:[#allocation3 + $0x50] sm:$0xff] }
 0x545   :  { %v12630_v18 = vpop.permute.xlu1 %8477  ;;  %v5719_v49 = vmax.f32 %v5520_v44, %v5655_v45  ;;  %8782 = vrot.lane.b32.xlu2 %v8781_v26, %s14050_s28  ;;  %v4670_v56 = vsel %vm2390_vm2, %v8897_v8, %v7944_v19  ;;  %v8716_v17 = vpack.i.bf16 %v2971_v36, %v2969_v13  ;;  %v8711_v48 = vpack.i.bf16 %v12678_v5, %v12674_v55  ;;  %v5987_v19 = vld [vmem:[#allocation3 + $0x60] sm:$0xff] }
 0x546   :  { %v8479_v59 = vunpack.i.l.bf16 %v12630_v18  ;;  %v8473_v38 = vpop.permute.xlu0 %8472  ;;  %v5313_v61 = vpop.f32.mrf.mxu3  ;;  %v8480_v44 = vunpack.i.h.bf16 %v12630_v18  ;;  %v4929_v60 = vsel %vm4881_vm6, %v4864_v37, %v8470_v63  ;;  %v12686_v18 = vld [vmem:[%s13992_s5] ss:$0 sm:$0xff]  ;;  %v8485_v27 = vunpack.i.h.bf16 %v12532_v50  ;;  %v8899_v50 = vld [vmem:[#allocation2 + $0x6d0] sm:$0xff] }
 0x547   :  { %v8474_v3 = vunpack.i.l.bf16 %v8473_v38  ;;  %v5787_v25 = vmul.f32 %v12203_v29, %v5719_v49  ;;  %v5314_v16 = vadd.f32 %v12644_v14, %v5313_v61 }
 0x549   :  { %7541 = vmatmul.msk.f32.gmra.mxu2 %vm2390_vm2, %v12368_v23  ;;  %v4993_v30 = vsel %vm4946_vm7, %v4928_v42, %v8474_v3  ;;  %v5855_v29 = vadd.f32 %v12654_v2, %v5787_v25  ;;  %v5523_v20 = vadd.f32 %v12444_v43, %v5314_v16  ;;  %v8475_v23 = vunpack.i.h.bf16 %v8473_v38  ;;  %v5978_v42 = vld [vmem:[#allocation3 + $0x10] sm:$0xff] }
 0x54a   :  { %v5058_v47 = vsel %vm5011_vm8, %v4993_v30, %v8479_v59  ;;  %v4735_v59 = vsel %vm4686_vm3, %v4670_v56, %v8484_v7  ;;  %v5980_v30 = vld [vmem:[#allocation3 + $0x20] sm:$0xff] }
 0x54b   :  { %5363 = vmatmul.f32.gmra.mxu3 %v5058_v47  ;;  %8702 = vrot.lane.b32.xlu1 %v8701_v12, %s8951_s29  ;;  %5940 = vst.msk [vmem:[#allocation3 + $0x168] sm:$0xff] %vm4686_vm3, %v5855_v29  ;;  %v5656_v43 = vmul.f32 0.2, %v5523_v20  ;;  %v4994_v41 = vsel %vm4946_vm7, %v4929_v60, %v8475_v23  ;;  %v12706_v12 = vpop.permute.xlu2 %8542  ;;  %v8499_v47 = vunpack.i.l.bf16 %v12571_v53 }
 0x54c   :  { %8697 = vrot.lane.b32.xlu0 %v8696_v51, %s8950_s21  ;;  %v12669_v62 = vpop.f32.mrf.mxu2  ;;  %v5059_v61 = vsel %vm5011_vm8, %v4994_v41, %v8480_v44 }
 0x54d   :  { %v12672_v33 = vpop.permute.xlu1 %8492  ;;  %v5720_v35 = vmax.f32 %v5523_v20, %v5656_v43  ;;  %v4671_v20 = vsel %vm2390_vm2, %v8899_v50, %v7945_v52  ;;  %v8900_v50 = vld [vmem:[#allocation2 + $0x6e0] sm:$0xff] }
 0x54e   :  { %v8488_v1 = vpop.permute.xlu0 %8487  ;;  %v5316_v26 = vpop.f32.mrf.mxu3  ;;  %v8494_v38 = vunpack.i.l.bf16 %v12672_v33  ;;  %v4736_v63 = vsel %vm4686_vm3, %v4671_v20, %v8485_v27  ;;  %v8495_v43 = vunpack.i.h.bf16 %v12672_v33 }
 0x54f   :  { %v8489_v45 = vunpack.i.l.bf16 %v8488_v1  ;;  %v5788_v31 = vmul.f32 %v12686_v18, %v5720_v35  ;;  %v5317_v49 = vadd.f32 %v12644_v14, %v5316_v26  ;;  %v8726_v35 = vpack.i.bf16 %v5980_v30, %v5978_v42 }
 0x550   :  { %v8731_v26 = vpack.i.bf16 %v5987_v19, %v5985_v40 }
 0x551   :  { %7542 = vmatmul.msk.f32.gmra.mxu2 %vm2390_vm2, %v12370_v0  ;;  %v5856_v15 = vadd.f32 %v12654_v2, %v5788_v31  ;;  %v4800_v24 = vsel %vm4751_vm5, %v4735_v59, %v8489_v45  ;;  %v5526_v3 = vadd.f32 %v12471_v54, %v5317_v49  ;;  %v8490_v0 = vunpack.i.h.bf16 %v8488_v1  ;;  %v14090_v31 = vld [vmem:[#allocation16_spill] sm:$0xff] }
 0x552   :  { %v4865_v29 = vsel %vm4816_vm4, %v4800_v24, %v8494_v38  ;;  %v7964_v49 = vunpack.i.l.bf16 %v14090_v31  ;;  %v8500_v59 = vunpack.i.h.bf16 %v12571_v53  ;;  %v8514_v38 = vunpack.i.l.bf16 %v12610_v22 }
 0x553   :  { %5366 = vmatmul.f32.gmra.mxu3 %v5059_v61  ;;  %8717 = vrot.lane.b32.xlu1 %v8716_v17, %s8954_s27  ;;  %5941 = vst.msk [vmem:[#allocation3 + $0x170] sm:$0xff] %vm4686_vm3, %v5856_v15  ;;  %v5657_v25 = vmul.f32 0.2, %v5526_v3  ;;  %v4801_v1 = vsel %vm4751_vm5, %v4736_v63, %v8490_v0  ;;  %v4930_v36 = vsel %vm4881_vm6, %v4865_v29, %v8499_v47  ;;  %v5984_v15 = vld [vmem:[#allocation3 + $0x40] sm:$0xff] }
 0x554   :  { %8712 = vrot.lane.b32.xlu0 %v8711_v48, %s8953_s18  ;;  %v12704_v16 = vpop.f32.mrf.mxu2  ;;  %v4866_v56 = vsel %vm4816_vm4, %v4801_v1, %v8495_v43  ;;  %v5982_v48 = vld [vmem:[#allocation3 + $0x30] sm:$0xff]  ;;  %v5991_v0 = vld [vmem:[#allocation3 + $0x80] sm:$0xff]  ;;  %v4672_v20 = vsel %vm2390_vm2, %v8900_v50, %v7964_v49  ;;  %v8515_v1 = vunpack.i.h.bf16 %v12610_v22  ;;  %v8529_v22 = vunpack.i.l.bf16 %v12661_v6 }
 0x555   :  { %v12708_v54 = vpop.permute.xlu1 %8507  ;;  %v5721_v51 = vmax.f32 %v5526_v3, %v5657_v25  ;;  %v4931_v27 = vsel %vm4881_vm6, %v4866_v56, %v8500_v59  ;;  %v12742_v25 = vpop.permute.xlu2 %8557  ;;  %v4737_v40 = vsel %vm4686_vm3, %v4672_v20, %v8514_v38  ;;  %v6005_v49 = vld [vmem:[#allocation3 + $0x100] sm:$0xff] }
 0x556   :  { %v8509_v23 = vunpack.i.l.bf16 %v12708_v54  ;;  %v8503_v37 = vpop.permute.xlu0 %8502  ;;  %v5319_v44 = vpop.f32.mrf.mxu3  ;;  %v8510_v24 = vunpack.i.h.bf16 %v12708_v54 }
 0x557   :  { %v8504_v7 = vunpack.i.l.bf16 %v8503_v37  ;;  %v5789_v60 = vmul.f32 %v12686_v18, %v5721_v51  ;;  %v5320_v13 = vadd.f32 %v12644_v14, %v5319_v44  ;;  %v8505_v8 = vunpack.i.h.bf16 %v8503_v37 }
 0x558   :  { %v8741_v51 = vpack.i.bf16 %v5984_v15, %v5982_v48  ;;  %v7965_v37 = vunpack.i.h.bf16 %v14090_v31  ;;  %v6003_v31 = vld [vmem:[#allocation3 + $0xf0] sm:$0xff]  ;;  %v5998_v48 = vld [vmem:[#allocation3 + $0xc0] sm:$0xff] }
 0x559   :  { %7543 = vmatmul.msk.f32.gmra.mxu2 %vm2390_vm2, %v12421_v28  ;;  %v4995_v45 = vsel %vm4946_vm7, %v4930_v36, %v8504_v7  ;;  %v5857_v41 = vadd.f32 %v12654_v2, %v5789_v60  ;;  %v5529_v33 = vadd.f32 %v12497_v58, %v5320_v13  ;;  %v6063_v58 = vld [vmem:[%s13994_s7 + $0x30] sm:$0xff]  ;;  %v4996_v29 = vsel %vm4946_vm7, %v4931_v27, %v8505_v8  ;;  %v6017_v60 = vld [vmem:[#allocation3 + $0x168] sm:$0xff] }
 0x55a   :  { %v5060_v52 = vsel %vm5011_vm8, %v4995_v45, %v8509_v23  ;;  %6559 = vmatpush.msrb.mxu3 %v6063_v58  ;;  %v5989_v23 = vld [vmem:[#allocation3 + $0x70] sm:$0xff] }
 0x55b   :  { %5369 = vmatmul.f32.gmra.mxu3 %v5060_v52  ;;  %8732 = vrot.lane.b32.xlu1 %v8731_v26, %s8953_s18  ;;  %5942 = vst.msk [vmem:[#allocation3 + $0x178] sm:$0xff] %vm4686_vm3, %v5857_v41  ;;  %v5658_v28 = vmul.f32 0.2, %v5529_v33  ;;  %v8746_v63 = vpack.i.bf16 %v5991_v0, %v5989_v23  ;;  %v8901_v41 = vld [vmem:[#allocation2 + $0x6f0] sm:$0xff]  ;;  %v14091_v23 = vld [vmem:[#allocation18_spill] sm:$0xff] }
 0x55c   :  { %8727 = vrot.lane.b32.xlu0 %v8726_v35, %s8951_s29  ;;  %v12739_v53 = vpop.f32.mrf.mxu2  ;;  %v5061_v35 = vsel %vm5011_vm8, %v4996_v29, %v8510_v24 }
 0x55d   :  { %v12736_v17 = vpop.permute.xlu1 %8522  ;;  %v5722_v3 = vmax.f32 %v5529_v33, %v5658_v28  ;;  %v4673_v33 = vsel %vm2390_vm2, %v8901_v41, %v7965_v37  ;;  %v12776_v0 = vpop.permute.xlu2 %8572  ;;  %v7969_v37 = vunpack.i.l.bf16 %v14091_v23 }
 0x55e   :  { %v8518_v61 = vpop.permute.xlu0 %8517  ;;  %v5322_v30 = vpop.f32.mrf.mxu3  ;;  %v8524_v19 = vunpack.i.l.bf16 %v12736_v17  ;;  %v4738_v59 = vsel %vm4686_vm3, %v4673_v33, %v8515_v1  ;;  %v8525_v28 = vunpack.i.h.bf16 %v12736_v17  ;;  %v6009_v1 = vld [vmem:[#allocation3 + $0x120] sm:$0xff]  ;;  %v6007_v33 = vld [vmem:[#allocation3 + $0x110] sm:$0xff] }
 0x55f   :  { %v8519_v42 = vunpack.i.l.bf16 %v8518_v61  ;;  %v5790_v47 = vmul.f32 %v12686_v18, %v5722_v3  ;;  %v5323_v54 = vadd.f32 %v12644_v14, %v5322_v30  ;;  %v8520_v36 = vunpack.i.h.bf16 %v8518_v61 }
 0x560   :  { %v8761_v30 = vpack.i.bf16 %v6005_v49, %v6003_v31 }
 0x561   :  { %7544 = vmatmul.msk.f32.gmra.mxu2 %vm2390_vm2, %v12426_v21  ;;  %v5858_v43 = vadd.f32 %v12654_v2, %v5790_v47  ;;  %v4802_v7 = vsel %vm4751_vm5, %v4737_v40, %v8519_v42  ;;  %v5532_v44 = vadd.f32 %v12526_v57, %v5323_v54  ;;  %v4803_v15 = vsel %vm4751_vm5, %v4738_v59, %v8520_v36  ;;  %v5996_v42 = vld [vmem:[#allocation3 + $0xb0] sm:$0xff] }
 0x562   :  { %v6019_v13 = vld [vmem:[#allocation3 + $0x178] sm:$0xff]  ;;  %v4867_v57 = vsel %vm4816_vm4, %v4802_v7, %v8524_v19  ;;  %v8756_v47 = vpack.i.bf16 %v5998_v48, %v5996_v42  ;;  %v7970_v36 = vunpack.i.h.bf16 %v14091_v23 }
 0x563   :  { %5372 = vmatmul.f32.gmra.mxu3 %v5061_v35  ;;  %8747 = vrot.lane.b32.xlu1 %v8746_v63, %s8953_s18  ;;  %5943 = vst.msk [vmem:[#allocation3 + $0x180] sm:$0xff] %vm4686_vm3, %v5858_v43  ;;  %v5659_v21 = vmul.f32 0.2, %v5532_v44  ;;  %v8796_v45 = vpack.i.bf16 %v6019_v13, %v6017_v60  ;;  %v4932_v27 = vsel %vm4881_vm6, %v4867_v57, %v8529_v22  ;;  %v6002_v35 = vld [vmem:[#allocation3 + $0xe0] sm:$0xff] }
 0x564   :  { %8742 = vrot.lane.b32.xlu0 %v8741_v51, %s8951_s29  ;;  %v12772_v3 = vpop.f32.mrf.mxu2  ;;  %v4868_v51 = vsel %vm4816_vm4, %v4803_v15, %v8525_v28 }
 0x565   :  { %v12761_v26 = vpop.permute.xlu1 %8537  ;;  %v5723_v52 = vmax.f32 %v5532_v44, %v5659_v21  ;;  %8797 = vrot.lane.b32.xlu2 %v8796_v45, %s14050_s28  ;;  %v8902_v21 = vld [vmem:[#allocation2 + $0x700] sm:$0xff]  ;;  %v12811_v48 = vpop.permute.xlu2 %8587 }
 0x566   :  { %v8539_v8 = vunpack.i.l.bf16 %v12761_v26  ;;  %v8533_v56 = vpop.permute.xlu0 %8532  ;;  %v5325_v38 = vpop.f32.mrf.mxu3  ;;  %v8540_v63 = vunpack.i.h.bf16 %v12761_v26  ;;  %v4674_v45 = vsel %vm2390_vm2, %v8902_v21, %v7969_v37  ;;  %v6000_v26 = vld [vmem:[#allocation3 + $0xd0] sm:$0xff] }
 0x567   :  { %v8534_v58 = vunpack.i.l.bf16 %v8533_v56  ;;  %v5791_v24 = vmul.f32 %v12686_v18, %v5723_v52  ;;  %v5326_v61 = vadd.f32 %v12644_v14, %v5325_v38  ;;  %v8535_v54 = vunpack.i.h.bf16 %v8533_v56 }
 0x568   :  { %v8776_v56 = vpack.i.bf16 %v6009_v1, %v6007_v33  ;;  %v8545_v38 = vunpack.i.h.bf16 %v12706_v12 }
 0x569   :  { %7545 = vmatmul.msk.f32.gmra.mxu2 %vm2390_vm2, %v12478_v46  ;;  %v4997_v17 = vsel %vm4946_vm7, %v4932_v27, %v8534_v58  ;;  %v5859_v29 = vadd.f32 %v12654_v2, %v5791_v24  ;;  %v5535_v50 = vadd.f32 %v12562_v4, %v5326_v61  ;;  %v8530_v46 = vunpack.i.h.bf16 %v12661_v6  ;;  %v6062_v24 = vld [vmem:[%s13994_s7 + $0x28] sm:$0xff] }
 0x56a   :  { %v5062_v20 = vsel %vm5011_vm8, %v4997_v17, %v8539_v8  ;;  %v8544_v4 = vunpack.i.l.bf16 %v12706_v12  ;;  %v8771_v8 = vpack.i.bf16 %v6002_v35, %v6000_v26  ;;  %6560 = vmatpush.msrb.mxu3 %v6062_v24  ;;  %v8903_v12 = vld [vmem:[#allocation2 + $0x710] sm:$0xff]  ;;  %v8559_v17 = vunpack.i.l.bf16 %v12742_v25 }
 0x56b   :  { %5375 = vmatmul.f32.gmra.mxu3 %v5062_v20  ;;  %8762 = vrot.lane.b32.xlu1 %v8761_v30, %s8953_s18  ;;  %5944 = vst.msk [vmem:[#allocation3 + $0x198] sm:$0xff] %vm4686_vm3, %v5859_v29  ;;  %v5660_v40 = vmul.f32 0.2, %v5535_v50  ;;  %v4933_v44 = vsel %vm4881_vm6, %v4868_v51, %v8530_v46  ;;  %v4675_v27 = vsel %vm2390_vm2, %v8903_v12, %v7970_v36  ;;  %v6016_v51 = vld [vmem:[#allocation3 + $0x160] sm:$0xff] }
 0x56c   :  { %8757 = vrot.lane.b32.xlu0 %v8756_v47, %s8951_s29  ;;  %v4998_v6 = vsel %vm4946_vm7, %v4933_v44, %v8535_v54  ;;  %v4739_v22 = vsel %vm4686_vm3, %v4674_v45, %v8544_v4  ;;  %v12805_v49 = vpop.f32.mrf.mxu2 }
 0x56d   :  { %v12791_v19 = vpop.permute.xlu1 %8552  ;;  %v5724_v43 = vmax.f32 %v5535_v50, %v5660_v40  ;;  %v5063_v58 = vsel %vm5011_vm8, %v4998_v6, %v8540_v63  ;;  %v4740_v50 = vsel %vm4686_vm3, %v4675_v27, %v8545_v38  ;;  %v6014_v63 = vld [vmem:[#allocation3 + $0x150] sm:$0xff] }
 0x56e   :  { %v8548_v7 = vpop.permute.xlu0 %8547  ;;  %v5328_v13 = vpop.f32.mrf.mxu3  ;;  %v8554_v52 = vunpack.i.l.bf16 %v12791_v19  ;;  %v8555_v20 = vunpack.i.h.bf16 %v12791_v19  ;;  %v8786_v35 = vpack.i.bf16 %v6016_v51, %v6014_v63  ;;  %v14092_v6 = vld [vmem:[#allocation15_spill] sm:$0xff] }
 0x56f   :  { %v8549_v60 = vunpack.i.l.bf16 %v8548_v7  ;;  %v5792_v57 = vmul.f32 %v12686_v18, %v5724_v43  ;;  %v5329_v41 = vadd.f32 %v12644_v14, %v5328_v13  ;;  %v6021_v43 = vld [vmem:[#allocation3 + $0x190] sm:$0xff]  ;;  %v7974_v36 = vunpack.i.l.bf16 %v14092_v6 }
 0x570   :  { %v7975_v24 = vunpack.i.h.bf16 %v14092_v6 }
 0x571   :  { %7546 = vmatmul.msk.f32.gmra.mxu2 %vm2390_vm2, %v12536_v34  ;;  %v5860_v31 = vadd.f32 %v12654_v2, %v5792_v57  ;;  %v4804_v59 = vsel %vm4751_vm5, %v4739_v22, %v8549_v60  ;;  %v5538_v28 = vadd.f32 %v12593_v32, %v5329_v41  ;;  %v8550_v34 = vunpack.i.h.bf16 %v8548_v7  ;;  %v12845_v41 = vpop.permute.xlu2 %8602 }
 0x572   :  { %v4869_v61 = vsel %vm4816_vm4, %v4804_v59, %v8554_v52  ;;  %v8574_v57 = vunpack.i.l.bf16 %v12776_v0 }
 0x573   :  { %5378 = vmatmul.f32.gmra.mxu3 %v5063_v58  ;;  %8777 = vrot.lane.b32.xlu1 %v8776_v56, %s8953_s18  ;;  %5945 = vst.msk [vmem:[#allocation3 + $0x1a0] sm:$0xff] %vm4686_vm3, %v5860_v31  ;;  %v5661_v15 = vmul.f32 0.2, %v5538_v28  ;;  %v4805_v23 = vsel %vm4751_vm5, %v4740_v50, %v8550_v34  ;;  %v4934_v40 = vsel %vm4881_vm6, %v4869_v61, %v8559_v17 }
 0x574   :  { %8772 = vrot.lane.b32.xlu0 %v8771_v8, %s8951_s29  ;;  %v4870_v13 = vsel %vm4816_vm4, %v4805_v23, %v8555_v20  ;;  %v12841_v21 = vpop.f32.mrf.mxu2  ;;  %v6020_v8 = vld [vmem:[#allocation3 + $0x180] sm:$0xff]  ;;  %v8589_v23 = vunpack.i.l.bf16 %v12811_v48 }
 0x575   :  { %v12819_v32 = vpop.permute.xlu1 %8567  ;;  %v5725_v42 = vmax.f32 %v5538_v28, %v5661_v15  ;;  %v8904_v28 = vld [vmem:[#allocation2 + $0x720] sm:$0xff]  ;;  %v6018_v15 = vld [vmem:[#allocation3 + $0x170] sm:$0xff] }
 0x576   :  { %v8569_v30 = vunpack.i.l.bf16 %v12819_v32  ;;  %v8563_v29 = vpop.permute.xlu0 %8562  ;;  %v5331_v54 = vpop.f32.mrf.mxu3  ;;  %v8570_v33 = vunpack.i.h.bf16 %v12819_v32  ;;  %v4676_v58 = vsel %vm2390_vm2, %v8904_v28, %v7974_v36  ;;  %v8801_v12 = vpack.i.bf16 %v6020_v8, %v6018_v15 }
 0x577   :  { %v8564_v47 = vunpack.i.l.bf16 %v8563_v29  ;;  %v5793_v37 = vmul.f32 %v12686_v18, %v5725_v42  ;;  %v5332_v46 = vadd.f32 %v12644_v14, %v5331_v54  ;;  %v8565_v1 = vunpack.i.h.bf16 %v8563_v29  ;;  %v8905_v54 = vld [vmem:[#allocation2 + $0x730] sm:$0xff] }
 0x578   :  { %v4741_v32 = vsel %vm4686_vm3, %v4676_v58, %v8574_v57  ;;  %v8575_v29 = vunpack.i.h.bf16 %v12776_v0  ;;  %v4677_v51 = vsel %vm2390_vm2, %v8905_v54, %v7975_v24  ;;  %v14093_v57 = vld [vmem:[#allocation23_spill] sm:$0xff]  ;;  %v8906_v58 = vld [vmem:[#allocation2 + $0x7e0] sm:$0xff] }
 0x579   :  { %7547 = vmatmul.msk.f32.gmra.mxu2 %vm2390_vm2, %v12538_v11  ;;  %v4999_v4 = vsel %vm4946_vm7, %v4934_v40, %v8564_v47  ;;  %v5861_v19 = vadd.f32 %v12654_v2, %v5793_v37  ;;  %v5541_v7 = vadd.f32 %v12625_v9, %v5332_v46  ;;  %v8560_v11 = vunpack.i.h.bf16 %v12742_v25 }
 0x57a   :  { %v5064_v44 = vsel %vm5011_vm8, %v4999_v4, %v8569_v30  ;;  %v6023_v60 = vld [vmem:[#allocation3 + $0x1a0] sm:$0xff]  ;;  %v4742_v40 = vsel %vm4686_vm3, %v4677_v51, %v8575_v29  ;;  %v12871_v4 = vpop.permute.xlu2 %8627  ;;  %v8907_v51 = vld [vmem:[#allocation2 + $0x7f0] sm:$0xff] }
 0x57b   :  { %5381 = vmatmul.f32.gmra.mxu3 %v5064_v44  ;;  %5946 = vst.msk [vmem:[#allocation3 + $0x1a8] sm:$0xff] %vm4686_vm3, %v5861_v19  ;;  %v5662_v45 = vmul.f32 0.2, %v5541_v7  ;;  %v8791_v9 = vpack.i.bf16 %v6023_v60, %v6021_v43  ;;  %v4935_v25 = vsel %vm4881_vm6, %v4870_v13, %v8560_v11 }
 0x57c   :  { %8787 = vrot.lane.b32.xlu0 %v8786_v35, %s8951_s29  ;;  %v5000_v59 = vsel %vm4946_vm7, %v4935_v25, %v8565_v1 }
 0x57d   :  { %v8583_v26 = vpop.permute.xlu1 %8582  ;;  %v5726_v22 = vmax.f32 %v5541_v7, %v5662_v45  ;;  %8792 = vrot.lane.b32.xlu1 %v8791_v9, %s8953_s18  ;;  %v5065_v30 = vsel %vm5011_vm8, %v5000_v59, %v8570_v33  ;;  %v8590_v33 = vunpack.i.h.bf16 %v12811_v48 }
 0x57e   :  { %v8578_v52 = vpop.permute.xlu0 %8577  ;;  %v5334_v31 = vpop.f32.mrf.mxu3  ;;  %v8584_v61 = vunpack.i.l.bf16 %v8583_v26  ;;  %v8585_v63 = vunpack.i.h.bf16 %v8583_v26  ;;  %v8109_v26 = vunpack.i.l.bf16 %v14093_v57 }
 0x57f   :  { %v8579_v56 = vunpack.i.l.bf16 %v8578_v52  ;;  %v5794_v38 = vmul.f32 %v12686_v18, %v5726_v22  ;;  %v5335_v34 = vadd.f32 %v12644_v14, %v5334_v31  ;;  %v8580_v50 = vunpack.i.h.bf16 %v8578_v52 }
 0x580   :  { %v8604_v22 = vunpack.i.l.bf16 %v12845_v41 }
 0x581   :  { %7548 = vmatmul.msk.f32.gmra.mxu2 %vm2390_vm2, %v12598_v39  ;;  %v5862_v27 = vadd.f32 %v12654_v2, %v5794_v38  ;;  %v4806_v17 = vsel %vm4751_vm5, %v4741_v32, %v8579_v56  ;;  %v5544_v42 = vadd.f32 %v12669_v62, %v5335_v34  ;;  %v12868_v62 = vpop.f32.mrf.mxu2  ;;  %v4807_v7 = vsel %vm4751_vm5, %v4742_v40, %v8580_v50 }
 0x582   :  { %v4871_v39 = vsel %vm4816_vm4, %v4806_v17, %v8584_v61  ;;  %v4872_v9 = vsel %vm4816_vm4, %v4807_v7, %v8585_v63  ;;  %v4678_v38 = vsel %vm2390_vm2, %v8906_v58, %v8109_v26  ;;  %v8110_v32 = vunpack.i.h.bf16 %v14093_v57 }
 0x583   :  { %5384 = vmatmul.f32.gmra.mxu3 %v5065_v30  ;;  %5947 = vst.msk [vmem:[#allocation3 + $0x1b0] sm:$0xff] %vm4686_vm3, %v5862_v27  ;;  %v5663_v20 = vmul.f32 0.2, %v5544_v42  ;;  %v4936_v1 = vsel %vm4881_vm6, %v4871_v39, %v8589_v23  ;;  %v4937_v31 = vsel %vm4881_vm6, %v4872_v9, %v8590_v33  ;;  %v4743_v61 = vsel %vm4686_vm3, %v4678_v38, %v8604_v22  ;;  %v2972_v38 = vld [vmem:[#allocation2 + $0x980] sm:$0xff] }
 0x584   :  { %8802 = vrot.lane.b32.xlu0 %v8801_v12, %s8951_s29  ;;  %v12904_v12 = vpop.permute.xlu2 %8632  ;;  %v8605_v50 = vunpack.i.h.bf16 %v12845_v41  ;;  %v4679_v23 = vsel %vm2390_vm2, %v8907_v51, %v8110_v32 }
 0x585   :  { %v8598_v47 = vpop.permute.xlu1 %8597  ;;  %v5727_v37 = vmax.f32 %v5544_v42, %v5663_v20  ;;  %v8629_v20 = vunpack.i.l.bf16 %v12871_v4 }
 0x586   :  { %v8599_v46 = vunpack.i.l.bf16 %v8598_v47  ;;  %v8593_v0 = vpop.permute.xlu0 %8592  ;;  %v5337_v19 = vpop.f32.mrf.mxu3  ;;  %v8600_v25 = vunpack.i.h.bf16 %v8598_v47 }
 0x587   :  { %v8594_v43 = vunpack.i.l.bf16 %v8593_v0  ;;  %v5795_v44 = vmul.f32 %v12686_v18, %v5727_v37  ;;  %v5338_v35 = vadd.f32 %v12644_v14, %v5337_v19  ;;  %v8595_v11 = vunpack.i.h.bf16 %v8593_v0 }
 0x588   :  { %v4744_v0 = vsel %vm4686_vm3, %v4679_v23, %v8605_v50 }
 0x589   :  { %7549 = vmatmul.msk.f32.gmra.mxu2 %vm2390_vm2, %v12602_v10  ;;  %v5001_v60 = vsel %vm4946_vm7, %v4936_v1, %v8594_v43  ;;  %v5863_v13 = vadd.f32 %v12654_v2, %v5795_v44  ;;  %v5547_v6 = vadd.f32 %v12704_v16, %v5338_v35  ;;  %v6061_v16 = vld [vmem:[%s13994_s7 + $0x20] sm:$0xff]  ;;  %v5002_v28 = vsel %vm4946_vm7, %v4937_v31, %v8595_v11  ;;  %v12898_v34 = vpop.f32.mrf.mxu2 }
 0x58a   :  { %v5066_v36 = vsel %vm5011_vm8, %v5001_v60, %v8599_v46  ;;  %v12883_v45 = vld [vmem:[#allocation3 + $0x1b0] sm:$0xff]  ;;  %6561 = vmatpush.msrb.mxu3 %v6061_v16  ;;  %v5067_v29 = vsel %vm5011_vm8, %v5002_v28, %v8600_v25  ;;  %v8630_v1 = vunpack.i.h.bf16 %v12871_v4 }
 0x58b   :  { %5387 = vmatmul.f32.gmra.mxu3 %v5066_v36  ;;  %5948 = vst.msk [vmem:[#allocation3 + $0x1b8] sm:$0xff] %vm4686_vm3, %v5863_v13  ;;  %v5664_v10 = vmul.f32 0.2, %v5547_v6  ;;  %6257 = vrot.lane.b32.xlu1 %v12883_v45, %s8953_s18 }
 0x58c   :  { %v12931_v11 = vpop.permute.xlu2 %8642 }
 0x58d   :  { %v8613_v52 = vpop.permute.xlu1 %8612  ;;  %v5728_v8 = vmax.f32 %v5547_v6, %v5664_v10  ;;  %v8634_v10 = vunpack.i.l.bf16 %v12904_v12  ;;  %v8644_v51 = vunpack.i.l.bf16 %v12931_v11 }
 0x58e   :  { %v8608_v56 = vpop.permute.xlu0 %8607  ;;  %v5340_v59 = vpop.f32.mrf.mxu3  ;;  %v8614_v27 = vunpack.i.l.bf16 %v8613_v52  ;;  %v8615_v40 = vunpack.i.h.bf16 %v8613_v52 }
 0x58f   :  { %v8609_v48 = vunpack.i.l.bf16 %v8608_v56  ;;  %v5796_v15 = vmul.f32 %v12686_v18, %v5728_v8  ;;  %v5341_v24 = vadd.f32 %v12644_v14, %v5340_v59  ;;  %v8610_v47 = vunpack.i.h.bf16 %v8608_v56 }
 0x591   :  { %7550 = vmatmul.msk.f32.gmra.mxu2 %vm2390_vm2, %v12674_v55  ;;  %v5864_v17 = vadd.f32 %v12654_v2, %v5796_v15  ;;  %v4808_v42 = vsel %vm4751_vm5, %v4743_v61, %v8609_v48  ;;  %v5550_v30 = vadd.f32 %v12739_v53, %v5341_v24  ;;  %v4809_v43 = vsel %vm4751_vm5, %v4744_v0, %v8610_v47  ;;  %v12926_v60 = vpop.f32.mrf.mxu2  ;;  %v8908_v48 = vld [vmem:[#allocation2 + $0x800] sm:$0xff]  ;;  %v6060_v47 = vld [vmem:[%s13994_s7 + $0x18] sm:$0xff] }
 0x592   :  { %v4873_v55 = vsel %vm4816_vm4, %v4808_v42, %v8614_v27  ;;  %v4874_v26 = vsel %vm4816_vm4, %v4809_v43, %v8615_v40  ;;  %6562 = vmatpush.msrb.mxu3 %v6060_v47  ;;  %v8911_v47 = vld [vmem:[#allocation2 + $0x830] sm:$0xff] }
 0x593   :  { %5390 = vmatmul.f32.gmra.mxu3 %v5067_v29  ;;  %5949 = vst.msk [vmem:[#allocation3 + $0x1c0] sm:$0xff] %vm4686_vm3, %v5864_v17  ;;  %v5665_v39 = vmul.f32 0.2, %v5550_v30  ;;  %v4938_v44 = vsel %vm4881_vm6, %v4873_v55, %v8629_v20  ;;  %v4939_v25 = vsel %vm4881_vm6, %v4874_v26, %v8630_v1  ;;  %v8909_v55 = vld [vmem:[#allocation2 + $0x810] sm:$0xff] }
 0x595   :  { %v8623_v54 = vpop.permute.xlu1 %8622  ;;  %v5729_v37 = vmax.f32 %v5550_v30, %v5665_v39  ;;  %v8635_v30 = vunpack.i.h.bf16 %v12904_v12  ;;  %v12957_v39 = vpop.permute.xlu2 %8662 }
 0x596   :  { %v8624_v46 = vunpack.i.l.bf16 %v8623_v54  ;;  %v8618_v53 = vpop.permute.xlu0 %8617  ;;  %v5343_v63 = vpop.f32.mrf.mxu3 }
 0x597   :  { %v8619_v41 = vunpack.i.l.bf16 %v8618_v53  ;;  %v5797_v19 = vmul.f32 %v12686_v18, %v5729_v37  ;;  %v5344_v7 = vadd.f32 %v12644_v14, %v5343_v63  ;;  %v8620_v9 = vunpack.i.h.bf16 %v8618_v53 }
 0x599   :  { %7551 = vmatmul.msk.f32.gmra.mxu2 %vm2390_vm2, %v12678_v5  ;;  %v5003_v35 = vsel %vm4946_vm7, %v4938_v44, %v8619_v41  ;;  %v5865_v13 = vadd.f32 %v12654_v2, %v5797_v19  ;;  %v5553_v6 = vadd.f32 %v12772_v3, %v5344_v7  ;;  %v14094_v5 = vld [vmem:[#allocation22_spill] sm:$0xff]  ;;  %v8625_v3 = vunpack.i.h.bf16 %v8623_v54  ;;  %v12951_v29 = vpop.f32.mrf.mxu2 }
 0x59a   :  { %v5068_v36 = vsel %vm5011_vm8, %v5003_v35, %v8624_v46  ;;  %v6027_v57 = vld [vmem:[#allocation3 + $0x1c0] sm:$0xff]  ;;  %v8129_v33 = vunpack.i.l.bf16 %v14094_v5  ;;  %v5004_v31 = vsel %vm4946_vm7, %v4939_v25, %v8620_v9  ;;  %v8130_v15 = vunpack.i.h.bf16 %v14094_v5  ;;  %v6039_v9 = vld [vmem:[#allocation3 + $0x230] sm:$0xff] }
 0x59b   :  { %5393 = vmatmul.f32.gmra.mxu3 %v5068_v36  ;;  %5950 = vst.msk [vmem:[#allocation3 + $0x1c8] sm:$0xff] %vm4686_vm3, %v5865_v13  ;;  %v5666_v4 = vmul.f32 0.2, %v5553_v6  ;;  %6259 = vrot.lane.b32.xlu2 %v6027_v57, %s8953_s18  ;;  %v5069_v42 = vsel %vm5011_vm8, %v5004_v31, %v8625_v3  ;;  %v14095_v57 = vld [vmem:[#allocation28_spill] sm:$0xff]  ;;  %v8645_v5 = vunpack.i.h.bf16 %v12931_v11  ;;  %v8910_v31 = vld [vmem:[#allocation2 + $0x820] sm:$0xff] }
 0x59c   :  { %v4680_v59 = vsel %vm2390_vm2, %v8908_v48, %v8129_v33  ;;  %v4681_v12 = vsel %vm2390_vm2, %v8909_v55, %v8130_v15  ;;  %v8134_v26 = vunpack.i.l.bf16 %v14095_v57 }
 0x59d   :  { %v8638_v16 = vpop.permute.xlu1 %8637  ;;  %v5730_v22 = vmax.f32 %v5553_v6, %v5666_v4  ;;  %v4745_v24 = vsel %vm4686_vm3, %v4680_v59, %v8634_v10  ;;  %v4746_v53 = vsel %vm4686_vm3, %v4681_v12, %v8635_v30  ;;  %v8664_v4 = vunpack.i.l.bf16 %v12957_v39  ;;  %v12980_v25 = vpop.permute.xlu2 %8677 }
 0x59e   :  { %v8648_v52 = vpop.permute.xlu0 %8647  ;;  %v5346_v56 = vpop.f32.mrf.mxu3  ;;  %v8639_v32 = vunpack.i.l.bf16 %v8638_v16  ;;  %v8640_v0 = vunpack.i.h.bf16 %v8638_v16  ;;  %v4682_v48 = vsel %vm2390_vm2, %v8910_v31, %v8134_v26 }
 0x59f   :  { %v8649_v8 = vunpack.i.l.bf16 %v8648_v52  ;;  %v5798_v28 = vmul.f32 %v12686_v18, %v5730_v22  ;;  %v5347_v58 = vadd.f32 %v12644_v14, %v5346_v56  ;;  %v8650_v50 = vunpack.i.h.bf16 %v8648_v52 }
 0x5a1   :  { %7552 = vmatmul.msk.f32.gmra.mxu2 %vm2390_vm2, %v2972_v38  ;;  %v5866_v61 = vadd.f32 %v12654_v2, %v5798_v28  ;;  %v4810_v27 = vsel %vm4751_vm5, %v4745_v24, %v8649_v8  ;;  %v5556_v17 = vadd.f32 %v12805_v49, %v5347_v58  ;;  %v4811_v63 = vsel %vm4751_vm5, %v4746_v53, %v8650_v50 }
 0x5a2   :  { %v4875_v49 = vsel %vm4816_vm4, %v4810_v27, %v8639_v32  ;;  %v4876_v36 = vsel %vm4816_vm4, %v4811_v63, %v8640_v0  ;;  %v8135_v58 = vunpack.i.h.bf16 %v14095_v57  ;;  %v4747_v38 = vsel %vm4686_vm3, %v4682_v48, %v8664_v4  ;;  %v14096_v57 = vld [vmem:[#allocation25_spill] sm:$0xff] }
 0x5a3   :  { %5396 = vmatmul.f32.gmra.mxu3 %v5069_v42  ;;  %5951 = vst.msk [vmem:[#allocation3 + $0x1d0] sm:$0xff] %vm4686_vm3, %v5866_v61  ;;  %v5667_v20 = vmul.f32 0.2, %v5556_v17  ;;  %v4940_v7 = vsel %vm4881_vm6, %v4875_v49, %v8644_v51  ;;  %6261 = vrot.lane.b32.xlu2 %v6039_v9, %s8953_s18  ;;  %v4941_v52 = vsel %vm4881_vm6, %v4876_v36, %v8645_v5  ;;  %v8679_v49 = vunpack.i.l.bf16 %v12980_v25 }
 0x5a4   :  { %v8139_v26 = vunpack.i.l.bf16 %v14096_v57  ;;  %v8680_v5 = vunpack.i.h.bf16 %v12980_v25 }
 0x5a5   :  { %v8658_v54 = vpop.permute.xlu1 %8657  ;;  %v5731_v23 = vmax.f32 %v5556_v17, %v5667_v20  ;;  %v8665_v17 = vunpack.i.h.bf16 %v12957_v39  ;;  %v6059_v39 = vld [vmem:[%s13994_s7 + $0x10] sm:$0xff] }
 0x5a6   :  { %v8659_v37 = vunpack.i.l.bf16 %v8658_v54  ;;  %v8653_v46 = vpop.permute.xlu0 %8652  ;;  %v5349_v41 = vpop.f32.mrf.mxu3  ;;  %v8660_v16 = vunpack.i.h.bf16 %v8658_v54  ;;  %v4683_v54 = vsel %vm2390_vm2, %v8911_v47, %v8135_v58  ;;  %6563 = vmatpush.msrb.mxu3 %v6059_v39 }
 0x5a7   :  { %v8654_v40 = vunpack.i.l.bf16 %v8653_v46  ;;  %v5799_v43 = vmul.f32 %v12686_v18, %v5731_v23  ;;  %v5350_v19 = vadd.f32 %v12644_v14, %v5349_v41  ;;  %v8655_v6 = vunpack.i.h.bf16 %v8653_v46 }
 0x5a8   :  { %v4748_v51 = vsel %vm4686_vm3, %v4683_v54, %v8665_v17 }
 0x5a9   :  { %v5005_v44 = vsel %vm4946_vm7, %v4940_v7, %v8654_v40  ;;  %v5867_v35 = vadd.f32 %v12654_v2, %v5799_v43  ;;  %v5559_v1 = vadd.f32 %v12841_v21, %v5350_v19  ;;  %v12977_v21 = vpop.f32.mrf.mxu2  ;;  %v5006_v11 = vsel %vm4946_vm7, %v4941_v52, %v8655_v6  ;;  %v6058_v43 = vld [vmem:[%s13994_s7 + $0x8] sm:$0xff]  ;;  %v8693_v19 = vpop.permute.xlu2 %8692 }
 0x5aa   :  { %v5070_v13 = vsel %vm5011_vm8, %v5005_v44, %v8659_v37  ;;  %v5071_v27 = vsel %vm5011_vm8, %v5006_v11, %v8660_v16  ;;  %6564 = vmatpush.msrb.mxu3 %v6058_v43  ;;  %v8912_v11 = vld [vmem:[#allocation2 + $0x840] sm:$0xff] }
 0x5ab   :  { %5399 = vmatmul.f32.gmra.mxu3 %v5070_v13  ;;  %5952 = vst.msk [vmem:[#allocation3 + $0x1e8] sm:$0xff] %vm4686_vm3, %v5867_v35  ;;  %v5668_v33 = vmul.f32 0.2, %v5559_v1  ;;  %v6057_v13 = vld [vmem:[%s13994_s7] sm:$0xff]  ;;  %v4684_v25 = vsel %vm2390_vm2, %v8912_v11, %v8139_v26 }
 0x5ac   :  { %6565 = vmatpush.msrb.mxu3 %v6057_v13 }
 0x5ad   :  { %v8673_v10 = vpop.permute.xlu1 %8672  ;;  %v5732_v3 = vmax.f32 %v5559_v1, %v5668_v33 }
 0x5ae   :  { %v8668_v22 = vpop.permute.xlu0 %8667  ;;  %v5352_v56 = vpop.f32.mrf.mxu3  ;;  %v8674_v15 = vunpack.i.l.bf16 %v8673_v10  ;;  %v8675_v23 = vunpack.i.h.bf16 %v8673_v10 }
 0x5af   :  { %v8669_v8 = vunpack.i.l.bf16 %v8668_v22  ;;  %v5800_v59 = vmul.f32 %v12686_v18, %v5732_v3  ;;  %v5353_v28 = vadd.f32 %v12644_v14, %v5352_v56  ;;  %v8670_v42 = vunpack.i.h.bf16 %v8668_v22 }
 0x5b1   :  { %v5868_v24 = vadd.f32 %v12654_v2, %v5800_v59  ;;  %v4812_v32 = vsel %vm4751_vm5, %v4747_v38, %v8669_v8  ;;  %v5562_v61 = vadd.f32 %v12868_v62, %v5353_v28  ;;  %v13001_v53 = vpop.f32.mrf.mxu2  ;;  %v4813_v0 = vsel %vm4751_vm5, %v4748_v51, %v8670_v42  ;;  %v8708_v17 = vpop.permute.xlu2 %8707 }
 0x5b2   :  { %v4877_v20 = vsel %vm4816_vm4, %v4812_v32, %v8674_v15  ;;  %v4878_v9 = vsel %vm4816_vm4, %v4813_v0, %v8675_v23  ;;  %v8140_v59 = vunpack.i.h.bf16 %v14096_v57  ;;  %v13038_v42 = vld [vmem:[#allocation3 + $0x1e8] sm:$0xff]  ;;  %v8710_v13 = vunpack.i.h.bf16 %v8708_v17 }
 0x5b3   :  { %5402 = vmatmul.f32.gmra.mxu3 %v5071_v27  ;;  %5953 = vst.msk [vmem:[#allocation3 + $0x1f0] sm:$0xff] %vm4686_vm3, %v5868_v24  ;;  %v5669_v30 = vmul.f32 0.2, %v5562_v61  ;;  %v4942_v63 = vsel %vm4881_vm6, %v4877_v20, %v8679_v49  ;;  %v4943_v22 = vsel %vm4881_vm6, %v4878_v9, %v8680_v5  ;;  %v8695_v27 = vunpack.i.h.bf16 %v8693_v19 }
 0x5b4   :  { %v8709_v49 = vunpack.i.l.bf16 %v8708_v17 }
 0x5b5   :  { %v8688_v50 = vpop.permute.xlu1 %8687  ;;  %v5733_v55 = vmax.f32 %v5562_v61, %v5669_v30 }
 0x5b6   :  { %v8689_v12 = vunpack.i.l.bf16 %v8688_v50  ;;  %v8683_v62 = vpop.permute.xlu0 %8682  ;;  %v5355_v46 = vpop.f32.mrf.mxu3  ;;  %v8690_v10 = vunpack.i.h.bf16 %v8688_v50 }
 0x5b7   :  { %v8684_v37 = vunpack.i.l.bf16 %v8683_v62  ;;  %v5801_v40 = vmul.f32 %v12686_v18, %v5733_v55  ;;  %v5356_v41 = vadd.f32 %v12644_v14, %v5355_v46  ;;  %v8685_v6 = vunpack.i.h.bf16 %v8683_v62 }
 0x5b9   :  { %v5007_v7 = vsel %vm4946_vm7, %v4942_v63, %v8684_v37  ;;  %v5869_v44 = vadd.f32 %v12654_v2, %v5801_v40  ;;  %v5565_v35 = vadd.f32 %v12898_v34, %v5356_v41  ;;  %v8694_v34 = vunpack.i.l.bf16 %v8693_v19  ;;  %v13032_v38 = vpop.f32.mrf.mxu2  ;;  %v13054_v40 = vld [vmem:[%s13991_s4] ss:$0 sm:$0xff] }
 0x5ba   :  { %v5072_v1 = vsel %vm5011_vm8, %v5007_v7, %v8689_v12  ;;  %v13017_v36 = vld [vmem:[#allocation3 + $0x1f0] sm:$0xff]  ;;  %v5008_v56 = vsel %vm4946_vm7, %v4943_v22, %v8685_v6  ;;  %v13062_v19 = vld [vmem:[%s13993_s6] ss:$0 sm:$0xff] }
 0x5bb   :  { %5405 = vmatmul.f32.gmra.mxu3 %v5072_v1  ;;  %5954 = vst.msk [vmem:[#allocation3 + $0x1f8] sm:$0xff] %vm4686_vm3, %v5869_v44  ;;  %v5670_v33 = vmul.f32 0.2, %v5565_v35  ;;  %6197 = vrot.lane.b32.xlu1 %v13017_v36, %s8951_s29  ;;  %v4749_v28 = vsel %vm4686_vm3, %v4684_v25, %v8694_v34  ;;  %v5073_v61 = vsel %vm5011_vm8, %v5008_v56, %v8690_v10 }
 0x5bd   :  { %v8703_v4 = vpop.permute.xlu1 %8702  ;;  %v5734_v16 = vmax.f32 %v5565_v35, %v5670_v33  ;;  %v8723_v33 = vpop.permute.xlu2 %8722 }
 0x5be   :  { %v8698_v3 = vpop.permute.xlu0 %8697  ;;  %v5358_v8 = vpop.f32.mrf.mxu3  ;;  %v8704_v58 = vunpack.i.l.bf16 %v8703_v4  ;;  %v8705_v51 = vunpack.i.h.bf16 %v8703_v4  ;;  %v8724_v10 = vunpack.i.l.bf16 %v8723_v33 }
 0x5bf   :  { %v8699_v52 = vunpack.i.l.bf16 %v8698_v3  ;;  %v5802_v31 = vmul.f32 %v12686_v18, %v5734_v16  ;;  %v5359_v48 = vadd.f32 %v12644_v14, %v5358_v8  ;;  %v8700_v30 = vunpack.i.h.bf16 %v8698_v3  ;;  %v13080_v16 = vld [vmem:[%s13992_s5] ss:$0 sm:$0xff] }
 0x5c0   :  { %v5976_v8 = vld [vmem:[#allocation3] sm:$0xff] }
 0x5c1   :  { %v5870_v15 = vadd.f32 %v12654_v2, %v5802_v31  ;;  %v4814_v24 = vsel %vm4751_vm5, %v4749_v28, %v8699_v52  ;;  %v5568_v32 = vadd.f32 %v12926_v60, %v5359_v48  ;;  %v8913_v60 = vld [vmem:[#allocation2 + $0x850] sm:$0xff]  ;;  %v13068_v6 = vpop.f32.mrf.mxu2  ;;  %v6417_v28 = vsel %vm4686_vm3, %v5976_v8, %v8724_v10 }
 0x5c2   :  { %v13040_v14 = vld [vmem:[#allocation3 + $0x1f8] sm:$0xff]  ;;  %v4879_v47 = vsel %vm4816_vm4, %v4814_v24, %v8704_v58  ;;  %v4685_v54 = vsel %vm2390_vm2, %v8913_v60, %v8140_v59 }
 0x5c3   :  { %5408 = vmatmul.f32.gmra.mxu3 %v5073_v61  ;;  %5955 = vst.msk [vmem:[#allocation3 + $0x200] sm:$0xff] %vm4686_vm3, %v5870_v15  ;;  %v5671_v50 = vmul.f32 0.2, %v5568_v32  ;;  %v8806_v2 = vpack.i.bf16 %v13040_v14, %v13038_v42  ;;  %v4750_v39 = vsel %vm4686_vm3, %v4685_v54, %v8695_v27  ;;  %v4944_v63 = vsel %vm4881_vm6, %v4879_v47, %v8709_v49  ;;  %v8917_v49 = vld [vmem:[#allocation3 + $0x10] sm:$0xff] }
 0x5c4   :  { %v4815_v46 = vsel %vm4751_vm5, %v4750_v39, %v8700_v30  ;;  %v8725_v27 = vunpack.i.h.bf16 %v8723_v33 }
 0x5c5   :  { %v8718_v20 = vpop.permute.xlu1 %8717  ;;  %v5735_v55 = vmax.f32 %v5568_v32, %v5671_v50  ;;  %8807 = vrot.lane.b32.xlu0 %v8806_v2, %s14050_s28  ;;  %v4880_v1 = vsel %vm4816_vm4, %v4815_v46, %v8705_v51  ;;  %v8738_v39 = vpop.permute.xlu2 %8737 }
 0x5c6   :  { %v8719_v12 = vunpack.i.l.bf16 %v8718_v20  ;;  %v8713_v62 = vpop.permute.xlu0 %8712  ;;  %v5361_v37 = vpop.f32.mrf.mxu3  ;;  %v8720_v26 = vunpack.i.h.bf16 %v8718_v20  ;;  %v8740_v33 = vunpack.i.h.bf16 %v8738_v39 }
 0x5c7   :  { %v8714_v23 = vunpack.i.l.bf16 %v8713_v62  ;;  %v5803_v0 = vmul.f32 %v12686_v18, %v5735_v55  ;;  %v5362_v41 = vadd.f32 %v13054_v40, %v5361_v37  ;;  %v8715_v35 = vunpack.i.h.bf16 %v8713_v62 }
 0x5c8   :  { %v6418_v55 = vsel %vm4686_vm3, %v8917_v49, %v8725_v27 }
 0x5c9   :  { %v5009_v43 = vsel %vm4946_vm7, %v4944_v63, %v8714_v23  ;;  %v5871_v7 = vadd.f32 %v13062_v19, %v5803_v0  ;;  %v5571_v18 = vadd.f32 %v12951_v29, %v5362_v41  ;;  %v4945_v29 = vsel %vm4881_vm6, %v4880_v1, %v8710_v13  ;;  %v13093_v15 = vpop.f32.mrf.mxu2  ;;  %v8918_v13 = vld [vmem:[#allocation3 + $0x20] sm:$0xff] }
 0x5ca   :  { %v5074_v44 = vsel %vm5011_vm8, %v5009_v43, %v8719_v12  ;;  %v13071_v57 = vld [vmem:[#allocation3 + $0x200] sm:$0xff]  ;;  %v5010_v4 = vsel %vm4946_vm7, %v4945_v29, %v8715_v35  ;;  %v8739_v23 = vunpack.i.l.bf16 %v8738_v39 }
 0x5cb   :  { %5411 = vmatmul.f32.gmra.mxu3 %v5074_v44  ;;  %5956 = vst.msk [vmem:[#allocation3 + $0x208] sm:$0xff] %vm4686_vm3, %v5871_v7  ;;  %v5672_v9 = vmul.f32 0.2, %v5571_v18  ;;  %v5075_v25 = vsel %vm5011_vm8, %v5010_v4, %v8720_v26 }
 0x5cd   :  { %v5736_v5 = vmax.f32 %v5571_v18, %v5672_v9  ;;  %6199 = vrot.lane.b32.xlu0 %v13071_v57, %s8951_s29  ;;  %v8733_v48 = vpop.permute.xlu1 %8732  ;;  %v6419_v9 = vsel %vm4686_vm3, %v8918_v13, %v8739_v23  ;;  %v8923_v13 = vld [vmem:[#allocation3 + $0xc8] sm:$0xff] }
 0x5ce   :  { %v5364_v34 = vpop.f32.mrf.mxu3  ;;  %v8728_v22 = vpop.permute.xlu0 %8727  ;;  %v8734_v32 = vunpack.i.l.bf16 %v8733_v48  ;;  %v8735_v12 = vunpack.i.h.bf16 %v8733_v48 }
 0x5cf   :  { %v5804_v3 = vmul.f32 %v13080_v16, %v5736_v5  ;;  %v5365_v52 = vadd.f32 %v13054_v40, %v5364_v34  ;;  %v8729_v31 = vunpack.i.l.bf16 %v8728_v22  ;;  %v8730_v47 = vunpack.i.h.bf16 %v8728_v22 }
 0x5d1   :  { %v5872_v56 = vadd.f32 %v13062_v19, %v5804_v3  ;;  %v5574_v11 = vadd.f32 %v12977_v21, %v5365_v52  ;;  %v6433_v61 = vsel %vm4816_vm4, %v6417_v28, %v8729_v31  ;;  %v13108_v37 = vpop.f32.mrf.mxu2  ;;  %v8920_v31 = vld [vmem:[#allocation3 + $0x30] sm:$0xff] }
 0x5d2   :  { %v13087_v59 = vld [vmem:[#allocation3 + $0x208] sm:$0xff]  ;;  %v6449_v20 = vsel %vm4946_vm7, %v6433_v61, %v8734_v32  ;;  %v6420_v48 = vsel %vm4686_vm3, %v8920_v31, %v8740_v33 }
 0x5d3   :  { %5414 = vmatmul.f32.gmra.mxu3 %v5075_v25  ;;  %5957 = vst.msk [vmem:[#allocation3 + $0x210] sm:$0xff] %vm4686_vm3, %v5872_v56  ;;  %v5673_v58 = vmul.f32 0.2, %v5574_v11  ;;  %6137 = vrot.lane.b32.xlu2 %v13087_v59, %s14050_s28  ;;  %v8919_v25 = vld [vmem:[#allocation3 + $0x60] sm:$0xff] }
 0x5d5   :  { %v5737_v24 = vmax.f32 %v5574_v11, %v5673_v58  ;;  %v8748_v44 = vpop.permute.xlu1 %8747  ;;  %v8753_v58 = vpop.permute.xlu2 %8752 }
 0x5d6   :  { %v5367_v21 = vpop.f32.mrf.mxu3  ;;  %v8743_v46 = vpop.permute.xlu0 %8742  ;;  %v8749_v26 = vunpack.i.l.bf16 %v8748_v44  ;;  %v8750_v28 = vunpack.i.h.bf16 %v8748_v44 }
 0x5d7   :  { %v5805_v17 = vmul.f32 %v13080_v16, %v5737_v24  ;;  %v5368_v30 = vadd.f32 %v13054_v40, %v5367_v21  ;;  %v8744_v18 = vunpack.i.l.bf16 %v8743_v46  ;;  %v8745_v8 = vunpack.i.h.bf16 %v8743_v46 }
 0x5d9   :  { %v5873_v50 = vadd.f32 %v13062_v19, %v5805_v17  ;;  %v5577_v2 = vadd.f32 %v13001_v53, %v5368_v30  ;;  %v6434_v53 = vsel %vm4816_vm4, %v6418_v55, %v8730_v47  ;;  %v13124_v10 = vpop.f32.mrf.mxu2  ;;  %v6436_v32 = vsel %vm4816_vm4, %v6420_v48, %v8745_v8 }
 0x5da   :  { %v13101_v60 = vld [vmem:[#allocation3 + $0x210] sm:$0xff]  ;;  %v6450_v7 = vsel %vm4946_vm7, %v6434_v53, %v8735_v12  ;;  %v8754_v17 = vunpack.i.l.bf16 %v8753_v58 }
 0x5db   :  { %6566 = vmatmul.f32.vlgmr.msrb.gmra.mxu3 %v6449_v20  ;;  %5958 = vst.msk [vmem:[#allocation3 + $0x218] sm:$0xff] %vm4686_vm3, %v5873_v50  ;;  %v5674_v54 = vmul.f32 0.2, %v5577_v2  ;;  %6201 = vrot.lane.b32.xlu0 %v13101_v60, %s8951_s29  ;;  %v8921_v12 = vld [vmem:[#allocation3 + $0x70] sm:$0xff] }
 0x5dd   :  { %v5738_v62 = vmax.f32 %v5577_v2, %v5674_v54  ;;  %v6452_v2 = vsel %vm4946_vm7, %v6436_v32, %v8750_v28  ;;  %v8763_v47 = vpop.permute.xlu1 %8762  ;;  %v5994_v54 = vld [vmem:[#allocation3 + $0xa0] sm:$0xff]  ;;  %v5993_v28 = vld [vmem:[#allocation3 + $0x90] sm:$0xff] }
 0x5de   :  { %v5370_v51 = vpop.f32.mrf.mxu3  ;;  %v13137_v21 = vpop.permute.xlu0 %8757 }
 0x5df   :  { %v5806_v0 = vmul.f32 %v13080_v16, %v5738_v62  ;;  %v5371_v41 = vadd.f32 %v13054_v40, %v5370_v51  ;;  %v8759_v20 = vunpack.i.l.bf16 %v13137_v21  ;;  %v8764_v62 = vunpack.i.l.bf16 %v8763_v47 }
 0x5e1   :  { %v5874_v63 = vadd.f32 %v13062_v19, %v5806_v0  ;;  %v5580_v43 = vadd.f32 %v13032_v38, %v5371_v41  ;;  %v6435_v38 = vsel %vm4816_vm4, %v6419_v9, %v8744_v18  ;;  %v13145_v49 = vpop.f32.mrf.mxu2  ;;  %v8755_v0 = vunpack.i.h.bf16 %v8753_v58  ;;  %v8925_v58 = vld [vmem:[#allocation3 + $0x100] sm:$0xff] }
 0x5e2   :  { %v13115_v35 = vld [vmem:[#allocation3 + $0x218] sm:$0xff]  ;;  %v6451_v52 = vsel %vm4946_vm7, %v6435_v38, %v8749_v26  ;;  %v8765_v9 = vunpack.i.h.bf16 %v8763_v47  ;;  %v8768_v38 = vpop.permute.xlu2 %8767 }
 0x5e3   :  { %6569 = vmatmul.f32.gmra.mxu3 %v6450_v7  ;;  %5959 = vst.msk [vmem:[#allocation3 + $0x220] sm:$0xff] %vm4686_vm3, %v5874_v63  ;;  %v5675_v1 = vmul.f32 0.2, %v5580_v43  ;;  %6139 = vrot.lane.b32.xlu2 %v13115_v35, %s14050_s28  ;;  %v8760_v7 = vunpack.i.h.bf16 %v13137_v21 }
 0x5e5   :  { %v5739_v5 = vmax.f32 %v5580_v43, %v5675_v1  ;;  %v8922_v1 = vld [vmem:[#allocation3 + $0xb8] sm:$0xff]  ;;  %v8778_v48 = vpop.permute.xlu1 %8777 }
 0x5e6   :  { %v5373_v29 = vpop.f32.mrf.mxu3 }
 0x5e7   :  { %v5807_v34 = vmul.f32 %v13080_v16, %v5739_v5  ;;  %v5374_v4 = vadd.f32 %v13054_v40, %v5373_v29  ;;  %v13169_v5 = vld [vmem:[#allocation3 + $0xb0] sm:$0xff] }
 0x5e8   :  { %v6422_v29 = vsel %vm4686_vm3, %v13169_v5, %v8755_v0 }
 0x5e9   :  { %v5875_v3 = vadd.f32 %v13062_v19, %v5807_v34  ;;  %v5583_v22 = vadd.f32 %v13068_v6, %v5374_v4  ;;  %v6438_v34 = vsel %vm4816_vm4, %v6422_v29, %v8760_v7  ;;  %v13176_v4 = vpop.permute.xlu0 %8772 }
 0x5ea   :  { %v13129_v56 = vld [vmem:[#allocation3 + $0x220] sm:$0xff]  ;;  %v8774_v31 = vunpack.i.l.bf16 %v13176_v4 }
 0x5eb   :  { %6572 = vmatmul.f32.gmra.mxu3 %v6451_v52  ;;  %5960 = vst.msk [vmem:[#allocation3 + $0x238] sm:$0xff] %vm4686_vm3, %v5875_v3  ;;  %v5676_v11 = vmul.f32 0.2, %v5583_v22  ;;  %6203 = vrot.lane.b32.xlu0 %v13129_v56, %s8951_s29  ;;  %v8769_v52 = vunpack.i.l.bf16 %v8768_v38 }
 0x5ec   :  { %6289 = vrot.lane.b32.xlu2 %v8919_v25, %s14050_s28  ;;  %v6454_v25 = vsel %vm4946_vm7, %v6438_v34, %v8765_v9 }
 0x5ed   :  { %v5740_v6 = vmax.f32 %v5583_v22, %v5676_v11 }
 0x5ee   :  { %v5376_v24 = vpop.f32.mrf.mxu3 }
 0x5ef   :  { %v5808_v61 = vmul.f32 %v13080_v16, %v5740_v6  ;;  %v5377_v27 = vadd.f32 %v13054_v40, %v5376_v24  ;;  %v6088_v24 = vld [vmem:[%s13994_s7 + $0xf8] sm:$0xff] }
 0x5f0   :  { %6615 = vmatpush.msra.mxu3 %v6088_v24 }
 0x5f1   :  { %v5876_v30 = vadd.f32 %v13062_v19, %v5808_v61  ;;  %v5586_v50 = vadd.f32 %v13093_v15, %v5377_v27  ;;  %v6421_v15 = vsel %vm4686_vm3, %v5994_v54, %v8754_v17  ;;  %v13190_v61 = vld [vmem:[#allocation3 + $0xc0] sm:$0xff] }
 0x5f2   :  { %v6437_v53 = vsel %vm4816_vm4, %v6421_v15, %v8759_v20  ;;  %v6423_v27 = vsel %vm4686_vm3, %v13190_v61, %v8769_v52  ;;  %v6012_v15 = vld [vmem:[#allocation3 + $0x140] sm:$0xff]  ;;  %v8793_v52 = vpop.permute.xlu1 %8792 }
 0x5f3   :  { %6575 = vmatmul.f32.gmra.mxu3 %v6452_v2  ;;  %5961 = vst.msk [vmem:[#allocation3 + $0x240] sm:$0xff] %vm4686_vm3, %v5876_v30  ;;  %v5677_v55 = vmul.f32 0.2, %v5586_v50  ;;  %6344 = vrot.lane.b32.xlu0 %v5994_v54, %s8951_s29  ;;  %v6453_v43 = vsel %vm4946_vm7, %v6437_v53, %v8764_v62  ;;  %v6439_v30 = vsel %vm4816_vm4, %v6423_v27, %v8774_v31  ;;  %v8770_v54 = vunpack.i.h.bf16 %v8768_v38 }
 0x5f4   :  { %6291 = vrot.lane.b32.xlu2 %v8921_v12, %s14050_s28 }
 0x5f5   :  { %v5741_v39 = vmax.f32 %v5586_v50, %v5677_v55 }
 0x5f6   :  { %v5379_v51 = vpop.f32.mrf.mxu3 }
 0x5f7   :  { %v5809_v23 = vmul.f32 %v13080_v16, %v5741_v39  ;;  %v5380_v46 = vadd.f32 %v13054_v40, %v5379_v51  ;;  %v8775_v39 = vunpack.i.h.bf16 %v13176_v4  ;;  %v6090_v4 = vld [vmem:[%s13994_s7 + $0x108] sm:$0xff] }
 0x5f9   :  { %v5877_v41 = vadd.f32 %v13062_v19, %v5809_v23  ;;  %v5589_v63 = vadd.f32 %v13108_v37, %v5380_v46  ;;  %v13167_v37 = vpop.f32.mrf.mxu2  ;;  %v8927_v23 = vld [vmem:[#allocation3 + $0x110] sm:$0xff]  ;;  %v8780_v46 = vunpack.i.h.bf16 %v8778_v48 }
 0x5fa   :  { %v13160_v18 = vld [vmem:[#allocation3 + $0x240] sm:$0xff] }
 0x5fb   :  { %6578 = vmatmul.f32.gmra.mxu3 %v6453_v43  ;;  %5962 = vst.msk [vmem:[#allocation3 + $0x248] sm:$0xff] %vm4686_vm3, %v5877_v41  ;;  %v5678_v44 = vmul.f32 0.2, %v5589_v63  ;;  %6371 = vrot.lane.b32.xlu0 %v8922_v1, %s8953_s18  ;;  %v13213_v41 = vld [vmem:[#allocation3 + $0xd0] sm:$0xff]  ;;  %v8783_v43 = vpop.permute.xlu2 %8782 }
 0x5fc   :  { %6373 = vrot.lane.b32.xlu2 %v8923_v13, %s8953_s18  ;;  %6263 = vrot.lane.b32.xlu1 %v13160_v18, %s8953_s18  ;;  %v13218_v13 = vpop.permute.xlu0 %8787  ;;  %v8784_v29 = vunpack.i.l.bf16 %v8783_v43  ;;  %v8785_v27 = vunpack.i.h.bf16 %v8783_v43 }
 0x5fd   :  { %v5742_v26 = vmax.f32 %v5589_v63, %v5678_v44  ;;  %v6424_v63 = vsel %vm4686_vm3, %v13213_v41, %v8770_v54  ;;  %v6011_v54 = vld [vmem:[#allocation3 + $0x130] sm:$0xff] }
 0x5fe   :  { %v5382_v33 = vpop.f32.mrf.mxu3  ;;  %v6440_v1 = vsel %vm4816_vm4, %v6424_v63, %v8775_v39  ;;  %v8931_v39 = vld [vmem:[#allocation3 + $0x1a0] sm:$0xff] }
 0x5ff   :  { %v5810_v3 = vmul.f32 %v13080_v16, %v5742_v26  ;;  %v5383_v22 = vadd.f32 %v13054_v40, %v5382_v33 }
 0x601   :  { %v5878_v8 = vadd.f32 %v13062_v19, %v5810_v3  ;;  %v5592_v11 = vadd.f32 %v13124_v10, %v5383_v22  ;;  %v8779_v10 = vunpack.i.l.bf16 %v8778_v48  ;;  %v5600_v50 = vpop.f32.mrf.mxu2  ;;  %v6456_v3 = vsel %vm4946_vm7, %v6440_v1, %v8780_v46  ;;  %v6086_v48 = vld [vmem:[%s13994_s7 + $0xe8] sm:$0xff]  ;;  %v13260_v1 = vld [vmem:[#allocation3 + $0x1e0] sm:$0xff] }
 0x602   :  { %v8789_v22 = vunpack.i.l.bf16 %v13218_v13 }
 0x603   :  { %6581 = vmatmul.f32.gmra.mxu3 %v6454_v25  ;;  %5963 = vst.msk [vmem:[#allocation3 + $0x250] sm:$0xff] %vm4686_vm3, %v5878_v8  ;;  %v5679_v6 = vmul.f32 0.2, %v5592_v11  ;;  %6295 = vrot.lane.b32.xlu0 %v5993_v28, %s14050_s28  ;;  %v6455_v62 = vsel %vm4946_vm7, %v6439_v30, %v8779_v10  ;;  %v8930_v25 = vld [vmem:[#allocation3 + $0x168] sm:$0xff]  ;;  %v6425_v28 = vsel %vm4686_vm3, %v6012_v15, %v8784_v29 }
 0x604   :  { %6297 = vrot.lane.b32.xlu2 %v8925_v58, %s14050_s28  ;;  %v6441_v24 = vsel %vm4816_vm4, %v6425_v28, %v8789_v22 }
 0x605   :  { %v5743_v32 = vmax.f32 %v5592_v11, %v5679_v6  ;;  %v8929_v11 = vld [vmem:[#allocation3 + $0x158] sm:$0xff] }
 0x606   :  { %v5385_v17 = vpop.f32.mrf.mxu3 }
 0x607   :  { %v5811_v2 = vmul.f32 %v13080_v16, %v5743_v32  ;;  %v5386_v47 = vadd.f32 %v13054_v40, %v5385_v17 }
 0x609   :  { %v5879_v55 = vadd.f32 %v13062_v19, %v5811_v2  ;;  %v5595_v12 = vadd.f32 %v13145_v49, %v5386_v47  ;;  %v6087_v49 = vld [vmem:[%s13994_s7 + $0xf0] sm:$0xff]  ;;  %v5603_v38 = vpop.f32.mrf.mxu2  ;;  %v8790_v47 = vunpack.i.h.bf16 %v13218_v13 }
 0x60a   :  { %v13203_v51 = vld [vmem:[#allocation3 + $0x250] sm:$0xff]  ;;  %6616 = vmatpush.msra.mxu3 %v6087_v49 }
 0x60b   :  { %6584 = vmatmul.f32.gmra.mxu3 %v6455_v62  ;;  %5964 = vst.msk [vmem:[#allocation3 + $0x258] sm:$0xff] %vm4686_vm3, %v5879_v55  ;;  %v5680_v53 = vmul.f32 0.2, %v5595_v12  ;;  %6346 = vrot.lane.b32.xlu0 %v6012_v15, %s8951_s29  ;;  %v8795_v15 = vunpack.i.h.bf16 %v8793_v52 }
 0x60c   :  { %6299 = vrot.lane.b32.xlu2 %v8927_v23, %s14050_s28  ;;  %6265 = vrot.lane.b32.xlu1 %v13203_v51, %s8953_s18  ;;  %v13251_v23 = vld [vmem:[#allocation3 + $0x150] sm:$0xff] }
 0x60d   :  { %v5744_v0 = vmax.f32 %v5595_v12, %v5680_v53  ;;  %6617 = vmatpush.msra.mxu3 %v6086_v48  ;;  %v6426_v49 = vsel %vm4686_vm3, %v13251_v23, %v8785_v27  ;;  %v6258_v48 = vpop.permute.xlu1 %6257 }
 0x60e   :  { %v5388_v44 = vpop.f32.mrf.mxu3 }
 0x60f   :  { %v5812_v9 = vmul.f32 %v13080_v16, %v5744_v0  ;;  %v5389_v26 = vadd.f32 %v13054_v40, %v5388_v44  ;;  %v6442_v0 = vsel %vm4816_vm4, %v6426_v49, %v8790_v47  ;;  %v8798_v44 = vpop.permute.xlu2 %8797 }
 0x611   :  { %v5880_v33 = vadd.f32 %v13062_v19, %v5812_v9  ;;  %v5598_v34 = vadd.f32 %v13167_v37, %v5389_v26  ;;  %v8794_v37 = vunpack.i.l.bf16 %v8793_v52  ;;  %v5606_v12 = vpop.f32.mrf.mxu2  ;;  %v13262_v9 = vpop.permute.xlu0 %8802  ;;  %v6084_v52 = vld [vmem:[%s13994_s7 + $0xd8] sm:$0xff] }
 0x613   :  { %6587 = vmatmul.f32.gmra.mxu3 %v6456_v3  ;;  %5965 = vst.msk [vmem:[#allocation3 + $0x260] sm:$0xff] %vm4686_vm3, %v5880_v33  ;;  %v5681_v8 = vmul.f32 0.2, %v5598_v34  ;;  %6379 = vrot.lane.b32.xlu0 %v8929_v11, %s8953_s18  ;;  %v6457_v2 = vsel %vm4946_vm7, %v6441_v24, %v8794_v37  ;;  %v6458_v33 = vsel %vm4946_vm7, %v6442_v0, %v8795_v15 }
 0x614   :  { %6381 = vrot.lane.b32.xlu2 %v8930_v25, %s8953_s18 }
 0x615   :  { %v5745_v6 = vmax.f32 %v5598_v34, %v5681_v8  ;;  %v8799_v34 = vunpack.i.l.bf16 %v8798_v44  ;;  %v8804_v8 = vunpack.i.l.bf16 %v13262_v9 }
 0x616   :  { %v5391_v58 = vpop.f32.mrf.mxu3 }
 0x617   :  { %v5813_v10 = vmul.f32 %v13080_v16, %v5745_v6  ;;  %v5392_v32 = vadd.f32 %v13054_v40, %v5391_v58  ;;  %v13278_v58 = vld [vmem:[#allocation3 + $0x160] sm:$0xff]  ;;  %v6260_v49 = vpop.permute.xlu2 %6259 }
 0x619   :  { %v5881_v17 = vadd.f32 %v13062_v19, %v5813_v10  ;;  %v5601_v30 = vadd.f32 %v5600_v50, %v5392_v32  ;;  %v6085_v50 = vld [vmem:[%s13994_s7 + $0xe0] sm:$0xff]  ;;  %v5609_v11 = vpop.f32.mrf.mxu2  ;;  %v8800_v10 = vunpack.i.h.bf16 %v8798_v44 }
 0x61a   :  { %v13241_v55 = vld [vmem:[#allocation3 + $0x260] sm:$0xff]  ;;  %6618 = vmatpush.msra.mxu3 %v6085_v50 }
 0x61b   :  { %6590 = vmatmul.f32.gmra.mxu3 %v6457_v2  ;;  %5966 = vst.msk [vmem:[#allocation3 + $0x268] sm:$0xff] %vm4686_vm3, %v5881_v17  ;;  %v5682_v62 = vmul.f32 0.2, %v5601_v30  ;;  %6303 = vrot.lane.b32.xlu0 %v6011_v54, %s14050_s28  ;;  %v6083_v54 = vld [vmem:[%s13994_s7 + $0xd0] sm:$0xff] }
 0x61c   :  { %6305 = vrot.lane.b32.xlu2 %v8931_v39, %s14050_s28  ;;  %6267 = vrot.lane.b32.xlu1 %v13241_v55, %s8953_s18  ;;  %v13297_v39 = vld [vmem:[#allocation3 + $0x170] sm:$0xff] }
 0x61d   :  { %v5746_v53 = vmax.f32 %v5601_v30, %v5682_v62  ;;  %6619 = vmatpush.msra.mxu3 %v6084_v52  ;;  %v8805_v30 = vunpack.i.h.bf16 %v13262_v9  ;;  %v8935_v62 = vld [vmem:[#allocation3 + $0x80] sm:$0xff]  ;;  %v6428_v50 = vsel %vm4686_vm3, %v13297_v39, %v8800_v10 }
 0x61e   :  { %v5394_v46 = vpop.f32.mrf.mxu3  ;;  %v6089_v9 = vld [vmem:[%s13994_s7 + $0x100] sm:$0xff] }
 0x61f   :  { %v5814_v63 = vmul.f32 %v13080_v16, %v5746_v53  ;;  %v5395_v43 = vadd.f32 %v13054_v40, %v5394_v46  ;;  %6620 = vmatpush.msra.mxu3 %v6083_v54  ;;  %v6029_v46 = vld [vmem:[#allocation3 + $0x1d0] sm:$0xff]  ;;  %v8938_v54 = vld [vmem:[#allocation3 + $0x148] sm:$0xff] }
 0x621   :  { %v5882_v26 = vadd.f32 %v13062_v19, %v5814_v63  ;;  %v5604_v29 = vadd.f32 %v5603_v38, %v5395_v43  ;;  %v8933_v38 = vld [vmem:[#allocation3 + $0xa8] sm:$0xff]  ;;  %v5612_v0 = vpop.f32.mrf.mxu2  ;;  %v6048_v63 = vld [vmem:[#allocation3 + $0x280] sm:$0xff]  ;;  %v8811_v43 = vpack.i.bf16 %v13160_v18, %v6029_v46  ;;  %v6080_v46 = vld [vmem:[%s13994_s7 + $0xb8] sm:$0xff] }
 0x623   :  { %6593 = vmatmul.f32.gmra.mxu3 %v6458_v33  ;;  %5967 = vst.msk [vmem:[#allocation3 + $0x270] sm:$0xff] %vm4686_vm3, %v5882_v26  ;;  %v5683_v3 = vmul.f32 0.2, %v5604_v29  ;;  %6348 = vrot.lane.b32.xlu0 %v13260_v1, %s8951_s29 }
 0x624   :  { %6307 = vrot.lane.b32.xlu2 %v12883_v45, %s14050_s28  ;;  %6369 = vrot.lane.b32.xlu1 %v8933_v38, %s8953_s18  ;;  %v6427_v45 = vsel %vm4686_vm3, %v13278_v58, %v8799_v34  ;;  %v6082_v34 = vld [vmem:[%s13994_s7 + $0xc8] sm:$0xff] }
 0x625   :  { %v5747_v25 = vmax.f32 %v5604_v29, %v5683_v3  ;;  %v6443_v24 = vsel %vm4816_vm4, %v6427_v45, %v8804_v8  ;;  %v8937_v3 = vld [vmem:[#allocation3 + $0xd8] sm:$0xff]  ;;  %6621 = vmatpush.msra.mxu3 %v6082_v34  ;;  %v6078_v34 = vld [vmem:[%s13994_s7 + $0xa8] sm:$0xff] }
 0x626   :  { %v5397_v37 = vpop.f32.mrf.mxu3  ;;  %v6459_v17 = vsel %vm4946_vm7, %v6443_v24, %v6258_v48 }
 0x627   :  { %v5815_v28 = vmul.f32 %v13080_v16, %v5747_v25  ;;  %v5398_v6 = vadd.f32 %v13054_v40, %v5397_v37 }
 0x629   :  { %v5883_v32 = vadd.f32 %v13062_v19, %v5815_v28  ;;  %v5607_v27 = vadd.f32 %v5606_v12, %v5398_v6  ;;  %v5615_v6 = vpop.f32.mrf.mxu2 }
 0x62b   :  { %6596 = vmatmul.f32.gmra.mxu3 %v6459_v17  ;;  %5968 = vst.msk [vmem:[#allocation3 + $0x288] sm:$0xff] %vm4686_vm3, %v5883_v32  ;;  %v5684_v2 = vmul.f32 0.2, %v5607_v27  ;;  %6387 = vrot.lane.b32.xlu0 %v13040_v14, %s8953_s18  ;;  %v6444_v14 = vsel %vm4816_vm4, %v6428_v50, %v8805_v30 }
 0x62c   :  { %6389 = vrot.lane.b32.xlu2 %v13087_v59, %s8953_s18  ;;  %6293 = vrot.lane.b32.xlu1 %v8935_v62, %s14050_s28  ;;  %v6460_v29 = vsel %vm4946_vm7, %v6444_v14, %v6260_v49 }
 0x62d   :  { %v5748_v12 = vmax.f32 %v5607_v27, %v5684_v2  ;;  %v13320_v45 = vpop.permute.xlu1 %6197  ;;  %v6262_v27 = vpop.permute.xlu2 %6261  ;;  %v6081_v2 = vld [vmem:[%s13994_s7 + $0xc0] sm:$0xff] }
 0x62e   :  { %v5400_v15 = vpop.f32.mrf.mxu3  ;;  %6622 = vmatpush.msra.mxu3 %v6081_v2 }
 0x62f   :  { %v5816_v53 = vmul.f32 %v13080_v16, %v5748_v12  ;;  %v5401_v59 = vadd.f32 %v13054_v40, %v5400_v15 }
 0x630   :  { %6623 = vmatpush.msra.mxu3 %v6080_v46 }
 0x631   :  { %v5884_v44 = vadd.f32 %v13062_v19, %v5816_v53  ;;  %v5610_v26 = vadd.f32 %v5609_v11, %v5401_v59 }
 0x632   :  { %v6049_v24 = vld [vmem:[#allocation3 + $0x288] sm:$0xff] }
 0x633   :  { %6599 = vmatmul.f32.gmra.mxu3 %v6460_v29  ;;  %5969 = vst.msk [vmem:[#allocation3 + $0x290] sm:$0xff] %vm4686_vm3, %v5884_v44  ;;  %v5685_v33 = vmul.f32 0.2, %v5610_v26  ;;  %8812 = vrot.lane.b32.xlu0 %v8811_v43, %s14050_s28  ;;  %v8939_v43 = vld [vmem:[#allocation3 + $0x120] sm:$0xff] }
 0x634   :  { %6350 = vrot.lane.b32.xlu2 %v6048_v63, %s8951_s29  ;;  %6375 = vrot.lane.b32.xlu1 %v8937_v3, %s8953_s18  ;;  %v5618_v63 = vpop.f32.mrf.mxu2 }
 0x635   :  { %v5749_v18 = vmax.f32 %v5610_v26, %v5685_v33 }
 0x636   :  { %v5403_v52 = vpop.f32.mrf.mxu3 }
 0x637   :  { %v5817_v38 = vmul.f32 %v13080_v16, %v5749_v18  ;;  %v5404_v11 = vadd.f32 %v13054_v40, %v5403_v52  ;;  %v13316_v25 = vpop.permute.xlu0 %8807 }
 0x638   :  { %v8809_v48 = vunpack.i.l.bf16 %v13316_v25 }
 0x639   :  { %v5885_v37 = vadd.f32 %v13062_v19, %v5817_v38  ;;  %v5613_v28 = vadd.f32 %v5612_v0, %v5404_v11  ;;  %v6079_v0 = vld [vmem:[%s13994_s7 + $0xb0] sm:$0xff]  ;;  %v8940_v11 = vld [vmem:[#allocation3 + $0x178] sm:$0xff] }
 0x63a   :  { %v13322_v10 = vld [vmem:[#allocation3 + $0x290] sm:$0xff]  ;;  %v6429_v32 = vsel %vm4686_vm3, %v13260_v1, %v8809_v48  ;;  %6624 = vmatpush.msra.mxu3 %v6079_v0 }
 0x63b   :  { %5970 = vst.msk [vmem:[#allocation3 + $0x298] sm:$0xff] %vm4686_vm3, %v5885_v37  ;;  %v5686_v17 = vmul.f32 0.2, %v5613_v28  ;;  %6393 = vrot.lane.b32.xlu0 %v6049_v24, %s8953_s18  ;;  %v6445_v30 = vsel %vm4816_vm4, %v6429_v32, %v13320_v45  ;;  %v6077_v32 = vld [vmem:[%s13994_s7 + $0xa0] sm:$0xff]  ;;  %v6075_v0 = vld [vmem:[%s13994_s7 + $0x90] sm:$0xff] }
 0x63c   :  { %6352 = vrot.lane.b32.xlu2 %v13322_v10, %s8951_s29  ;;  %6377 = vrot.lane.b32.xlu1 %v8938_v54, %s8953_s18  ;;  %v6461_v1 = vsel %vm4946_vm7, %v6445_v30, %v6262_v27  ;;  %v5621_v37 = vpop.f32.mrf.mxu2 }
 0x63d   :  { %v5750_v62 = vmax.f32 %v5613_v28, %v5686_v17  ;;  %6602 = vmatmul.f32.gmra.mxu3 %v6461_v1 }
 0x63e   :  { %v5406_v12 = vpop.f32.mrf.mxu3  ;;  %6625 = vmatpush.msra.mxu3 %v6078_v34  ;;  %v6073_v34 = vld [vmem:[%s13994_s7 + $0x80] sm:$0xff] }
 0x63f   :  { %v5818_v50 = vmul.f32 %v13080_v16, %v5750_v62  ;;  %v5407_v15 = vadd.f32 %v13054_v40, %v5406_v12 }
 0x640   :  { %6626 = vmatpush.msra.mxu3 %v6077_v32 }
 0x641   :  { %v5886_v14 = vadd.f32 %v13062_v19, %v5818_v50  ;;  %v5616_v53 = vadd.f32 %v5615_v6, %v5407_v15  ;;  %v6076_v50 = vld [vmem:[%s13994_s7 + $0x98] sm:$0xff] }
 0x642   :  { %v6051_v59 = vld [vmem:[#allocation3 + $0x298] sm:$0xff]  ;;  %6627 = vmatpush.msra.mxu3 %v6076_v50 }
 0x643   :  { %5971 = vst.msk [vmem:[#allocation3 + $0x2a0] sm:$0xff] %vm4686_vm3, %v5886_v14  ;;  %v5687_v49 = vmul.f32 0.2, %v5616_v53  ;;  %6395 = vrot.lane.b32.xlu0 %v6051_v59, %s8953_s18 }
 0x644   :  { %6301 = vrot.lane.b32.xlu1 %v8939_v43, %s14050_s28  ;;  %v5624_v15 = vpop.f32.mrf.mxu2  ;;  %6628 = vmatpush.msra.mxu3 %v6075_v0 }
 0x645   :  { %v5751_v44 = vmax.f32 %v5616_v53, %v5687_v49  ;;  %v8941_v49 = vld [vmem:[#allocation3 + $0x1c0] sm:$0xff] }
 0x646   :  { %v5409_v26 = vpop.f32.mrf.mxu3 }
 0x647   :  { %v5819_v29 = vmul.f32 %v13080_v16, %v5751_v44  ;;  %v5410_v33 = vadd.f32 %v13054_v40, %v5409_v26  ;;  %v6074_v44 = vld [vmem:[%s13994_s7 + $0x88] sm:$0xff]  ;;  %v13396_v26 = vpop.permute.xlu0 %6199 }
 0x648   :  { %6629 = vmatpush.msra.mxu3 %v6074_v44 }
 0x649   :  { %v5887_v3 = vadd.f32 %v13062_v19, %v5819_v29  ;;  %v5619_v18 = vadd.f32 %v5618_v63, %v5410_v33 }
 0x64a   :  { %v13355_v52 = vld [vmem:[#allocation3 + $0x2a0] sm:$0xff]  ;;  %6630 = vmatpush.msra.mxu3 %v6073_v34 }
 0x64b   :  { %5972 = vst.msk [vmem:[#allocation3 + $0x2a8] sm:$0xff] %vm4686_vm3, %v5887_v3  ;;  %v5688_v38 = vmul.f32 0.2, %v5619_v18  ;;  %6354 = vrot.lane.b32.xlu2 %v13355_v52, %s8951_s29 }
 0x64c   :  { %6383 = vrot.lane.b32.xlu1 %v8940_v11, %s8953_s18 }
 0x64d   :  { %v5752_v48 = vmax.f32 %v5619_v18, %v5688_v38  ;;  %v6047_v18 = vld [vmem:[#allocation3 + $0x270] sm:$0xff] }
 0x64e   :  { %v5412_v28 = vpop.f32.mrf.mxu3 }
 0x64f   :  { %v5820_v6 = vmul.f32 %v13080_v16, %v5752_v48  ;;  %v5413_v24 = vadd.f32 %v13054_v40, %v5412_v28  ;;  %v13416_v3 = vpop.permute.xlu0 %6201 }
 0x651   :  { %v5888_v27 = vadd.f32 %v13062_v19, %v5820_v6  ;;  %v5622_v17 = vadd.f32 %v5621_v37, %v5413_v24 }
 0x652   :  { %v6053_v30 = vld [vmem:[#allocation3 + $0x2a8] sm:$0xff] }
 0x653   :  { %5973 = vst.msk [vmem:[#allocation3 + $0x2b0] sm:$0xff] %vm4686_vm3, %v5888_v27  ;;  %v5689_v2 = vmul.f32 0.2, %v5622_v17  ;;  %6397 = vrot.lane.b32.xlu0 %v6053_v30, %s8953_s18 }
 0x654   :  { %6385 = vrot.lane.b32.xlu1 %v13038_v42, %s8953_s18 }
 0x655   :  { %v5753_v54 = vmax.f32 %v5622_v17, %v5689_v2 }
 0x656   :  { %v5415_v1 = vpop.f32.mrf.mxu3 }
 0x657   :  { %v5821_v62 = vmul.f32 %v13080_v16, %v5753_v54  ;;  %v5416_v12 = vadd.f32 %v13054_v40, %v5415_v1  ;;  %v5986_v54 = vld [vmem:[#allocation3 + $0x58] sm:$0xff] }
 0x659   :  { %v5889_v14 = vadd.f32 %v13062_v19, %v5821_v62  ;;  %v5625_v53 = vadd.f32 %v5624_v15, %v5416_v12 }
 0x65a   :  { %v13377_v59 = vld [vmem:[#allocation3 + $0x2b0] sm:$0xff] }
 0x65b   :  { %5974 = vst.msk [vmem:[#allocation3 + $0x2b8] sm:$0xff] %vm4686_vm3, %v5889_v14  ;;  %v5690_v42 = vmul.f32 0.2, %v5625_v53  ;;  %6356 = vrot.lane.b32.xlu2 %v13377_v59, %s8951_s29 }
 0x65c   :  { %6309 = vrot.lane.b32.xlu1 %v8941_v49, %s14050_s28 }
 0x65d   :  { %v5754_v40 = vmax.f32 %v5625_v53, %v5690_v42  ;;  %v6204_v6 = vpop.permute.xlu0 %6203  ;;  %v5988_v53 = vld [vmem:[#allocation3 + $0x68] sm:$0xff] }
 0x65e   :  { %v13424_v28 = vpop.f32.mrf.mxu3 }
 0x65f   :  { %v5822_v46 = vmul.f32 %v13080_v16, %v5754_v40  ;;  %v8810_v16 = vunpack.i.h.bf16 %v13316_v25  ;;  %v6138_v25 = vpop.permute.xlu2 %6137 }
 0x660   :  { %v6431_v38 = vsel %vm4686_vm3, %v13071_v57, %v6138_v25 }
 0x661   :  { %v5890_v63 = vadd.f32 %v13062_v19, %v5822_v46  ;;  %v6430_v19 = vsel %vm4686_vm3, %v13017_v36, %v8810_v16  ;;  %v6942_v36 = vld [vmem:[%s13996_s11 + $0x238] sm:$0xff] }
 0x662   :  { %v6055_v43 = vld [vmem:[#allocation3 + $0x2b8] sm:$0xff]  ;;  %v6446_v29 = vsel %vm4816_vm4, %v6430_v19, %v13396_v26  ;;  %7145 = vmatpush.msrb.mxu2 %v6942_v36 }
 0x663   :  { %5975 = vst.msk [vmem:[#allocation3 + $0x2c0] sm:$0xff] %vm4686_vm3, %v5890_v63  ;;  %6399 = vrot.lane.b32.xlu0 %v6055_v43, %s8953_s18  ;;  %v5990_v63 = vld [vmem:[#allocation3 + $0x78] sm:$0xff] }
 0x664   :  { %6391 = vrot.lane.b32.xlu1 %v13115_v35, %s8953_s18 }
 0x665   :  { %v6345_v2 = vpop.permute.xlu0 %6344 }
 0x666   :  { %v13429_v30 = vpop.f32.mrf.mxu3 }
 0x667   :  { %v6140_v37 = vpop.permute.xlu2 %6139 }
 0x668   :  { %v6432_v24 = vsel %vm4686_vm3, %v13101_v60, %v6140_v37  ;;  %v6091_v60 = vld [vmem:[%s13994_s7 + $0x110] sm:$0xff] }
 0x669   :  { %v6448_v27 = vsel %vm4816_vm4, %v6432_v24, %v6204_v6  ;;  %v6006_v24 = vld [vmem:[#allocation3 + $0x108] sm:$0xff] }
 0x66c   :  { %6315 = vrot.lane.b32.xlu1 %v13203_v51, %s14050_s28  ;;  %v6092_v51 = vld [vmem:[%s13994_s7 + $0x118] sm:$0xff] }
 0x66d   :  { %6692 = vmatpush.msrb.mxu3 %v6092_v51  ;;  %v6372_v49 = vpop.permute.xlu0 %6371 }
 0x66e   :  { %v6264_v33 = vpop.permute.xlu1 %6263  ;;  %v13438_v14 = vpop.f32.mrf.mxu3 }
 0x66f   :  { %v6462_v35 = vsel %vm4946_vm7, %v6446_v29, %v6264_v33  ;;  %v6290_v32 = vpop.permute.xlu2 %6289  ;;  %6693 = vmatpush.msrb.mxu3 %v6091_v60 }
 0x670   :  { %6605 = vmatmul.f32.gmra.mxu3 %v6462_v35  ;;  %v6465_v1 = vsel %vm4686_vm3, %v5986_v54, %v6290_v32  ;;  %v5992_v35 = vld [vmem:[#allocation3 + $0x88] sm:$0xff]  ;;  %v6008_v54 = vld [vmem:[#allocation3 + $0x118] sm:$0xff] }
 0x671   :  { %v6481_v62 = vsel %vm4816_vm4, %v6465_v1, %v6345_v2  ;;  %6694 = vmatpush.msrb.mxu3 %v6090_v4 }
 0x673   :  { %6695 = vmatpush.msrb.mxu3 %v6089_v9 }
 0x674   :  { %6317 = vrot.lane.b32.xlu1 %v13241_v55, %s14050_s28  ;;  %v6447_v55 = vsel %vm4816_vm4, %v6431_v38, %v13416_v3 }
 0x675   :  { %v6296_v33 = vpop.permute.xlu0 %6295 }
 0x676   :  { %v13446_v44 = vpop.f32.mrf.mxu3 }
 0x677   :  { %v6292_v15 = vpop.permute.xlu2 %6291 }
 0x678   :  { %v6466_v42 = vsel %vm4686_vm3, %v5988_v53, %v6292_v15  ;;  %v6010_v53 = vld [vmem:[#allocation3 + $0x128] sm:$0xff] }
 0x679   :  { %v6482_v46 = vsel %vm4816_vm4, %v6466_v42, %v8759_v20  ;;  %v6468_v20 = vsel %vm4686_vm3, %v5992_v35, %v6296_v33 }
 0x67a   :  { %v6498_v0 = vsel %vm4946_vm7, %v6482_v46, %v6372_v49  ;;  %v6484_v25 = vsel %vm4816_vm4, %v6468_v20, %v8774_v31  ;;  %v6941_v31 = vld [vmem:[%s13996_s11 + $0x230] sm:$0xff] }
 0x67b   :  { %7146 = vmatpush.msrb.mxu2 %v6941_v31 }
 0x67c   :  { %6319 = vrot.lane.b32.xlu1 %v6047_v18, %s14050_s28 }
 0x67d   :  { %v6347_v21 = vpop.permute.xlu0 %6346 }
 0x67e   :  { %v6266_v11 = vpop.permute.xlu1 %6265  ;;  %v13453_v51 = vpop.f32.mrf.mxu3 }
 0x67f   :  { %v6463_v48 = vsel %vm4946_vm7, %v6447_v55, %v6266_v11  ;;  %v6374_v16 = vpop.permute.xlu2 %6373 }
 0x680   :  { %6608 = vmatmul.f32.gmra.mxu3 %v6463_v48 }
 0x686   :  { %v13461_v48 = vpop.f32.mrf.mxu3 }
 0x687   :  { %v6298_v36 = vpop.permute.xlu2 %6297 }
 0x68e   :  { %v6268_v17 = vpop.permute.xlu1 %6267  ;;  %v13475_v1 = vpop.f32.mrf.mxu3 }
 0x68f   :  { %v6464_v57 = vsel %vm4946_vm7, %v6448_v27, %v6268_v17  ;;  %v6300_v6 = vpop.permute.xlu2 %6299  ;;  %v6380_v27 = vpop.permute.xlu0 %6379 }
 0x690   :  { %6611 = vmatmul.f32.gmra.mxu3 %v6464_v57  ;;  %v6470_v32 = vsel %vm4686_vm3, %v6006_v24, %v6300_v6 }
 0x691   :  { %v6486_v57 = vsel %vm4816_vm4, %v6470_v32, %v8789_v22 }
 0x692   :  { %v6502_v2 = vsel %vm4946_vm7, %v6486_v57, %v6380_v27 }
 0x696   :  { %v6370_v12 = vpop.permute.xlu1 %6369  ;;  %v13483_v49 = vpop.f32.mrf.mxu3 }
 0x697   :  { %v6497_v50 = vsel %vm4946_vm7, %v6481_v62, %v6370_v12  ;;  %v6382_v12 = vpop.permute.xlu2 %6381  ;;  %v6304_v15 = vpop.permute.xlu0 %6303 }
 0x698   :  { %6631 = vmatmul.f32.vlgmr.msra.gmra.mxu3 %v6497_v50  ;;  %v6472_v22 = vsel %vm4686_vm3, %v6010_v53, %v6304_v15 }
 0x699   :  { %v6488_v46 = vsel %vm4816_vm4, %v6472_v22, %v8804_v8  ;;  %v6024_v8 = vld [vmem:[#allocation3 + $0x1a8] sm:$0xff] }
 0x69e   :  { %v6294_v40 = vpop.permute.xlu1 %6293 }
 0x69f   :  { %v6467_v43 = vsel %vm4686_vm3, %v5990_v63, %v6294_v40  ;;  %v6306_v40 = vpop.permute.xlu2 %6305  ;;  %v6349_v13 = vpop.permute.xlu0 %6348 }
 0x6a0   :  { %6634 = vmatmul.f32.gmra.mxu3 %v6498_v0  ;;  %v6483_v19 = vsel %vm4816_vm4, %v6467_v43, %v8760_v7  ;;  %v6004_v7 = vld [vmem:[#allocation3 + $0xf8] sm:$0xff] }
 0x6a1   :  { %v6499_v29 = vsel %vm4946_vm7, %v6483_v19, %v6374_v16  ;;  %v6469_v55 = vsel %vm4686_vm3, %v6004_v7, %v6298_v36  ;;  %v13490_v16 = vpop.f32.mrf.mxu3 }
 0x6a2   :  { %v6485_v11 = vsel %vm4816_vm4, %v6469_v55, %v6347_v21  ;;  %v6026_v21 = vld [vmem:[#allocation3 + $0x1b8] sm:$0xff] }
 0x6a6   :  { %v6376_v34 = vpop.permute.xlu1 %6375 }
 0x6a7   :  { %v6500_v18 = vsel %vm4946_vm7, %v6484_v25, %v6376_v34  ;;  %v6308_v33 = vpop.permute.xlu2 %6307  ;;  %v6388_v35 = vpop.permute.xlu0 %6387 }
 0x6a8   :  { %6637 = vmatmul.f32.gmra.mxu3 %v6499_v29  ;;  %v6474_v34 = vsel %vm4686_vm3, %v6024_v8, %v6308_v33 }
 0x6a9   :  { %v6490_v36 = vsel %vm4816_vm4, %v6474_v34, %v13320_v45  ;;  %v13500_v25 = vpop.f32.mrf.mxu3  ;;  %v6028_v45 = vld [vmem:[#allocation3 + $0x1c8] sm:$0xff] }
 0x6ae   :  { %v6378_v38 = vpop.permute.xlu1 %6377 }
 0x6af   :  { %v6501_v37 = vsel %vm4946_vm7, %v6485_v11, %v6378_v38  ;;  %v8813_v38 = vpop.permute.xlu0 %8812  ;;  %v6390_v11 = vpop.permute.xlu2 %6389 }
 0x6b0   :  { %6640 = vmatmul.f32.gmra.mxu3 %v6500_v18  ;;  %v6506_v18 = vsel %vm4946_vm7, %v6490_v36, %v6388_v35  ;;  %v8815_v27 = vunpack.i.h.bf16 %v8813_v38  ;;  %v6046_v35 = vld [vmem:[#allocation3 + $0x268] sm:$0xff] }
 0x6b1   :  { %v13507_v31 = vpop.f32.mrf.mxu3 }
 0x6b6   :  { %v6302_v17 = vpop.permute.xlu1 %6301 }
 0x6b7   :  { %v6471_v62 = vsel %vm4686_vm3, %v6008_v54, %v6302_v17  ;;  %v6351_v57 = vpop.permute.xlu2 %6350 }
 0x6b8   :  { %6643 = vmatmul.f32.gmra.mxu3 %v6501_v37  ;;  %v6487_v50 = vsel %vm4816_vm4, %v6471_v62, %v8790_v47  ;;  %v6022_v47 = vld [vmem:[#allocation3 + $0x198] sm:$0xff]  ;;  %v8814_v37 = vunpack.i.l.bf16 %v8813_v38 }
 0x6b9   :  { %v6503_v60 = vsel %vm4946_vm7, %v6487_v50, %v6382_v12  ;;  %v6473_v43 = vsel %vm4686_vm3, %v6022_v47, %v6306_v40  ;;  %v13513_v54 = vpop.f32.mrf.mxu3  ;;  %v6394_v12 = vpop.permute.xlu0 %6393  ;;  %v6044_v47 = vld [vmem:[#allocation3 + $0x258] sm:$0xff] }
 0x6ba   :  { %v6489_v19 = vsel %vm4816_vm4, %v6473_v43, %v6349_v13  ;;  %v6476_v24 = vsel %vm4686_vm3, %v6028_v45, %v8814_v37 }
 0x6bb   :  { %v6492_v32 = vsel %vm4816_vm4, %v6476_v24, %v13416_v3  ;;  %v8943_v24 = vld [vmem:[#allocation3 + $0x180] sm:$0xff] }
 0x6be   :  { %v6384_v42 = vpop.permute.xlu1 %6383 }
 0x6bf   :  { %v6504_v0 = vsel %vm4946_vm7, %v6488_v46, %v6384_v42  ;;  %v6353_v53 = vpop.permute.xlu2 %6352  ;;  %v6940_v46 = vld [vmem:[%s13996_s11 + $0x228] sm:$0xff] }
 0x6c0   :  { %6646 = vmatmul.f32.gmra.mxu3 %v6502_v2  ;;  %v6040_v2 = vld [vmem:[#allocation3 + $0x238] sm:$0xff]  ;;  %7147 = vmatpush.msrb.mxu2 %v6940_v46 }
 0x6c1   :  { %v6477_v62 = vsel %vm4686_vm3, %v6040_v2, %v8815_v27  ;;  %v13519_v42 = vpop.f32.mrf.mxu3  ;;  %v6886_v46 = vld [vmem:[%s13996_s11 + $0x78] sm:$0xff] }
 0x6c2   :  { %v6493_v50 = vsel %vm4816_vm4, %v6477_v62, %v6351_v57  ;;  %v8946_v57 = vld [vmem:[#allocation3 + $0x210] sm:$0xff]  ;;  %7021 = vmatpush.msra.mxu3 %v6886_v46 }
 0x6c3   :  { %v6509_v15 = vsel %vm4946_vm7, %v6493_v50, %v6394_v12  ;;  %v6938_v12 = vld [vmem:[%s13996_s11 + $0x218] sm:$0xff]  ;;  %v6056_v50 = vld [vmem:[#allocation3 + $0x2c0] sm:$0xff] }
 0x6c6   :  { %v6386_v63 = vpop.permute.xlu1 %6385 }
 0x6c7   :  { %v6505_v29 = vsel %vm4946_vm7, %v6489_v19, %v6386_v63  ;;  %v6355_v43 = vpop.permute.xlu2 %6354 }
 0x6c8   :  { %6649 = vmatmul.f32.gmra.mxu3 %v6503_v60  ;;  %v6042_v60 = vld [vmem:[#allocation3 + $0x248] sm:$0xff] }
 0x6ce   :  { %v6310_v20 = vpop.permute.xlu1 %6309 }
 0x6cf   :  { %v6475_v7 = vsel %vm4686_vm3, %v6026_v21, %v6310_v20  ;;  %v6357_v20 = vpop.permute.xlu2 %6356 }
 0x6d0   :  { %6652 = vmatmul.f32.gmra.mxu3 %v6504_v0  ;;  %v6491_v55 = vsel %vm4816_vm4, %v6475_v7, %v13396_v26  ;;  %v6396_v0 = vpop.permute.xlu0 %6395 }
 0x6d1   :  { %v6507_v6 = vsel %vm4946_vm7, %v6491_v55, %v6390_v11 }
 0x6d6   :  { %v6392_v4 = vpop.permute.xlu1 %6391 }
 0x6d7   :  { %v6508_v17 = vsel %vm4946_vm7, %v6492_v32, %v6392_v4  ;;  %v8944_v32 = vld [vmem:[#allocation3 + $0x1f0] sm:$0xff] }
 0x6d8   :  { %6655 = vmatmul.f32.gmra.mxu3 %v6505_v29  ;;  %v6398_v33 = vpop.permute.xlu0 %6397 }
 0x6de   :  { %v6316_v26 = vpop.permute.xlu1 %6315 }
 0x6df   :  { %v6478_v3 = vsel %vm4686_vm3, %v6042_v60, %v6316_v26 }
 0x6e0   :  { %6658 = vmatmul.f32.gmra.mxu3 %v6506_v18  ;;  %v6494_v40 = vsel %vm4816_vm4, %v6478_v3, %v6353_v53  ;;  %v6400_v21 = vpop.permute.xlu0 %6399 }
 0x6e1   :  { %v6510_v13 = vsel %vm4946_vm7, %v6494_v40, %v6396_v0  ;;  %v13606_v40 = vld [vmem:[%s13997_s9] ss:$0 sm:$0xff] }
 0x6e6   :  { %v6318_v22 = vpop.permute.xlu1 %6317 }
 0x6e7   :  { %v6479_v63 = vsel %vm4686_vm3, %v6044_v47, %v6318_v22  ;;  %v6847_v22 = vld [vmem:[#allocation4 + $0x8] sm:$0xff] }
 0x6e8   :  { %6661 = vmatmul.f32.gmra.mxu3 %v6507_v6  ;;  %v6495_v29 = vsel %vm4816_vm4, %v6479_v63, %v6355_v43  ;;  %v8942_v6 = vld [vmem:[#allocation3 + $0xe0] sm:$0xff]  ;;  %6947 = vrot.lane.b32.xlu1 %v6847_v22, %s8951_s29 }
 0x6e9   :  { %v6511_v8 = vsel %vm4946_vm7, %v6495_v29, %v6398_v33 }
 0x6ee   :  { %v6320_v9 = vpop.permute.xlu1 %6319 }
 0x6ef   :  { %v6480_v34 = vsel %vm4686_vm3, %v6046_v35, %v6320_v9 }
 0x6f0   :  { %6664 = vmatmul.f32.gmra.mxu3 %v6508_v17  ;;  %v6496_v18 = vsel %vm4816_vm4, %v6480_v34, %v6357_v20  ;;  %v8945_v17 = vld [vmem:[#allocation3 + $0x200] sm:$0xff] }
 0x6f1   :  { %v6512_v7 = vsel %vm4946_vm7, %v6496_v18, %v6400_v21 }
 0x6f3   :  { %v13527_v19 = vpop.f32.mrf.mxu3 }
 0x6f8   :  { %6667 = vmatmul.f32.gmra.mxu3 %v6509_v15 }
 0x700   :  { %6670 = vmatmul.f32.gmra.mxu3 %v6510_v13  ;;  %v13617_v13 = vld [vmem:[%s13998_s10] ss:$0 sm:$0xff] }
 0x703   :  { %v13532_v36 = vpop.f32.mrf.mxu3 }
 0x708   :  { %6673 = vmatmul.f32.gmra.mxu3 %v6511_v8 }
 0x710   :  { %6676 = vmatmul.f32.gmra.mxu3 %v6512_v7 }
 0x713   :  { %v13536_v38 = vpop.f32.mrf.mxu3 }
 0x718   :  { %7553 = vmatmul.msk.f32.vlgmr.msrb.gmra.mxu3 %vm4686_vm3, %v13169_v5  ;;  %v6939_v5 = vld [vmem:[%s13996_s11 + $0x220] sm:$0xff] }
 0x719   :  { %7148 = vmatpush.msrb.mxu2 %v6939_v5 }
 0x71b   :  { %v6632_v55 = vpop.f32.mrf.mxu3  ;;  %7149 = vmatpush.msrb.mxu2 %v6938_v12 }
 0x720   :  { %7554 = vmatmul.msk.f32.gmra.mxu3 %vm4686_vm3, %v13190_v61 }
 0x723   :  { %v6635_v11 = vpop.f32.mrf.mxu3 }
 0x728   :  { %7555 = vmatmul.msk.f32.gmra.mxu3 %vm4686_vm3, %v13213_v41 }
 0x72b   :  { %v6638_v37 = vpop.f32.mrf.mxu3 }
 0x730   :  { %7556 = vmatmul.msk.f32.gmra.mxu3 %vm4686_vm3, %v8942_v6 }
 0x733   :  { %v13545_v4 = vpop.f32.mrf.mxu3 }
 0x738   :  { %7557 = vmatmul.msk.f32.gmra.mxu3 %vm4686_vm3, %v13251_v23 }
 0x73b   :  { %v13549_v45 = vpop.f32.mrf.mxu3 }
 0x740   :  { %7558 = vmatmul.msk.f32.gmra.mxu3 %vm4686_vm3, %v13278_v58 }
 0x743   :  { %v13556_v61 = vpop.f32.mrf.mxu3 }
 0x748   :  { %7559 = vmatmul.msk.f32.gmra.mxu3 %vm4686_vm3, %v13297_v39 }
 0x74b   :  { %v13560_v41 = vpop.f32.mrf.mxu3 }
 0x750   :  { %7560 = vmatmul.msk.f32.gmra.mxu3 %vm4686_vm3, %v8943_v24 }
 0x753   :  { %v13563_v23 = vpop.f32.mrf.mxu3 }
 0x758   :  { %7561 = vmatmul.msk.f32.gmra.mxu3 %vm4686_vm3, %v8944_v32  ;;  %v6936_v32 = vld [vmem:[%s13996_s11 + $0x208] sm:$0xff] }
 0x75b   :  { %v13566_v27 = vpop.f32.mrf.mxu3 }
 0x760   :  { %7562 = vmatmul.msk.f32.gmra.mxu3 %vm4686_vm3, %v8945_v17 }
 0x763   :  { %v13569_v58 = vpop.f32.mrf.mxu3 }
 0x768   :  { %7563 = vmatmul.msk.f32.gmra.mxu3 %vm4686_vm3, %v8946_v57 }
 0x76b   :  { %v13572_v39 = vpop.f32.mrf.mxu3 }
 0x770   :  { %7564 = vmatmul.msk.f32.gmra.mxu3 %vm4686_vm3, %v13129_v56 }
 0x773   :  { %v13576_v26 = vpop.f32.mrf.mxu3 }
 0x778   :  { %7565 = vmatmul.msk.f32.gmra.mxu3 %vm4686_vm3, %v13322_v10 }
 0x77b   :  { %v13580_v2 = vpop.f32.mrf.mxu3 }
 0x780   :  { %7566 = vmatmul.msk.f32.gmra.mxu3 %vm4686_vm3, %v13355_v52  ;;  %v13599_v52 = vld [vmem:[%s13995_s8] ss:$0 sm:$0xff] }
 0x781   :  { %v6568_v15 = vadd.f32 %v13599_v52, %v13424_v28  ;;  %v6571_v28 = vadd.f32 %v13599_v52, %v13429_v30  ;;  %v6885_v30 = vld [vmem:[%s13996_s11 + $0x70] sm:$0xff]  ;;  %v6574_v8 = vadd.f32 %v13599_v52, %v13438_v14  ;;  %v6577_v6 = vadd.f32 %v13599_v52, %v13446_v44  ;;  %v6935_v44 = vld [vmem:[%s13996_s11 + $0x200] sm:$0xff] }
 0x782   :  { %7022 = vmatpush.msra.mxu3 %v6885_v30 }
 0x783   :  { %v13584_v62 = vpop.f32.mrf.mxu3  ;;  %v6633_v60 = vadd.f32 %v6632_v55, %v6568_v15  ;;  %v6636_v47 = vadd.f32 %v6635_v11, %v6571_v28  ;;  %v6639_v34 = vadd.f32 %v6638_v37, %v6574_v8  ;;  %v6884_v11 = vld [vmem:[%s13996_s11 + $0x68] sm:$0xff]  ;;  %v6937_v37 = vld [vmem:[%s13996_s11 + $0x210] sm:$0xff]  ;;  %v6642_v5 = vadd.f32 %v13545_v4, %v6577_v6  ;;  %v6883_v4 = vld [vmem:[%s13996_s11 + $0x60] sm:$0xff] }
 0x784   :  { %7023 = vmatpush.msra.mxu3 %v6884_v11  ;;  %7150 = vmatpush.msrb.mxu2 %v6937_v37  ;;  %v6580_v15 = vadd.f32 %v13599_v52, %v13453_v51  ;;  %v6849_v28 = vld [vmem:[#allocation4 + $0x18] sm:$0xff]  ;;  %v6583_v51 = vadd.f32 %v13599_v52, %v13461_v48  ;;  %v6881_v8 = vld [vmem:[%s13996_s11 + $0x50] sm:$0xff]  ;;  %v6586_v48 = vadd.f32 %v13599_v52, %v13475_v1  ;;  %v6880_v1 = vld [vmem:[%s13996_s11 + $0x48] sm:$0xff] }
 0x785   :  { %6949 = vrot.lane.b32.xlu2 %v6849_v28, %s8951_s29 }
 0x786   :  { %7151 = vmatpush.msrb.mxu2 %v6936_v32  ;;  %7024 = vmatpush.msra.mxu3 %v6883_v4 }
 0x788   :  { %7567 = vmatmul.msk.f32.gmra.mxu3 %vm4686_vm3, %v13377_v59  ;;  %7152 = vmatpush.msrb.mxu2 %v6935_v44 }
 0x78b   :  { %v13591_v56 = vpop.f32.mrf.mxu3 }
 0x790   :  { %7568 = vmatmul.msk.f32.gmra.mxu3 %vm4686_vm3, %v6056_v50 }
 0x793   :  { %v13594_v10 = vpop.f32.mrf.mxu3 }
 0x79b   :  { %v6697_v3 = vpop.f32.mrf.mxu3 }
 0x79c   :  { %v6698_v53 = vadd.f32 %v6697_v3, %v6633_v60  ;;  %v6645_v3 = vadd.f32 %v13549_v45, %v6580_v15 }
 0x79e   :  { %v6745_v59 = vmul.f32 0.2, %v6698_v53 }
 0x7a0   :  { %v6761_v0 = vmax.f32 %v6698_v53, %v6745_v59 }
 0x7a2   :  { %v6781_v63 = vmul.f32 %v13606_v40, %v6761_v0 }
 0x7a3   :  { %v6700_v43 = vpop.f32.mrf.mxu3 }
 0x7a4   :  { %v6801_v29 = vadd.f32 %v13617_v13, %v6781_v63  ;;  %v6701_v33 = vadd.f32 %v6700_v43, %v6636_v47  ;;  %v6882_v47 = vld [vmem:[%s13996_s11 + $0x58] sm:$0xff]  ;;  %v6648_v63 = vadd.f32 %v13556_v61, %v6583_v51  ;;  %v6651_v61 = vadd.f32 %v13560_v41, %v6586_v48  ;;  %v6861_v51 = vld [vmem:[#allocation4 + $0x90] sm:$0xff] }
 0x7a5   :  { %7025 = vmatpush.msra.mxu3 %v6882_v47  ;;  %v6589_v41 = vadd.f32 %v13599_v52, %v13483_v49  ;;  %v6879_v49 = vld [vmem:[%s13996_s11 + $0x40] sm:$0xff] }
 0x7a6   :  { %6830 = vst.msk [vmem:[#allocation4 + $0x38] sm:$0xff] %vm4816_vm4, %v6801_v29  ;;  %v6746_v9 = vmul.f32 0.2, %v6701_v33 }
 0x7a7   :  { %7026 = vmatpush.msra.mxu3 %v6881_v8 }
 0x7a8   :  { %v6762_v35 = vmax.f32 %v6701_v33, %v6746_v9 }
 0x7a9   :  { %7027 = vmatpush.msra.mxu3 %v6880_v1 }
 0x7aa   :  { %v6782_v20 = vmul.f32 %v13606_v40, %v6762_v35 }
 0x7ab   :  { %v6703_v18 = vpop.f32.mrf.mxu3  ;;  %7028 = vmatpush.msra.mxu3 %v6879_v49 }
 0x7ac   :  { %v6802_v21 = vadd.f32 %v13617_v13, %v6782_v20  ;;  %v6704_v7 = vadd.f32 %v6703_v18, %v6639_v34 }
 0x7ae   :  { %6831 = vst.msk [vmem:[#allocation4 + $0x40] sm:$0xff] %vm4816_vm4, %v6802_v21  ;;  %v6747_v55 = vmul.f32 0.2, %v6704_v7 }
 0x7b0   :  { %v6763_v14 = vmax.f32 %v6704_v7, %v6747_v55  ;;  %v6851_v55 = vld [vmem:[#allocation4 + $0x30] sm:$0xff] }
 0x7b1   :  { %6963 = vrot.lane.b32.xlu2 %v6851_v55, %s8951_s29 }
 0x7b2   :  { %v6783_v24 = vmul.f32 %v13606_v40, %v6763_v14  ;;  %v6654_v14 = vadd.f32 %v13563_v23, %v6589_v41  ;;  %v6592_v23 = vadd.f32 %v13599_v52, %v13490_v16  ;;  %v6878_v16 = vld [vmem:[%s13996_s11 + $0x38] sm:$0xff]  ;;  %v6875_v41 = vld [vmem:[%s13996_s11 + $0x20] sm:$0xff] }
 0x7b3   :  { %v6706_v17 = vpop.f32.mrf.mxu3  ;;  %7029 = vmatpush.msra.mxu3 %v6878_v16 }
 0x7b4   :  { %v6803_v57 = vadd.f32 %v13617_v13, %v6783_v24  ;;  %v6707_v12 = vadd.f32 %v6706_v17, %v6642_v5 }
 0x7b6   :  { %6832 = vst.msk [vmem:[#allocation4 + $0x48] sm:$0xff] %vm4816_vm4, %v6803_v57  ;;  %v6748_v50 = vmul.f32 0.2, %v6707_v12  ;;  %v6853_v57 = vld [vmem:[#allocation4 + $0x40] sm:$0xff] }
 0x7b8   :  { %v6764_v60 = vmax.f32 %v6707_v12, %v6748_v50  ;;  %v6657_v50 = vadd.f32 %v13566_v27, %v6592_v23  ;;  %v6595_v27 = vadd.f32 %v13599_v52, %v13500_v25  ;;  %v6877_v25 = vld [vmem:[%s13996_s11 + $0x30] sm:$0xff] }
 0x7b9   :  { %7030 = vmatpush.msra.mxu3 %v6877_v25  ;;  %v6948_v25 = vpop.permute.xlu1 %6947 }
 0x7ba   :  { %v6784_v53 = vmul.f32 %v13606_v40, %v6764_v60  ;;  %v6660_v28 = vadd.f32 %v13569_v58, %v6595_v27  ;;  %v6598_v58 = vadd.f32 %v13599_v52, %v13507_v31  ;;  %v6601_v31 = vadd.f32 %v13599_v52, %v13513_v54 }
 0x7bb   :  { %v6709_v22 = vpop.f32.mrf.mxu3  ;;  %v6604_v54 = vadd.f32 %v13599_v52, %v13519_v42  ;;  %v6873_v42 = vld [vmem:[%s13996_s11 + $0x10] sm:$0xff] }
 0x7bc   :  { %v6804_v59 = vadd.f32 %v13617_v13, %v6784_v53  ;;  %v6710_v46 = vadd.f32 %v6709_v22, %v6645_v3 }
 0x7be   :  { %6833 = vst.msk [vmem:[#allocation4 + $0x50] sm:$0xff] %vm4816_vm4, %v6804_v59  ;;  %v6749_v0 = vmul.f32 0.2, %v6710_v46 }
 0x7c0   :  { %v6765_v45 = vmax.f32 %v6710_v46, %v6749_v0 }
 0x7c2   :  { %v6785_v43 = vmul.f32 %v13606_v40, %v6765_v45 }
 0x7c3   :  { %v6712_v29 = vpop.f32.mrf.mxu3 }
 0x7c4   :  { %v6805_v33 = vadd.f32 %v13617_v13, %v6785_v43  ;;  %v6713_v9 = vadd.f32 %v6712_v29, %v6648_v63 }
 0x7c5   :  { %v6855_v22 = vld [vmem:[#allocation4 + $0x50] sm:$0xff] }
 0x7c6   :  { %6834 = vst.msk [vmem:[#allocation4 + $0x68] sm:$0xff] %vm4816_vm4, %v6805_v33  ;;  %v6750_v30 = vmul.f32 0.2, %v6713_v9 }
 0x7c8   :  { %v6766_v35 = vmax.f32 %v6713_v9, %v6750_v30  ;;  %v6663_v9 = vadd.f32 %v13572_v39, %v6598_v58  ;;  %v6666_v39 = vadd.f32 %v13576_v26, %v6601_v31 }
 0x7ca   :  { %v6786_v34 = vmul.f32 %v13606_v40, %v6766_v35 }
 0x7cb   :  { %v6715_v20 = vpop.f32.mrf.mxu3 }
 0x7cc   :  { %v6806_v18 = vadd.f32 %v13617_v13, %v6786_v34  ;;  %v6716_v21 = vadd.f32 %v6715_v20, %v6651_v61  ;;  %v6876_v34 = vld [vmem:[%s13996_s11 + $0x28] sm:$0xff] }
 0x7cd   :  { %v6857_v7 = vld [vmem:[#allocation4 + $0x68] sm:$0xff]  ;;  %7031 = vmatpush.msra.mxu3 %v6876_v34 }
 0x7ce   :  { %6835 = vst.msk [vmem:[#allocation4 + $0x70] sm:$0xff] %vm4816_vm4, %v6806_v18  ;;  %v6751_v11 = vmul.f32 0.2, %v6716_v21  ;;  %6951 = vrot.lane.b32.xlu0 %v6857_v7, %s8951_s29 }
 0x7cf   :  { %7032 = vmatpush.msra.mxu3 %v6875_v41  ;;  %v6891_v41 = vld [vmem:[%s13996_s11 + $0xa0] sm:$0xff] }
 0x7d0   :  { %v6767_v6 = vmax.f32 %v6716_v21, %v6751_v11 }
 0x7d2   :  { %v6787_v37 = vmul.f32 %v13606_v40, %v6767_v6  ;;  %v6669_v6 = vadd.f32 %v13580_v2, %v6604_v54  ;;  %v6607_v2 = vadd.f32 %v13599_v52, %v13527_v19  ;;  %v6872_v19 = vld [vmem:[%s13996_s11 + $0x8] sm:$0xff]  ;;  %v6890_v54 = vld [vmem:[%s13996_s11 + $0x98] sm:$0xff] }
 0x7d3   :  { %v6718_v5 = vpop.f32.mrf.mxu3 }
 0x7d4   :  { %v6807_v24 = vadd.f32 %v13617_v13, %v6787_v37  ;;  %v6719_v32 = vadd.f32 %v6718_v5, %v6654_v14  ;;  %v6672_v49 = vadd.f32 %v13584_v62, %v6607_v2  ;;  %v6871_v62 = vld [vmem:[%s13996_s11] sm:$0xff] }
 0x7d5   :  { %v13686_v17 = vld [vmem:[#allocation4 + $0x70] sm:$0xff] }
 0x7d6   :  { %6836 = vst.msk [vmem:[#allocation4 + $0x78] sm:$0xff] %vm4816_vm4, %v6807_v24  ;;  %v6752_v12 = vmul.f32 0.2, %v6719_v32  ;;  %7569 = vmatmul.msk.f32.vlgmr.msrb.gmra.mxu2 %vm4816_vm4, %v13686_v17  ;;  %6965 = vrot.lane.b32.xlu0 %v6853_v57, %s8951_s29  ;;  %v6874_v57 = vld [vmem:[%s13996_s11 + $0x18] sm:$0xff] }
 0x7d7   :  { %7033 = vmatpush.msra.mxu3 %v6874_v57  ;;  %v6915_v57 = vld [vmem:[%s13996_s11 + $0x160] sm:$0xff] }
 0x7d8   :  { %v6768_v44 = vmax.f32 %v6719_v32, %v6752_v12 }
 0x7d9   :  { %7034 = vmatpush.msra.mxu3 %v6873_v42 }
 0x7da   :  { %v6788_v4 = vmul.f32 %v13606_v40, %v6768_v44 }
 0x7db   :  { %v6721_v15 = vpop.f32.mrf.mxu3  ;;  %7035 = vmatpush.msra.mxu3 %v6872_v19 }
 0x7dc   :  { %v6808_v60 = vadd.f32 %v13617_v13, %v6788_v4  ;;  %v6722_v3 = vadd.f32 %v6721_v15, %v6657_v50 }
 0x7dd   :  { %v6859_v53 = vld [vmem:[#allocation4 + $0x78] sm:$0xff]  ;;  %7036 = vmatpush.msra.mxu3 %v6871_v62 }
 0x7de   :  { %6837 = vst.msk [vmem:[#allocation4 + $0x80] sm:$0xff] %vm4816_vm4, %v6808_v60  ;;  %v6753_v59 = vmul.f32 0.2, %v6722_v3  ;;  %6953 = vrot.lane.b32.xlu1 %v6859_v53, %s8951_s29  ;;  %6977 = vrot.lane.b32.xlu0 %v6855_v22, %s8951_s29  ;;  %v6610_v53 = vadd.f32 %v13599_v52, %v13532_v36 }
 0x7df   :  { %v6950_v34 = vpop.permute.xlu2 %6949 }
 0x7e0   :  { %v6769_v46 = vmax.f32 %v6722_v3, %v6753_v59  ;;  %v6902_v3 = vld [vmem:[%s13996_s11 + $0xf8] sm:$0xff]  ;;  %v6901_v59 = vld [vmem:[%s13996_s11 + $0xf0] sm:$0xff]  ;;  %v6675_v16 = vadd.f32 %v13591_v56, %v6610_v53 }
 0x7e1   :  { %7050 = vmatpush.msrb.mxu3 %v6902_v3  ;;  %v6906_v3 = vld [vmem:[%s13996_s11 + $0x118] sm:$0xff]  ;;  %v6905_v53 = vld [vmem:[%s13996_s11 + $0x110] sm:$0xff] }
 0x7e2   :  { %v6789_v0 = vmul.f32 %v13606_v40, %v6769_v46 }
 0x7e3   :  { %v6724_v47 = vpop.f32.mrf.mxu3  ;;  %7051 = vmatpush.msrb.mxu3 %v6901_v59 }
 0x7e4   :  { %v6809_v45 = vadd.f32 %v13617_v13, %v6789_v0  ;;  %v6725_v63 = vadd.f32 %v6724_v47, %v6660_v28  ;;  %v6900_v28 = vld [vmem:[%s13996_s11 + $0xe8] sm:$0xff] }
 0x7e5   :  { %v13711_v43 = vld [vmem:[#allocation4 + $0x80] sm:$0xff]  ;;  %7052 = vmatpush.msrb.mxu3 %v6900_v28  ;;  %v6933_v28 = vld [vmem:[%s13996_s11 + $0x1f0] sm:$0xff] }
 0x7e6   :  { %6838 = vst.msk [vmem:[#allocation4 + $0x98] sm:$0xff] %vm4816_vm4, %v6809_v45  ;;  %v6754_v29 = vmul.f32 0.2, %v6725_v63  ;;  %6967 = vrot.lane.b32.xlu1 %v6861_v51, %s8951_s29  ;;  %7570 = vmatmul.msk.f32.gmra.mxu2 %vm4816_vm4, %v13711_v43  ;;  %v6899_v51 = vld [vmem:[%s13996_s11 + $0xe0] sm:$0xff] }
 0x7e7   :  { %v6846_v45 = vld [vmem:[#allocation4] sm:$0xff]  ;;  %7053 = vmatpush.msrb.mxu3 %v6899_v51 }
 0x7e8   :  { %v6770_v33 = vmax.f32 %v6725_v63, %v6754_v29  ;;  %v6613_v63 = vadd.f32 %v13599_v52, %v13536_v38  ;;  %v6991_v58 = vsel %vm4816_vm4, %v6846_v45, %v6948_v25  ;;  %v13794_v38 = vld [vmem:[#allocation4 + $0x10] sm:$0xff]  ;;  %v6931_v51 = vld [vmem:[%s13996_s11 + $0x1e0] sm:$0xff]  ;;  %v6930_v45 = vld [vmem:[%s13996_s11 + $0x1d8] sm:$0xff] }
 0x7e9   :  { %7037 = vmatmul.f32.vlgmr.msra.gmra.mxu3 %v6991_v58  ;;  %v6927_v58 = vld [vmem:[%s13996_s11 + $0x1c0] sm:$0xff] }
 0x7ea   :  { %v6790_v30 = vmul.f32 %v13606_v40, %v6770_v33  ;;  %v6678_v33 = vadd.f32 %v13594_v10, %v6613_v63  ;;  %v6992_v10 = vsel %vm4816_vm4, %v13794_v38, %v6950_v34  ;;  %v6929_v63 = vld [vmem:[%s13996_s11 + $0x1d0] sm:$0xff]  ;;  %v6920_v34 = vld [vmem:[%s13996_s11 + $0x188] sm:$0xff] }
 0x7eb   :  { %v6727_v8 = vpop.f32.mrf.mxu3 }
 0x7ec   :  { %v6810_v48 = vadd.f32 %v13617_v13, %v6790_v30  ;;  %v6728_v35 = vadd.f32 %v6727_v8, %v6663_v9 }
 0x7ee   :  { %6839 = vst.msk [vmem:[#allocation4 + $0xa0] sm:$0xff] %vm4816_vm4, %v6810_v48  ;;  %v6755_v61 = vmul.f32 0.2, %v6728_v35 }
 0x7f0   :  { %v6771_v20 = vmax.f32 %v6728_v35, %v6755_v61 }
 0x7f1   :  { %7040 = vmatmul.f32.gmra.mxu3 %v6992_v10  ;;  %v6852_v10 = vld [vmem:[#allocation4 + $0x38] sm:$0xff] }
 0x7f2   :  { %v6791_v18 = vmul.f32 %v13606_v40, %v6771_v20 }
 0x7f3   :  { %v6730_v21 = vpop.f32.mrf.mxu3 }
 0x7f4   :  { %v6811_v7 = vadd.f32 %v13617_v13, %v6791_v18  ;;  %v6731_v55 = vadd.f32 %v6730_v21, %v6666_v39  ;;  %v6898_v18 = vld [vmem:[%s13996_s11 + $0xd8] sm:$0xff]  ;;  %v6897_v21 = vld [vmem:[%s13996_s11 + $0xd0] sm:$0xff] }
 0x7f5   :  { %v6863_v11 = vld [vmem:[#allocation4 + $0xa0] sm:$0xff]  ;;  %7054 = vmatpush.msrb.mxu3 %v6898_v18 }
 0x7f6   :  { %6840 = vst.msk [vmem:[#allocation4 + $0xa8] sm:$0xff] %vm4816_vm4, %v6811_v7  ;;  %v6756_v1 = vmul.f32 0.2, %v6731_v55  ;;  %6969 = vrot.lane.b32.xlu2 %v6863_v11, %s8951_s29  ;;  %v6893_v11 = vld [vmem:[%s13996_s11 + $0xb0] sm:$0xff] }
 0x7f7   :  { %7055 = vmatpush.msrb.mxu3 %v6897_v21  ;;  %v6862_v21 = vld [vmem:[#allocation4 + $0x98] sm:$0xff] }
 0x7f8   :  { %v6772_v26 = vmax.f32 %v6731_v55, %v6756_v1  ;;  %v6894_v55 = vld [vmem:[%s13996_s11 + $0xb8] sm:$0xff]  ;;  %v6892_v1 = vld [vmem:[%s13996_s11 + $0xa8] sm:$0xff] }
 0x7fa   :  { %v6792_v14 = vmul.f32 %v13606_v40, %v6772_v26  ;;  %v6889_v26 = vld [vmem:[%s13996_s11 + $0x90] sm:$0xff] }
 0x7fb   :  { %v6733_v37 = vpop.f32.mrf.mxu3 }
 0x7fc   :  { %v6812_v5 = vadd.f32 %v13617_v13, %v6792_v14  ;;  %v6734_v24 = vadd.f32 %v6733_v37, %v6669_v6  ;;  %v6888_v6 = vld [vmem:[%s13996_s11 + $0x88] sm:$0xff]  ;;  %v6887_v14 = vld [vmem:[%s13996_s11 + $0x80] sm:$0xff]  ;;  %v6918_v37 = vld [vmem:[%s13996_s11 + $0x178] sm:$0xff] }
 0x7fe   :  { %6841 = vst.msk [vmem:[#allocation4 + $0xb0] sm:$0xff] %vm4816_vm4, %v6812_v5  ;;  %v6757_v32 = vmul.f32 0.2, %v6734_v24  ;;  %v6917_v5 = vld [vmem:[%s13996_s11 + $0x170] sm:$0xff] }
 0x800   :  { %v6773_v12 = vmax.f32 %v6734_v24, %v6757_v32  ;;  %v6916_v24 = vld [vmem:[%s13996_s11 + $0x168] sm:$0xff]  ;;  %v6856_v32 = vld [vmem:[#allocation4 + $0x60] sm:$0xff] }
 0x802   :  { %v6793_v23 = vmul.f32 %v13606_v40, %v6773_v12  ;;  %v6914_v12 = vld [vmem:[%s13996_s11 + $0x158] sm:$0xff] }
 0x803   :  { %v6736_v44 = vpop.f32.mrf.mxu3 }
 0x804   :  { %v6813_v50 = vadd.f32 %v13617_v13, %v6793_v23  ;;  %v6737_v4 = vadd.f32 %v6736_v44, %v6672_v49  ;;  %v6913_v49 = vld [vmem:[%s13996_s11 + $0x150] sm:$0xff]  ;;  %v6912_v23 = vld [vmem:[%s13996_s11 + $0x148] sm:$0xff]  ;;  %v6911_v44 = vld [vmem:[%s13996_s11 + $0x140] sm:$0xff] }
 0x805   :  { %v6865_v15 = vld [vmem:[#allocation4 + $0xb0] sm:$0xff] }
 0x806   :  { %6842 = vst.msk [vmem:[#allocation4 + $0xc8] sm:$0xff] %vm4816_vm4, %v6813_v50  ;;  %v6758_v60 = vmul.f32 0.2, %v6737_v4  ;;  %6979 = vrot.lane.b32.xlu1 %v6865_v15, %s8951_s29  ;;  %v6910_v50 = vld [vmem:[%s13996_s11 + $0x138] sm:$0xff]  ;;  %v6908_v15 = vld [vmem:[%s13996_s11 + $0x128] sm:$0xff] }
 0x808   :  { %v6774_v22 = vmax.f32 %v6737_v4, %v6758_v60  ;;  %v6909_v4 = vld [vmem:[%s13996_s11 + $0x130] sm:$0xff]  ;;  %v6907_v60 = vld [vmem:[%s13996_s11 + $0x120] sm:$0xff] }
 0x80a   :  { %v6794_v27 = vmul.f32 %v13606_v40, %v6774_v22  ;;  %v6904_v22 = vld [vmem:[%s13996_s11 + $0x108] sm:$0xff] }
 0x80b   :  { %v6739_v46 = vpop.f32.mrf.mxu3  ;;  %v6964_v59 = vpop.permute.xlu2 %6963 }
 0x80c   :  { %v6814_v0 = vadd.f32 %v13617_v13, %v6794_v27  ;;  %v6740_v47 = vadd.f32 %v6739_v46, %v6675_v16  ;;  %v6903_v16 = vld [vmem:[%s13996_s11 + $0x100] sm:$0xff]  ;;  %v6995_v27 = vsel %vm4816_vm4, %v13794_v38, %v6964_v59  ;;  %v6934_v46 = vld [vmem:[%s13996_s11 + $0x1f8] sm:$0xff] }
 0x80d   :  { %v6867_v36 = vld [vmem:[#allocation4 + $0xc8] sm:$0xff]  ;;  %v6922_v38 = vld [vmem:[%s13996_s11 + $0x198] sm:$0xff]  ;;  %v8824_v59 = vld [vmem:[%s14000_s13] ss:$0 sm:$0xff] }
 0x80e   :  { %6843 = vst.msk [vmem:[#allocation4 + $0xd0] sm:$0xff] %vm4816_vm4, %v6814_v0  ;;  %v6759_v56 = vmul.f32 0.2, %v6740_v47  ;;  %6985 = vrot.lane.b32.xlu2 %v6867_v36, %s8951_s29  ;;  %v6932_v0 = vld [vmem:[%s13996_s11 + $0x1e8] sm:$0xff]  ;;  %v6850_v36 = vld [vmem:[#allocation4 + $0x20] sm:$0xff] }
 0x810   :  { %v6775_v29 = vmax.f32 %v6740_v47, %v6759_v56 }
 0x812   :  { %v6795_v9 = vmul.f32 %v13606_v40, %v6775_v29  ;;  %v6928_v29 = vld [vmem:[%s13996_s11 + $0x1c8] sm:$0xff] }
 0x813   :  { %v6742_v30 = vpop.f32.mrf.mxu3 }
 0x814   :  { %v6815_v8 = vadd.f32 %v13617_v13, %v6795_v9  ;;  %v6743_v48 = vadd.f32 %v6742_v30, %v6678_v33  ;;  %v6926_v9 = vld [vmem:[%s13996_s11 + $0x1b8] sm:$0xff]  ;;  %v6925_v30 = vld [vmem:[%s13996_s11 + $0x1b0] sm:$0xff] }
 0x815   :  { %v13789_v35 = vld [vmem:[#allocation4 + $0xd0] sm:$0xff] }
 0x816   :  { %6844 = vst.msk [vmem:[#allocation4 + $0xd8] sm:$0xff] %vm4816_vm4, %v6815_v8  ;;  %v6760_v61 = vmul.f32 0.2, %v6743_v48  ;;  %7571 = vmatmul.msk.f32.gmra.mxu2 %vm4816_vm4, %v13789_v35  ;;  %v6924_v8 = vld [vmem:[%s13996_s11 + $0x1a8] sm:$0xff] }
 0x818   :  { %v6776_v52 = vmax.f32 %v6743_v48, %v6760_v61 }
 0x81a   :  { %v6796_v31 = vmul.f32 %v13606_v40, %v6776_v52  ;;  %v6896_v40 = vld [vmem:[%s13996_s11 + $0xc8] sm:$0xff]  ;;  %v6921_v52 = vld [vmem:[%s13996_s11 + $0x190] sm:$0xff] }
 0x81b   :  { %7056 = vmatpush.msrb.mxu3 %v6896_v40 }
 0x81c   :  { %v6816_v20 = vadd.f32 %v13617_v13, %v6796_v31  ;;  %v6895_v13 = vld [vmem:[%s13996_s11 + $0xc0] sm:$0xff] }
 0x81d   :  { %v6869_v39 = vld [vmem:[#allocation4 + $0xd8] sm:$0xff]  ;;  %7057 = vmatpush.msrb.mxu3 %v6895_v13  ;;  %v6864_v13 = vld [vmem:[#allocation4 + $0xa8] sm:$0xff] }
 0x81e   :  { %6845 = vst.msk [vmem:[#allocation4 + $0xe0] sm:$0xff] %vm4816_vm4, %v6816_v20  ;;  %6987 = vrot.lane.b32.xlu0 %v6869_v39, %s8951_s29  ;;  %v6854_v39 = vld [vmem:[#allocation4 + $0x48] sm:$0xff] }
 0x81f   :  { %7058 = vmatpush.msrb.mxu3 %v6894_v55 }
 0x821   :  { %7059 = vmatpush.msrb.mxu3 %v6893_v11 }
 0x823   :  { %7060 = vmatpush.msrb.mxu3 %v6892_v1  ;;  %v6866_v1 = vld [vmem:[#allocation4 + $0xc0] sm:$0xff] }
 0x825   :  { %v6870_v7 = vld [vmem:[#allocation4 + $0xe0] sm:$0xff]  ;;  %7061 = vmatpush.msrb.mxu3 %v6891_v41 }
 0x826   :  { %7572 = vmatmul.msk.f32.gmra.mxu2 %vm4816_vm4, %v6870_v7 }
 0x827   :  { %7062 = vmatpush.msrb.mxu3 %v6890_v54 }
 0x829   :  { %7063 = vmatpush.msrb.mxu3 %v6889_v26 }
 0x82b   :  { %7064 = vmatpush.msrb.mxu3 %v6888_v6 }
 0x82d   :  { %7065 = vmatpush.msrb.mxu3 %v6887_v14 }
 0x82f   :  { %7079 = vmatpush.msra.mxu3 %v6918_v37 }
 0x831   :  { %7080 = vmatpush.msra.mxu3 %v6917_v5 }
 0x833   :  { %7081 = vmatpush.msra.mxu3 %v6916_v24 }
 0x835   :  { %7082 = vmatpush.msra.mxu3 %v6915_v57 }
 0x837   :  { %7083 = vmatpush.msra.mxu3 %v6914_v12 }
 0x839   :  { %7084 = vmatpush.msra.mxu3 %v6913_v49 }
 0x83b   :  { %7085 = vmatpush.msra.mxu3 %v6912_v23  ;;  %v8823_v23 = vld [vmem:[%s13999_s12] ss:$0 sm:$0xff] }
 0x83d   :  { %7086 = vmatpush.msra.mxu3 %v6911_v44 }
 0x83f   :  { %7087 = vmatpush.msra.mxu3 %v6910_v50 }
 0x840   :  { %v6952_v42 = vpop.permute.xlu0 %6951 }
 0x841   :  { %v13852_v2 = vsel %vm4816_vm4, %v6856_v32, %v6952_v42  ;;  %7088 = vmatpush.msra.mxu3 %v6909_v4 }
 0x842   :  { %7043 = vmatmul.f32.gmra.mxu3 %v13852_v2 }
 0x843   :  { %7089 = vmatpush.msra.mxu3 %v6908_v15 }
 0x845   :  { %7090 = vmatpush.msra.mxu3 %v6907_v60 }
 0x847   :  { %7091 = vmatpush.msra.mxu3 %v6906_v3 }
 0x848   :  { %v6966_v47 = vpop.permute.xlu0 %6965 }
 0x849   :  { %7092 = vmatpush.msra.mxu3 %v6905_v53  ;;  %v6996_v56 = vsel %vm4816_vm4, %v6850_v36, %v6966_v47  ;;  %v6999_v31 = vsel %vm4816_vm4, %v6852_v10, %v6966_v47  ;;  %v8826_v36 = vld [vmem:[%s14002_s15] ss:$0 sm:$0xff] }
 0x84b   :  { %7093 = vmatpush.msra.mxu3 %v6904_v22 }
 0x84d   :  { %7094 = vmatpush.msra.mxu3 %v6903_v16 }
 0x850   :  { %v6954_v19 = vpop.permute.xlu1 %6953  ;;  %v6970_v48 = vpop.permute.xlu2 %6969 }
 0x851   :  { %v13881_v62 = vsel %vm4816_vm4, %v13686_v17, %v6954_v19  ;;  %v6998_v61 = vsel %vm4816_vm4, %v13711_v43, %v6970_v48  ;;  %v6919_v43 = vld [vmem:[%s13996_s11 + $0x180] sm:$0xff]  ;;  %v6978_v20 = vpop.permute.xlu0 %6977  ;;  %v7001_v40 = vsel %vm4816_vm4, %v6862_v21, %v6970_v48 }
 0x852   :  { %7046 = vmatmul.f32.gmra.mxu3 %v13881_v62  ;;  %v7000_v18 = vsel %vm4816_vm4, %v6854_v39, %v6978_v20 }
 0x858   :  { %v6968_v25 = vpop.permute.xlu1 %6967 }
 0x859   :  { %v6997_v33 = vsel %vm4816_vm4, %v13686_v17, %v6968_v25  ;;  %v6923_v17 = vld [vmem:[%s13996_s11 + $0x1a0] sm:$0xff]  ;;  %v7154_v19 = vpop.f32.mrf.mxu2 }
 0x85a   :  { %7066 = vmatmul.f32.vlgmr.msrb.gmra.mxu3 %v6995_v27 }
 0x85b   :  { %7108 = vmatpush.msrb.mxu3 %v6934_v46  ;;  %v8825_v46 = vld [vmem:[%s14001_s14] ss:$0 sm:$0xff] }
 0x85d   :  { %7109 = vmatpush.msrb.mxu3 %v6933_v28 }
 0x85f   :  { %7110 = vmatpush.msrb.mxu3 %v6932_v0 }
 0x861   :  { %7111 = vmatpush.msrb.mxu3 %v6931_v51 }
 0x862   :  { %7069 = vmatmul.f32.gmra.mxu3 %v6996_v56 }
 0x863   :  { %7112 = vmatpush.msrb.mxu3 %v6930_v45 }
 0x865   :  { %7113 = vmatpush.msrb.mxu3 %v6929_v63 }
 0x867   :  { %7114 = vmatpush.msrb.mxu3 %v6928_v29 }
 0x868   :  { %v6986_v11 = vpop.permute.xlu2 %6985 }
 0x869   :  { %7115 = vmatpush.msrb.mxu3 %v6927_v58  ;;  %v7003_v41 = vsel %vm4816_vm4, %v6866_v1, %v6986_v11  ;;  %v7157_v51 = vpop.f32.mrf.mxu2 }
 0x86a   :  { %7072 = vmatmul.f32.gmra.mxu3 %v6997_v33 }
 0x86b   :  { %7116 = vmatpush.msrb.mxu3 %v6926_v9 }
 0x86c   :  { %v7038_v6 = vpop.f32.mrf.mxu3 }
 0x86d   :  { %7117 = vmatpush.msrb.mxu3 %v6925_v30  ;;  %v7039_v50 = vadd.f32 %v8823_v23, %v7038_v6  ;;  %v8829_v6 = vld [vmem:[%s14002_s15 + $0x3] ss:$0 sm:$0xff] }
 0x86f   :  { %7118 = vmatpush.msrb.mxu3 %v6924_v8 }
 0x871   :  { %7119 = vmatpush.msrb.mxu3 %v6923_v17  ;;  %v8827_v17 = vld [vmem:[%s14002_s15 + $0x1] ss:$0 sm:$0xff] }
 0x872   :  { %7075 = vmatmul.f32.gmra.mxu3 %v6998_v61 }
 0x873   :  { %7120 = vmatpush.msrb.mxu3 %v6922_v38 }
 0x874   :  { %v7041_v14 = vpop.f32.mrf.mxu3 }
 0x875   :  { %7121 = vmatpush.msrb.mxu3 %v6921_v52 }
 0x877   :  { %7122 = vmatpush.msrb.mxu3 %v6920_v34 }
 0x878   :  { %v6980_v7 = vpop.permute.xlu1 %6979 }
 0x879   :  { %7123 = vmatpush.msrb.mxu3 %v6919_v43  ;;  %v7002_v55 = vsel %vm4816_vm4, %v6864_v13, %v6980_v7  ;;  %v8828_v7 = vld [vmem:[%s14002_s15 + $0x2] ss:$0 sm:$0xff] }
 0x87a   :  { %7095 = vmatmul.f32.vlgmr.msra.gmra.mxu3 %v6999_v31 }
 0x882   :  { %7098 = vmatmul.f32.gmra.mxu3 %v7000_v18 }
 0x88a   :  { %7101 = vmatmul.f32.gmra.mxu3 %v7001_v40 }
 0x890   :  { %v6988_v54 = vpop.permute.xlu0 %6987 }
 0x891   :  { %v7004_v26 = vsel %vm4816_vm4, %v13789_v35, %v6988_v54 }
 0x892   :  { %7104 = vmatmul.f32.gmra.mxu3 %v7002_v55 }
 0x899   :  { %v7160_v61 = vpop.f32.mrf.mxu2 }
 0x89a   :  { %7124 = vmatmul.f32.vlgmr.msrb.gmra.mxu3 %v13852_v2 }
 0x8a2   :  { %7127 = vmatmul.f32.gmra.mxu3 %v13881_v62  ;;  %v7042_v62 = vadd.f32 %v8823_v23, %v7041_v14 }
 0x8a9   :  { %v7163_v13 = vpop.f32.mrf.mxu2 }
 0x8aa   :  { %7130 = vmatmul.f32.gmra.mxu3 %v7003_v41 }
 0x8b2   :  { %7133 = vmatmul.f32.gmra.mxu3 %v7004_v26 }
 0x8c5   :  { %v7044_v37 = vpop.f32.mrf.mxu3 }
 0x8c6   :  { %v7045_v56 = vadd.f32 %v8823_v23, %v7044_v37 }
 0x8d5   :  { %v7047_v5 = vpop.f32.mrf.mxu3 }
 0x8d6   :  { %v7048_v38 = vadd.f32 %v8823_v23, %v7047_v5  ;;  %v22_v5 = vstv %s14003_s16 }
 0x8d7   :  { %23 = vst [vmem:[#allocation5] sm:$0x1] %v22_v5 }
 0x8dd   :  { %v7067_v24 = vpop.f32.mrf.mxu3 }
 0x8de   :  { %v7068_v4 = vadd.f32 %v7067_v24, %v7039_v50 }
 0x8e5   :  { %v7070_v32 = vpop.f32.mrf.mxu3 }
 0x8e6   :  { %v7071_v53 = vadd.f32 %v7070_v32, %v7042_v62 }
 0x8ed   :  { %v7073_v57 = vpop.f32.mrf.mxu3 }
 0x8ee   :  { %v7074_v29 = vadd.f32 %v7073_v57, %v7045_v56 }
 0x8f5   :  { %v7076_v42 = vpop.f32.mrf.mxu3 }
 0x8f6   :  { %v7077_v43 = vadd.f32 %v7076_v42, %v7048_v38 }
 0x8fd   :  { %v7096_v2 = vpop.f32.mrf.mxu3 }
 0x8fe   :  { %v7097_v35 = vadd.f32 %v7096_v2, %v7068_v4 }
 0x905   :  { %v7099_v12 = vpop.f32.mrf.mxu3 }
 0x906   :  { %v7100_v16 = vadd.f32 %v7099_v12, %v7071_v53  ;;  %v8830_v12 = vld [vmem:[#allocation5] ss:$0 sm:$0xff] }
 0x90d   :  { %v7102_v49 = vpop.f32.mrf.mxu3 }
 0x90e   :  { %v7103_v33 = vadd.f32 %v7102_v49, %v7074_v29 }
 0x915   :  { %v7105_v44 = vpop.f32.mrf.mxu3 }
 0x916   :  { %v7106_v20 = vadd.f32 %v7105_v44, %v7077_v43 }
 0x91d   :  { %v7125_v15 = vpop.f32.mrf.mxu3 }
 0x91e   :  { %v7126_v60 = vadd.f32 %v7125_v15, %v7097_v35 }
 0x920   :  { %v7155_v3 = vadd.f32 %v7154_v19, %v7126_v60 }
 0x922   :  { %v7166_v22 = vmul.f32 0.2, %v7155_v3 }
 0x924   :  { %v7170_v27 = vmax.f32 %v7155_v3, %v7166_v22 }
 0x925   :  { %v7128_v28 = vpop.f32.mrf.mxu3 }
 0x926   :  { %v7178_v0 = vmul.f32 %v8824_v59, %v7170_v27  ;;  %v7129_v47 = vadd.f32 %v7128_v28, %v7100_v16 }
 0x928   :  { %v7158_v45 = vadd.f32 %v7157_v51, %v7129_v47  ;;  %v7186_v63 = vadd.f32 %v8825_v46, %v7178_v0 }
 0x92a   :  { %v7167_v25 = vmul.f32 0.2, %v7158_v45  ;;  %v7206_v58 = vmul.f32 %v8826_v36, %v7186_v63 }
 0x92c   :  { %v7171_v9 = vmax.f32 %v7158_v45, %v7167_v25  ;;  %7210 = vadd.xlane.f32.xlu1 %v7206_v58 }
 0x92d   :  { %v7131_v30 = vpop.f32.mrf.mxu3 }
 0x92e   :  { %v7179_v8 = vmul.f32 %v8824_v59, %v7171_v9  ;;  %v7132_v48 = vadd.f32 %v7131_v30, %v7103_v33 }
 0x930   :  { %v7161_v52 = vadd.f32 %v7160_v61, %v7132_v48  ;;  %v7187_v34 = vadd.f32 %v8825_v46, %v7179_v8 }
 0x932   :  { %v7168_v10 = vmul.f32 0.2, %v7161_v52  ;;  %v7207_v31 = vmul.f32 %v8827_v17, %v7187_v34 }
 0x934   :  { %v7172_v39 = vmax.f32 %v7161_v52, %v7168_v10  ;;  %7212 = vadd.xlane.f32.xlu2 %v7207_v31 }
 0x935   :  { %v7134_v18 = vpop.f32.mrf.mxu3 }
 0x936   :  { %v7180_v21 = vmul.f32 %v8824_v59, %v7172_v39  ;;  %v7135_v40 = vadd.f32 %v7134_v18, %v7106_v20 }
 0x938   :  { %v7164_v55 = vadd.f32 %v7163_v13, %v7135_v40  ;;  %v7188_v11 = vadd.f32 %v8825_v46, %v7180_v21 }
 0x93a   :  { %v7169_v1 = vmul.f32 0.2, %v7164_v55  ;;  %v7208_v41 = vmul.f32 %v8828_v7, %v7188_v11 }
 0x93c   :  { %v7173_v54 = vmax.f32 %v7164_v55, %v7169_v1  ;;  %7214 = vadd.xlane.f32.xlu0 %v7208_v41 }
 0x93e   :  { %v7181_v26 = vmul.f32 %v8824_v59, %v7173_v54 }
 0x940   :  { %v7189_v14 = vadd.f32 %v8825_v46, %v7181_v26 }
 0x942   :  { %v7209_v37 = vmul.f32 %v8829_v6, %v7189_v14 }
 0x944   :  { %7216 = vadd.xlane.f32.xlu2 %v7209_v37 }
 0x99f   :  { %v7211_v32 = vpop.xlane.xlu1 %7210 }
 0x9a7   :  { %v7213_v24 = vpop.xlane.xlu2 %7212 }
 0x9a8   :  { %v7218_v42 = vadd.f32 %v7213_v24, %v7211_v32 }
 0x9af   :  { %v7215_v57 = vpop.xlane.xlu0 %7214 }
 0x9b0   :  { %v7219_v2 = vadd.f32 %v7218_v42, %v7215_v57 }
 0x9b7   :  { %v7217_v49 = vpop.xlane.xlu2 %7216 }
 0x9b8   :  { %v7220_v23 = vadd.f32 %v7219_v2, %v7217_v49 }
 0x9ba   :  { %v7225_v44 = vadd.f32 %v8830_v12, %v7220_v23 }
 0x9bc   :  { %7227 = vst.msk [vmem:[%s14004_s17] sm:$0xff] %vm7226_vm9, %v7225_v44 }

</bundles_post_ra>
